<compile_context>
chip_gen: v7x
topology: tpu7x:2x2x1
jax: 0.10.0
libtpu: 0.0.40
codegen_flags: <defaults>
</compile_context>

<pallas_src>
import numpy as np
import jax
import jax.numpy as jnp
from jax import lax
from jax.experimental import pallas as pl
from jax.experimental.pallas import tpu as pltpu


# --------------------------- fused per-branch kernel ---------------------------

def _make_branch_kernel(B, H, W):
    Hp, Wp = H + 2, W + 2
    H2, W2 = H // 2, W // 2
    Hp2, Wp2 = H2 + 2, W2 + 2
    Npc2 = Hp2 * Wp2

    def conv3x3_relu(a, w2d, bias, canvas_w):
        # a: (Cin, N) zero-ring canvases (pixels on lanes); w2d: (Cout, 9*Cin);
        # bias: (Cout, 1).  Taps are static lane shifts; wrong values only land
        # on ring positions, which downstream ops mask or zero-weight.
        taps = []
        for dy in (-1, 0, 1):
            for dx in (-1, 0, 1):
                s = dy * canvas_w + dx
                taps.append(a if s == 0 else jnp.roll(a, -s, axis=1))
        patches = jnp.concatenate(taps, axis=0)                          # (9*Cin, N)
        y = jnp.dot(w2d, patches, preferred_element_type=jnp.float32) + bias
        return jnp.maximum(y, 0.0)

    def kernel(x_ref, w1_ref, b1_ref, w2_ref, b2_ref, w3_ref, b3_ref,
               w4_ref, b4_ref, pool_ref, sel_ref, m1_ref, m2_ref, o_ref):
        m1 = m1_ref[...]                                                 # (1, B*Hp*Wp)
        m2 = m2_ref[...]                                                 # (1, B*Hp2*Wp2)
        a = x_ref[0]                                                     # (1, B*Hp*Wp)
        a = conv3x3_relu(a, w1_ref[0], b1_ref[0], Wp) * m1               # (12, .)
        a = conv3x3_relu(a, w2_ref[0], b2_ref[0], Wp)                    # (8, .)  ring zero-weighted by pool
        a = jnp.dot(a, pool_ref[...], preferred_element_type=jnp.float32)  # (8, B*Hp2*Wp2)
        a = conv3x3_relu(a, w3_ref[0], b3_ref[0], Wp2) * m2              # (4, .)
        a = conv3x3_relu(a, w4_ref[0], b4_ref[0], Wp2)                   # (1, .)  ring zero-weighted by sel
        rows = []
        for b in range(B):
            cb = a[:, b * Npc2:(b + 1) * Npc2]                           # (1, Hp2*Wp2)
            rows.append(jnp.dot(cb, sel_ref[...],
                                preferred_element_type=jnp.float32))     # (1, H2*W2)
        o_ref[0] = jnp.concatenate(rows, axis=0)                         # (B, H2*W2)

    return kernel


def _branch_constants(B, H, W):
    Hp, Wp = H + 2, W + 2
    H2, W2 = H // 2, W // 2
    Hp2, Wp2 = H2 + 2, W2 + 2
    Npc, Npc2 = Hp * Wp, Hp2 * Wp2

    pool = np.zeros((Npc, Npc2), np.float32)           # 2x2 mean, canvas -> canvas
    for y2 in range(H2):
        for x2 in range(W2):
            q = (y2 + 1) * Wp2 + (x2 + 1)
            for dy in range(2):
                for dx in range(2):
                    p = (2 * y2 + dy + 1) * Wp + (2 * x2 + dx + 1)
                    pool[p, q] = 0.25
    pool = np.kron(np.eye(B, dtype=np.float32), pool)  # block-diag over batch canvases

    sel = np.zeros((Npc2, H2 * W2), np.float32)        # interior -> row-major features
    for y in range(H2):
        for x in range(W2):
            sel[(y + 1) * Wp2 + (x + 1), y * W2 + x] = 1.0

    def ring_mask(h, w):
        m = np.zeros((h + 2, w + 2), np.float32)
        m[1:h + 1, 1:w + 1] = 1.0
        return np.tile(m.reshape(-1), B)[None, :]

    return (jnp.asarray(pool), jnp.asarray(sel),
            jnp.asarray(ring_mask(H, W)), jnp.asarray(ring_mask(H2, W2)))


def branch_forward(xc, conv_params, B, H, W):
    NC = xc.shape[0]
    H2, W2 = H // 2, W // 2
    pool, sel, m1, m2 = _branch_constants(B, H, W)

    def per_branch(a):   # fetched per grid step (block index = branch c)
        return pl.BlockSpec((1,) + a.shape[1:], lambda c: (c, 0, 0))

    def resident(a):     # constant block index -> DMA'd once, stays in VMEM
        return pl.BlockSpec(a.shape, lambda c: (0, 0))

    wb = []
    for (w, b) in conv_params:
        wb += [w, b]
    args = [xc] + wb + [pool, sel, m1, m2]
    in_specs = ([per_branch(xc)] + [per_branch(a) for a in wb]
                + [resident(a) for a in (pool, sel, m1, m2)])

    return pl.pallas_call(
        _make_branch_kernel(B, H, W),
        out_shape=jax.ShapeDtypeStruct((NC, B, H2 * W2), jnp.float32),
        grid=(NC,),
        in_specs=in_specs,
        out_specs=pl.BlockSpec((1, B, H2 * W2), lambda c: (c, 0, 0)),
        compiler_params=pltpu.CompilerParams(dimension_semantics=("parallel",)),
    )(*args)


# ---------------------------------- FC kernel ----------------------------------

def _fc_kernel(x_ref, w1_ref, b1_ref, w2_ref, b2_ref, o_ref):
    h = jnp.dot(x_ref[...], w1_ref[...], preferred_element_type=jnp.float32) + b1_ref[...]
    h = jnp.maximum(h, 0.0)
    o_ref[...] = jnp.dot(h, w2_ref[...], preferred_element_type=jnp.float32) + b2_ref[...]


def fc_forward(x, w1, b1, w2, b2):
    B = x.shape[0]
    n_classes = w2.shape[-1]
    vm = pl.BlockSpec(memory_space=pltpu.MemorySpace.VMEM)
    return pl.pallas_call(
        _fc_kernel,
        out_shape=jax.ShapeDtypeStruct((B, n_classes), jnp.float32),
        in_specs=[vm, vm, vm, vm, vm],
        out_specs=vm,
    )(x, w1, b1, w2, b2)


# ------------------------------- forward wrapper --------------------------------

def pce_forward(x, params):
    # x: (B, NC, 1, H, W) -- same layout as the PyTorch module's `input`.
    B, NC, _, H, W = x.shape
    H2, W2 = H // 2, W // 2

    # Layout plumbing: flattened zero-padded per-batch canvases, pixel-last.
    xt = jnp.transpose(x.astype(jnp.float32), (1, 2, 0, 3, 4))        # (NC, 1, B, H, W)
    xp = jnp.pad(xt, ((0, 0), (0, 0), (0, 0), (1, 1), (1, 1)))        # (NC, 1, B, H+2, W+2)
    xc = xp.reshape(NC, 1, B * (H + 2) * (W + 2))

    def wmat(w):
        nc, cout, cin = w.shape[:3]
        # (NC, Cout, Cin, 3, 3) -> (NC, Cout, ky, kx, Cin) -> (NC, Cout, 9*Cin)
        return jnp.transpose(w, (0, 1, 3, 4, 2)).reshape(nc, cout, 9 * cin)

    conv_params = [(wmat(w), b[:, :, None]) for (w, b) in params["convs"]]
    feats_br = branch_forward(xc, conv_params, B, H, W)               # (NC, B, 96)
    feats = jnp.transpose(feats_br, (1, 0, 2)).reshape(B, NC * H2 * W2)

    # TODO(synk): Dropout(p=0.2) is eval-mode identity here (training-mode RNG mask omitted).

    fw1, fb1, fw2, fb2 = params["fc"]
    pad_h = (-fw1.shape[1]) % 128                                     # 496 -> 512 lane-dense hidden
    fw1p = jnp.pad(fw1, ((0, 0), (0, pad_h)))
    fb1p = jnp.pad(fb1, ((0, 0), (0, pad_h)))
    fw2p = jnp.pad(fw2, ((0, pad_h), (0, 0)))
    return fc_forward(feats, fw1p, fb1p, fw2p, fb2)


# --------------------------- parameter creation ------------------------------

def init_params(key, n_channels=10, n_classes=192):
    conv_defs = [(1, 12), (12, 8), (8, 4), (4, 1)]
    keys = jax.random.split(key, 2 * len(conv_defs) + 2)
    convs = []
    for i, (cin, cout) in enumerate(conv_defs):
        bound = 1.0 / np.sqrt(cin * 9)
        w = jax.random.uniform(keys[2 * i], (n_channels, cout, cin, 3, 3),
                               jnp.float32, -bound, bound)
        b = jax.random.uniform(keys[2 * i + 1], (n_channels, cout),
                               jnp.float32, -bound, bound)
        convs.append((w, b))
    d_in = 96 * n_channels
    gain = np.sqrt(2.0)  # torch.nn.init.calculate_gain('relu')
    bnd1 = gain * np.sqrt(6.0 / (d_in + 496))
    bnd2 = gain * np.sqrt(6.0 / (496 + n_classes))
    fw1 = jax.random.uniform(keys[-2], (d_in, 496), jnp.float32, -bnd1, bnd1)
    fb1 = jnp.full((1, 496), 0.1, jnp.float32)
    fw2 = jax.random.uniform(keys[-1], (496, n_classes), jnp.float32, -bnd2, bnd2)
    fb2 = jnp.full((1, n_classes), 0.1, jnp.float32)
    return {"convs": convs, "fc": (fw1, fb1, fw2, fb2)}


# ----------------------------- pure-JAX reference ----------------------------

def _ref_forward(x, params):
    B, NC, _, H, W = x.shape
    (w1, b1), (w2, b2), (w3, b3), (w4, b4) = params["convs"]

    def conv(a, w, b):
        y = lax.conv_general_dilated(a, w, (1, 1), "SAME",
                                     dimension_numbers=("NCHW", "OIHW", "NCHW"),
                                     precision=lax.Precision.HIGHEST)
        return jnp.maximum(y + b[None, :, None, None], 0.0)

    feats = []
    for c in range(NC):
        a = x[:, c]
        a = conv(a, w1[c], b1[c])
        a = conv(a, w2[c], b2[c])
        Bc, Cc, Hc, Wc = a.shape
        a = a.reshape(Bc, Cc, Hc // 2, 2, Wc // 2, 2).mean(axis=(3, 5))
        a = conv(a, w3[c], b3[c])
        a = conv(a, w4[c], b4[c])
        feats.append(a)
    f = jnp.concatenate(feats, axis=1).reshape(B, -1)
    fw1, fb1, fw2, fb2 = params["fc"]
    h = jnp.maximum(jnp.dot(f, fw1, precision=lax.Precision.HIGHEST) + fb1, 0.0)
    return jnp.dot(h, fw2, precision=lax.Precision.HIGHEST) + fb2


# ----------------------------------- main ------------------------------------

if __name__ == "__main__":
    # (H//2)*(W//2) must equal 96 to match the module's fc (96 * n_channels).
    B, NC, H, W = 2, 10, 16, 24
    n_classes = 192

    key = jax.random.PRNGKey(0)
    kx, kp = jax.random.split(key)
    x = jax.random.normal(kx, (B, NC, 1, H, W), jnp.float32)
    params = init_params(kp, NC, n_classes)

    out = jax.jit(pce_forward)(x, params)
    out = jax.block_until_ready(out)
    assert out.shape == (B, n_classes), out.shape

    ref = _ref_forward(x, params)
    if not np.allclose(np.asarray(out), np.asarray(ref), rtol=5e-2, atol=5e-2):
        raise AssertionError("Pallas output does not match pure-JAX reference")

    print("KERNEL_OK")
</pallas_src>

<mosaic_0001>
module attributes {stable_mosaic.version = 11 : i64} {
  func.func @kernel(%arg0: i32, %arg1: memref<1x1x936xf32, #tpu.memory_space<vmem>>, %arg2: memref<1x12x9xf32, #tpu.memory_space<vmem>>, %arg3: memref<1x12x1xf32, #tpu.memory_space<vmem>>, %arg4: memref<1x8x108xf32, #tpu.memory_space<vmem>>, %arg5: memref<1x8x1xf32, #tpu.memory_space<vmem>>, %arg6: memref<1x4x72xf32, #tpu.memory_space<vmem>>, %arg7: memref<1x4x1xf32, #tpu.memory_space<vmem>>, %arg8: memref<1x1x36xf32, #tpu.memory_space<vmem>>, %arg9: memref<1x1x1xf32, #tpu.memory_space<vmem>>, %arg10: memref<936x280xf32, #tpu.memory_space<vmem>>, %arg11: memref<140x96xf32, #tpu.memory_space<vmem>>, %arg12: memref<1x936xf32, #tpu.memory_space<vmem>>, %arg13: memref<1x280xf32, #tpu.memory_space<vmem>>, %arg14: memref<1x2x96xf32, #tpu.memory_space<vmem>>) attributes {dimension_semantics = [#tpu.dimension_semantics<parallel>], iteration_bounds = array<i64: 10>, scalar_prefetch = 0 : i64, scratch_operands = 0 : i64, tpu.core_type = #tpu.core_type<tc>, window_params = [{transform_indices = @transform_0, window_bounds = array<i64: 1, 1, 936>}, {transform_indices = @transform_1, window_bounds = array<i64: 1, 12, 9>}, {transform_indices = @transform_2, window_bounds = array<i64: 1, 12, 1>}, {transform_indices = @transform_3, window_bounds = array<i64: 1, 8, 108>}, {transform_indices = @transform_4, window_bounds = array<i64: 1, 8, 1>}, {transform_indices = @transform_5, window_bounds = array<i64: 1, 4, 72>}, {transform_indices = @transform_6, window_bounds = array<i64: 1, 4, 1>}, {transform_indices = @transform_7, window_bounds = array<i64: 1, 1, 36>}, {transform_indices = @transform_8, window_bounds = array<i64: 1, 1, 1>}, {pipeline_mode = #tpu.pipeline_mode<synchronous>, transform_indices = @transform_9, window_bounds = array<i64: 936, 280>}, {pipeline_mode = #tpu.pipeline_mode<synchronous>, transform_indices = @transform_10, window_bounds = array<i64: 140, 96>}, {pipeline_mode = #tpu.pipeline_mode<synchronous>, transform_indices = @transform_11, window_bounds = array<i64: 1, 936>}, {pipeline_mode = #tpu.pipeline_mode<synchronous>, transform_indices = @transform_12, window_bounds = array<i64: 1, 280>}, {transform_indices = @transform_13, window_bounds = array<i64: 1, 2, 96>}]} {
    %c0 = arith.constant 0 : index
    %c0_0 = arith.constant 0 : index
    %0 = vector.load %arg12[%c0, %c0_0] : memref<1x936xf32, #tpu.memory_space<vmem>>, vector<1x936xf32>
    %c0_1 = arith.constant 0 : index
    %c0_2 = arith.constant 0 : index
    %1 = vector.load %arg13[%c0_1, %c0_2] : memref<1x280xf32, #tpu.memory_space<vmem>>, vector<1x280xf32>
    %c0_3 = arith.constant 0 : index
    %c0_4 = arith.constant 0 : index
    %c0_5 = arith.constant 0 : index
    %2 = vector.load %arg1[%c0_3, %c0_4, %c0_5] : memref<1x1x936xf32, #tpu.memory_space<vmem>>, vector<1x1x936xf32>
    %3 = vector.shape_cast %2 : vector<1x1x936xf32> to vector<1x936xf32>
    %c0_6 = arith.constant 0 : index
    %c0_7 = arith.constant 0 : index
    %c0_8 = arith.constant 0 : index
    %4 = vector.load %arg2[%c0_6, %c0_7, %c0_8] : memref<1x12x9xf32, #tpu.memory_space<vmem>>, vector<1x12x9xf32>
    %5 = vector.shape_cast %4 : vector<1x12x9xf32> to vector<12x9xf32>
    %c0_9 = arith.constant 0 : index
    %c0_10 = arith.constant 0 : index
    %c0_11 = arith.constant 0 : index
    %6 = vector.load %arg3[%c0_9, %c0_10, %c0_11] : memref<1x12x1xf32, #tpu.memory_space<vmem>>, vector<1x12x1xf32>
    %7 = vector.shape_cast %6 : vector<1x12x1xf32> to vector<12x1xf32>
    %8 = vector.extract_strided_slice %3 {offsets = [0, 909], sizes = [1, 27], strides = [1, 1]} : vector<1x936xf32> to vector<1x27xf32>
    %9 = vector.extract_strided_slice %3 {offsets = [0, 0], sizes = [1, 909], strides = [1, 1]} : vector<1x936xf32> to vector<1x909xf32>
    %10 = tpu.concatenate %8, %9 in 1 : vector<1x27xf32>, vector<1x909xf32> -> vector<1x936xf32>
    %11 = vector.extract_strided_slice %3 {offsets = [0, 910], sizes = [1, 26], strides = [1, 1]} : vector<1x936xf32> to vector<1x26xf32>
    %12 = vector.extract_strided_slice %3 {offsets = [0, 0], sizes = [1, 910], strides = [1, 1]} : vector<1x936xf32> to vector<1x910xf32>
    %13 = tpu.concatenate %11, %12 in 1 : vector<1x26xf32>, vector<1x910xf32> -> vector<1x936xf32>
    %14 = vector.extract_strided_slice %3 {offsets = [0, 911], sizes = [1, 25], strides = [1, 1]} : vector<1x936xf32> to vector<1x25xf32>
    %15 = vector.extract_strided_slice %3 {offsets = [0, 0], sizes = [1, 911], strides = [1, 1]} : vector<1x936xf32> to vector<1x911xf32>
    %16 = tpu.concatenate %14, %15 in 1 : vector<1x25xf32>, vector<1x911xf32> -> vector<1x936xf32>
    %17 = vector.extract_strided_slice %3 {offsets = [0, 935], sizes = [1, 1], strides = [1, 1]} : vector<1x936xf32> to vector<1x1xf32>
    %18 = vector.extract_strided_slice %3 {offsets = [0, 0], sizes = [1, 935], strides = [1, 1]} : vector<1x936xf32> to vector<1x935xf32>
    %19 = tpu.concatenate %17, %18 in 1 : vector<1x1xf32>, vector<1x935xf32> -> vector<1x936xf32>
    %20 = vector.extract_strided_slice %3 {offsets = [0, 1], sizes = [1, 935], strides = [1, 1]} : vector<1x936xf32> to vector<1x935xf32>
    %21 = vector.extract_strided_slice %3 {offsets = [0, 0], sizes = [1, 1], strides = [1, 1]} : vector<1x936xf32> to vector<1x1xf32>
    %22 = tpu.concatenate %20, %21 in 1 : vector<1x935xf32>, vector<1x1xf32> -> vector<1x936xf32>
    %23 = vector.extract_strided_slice %3 {offsets = [0, 25], sizes = [1, 911], strides = [1, 1]} : vector<1x936xf32> to vector<1x911xf32>
    %24 = vector.extract_strided_slice %3 {offsets = [0, 0], sizes = [1, 25], strides = [1, 1]} : vector<1x936xf32> to vector<1x25xf32>
    %25 = tpu.concatenate %23, %24 in 1 : vector<1x911xf32>, vector<1x25xf32> -> vector<1x936xf32>
    %26 = vector.extract_strided_slice %3 {offsets = [0, 26], sizes = [1, 910], strides = [1, 1]} : vector<1x936xf32> to vector<1x910xf32>
    %27 = vector.extract_strided_slice %3 {offsets = [0, 0], sizes = [1, 26], strides = [1, 1]} : vector<1x936xf32> to vector<1x26xf32>
    %28 = tpu.concatenate %26, %27 in 1 : vector<1x910xf32>, vector<1x26xf32> -> vector<1x936xf32>
    %29 = vector.extract_strided_slice %3 {offsets = [0, 27], sizes = [1, 909], strides = [1, 1]} : vector<1x936xf32> to vector<1x909xf32>
    %30 = vector.extract_strided_slice %3 {offsets = [0, 0], sizes = [1, 27], strides = [1, 1]} : vector<1x936xf32> to vector<1x27xf32>
    %31 = tpu.concatenate %29, %30 in 1 : vector<1x909xf32>, vector<1x27xf32> -> vector<1x936xf32>
    %32 = tpu.concatenate %10, %13, %16, %19, %3, %22, %25, %28, %31 in 0 : vector<1x936xf32>, vector<1x936xf32>, vector<1x936xf32>, vector<1x936xf32>, vector<1x936xf32>, vector<1x936xf32>, vector<1x936xf32>, vector<1x936xf32>, vector<1x936xf32> -> vector<9x936xf32>
    %cst = arith.constant dense<0.000000e+00> : vector<12x936xf32>
    %33 = tpu.matmul %5, %32, %cst {dimension_numbers = #tpu.dot_dimension_numbers<[1], [0], [0], [1], [0, 0, 1, 1], [], []>} : vector<12x9xf32>, vector<9x936xf32>, vector<12x936xf32> -> vector<12x936xf32>
    %34 = vector.broadcast %7 : vector<12x1xf32> to vector<12x936xf32>
    %35 = arith.addf %33, %34 : vector<12x936xf32>
    %cst_12 = arith.constant 0.000000e+00 : f32
    %36 = vector.broadcast %cst_12 : f32 to vector<12x936xf32>
    %37 = arith.maximumf %35, %36 : vector<12x936xf32>
    %38 = vector.broadcast %0 : vector<1x936xf32> to vector<12x936xf32>
    %39 = arith.mulf %37, %38 : vector<12x936xf32>
    %c0_13 = arith.constant 0 : index
    %c0_14 = arith.constant 0 : index
    %c0_15 = arith.constant 0 : index
    %40 = vector.load %arg4[%c0_13, %c0_14, %c0_15] : memref<1x8x108xf32, #tpu.memory_space<vmem>>, vector<1x8x108xf32>
    %41 = vector.shape_cast %40 : vector<1x8x108xf32> to vector<8x108xf32>
    %c0_16 = arith.constant 0 : index
    %c0_17 = arith.constant 0 : index
    %c0_18 = arith.constant 0 : index
    %42 = vector.load %arg5[%c0_16, %c0_17, %c0_18] : memref<1x8x1xf32, #tpu.memory_space<vmem>>, vector<1x8x1xf32>
    %43 = vector.shape_cast %42 : vector<1x8x1xf32> to vector<8x1xf32>
    %44 = vector.extract_strided_slice %39 {offsets = [0, 909], sizes = [12, 27], strides = [1, 1]} : vector<12x936xf32> to vector<12x27xf32>
    %45 = vector.extract_strided_slice %39 {offsets = [0, 0], sizes = [12, 909], strides = [1, 1]} : vector<12x936xf32> to vector<12x909xf32>
    %46 = tpu.concatenate %44, %45 in 1 : vector<12x27xf32>, vector<12x909xf32> -> vector<12x936xf32>
    %47 = vector.extract_strided_slice %39 {offsets = [0, 910], sizes = [12, 26], strides = [1, 1]} : vector<12x936xf32> to vector<12x26xf32>
    %48 = vector.extract_strided_slice %39 {offsets = [0, 0], sizes = [12, 910], strides = [1, 1]} : vector<12x936xf32> to vector<12x910xf32>
    %49 = tpu.concatenate %47, %48 in 1 : vector<12x26xf32>, vector<12x910xf32> -> vector<12x936xf32>
    %50 = vector.extract_strided_slice %39 {offsets = [0, 911], sizes = [12, 25], strides = [1, 1]} : vector<12x936xf32> to vector<12x25xf32>
    %51 = vector.extract_strided_slice %39 {offsets = [0, 0], sizes = [12, 911], strides = [1, 1]} : vector<12x936xf32> to vector<12x911xf32>
    %52 = tpu.concatenate %50, %51 in 1 : vector<12x25xf32>, vector<12x911xf32> -> vector<12x936xf32>
    %53 = vector.extract_strided_slice %39 {offsets = [0, 935], sizes = [12, 1], strides = [1, 1]} : vector<12x936xf32> to vector<12x1xf32>
    %54 = vector.extract_strided_slice %39 {offsets = [0, 0], sizes = [12, 935], strides = [1, 1]} : vector<12x936xf32> to vector<12x935xf32>
    %55 = tpu.concatenate %53, %54 in 1 : vector<12x1xf32>, vector<12x935xf32> -> vector<12x936xf32>
    %56 = vector.extract_strided_slice %39 {offsets = [0, 1], sizes = [12, 935], strides = [1, 1]} : vector<12x936xf32> to vector<12x935xf32>
    %57 = vector.extract_strided_slice %39 {offsets = [0, 0], sizes = [12, 1], strides = [1, 1]} : vector<12x936xf32> to vector<12x1xf32>
    %58 = tpu.concatenate %56, %57 in 1 : vector<12x935xf32>, vector<12x1xf32> -> vector<12x936xf32>
    %59 = vector.extract_strided_slice %39 {offsets = [0, 25], sizes = [12, 911], strides = [1, 1]} : vector<12x936xf32> to vector<12x911xf32>
    %60 = vector.extract_strided_slice %39 {offsets = [0, 0], sizes = [12, 25], strides = [1, 1]} : vector<12x936xf32> to vector<12x25xf32>
    %61 = tpu.concatenate %59, %60 in 1 : vector<12x911xf32>, vector<12x25xf32> -> vector<12x936xf32>
    %62 = vector.extract_strided_slice %39 {offsets = [0, 26], sizes = [12, 910], strides = [1, 1]} : vector<12x936xf32> to vector<12x910xf32>
    %63 = vector.extract_strided_slice %39 {offsets = [0, 0], sizes = [12, 26], strides = [1, 1]} : vector<12x936xf32> to vector<12x26xf32>
    %64 = tpu.concatenate %62, %63 in 1 : vector<12x910xf32>, vector<12x26xf32> -> vector<12x936xf32>
    %65 = vector.extract_strided_slice %39 {offsets = [0, 27], sizes = [12, 909], strides = [1, 1]} : vector<12x936xf32> to vector<12x909xf32>
    %66 = vector.extract_strided_slice %39 {offsets = [0, 0], sizes = [12, 27], strides = [1, 1]} : vector<12x936xf32> to vector<12x27xf32>
    %67 = tpu.concatenate %65, %66 in 1 : vector<12x909xf32>, vector<12x27xf32> -> vector<12x936xf32>
    %68 = tpu.concatenate %46, %49, %52, %55, %39, %58, %61, %64, %67 in 0 : vector<12x936xf32>, vector<12x936xf32>, vector<12x936xf32>, vector<12x936xf32>, vector<12x936xf32>, vector<12x936xf32>, vector<12x936xf32>, vector<12x936xf32>, vector<12x936xf32> -> vector<108x936xf32>
    %cst_19 = arith.constant dense<0.000000e+00> : vector<8x936xf32>
    %69 = tpu.matmul %41, %68, %cst_19 {dimension_numbers = #tpu.dot_dimension_numbers<[1], [0], [0], [1], [0, 0, 1, 1], [], []>} : vector<8x108xf32>, vector<108x936xf32>, vector<8x936xf32> -> vector<8x936xf32>
    %70 = vector.broadcast %43 : vector<8x1xf32> to vector<8x936xf32>
    %71 = arith.addf %69, %70 : vector<8x936xf32>
    %cst_20 = arith.constant 0.000000e+00 : f32
    %72 = vector.broadcast %cst_20 : f32 to vector<8x936xf32>
    %73 = arith.maximumf %71, %72 : vector<8x936xf32>
    %c0_21 = arith.constant 0 : index
    %c0_22 = arith.constant 0 : index
    %74 = vector.load %arg10[%c0_21, %c0_22] : memref<936x280xf32, #tpu.memory_space<vmem>>, vector<936x280xf32>
    %cst_23 = arith.constant dense<0.000000e+00> : vector<8x280xf32>
    %75 = tpu.matmul %73, %74, %cst_23 {dimension_numbers = #tpu.dot_dimension_numbers<[1], [0], [0], [1], [0, 0, 1, 1], [], []>} : vector<8x936xf32>, vector<936x280xf32>, vector<8x280xf32> -> vector<8x280xf32>
    %c0_24 = arith.constant 0 : index
    %c0_25 = arith.constant 0 : index
    %c0_26 = arith.constant 0 : index
    %76 = vector.load %arg6[%c0_24, %c0_25, %c0_26] : memref<1x4x72xf32, #tpu.memory_space<vmem>>, vector<1x4x72xf32>
    %77 = vector.shape_cast %76 : vector<1x4x72xf32> to vector<4x72xf32>
    %c0_27 = arith.constant 0 : index
    %c0_28 = arith.constant 0 : index
    %c0_29 = arith.constant 0 : index
    %78 = vector.load %arg7[%c0_27, %c0_28, %c0_29] : memref<1x4x1xf32, #tpu.memory_space<vmem>>, vector<1x4x1xf32>
    %79 = vector.shape_cast %78 : vector<1x4x1xf32> to vector<4x1xf32>
    %80 = vector.extract_strided_slice %75 {offsets = [0, 265], sizes = [8, 15], strides = [1, 1]} : vector<8x280xf32> to vector<8x15xf32>
    %81 = vector.extract_strided_slice %75 {offsets = [0, 0], sizes = [8, 265], strides = [1, 1]} : vector<8x280xf32> to vector<8x265xf32>
    %82 = tpu.concatenate %80, %81 in 1 : vector<8x15xf32>, vector<8x265xf32> -> vector<8x280xf32>
    %83 = vector.extract_strided_slice %75 {offsets = [0, 266], sizes = [8, 14], strides = [1, 1]} : vector<8x280xf32> to vector<8x14xf32>
    %84 = vector.extract_strided_slice %75 {offsets = [0, 0], sizes = [8, 266], strides = [1, 1]} : vector<8x280xf32> to vector<8x266xf32>
    %85 = tpu.concatenate %83, %84 in 1 : vector<8x14xf32>, vector<8x266xf32> -> vector<8x280xf32>
    %86 = vector.extract_strided_slice %75 {offsets = [0, 267], sizes = [8, 13], strides = [1, 1]} : vector<8x280xf32> to vector<8x13xf32>
    %87 = vector.extract_strided_slice %75 {offsets = [0, 0], sizes = [8, 267], strides = [1, 1]} : vector<8x280xf32> to vector<8x267xf32>
    %88 = tpu.concatenate %86, %87 in 1 : vector<8x13xf32>, vector<8x267xf32> -> vector<8x280xf32>
    %89 = vector.extract_strided_slice %75 {offsets = [0, 279], sizes = [8, 1], strides = [1, 1]} : vector<8x280xf32> to vector<8x1xf32>
    %90 = vector.extract_strided_slice %75 {offsets = [0, 0], sizes = [8, 279], strides = [1, 1]} : vector<8x280xf32> to vector<8x279xf32>
    %91 = tpu.concatenate %89, %90 in 1 : vector<8x1xf32>, vector<8x279xf32> -> vector<8x280xf32>
    %92 = vector.extract_strided_slice %75 {offsets = [0, 1], sizes = [8, 279], strides = [1, 1]} : vector<8x280xf32> to vector<8x279xf32>
    %93 = vector.extract_strided_slice %75 {offsets = [0, 0], sizes = [8, 1], strides = [1, 1]} : vector<8x280xf32> to vector<8x1xf32>
    %94 = tpu.concatenate %92, %93 in 1 : vector<8x279xf32>, vector<8x1xf32> -> vector<8x280xf32>
    %95 = vector.extract_strided_slice %75 {offsets = [0, 13], sizes = [8, 267], strides = [1, 1]} : vector<8x280xf32> to vector<8x267xf32>
    %96 = vector.extract_strided_slice %75 {offsets = [0, 0], sizes = [8, 13], strides = [1, 1]} : vector<8x280xf32> to vector<8x13xf32>
    %97 = tpu.concatenate %95, %96 in 1 : vector<8x267xf32>, vector<8x13xf32> -> vector<8x280xf32>
    %98 = vector.extract_strided_slice %75 {offsets = [0, 14], sizes = [8, 266], strides = [1, 1]} : vector<8x280xf32> to vector<8x266xf32>
    %99 = vector.extract_strided_slice %75 {offsets = [0, 0], sizes = [8, 14], strides = [1, 1]} : vector<8x280xf32> to vector<8x14xf32>
    %100 = tpu.concatenate %98, %99 in 1 : vector<8x266xf32>, vector<8x14xf32> -> vector<8x280xf32>
    %101 = vector.extract_strided_slice %75 {offsets = [0, 15], sizes = [8, 265], strides = [1, 1]} : vector<8x280xf32> to vector<8x265xf32>
    %102 = vector.extract_strided_slice %75 {offsets = [0, 0], sizes = [8, 15], strides = [1, 1]} : vector<8x280xf32> to vector<8x15xf32>
    %103 = tpu.concatenate %101, %102 in 1 : vector<8x265xf32>, vector<8x15xf32> -> vector<8x280xf32>
    %104 = tpu.concatenate %82, %85, %88, %91, %75, %94, %97, %100, %103 in 0 : vector<8x280xf32>, vector<8x280xf32>, vector<8x280xf32>, vector<8x280xf32>, vector<8x280xf32>, vector<8x280xf32>, vector<8x280xf32>, vector<8x280xf32>, vector<8x280xf32> -> vector<72x280xf32>
    %cst_30 = arith.constant dense<0.000000e+00> : vector<4x280xf32>
    %105 = tpu.matmul %77, %104, %cst_30 {dimension_numbers = #tpu.dot_dimension_numbers<[1], [0], [0], [1], [0, 0, 1, 1], [], []>} : vector<4x72xf32>, vector<72x280xf32>, vector<4x280xf32> -> vector<4x280xf32>
    %106 = vector.broadcast %79 : vector<4x1xf32> to vector<4x280xf32>
    %107 = arith.addf %105, %106 : vector<4x280xf32>
    %cst_31 = arith.constant 0.000000e+00 : f32
    %108 = vector.broadcast %cst_31 : f32 to vector<4x280xf32>
    %109 = arith.maximumf %107, %108 : vector<4x280xf32>
    %110 = vector.broadcast %1 : vector<1x280xf32> to vector<4x280xf32>
    %111 = arith.mulf %109, %110 : vector<4x280xf32>
    %c0_32 = arith.constant 0 : index
    %c0_33 = arith.constant 0 : index
    %c0_34 = arith.constant 0 : index
    %112 = vector.load %arg8[%c0_32, %c0_33, %c0_34] : memref<1x1x36xf32, #tpu.memory_space<vmem>>, vector<1x1x36xf32>
    %113 = vector.shape_cast %112 : vector<1x1x36xf32> to vector<1x36xf32>
    %c0_35 = arith.constant 0 : index
    %c0_36 = arith.constant 0 : index
    %c0_37 = arith.constant 0 : index
    %114 = vector.load %arg9[%c0_35, %c0_36, %c0_37] : memref<1x1x1xf32, #tpu.memory_space<vmem>>, vector<1x1x1xf32>
    %115 = vector.shape_cast %114 : vector<1x1x1xf32> to vector<1x1xf32>
    %116 = vector.extract_strided_slice %111 {offsets = [0, 265], sizes = [4, 15], strides = [1, 1]} : vector<4x280xf32> to vector<4x15xf32>
    %117 = vector.extract_strided_slice %111 {offsets = [0, 0], sizes = [4, 265], strides = [1, 1]} : vector<4x280xf32> to vector<4x265xf32>
    %118 = tpu.concatenate %116, %117 in 1 : vector<4x15xf32>, vector<4x265xf32> -> vector<4x280xf32>
    %119 = vector.extract_strided_slice %111 {offsets = [0, 266], sizes = [4, 14], strides = [1, 1]} : vector<4x280xf32> to vector<4x14xf32>
    %120 = vector.extract_strided_slice %111 {offsets = [0, 0], sizes = [4, 266], strides = [1, 1]} : vector<4x280xf32> to vector<4x266xf32>
    %121 = tpu.concatenate %119, %120 in 1 : vector<4x14xf32>, vector<4x266xf32> -> vector<4x280xf32>
    %122 = vector.extract_strided_slice %111 {offsets = [0, 267], sizes = [4, 13], strides = [1, 1]} : vector<4x280xf32> to vector<4x13xf32>
    %123 = vector.extract_strided_slice %111 {offsets = [0, 0], sizes = [4, 267], strides = [1, 1]} : vector<4x280xf32> to vector<4x267xf32>
    %124 = tpu.concatenate %122, %123 in 1 : vector<4x13xf32>, vector<4x267xf32> -> vector<4x280xf32>
    %125 = vector.extract_strided_slice %111 {offsets = [0, 279], sizes = [4, 1], strides = [1, 1]} : vector<4x280xf32> to vector<4x1xf32>
    %126 = vector.extract_strided_slice %111 {offsets = [0, 0], sizes = [4, 279], strides = [1, 1]} : vector<4x280xf32> to vector<4x279xf32>
    %127 = tpu.concatenate %125, %126 in 1 : vector<4x1xf32>, vector<4x279xf32> -> vector<4x280xf32>
    %128 = vector.extract_strided_slice %111 {offsets = [0, 1], sizes = [4, 279], strides = [1, 1]} : vector<4x280xf32> to vector<4x279xf32>
    %129 = vector.extract_strided_slice %111 {offsets = [0, 0], sizes = [4, 1], strides = [1, 1]} : vector<4x280xf32> to vector<4x1xf32>
    %130 = tpu.concatenate %128, %129 in 1 : vector<4x279xf32>, vector<4x1xf32> -> vector<4x280xf32>
    %131 = vector.extract_strided_slice %111 {offsets = [0, 13], sizes = [4, 267], strides = [1, 1]} : vector<4x280xf32> to vector<4x267xf32>
    %132 = vector.extract_strided_slice %111 {offsets = [0, 0], sizes = [4, 13], strides = [1, 1]} : vector<4x280xf32> to vector<4x13xf32>
    %133 = tpu.concatenate %131, %132 in 1 : vector<4x267xf32>, vector<4x13xf32> -> vector<4x280xf32>
    %134 = vector.extract_strided_slice %111 {offsets = [0, 14], sizes = [4, 266], strides = [1, 1]} : vector<4x280xf32> to vector<4x266xf32>
    %135 = vector.extract_strided_slice %111 {offsets = [0, 0], sizes = [4, 14], strides = [1, 1]} : vector<4x280xf32> to vector<4x14xf32>
    %136 = tpu.concatenate %134, %135 in 1 : vector<4x266xf32>, vector<4x14xf32> -> vector<4x280xf32>
    %137 = vector.extract_strided_slice %111 {offsets = [0, 15], sizes = [4, 265], strides = [1, 1]} : vector<4x280xf32> to vector<4x265xf32>
    %138 = vector.extract_strided_slice %111 {offsets = [0, 0], sizes = [4, 15], strides = [1, 1]} : vector<4x280xf32> to vector<4x15xf32>
    %139 = tpu.concatenate %137, %138 in 1 : vector<4x265xf32>, vector<4x15xf32> -> vector<4x280xf32>
    %140 = tpu.concatenate %118, %121, %124, %127, %111, %130, %133, %136, %139 in 0 : vector<4x280xf32>, vector<4x280xf32>, vector<4x280xf32>, vector<4x280xf32>, vector<4x280xf32>, vector<4x280xf32>, vector<4x280xf32>, vector<4x280xf32>, vector<4x280xf32> -> vector<36x280xf32>
    %cst_38 = arith.constant dense<0.000000e+00> : vector<1x280xf32>
    %141 = tpu.matmul %113, %140, %cst_38 {dimension_numbers = #tpu.dot_dimension_numbers<[1], [0], [0], [1], [0, 0, 1, 1], [], []>} : vector<1x36xf32>, vector<36x280xf32>, vector<1x280xf32> -> vector<1x280xf32>
    %142 = vector.broadcast %115 : vector<1x1xf32> to vector<1x280xf32>
    %143 = arith.addf %141, %142 : vector<1x280xf32>
    %cst_39 = arith.constant 0.000000e+00 : f32
    %144 = vector.broadcast %cst_39 : f32 to vector<1x280xf32>
    %145 = arith.maximumf %143, %144 : vector<1x280xf32>
    %146 = vector.extract_strided_slice %145 {offsets = [0, 0], sizes = [1, 140], strides = [1, 1]} : vector<1x280xf32> to vector<1x140xf32>
    %c0_40 = arith.constant 0 : index
    %c0_41 = arith.constant 0 : index
    %147 = vector.load %arg11[%c0_40, %c0_41] : memref<140x96xf32, #tpu.memory_space<vmem>>, vector<140x96xf32>
    %cst_42 = arith.constant dense<0.000000e+00> : vector<1x96xf32>
    %148 = tpu.matmul %146, %147, %cst_42 {dimension_numbers = #tpu.dot_dimension_numbers<[1], [0], [0], [1], [0, 0, 1, 1], [], []>} : vector<1x140xf32>, vector<140x96xf32>, vector<1x96xf32> -> vector<1x96xf32>
    %149 = vector.extract_strided_slice %145 {offsets = [0, 140], sizes = [1, 140], strides = [1, 1]} : vector<1x280xf32> to vector<1x140xf32>
    %c0_43 = arith.constant 0 : index
    %c0_44 = arith.constant 0 : index
    %150 = vector.load %arg11[%c0_43, %c0_44] : memref<140x96xf32, #tpu.memory_space<vmem>>, vector<140x96xf32>
    %cst_45 = arith.constant dense<0.000000e+00> : vector<1x96xf32>
    %151 = tpu.matmul %149, %150, %cst_45 {dimension_numbers = #tpu.dot_dimension_numbers<[1], [0], [0], [1], [0, 0, 1, 1], [], []>} : vector<1x140xf32>, vector<140x96xf32>, vector<1x96xf32> -> vector<1x96xf32>
    %152 = tpu.concatenate %148, %151 in 0 : vector<1x96xf32>, vector<1x96xf32> -> vector<2x96xf32>
    %c0_46 = arith.constant 0 : index
    %c0_47 = arith.constant 0 : index
    %c0_48 = arith.constant 0 : index
    %153 = vector.load %arg14[%c0_46, %c0_47, %c0_48] : memref<1x2x96xf32, #tpu.memory_space<vmem>>, vector<1x2x96xf32>
    %154 = vector.shape_cast %153 : vector<1x2x96xf32> to vector<2x96xf32>
    %155 = vector.shape_cast %152 : vector<2x96xf32> to vector<1x2x96xf32>
    tpu.vector_store %arg14[%c0_46, %c0_47, %c0_48], %155 {strides = array<i32>} : memref<1x2x96xf32, #tpu.memory_space<vmem>>, vector<1x2x96xf32>,
    return
  }
  func.func @transform_0(%arg0: i32) -> (i32, i32, i32) {
    %c0_i32 = arith.constant 0 : i32
    %c0_i32_0 = arith.constant 0 : i32
    %c0_i32_1 = arith.constant 0 : i32
    return %arg0, %c0_i32, %c0_i32_0 : i32, i32, i32
  }
  func.func @transform_1(%arg0: i32) -> (i32, i32, i32) {
    %c0_i32 = arith.constant 0 : i32
    %c0_i32_0 = arith.constant 0 : i32
    %c0_i32_1 = arith.constant 0 : i32
    return %arg0, %c0_i32, %c0_i32_0 : i32, i32, i32
  }
  func.func @transform_2(%arg0: i32) -> (i32, i32, i32) {
    %c0_i32 = arith.constant 0 : i32
    %c0_i32_0 = arith.constant 0 : i32
    %c0_i32_1 = arith.constant 0 : i32
    return %arg0, %c0_i32, %c0_i32_0 : i32, i32, i32
  }
  func.func @transform_3(%arg0: i32) -> (i32, i32, i32) {
    %c0_i32 = arith.constant 0 : i32
    %c0_i32_0 = arith.constant 0 : i32
    %c0_i32_1 = arith.constant 0 : i32
    return %arg0, %c0_i32, %c0_i32_0 : i32, i32, i32
  }
  func.func @transform_4(%arg0: i32) -> (i32, i32, i32) {
    %c0_i32 = arith.constant 0 : i32
    %c0_i32_0 = arith.constant 0 : i32
    %c0_i32_1 = arith.constant 0 : i32
    return %arg0, %c0_i32, %c0_i32_0 : i32, i32, i32
  }
  func.func @transform_5(%arg0: i32) -> (i32, i32, i32) {
    %c0_i32 = arith.constant 0 : i32
    %c0_i32_0 = arith.constant 0 : i32
    %c0_i32_1 = arith.constant 0 : i32
    return %arg0, %c0_i32, %c0_i32_0 : i32, i32, i32
  }
  func.func @transform_6(%arg0: i32) -> (i32, i32, i32) {
    %c0_i32 = arith.constant 0 : i32
    %c0_i32_0 = arith.constant 0 : i32
    %c0_i32_1 = arith.constant 0 : i32
    return %arg0, %c0_i32, %c0_i32_0 : i32, i32, i32
  }
  func.func @transform_7(%arg0: i32) -> (i32, i32, i32) {
    %c0_i32 = arith.constant 0 : i32
    %c0_i32_0 = arith.constant 0 : i32
    %c0_i32_1 = arith.constant 0 : i32
    return %arg0, %c0_i32, %c0_i32_0 : i32, i32, i32
  }
  func.func @transform_8(%arg0: i32) -> (i32, i32, i32) {
    %c0_i32 = arith.constant 0 : i32
    %c0_i32_0 = arith.constant 0 : i32
    %c0_i32_1 = arith.constant 0 : i32
    return %arg0, %c0_i32, %c0_i32_0 : i32, i32, i32
  }
  func.func @transform_9(%arg0: i32) -> (i32, i32) {
    %c0_i32 = arith.constant 0 : i32
    %c0_i32_0 = arith.constant 0 : i32
    %c0_i32_1 = arith.constant 0 : i32
    return %c0_i32, %c0_i32_0 : i32, i32
  }
  func.func @transform_10(%arg0: i32) -> (i32, i32) {
    %c0_i32 = arith.constant 0 : i32
    %c0_i32_0 = arith.constant 0 : i32
    %c0_i32_1 = arith.constant 0 : i32
    return %c0_i32, %c0_i32_0 : i32, i32
  }
  func.func @transform_11(%arg0: i32) -> (i32, i32) {
    %c0_i32 = arith.constant 0 : i32
    %c0_i32_0 = arith.constant 0 : i32
    %c0_i32_1 = arith.constant 0 : i32
    return %c0_i32, %c0_i32_0 : i32, i32
  }
  func.func @transform_12(%arg0: i32) -> (i32, i32) {
    %c0_i32 = arith.constant 0 : i32
    %c0_i32_0 = arith.constant 0 : i32
    %c0_i32_1 = arith.constant 0 : i32
    return %c0_i32, %c0_i32_0 : i32, i32
  }
  func.func @transform_13(%arg0: i32) -> (i32, i32, i32) {
    %c0_i32 = arith.constant 0 : i32
    %c0_i32_0 = arith.constant 0 : i32
    %c0_i32_1 = arith.constant 0 : i32
    return %arg0, %c0_i32, %c0_i32_0 : i32, i32, i32
  }
}

module attributes {stable_mosaic.version = 11 : i64} {
  func.func @_fc_kernel(%arg0: memref<2x960xf32, #tpu.memory_space<vmem>>, %arg1: memref<960x512xf32, #tpu.memory_space<vmem>>, %arg2: memref<1x512xf32, #tpu.memory_space<vmem>>, %arg3: memref<512x192xf32, #tpu.memory_space<vmem>>, %arg4: memref<1x192xf32, #tpu.memory_space<vmem>>, %arg5: memref<2x192xf32, #tpu.memory_space<vmem>>) attributes {dimension_semantics = [], scalar_prefetch = 0 : i64, scratch_operands = 0 : i64, tpu.core_type = #tpu.core_type<tc>} {
    %c0 = arith.constant 0 : index
    %c0_0 = arith.constant 0 : index
    %0 = vector.load %arg0[%c0, %c0_0] : memref<2x960xf32, #tpu.memory_space<vmem>>, vector<2x960xf32>
    %c0_1 = arith.constant 0 : index
    %c0_2 = arith.constant 0 : index
    %1 = vector.load %arg1[%c0_1, %c0_2] : memref<960x512xf32, #tpu.memory_space<vmem>>, vector<960x512xf32>
    %cst = arith.constant dense<0.000000e+00> : vector<2x512xf32>
    %2 = tpu.matmul %0, %1, %cst {dimension_numbers = #tpu.dot_dimension_numbers<[1], [0], [0], [1], [0, 0, 1, 1], [], []>} : vector<2x960xf32>, vector<960x512xf32>, vector<2x512xf32> -> vector<2x512xf32>
    %c0_3 = arith.constant 0 : index
    %c0_4 = arith.constant 0 : index
    %3 = vector.load %arg2[%c0_3, %c0_4] : memref<1x512xf32, #tpu.memory_space<vmem>>, vector<1x512xf32>
    %4 = vector.broadcast %3 : vector<1x512xf32> to vector<2x512xf32>
    %5 = arith.addf %2, %4 : vector<2x512xf32>
    %cst_5 = arith.constant 0.000000e+00 : f32
    %6 = vector.broadcast %cst_5 : f32 to vector<2x512xf32>
    %7 = arith.maximumf %5, %6 : vector<2x512xf32>
    %c0_6 = arith.constant 0 : index
    %c0_7 = arith.constant 0 : index
    %8 = vector.load %arg3[%c0_6, %c0_7] : memref<512x192xf32, #tpu.memory_space<vmem>>, vector<512x192xf32>
    %cst_8 = arith.constant dense<0.000000e+00> : vector<2x192xf32>
    %9 = tpu.matmul %7, %8, %cst_8 {dimension_numbers = #tpu.dot_dimension_numbers<[1], [0], [0], [1], [0, 0, 1, 1], [], []>} : vector<2x512xf32>, vector<512x192xf32>, vector<2x192xf32> -> vector<2x192xf32>
    %c0_9 = arith.constant 0 : index
    %c0_10 = arith.constant 0 : index
    %10 = vector.load %arg4[%c0_9, %c0_10] : memref<1x192xf32, #tpu.memory_space<vmem>>, vector<1x192xf32>
    %11 = vector.broadcast %10 : vector<1x192xf32> to vector<2x192xf32>
    %12 = arith.addf %9, %11 : vector<2x192xf32>
    %c0_11 = arith.constant 0 : index
    %c0_12 = arith.constant 0 : index
    %13 = vector.load %arg5[%c0_11, %c0_12] : memref<2x192xf32, #tpu.memory_space<vmem>>, vector<2x192xf32>
    tpu.vector_store %arg5[%c0_11, %c0_12], %12 {strides = array<i32>} : memref<2x192xf32, #tpu.memory_space<vmem>>, vector<2x192xf32>,
    return
  }
}

</mosaic_0001>

<bundles_post_ra>
// kernel: pce_forward.3
= control target key start
LH: loop header
LB: loop body
LE: loop exit
PB: predicated region body
PF: predicated region fallthrough
CT: control target
= control target key end

     0   :  { %vm568_vm0 = vcmask 523264   ;;  %s4067_s0 = inlined_call_operand.vmem [shape: f32[2,960], index: 0, kind: input, shape index: {}]   ;;  %s4068_s1 = inlined_call_operand.vmem [shape: f32[960,512], index: 1, kind: input, shape index: {}]   ;;  %s4069_s2 = inlined_call_operand.vmem [shape: f32[1,512], index: 2, kind: input, shape index: {}]   ;;  %s4070_s3 = inlined_call_operand.vmem [shape: f32[512,192], index: 3, kind: input, shape index: {}]   ;;  %s4071_s4 = inlined_call_operand.vmem [shape: f32[1,192], index: 4, kind: input, shape index: {}]   ;;  %s4072_s5 = inlined_call_operand.hbm [shape: f32[2,192], index: 5, kind: output, shape index: {}]  }
   0x1   :  { %v24_v0 = vld [vmem:[%s4068_s1 + $0x8] sm:$0xff]  ;;  %v23_v5 = vld [vmem:[%s4068_s1] sm:$0xff] }
   0x2   :  { %v28_v1 = vld [vmem:[%s4068_s1 + $0x28] sm:$0xff]  ;;  %v27_v6 = vld [vmem:[%s4068_s1 + $0x20] sm:$0xff] }
   0x3   :  { %v152_v2 = vld [vmem:[%s4068_s1 + $0x408] sm:$0xff]  ;;  %v1456_v3 = vpack.c.bf16 %v28_v1, %v24_v0  ;;  %v1458_v8 = vpack.c.bf16 %v27_v6, %v23_v5  ;;  %v151_v9 = vld [vmem:[%s4068_s1 + $0x400] sm:$0xff] }
   0x4   :  { %v156_v4 = vld [vmem:[%s4068_s1 + $0x428] sm:$0xff]  ;;  %v155_v10 = vld [vmem:[%s4068_s1 + $0x420] sm:$0xff] }
   0x5   :  { %v1520_v7 = vpack.c.bf16 %v156_v4, %v152_v2  ;;  %v32_v11 = vld [vmem:[%s4068_s1 + $0x48] sm:$0xff]  ;;  %1457 = vmatprep.subr.bf16.mxu1 %v1456_v3  ;;  %v1522_v12 = vpack.c.bf16 %v155_v10, %v151_v9  ;;  %v31_v18 = vld [vmem:[%s4068_s1 + $0x40] sm:$0xff] }
   0x6   :  { %v36_v13 = vld [vmem:[%s4068_s1 + $0x68] sm:$0xff]  ;;  %1459 = vmatpush1.bf16.msra.mxu1 %v1458_v8  ;;  %v35_v19 = vld [vmem:[%s4068_s1 + $0x60] sm:$0xff] }
   0x7   :  { %v160_v14 = vld [vmem:[%s4068_s1 + $0x448] sm:$0xff]  ;;  %1521 = vmatprep.subr.bf16.mxu0 %v1520_v7  ;;  %v1460_v16 = vpack.c.bf16 %v36_v13, %v32_v11  ;;  %v159_v20 = vld [vmem:[%s4068_s1 + $0x440] sm:$0xff]  ;;  %v1462_v21 = vpack.c.bf16 %v35_v19, %v31_v18 }
   0x8   :  { %v164_v15 = vld [vmem:[%s4068_s1 + $0x468] sm:$0xff]  ;;  %1523 = vmatpush1.bf16.msra.mxu0 %v1522_v12  ;;  %v163_v22 = vld [vmem:[%s4068_s1 + $0x460] sm:$0xff] }
   0x9   :  { %v1524_v17 = vpack.c.bf16 %v164_v15, %v160_v14  ;;  %v40_v23 = vld [vmem:[%s4068_s1 + $0x88] sm:$0xff]  ;;  %1461 = vmatprep.subr.bf16.mxu1 %v1460_v16  ;;  %v1526_v25 = vpack.c.bf16 %v163_v22, %v159_v20  ;;  %v39_v29 = vld [vmem:[%s4068_s1 + $0x80] sm:$0xff] }
   0xa   :  { %v44_v24 = vld [vmem:[%s4068_s1 + $0xa8] sm:$0xff]  ;;  %v43_v31 = vld [vmem:[%s4068_s1 + $0xa0] sm:$0xff]  ;;  %1463 = vmatpush1.bf16.msra.mxu1 %v1462_v21 }
   0xb   :  { %1525 = vmatprep.subr.bf16.mxu0 %v1524_v17  ;;  %v1464_v26 = vpack.c.bf16 %v44_v24, %v40_v23  ;;  %v168_v27 = vld [vmem:[%s4068_s1 + $0x488] sm:$0xff]  ;;  %v167_v32 = vld [vmem:[%s4068_s1 + $0x480] sm:$0xff]  ;;  %v1466_v34 = vpack.c.bf16 %v43_v31, %v39_v29 }
   0xc   :  { %v172_v28 = vld [vmem:[%s4068_s1 + $0x4a8] sm:$0xff]  ;;  %v171_v33 = vld [vmem:[%s4068_s1 + $0x4a0] sm:$0xff]  ;;  %1527 = vmatpush1.bf16.msra.mxu0 %v1526_v25 }
   0xd   :  { %v1528_v30 = vpack.c.bf16 %v172_v28, %v168_v27  ;;  %v48_v35 = vld [vmem:[%s4068_s1 + $0xc8] sm:$0xff]  ;;  %1465 = vmatprep.subr.bf16.mxu1 %v1464_v26  ;;  %v1530_v38 = vpack.c.bf16 %v171_v33, %v167_v32  ;;  %v47_v41 = vld [vmem:[%s4068_s1 + $0xc0] sm:$0xff] }
   0xe   :  { %v52_v36 = vld [vmem:[%s4068_s1 + $0xe8] sm:$0xff]  ;;  %v51_v42 = vld [vmem:[%s4068_s1 + $0xe0] sm:$0xff]  ;;  %1467 = vmatpush1.bf16.msra.mxu1 %v1466_v34 }
   0xf   :  { %v176_v37 = vld [vmem:[%s4068_s1 + $0x4c8] sm:$0xff]  ;;  %v1468_v39 = vpack.c.bf16 %v52_v36, %v48_v35  ;;  %1529 = vmatprep.subr.bf16.mxu0 %v1528_v30  ;;  %v175_v44 = vld [vmem:[%s4068_s1 + $0x4c0] sm:$0xff]  ;;  %v1470_v50 = vpack.c.bf16 %v51_v42, %v47_v41 }
  0x10   :  { %v180_v40 = vld [vmem:[%s4068_s1 + $0x4e8] sm:$0xff]  ;;  %v179_v45 = vld [vmem:[%s4068_s1 + $0x4e0] sm:$0xff]  ;;  %1531 = vmatpush1.bf16.msra.mxu0 %v1530_v38 }
  0x11   :  { %v1532_v43 = vpack.c.bf16 %v180_v40, %v176_v37  ;;  %v56_v46 = vld [vmem:[%s4068_s1 + $0x108] sm:$0xff]  ;;  %1469 = vmatprep.subr.bf16.mxu1 %v1468_v39  ;;  %v1534_v51 = vpack.c.bf16 %v179_v45, %v175_v44  ;;  %v55_v53 = vld [vmem:[%s4068_s1 + $0x100] sm:$0xff] }
  0x12   :  { %v60_v47 = vld [vmem:[%s4068_s1 + $0x128] sm:$0xff]  ;;  %v59_v54 = vld [vmem:[%s4068_s1 + $0x120] sm:$0xff]  ;;  %1471 = vmatpush1.bf16.msra.mxu1 %v1470_v50 }
  0x13   :  { %v184_v48 = vld [vmem:[%s4068_s1 + $0x508] sm:$0xff]  ;;  %v1472_v52 = vpack.c.bf16 %v60_v47, %v56_v46  ;;  %v183_v55 = vld [vmem:[%s4068_s1 + $0x500] sm:$0xff]  ;;  %1533 = vmatprep.subr.bf16.mxu0 %v1532_v43  ;;  %v1474_v62 = vpack.c.bf16 %v59_v54, %v55_v53  ;;  %v505_v46 = vlaneseq  ;;  %v2112_v47 = vmov 1983009808  }
  0x14   :  { %v188_v49 = vld [vmem:[%s4068_s1 + $0x528] sm:$0xff]  ;;  %v187_v57 = vld [vmem:[%s4068_s1 + $0x520] sm:$0xff]  ;;  %1535 = vmatpush1.bf16.msra.mxu0 %v1534_v51 }
  0x15   :  { %v1536_v56 = vpack.c.bf16 %v188_v49, %v184_v48  ;;  %v64_v58 = vld [vmem:[%s4068_s1 + $0x148] sm:$0xff]  ;;  %1473 = vmatprep.subr.bf16.mxu1 %v1472_v52  ;;  %v1538_v63 = vpack.c.bf16 %v187_v57, %v183_v55  ;;  %v63_v1 = vld [vmem:[%s4068_s1 + $0x140] sm:$0xff]  ;;  %v529_v48 = vunpack.c.l.s4 %v2112_v47 }
  0x16   :  { %v68_v59 = vld [vmem:[%s4068_s1 + $0x168] sm:$0xff]  ;;  %v67_v2 = vld [vmem:[%s4068_s1 + $0x160] sm:$0xff]  ;;  %1475 = vmatpush1.bf16.msra.mxu1 %v1474_v62 }
  0x17   :  { %v192_v60 = vld [vmem:[%s4068_s1 + $0x548] sm:$0xff]  ;;  %v1476_v0 = vpack.c.bf16 %v68_v59, %v64_v58  ;;  %v191_v3 = vld [vmem:[%s4068_s1 + $0x540] sm:$0xff]  ;;  %1537 = vmatprep.subr.bf16.mxu0 %v1536_v56  ;;  %v1478_v10 = vpack.c.bf16 %v67_v2, %v63_v1  ;;  %v530_v62 = vunpack.c.0.s8 %v529_v48 }
  0x18   :  { %v196_v61 = vld [vmem:[%s4068_s1 + $0x568] sm:$0xff]  ;;  %v195_v5 = vld [vmem:[%s4068_s1 + $0x560] sm:$0xff]  ;;  %1539 = vmatpush1.bf16.msra.mxu0 %v1538_v63 }
  0x19   :  { %v1540_v4 = vpack.c.bf16 %v196_v61, %v192_v60  ;;  %v72_v6 = vld [vmem:[%s4068_s1 + $0x188] sm:$0xff]  ;;  %1477 = vmatprep.subr.bf16.mxu1 %v1476_v0  ;;  %v1542_v11 = vpack.c.bf16 %v195_v5, %v191_v3  ;;  %v71_v13 = vld [vmem:[%s4068_s1 + $0x180] sm:$0xff]  ;;  %v2396_v61 = vshrl.u32 %v505_v46, 7 }
  0x1a   :  { %v76_v7 = vld [vmem:[%s4068_s1 + $0x1a8] sm:$0xff]  ;;  %v75_v14 = vld [vmem:[%s4068_s1 + $0x1a0] sm:$0xff]  ;;  %1479 = vmatpush1.bf16.msra.mxu1 %v1478_v10 }
  0x1b   :  { %v200_v8 = vld [vmem:[%s4068_s1 + $0x588] sm:$0xff]  ;;  %v1480_v12 = vpack.c.bf16 %v76_v7, %v72_v6  ;;  %v199_v15 = vld [vmem:[%s4068_s1 + $0x580] sm:$0xff]  ;;  %1541 = vmatprep.subr.bf16.mxu0 %v1540_v4  ;;  %v1482_v22 = vpack.c.bf16 %v75_v14, %v71_v13 }
  0x1c   :  { %v204_v9 = vld [vmem:[%s4068_s1 + $0x5a8] sm:$0xff]  ;;  %v203_v17 = vld [vmem:[%s4068_s1 + $0x5a0] sm:$0xff]  ;;  %1543 = vmatpush1.bf16.msra.mxu0 %v1542_v11  ;;  %v2423_v11 = vsub.s32 %v530_v62, %v2396_v61 }
  0x1d   :  { %v1544_v16 = vpack.c.bf16 %v204_v9, %v200_v8  ;;  %v80_v18 = vld [vmem:[%s4068_s1 + $0x1c8] sm:$0xff]  ;;  %1481 = vmatprep.subr.bf16.mxu1 %v1480_v12  ;;  %v1546_v23 = vpack.c.bf16 %v203_v17, %v199_v15  ;;  %v79_v25 = vld [vmem:[%s4068_s1 + $0x1c0] sm:$0xff] }
  0x1e   :  { %v84_v19 = vld [vmem:[%s4068_s1 + $0x1e8] sm:$0xff]  ;;  %v83_v26 = vld [vmem:[%s4068_s1 + $0x1e0] sm:$0xff]  ;;  %1483 = vmatpush1.bf16.msra.mxu1 %v1482_v22 }
  0x1f   :  { %v208_v20 = vld [vmem:[%s4068_s1 + $0x5c8] sm:$0xff]  ;;  %v1484_v24 = vpack.c.bf16 %v84_v19, %v80_v18  ;;  %v207_v27 = vld [vmem:[%s4068_s1 + $0x5c0] sm:$0xff]  ;;  %1545 = vmatprep.subr.bf16.mxu0 %v1544_v16  ;;  %v1486_v34 = vpack.c.bf16 %v83_v26, %v79_v25 }
  0x20   :  { %v212_v21 = vld [vmem:[%s4068_s1 + $0x5e8] sm:$0xff]  ;;  %v211_v29 = vld [vmem:[%s4068_s1 + $0x5e0] sm:$0xff]  ;;  %1547 = vmatpush1.bf16.msra.mxu0 %v1546_v23 }
  0x21   :  { %v1548_v28 = vpack.c.bf16 %v212_v21, %v208_v20  ;;  %v88_v30 = vld [vmem:[%s4068_s1 + $0x208] sm:$0xff]  ;;  %1485 = vmatprep.subr.bf16.mxu1 %v1484_v24  ;;  %v1550_v35 = vpack.c.bf16 %v211_v29, %v207_v27  ;;  %v87_v37 = vld [vmem:[%s4068_s1 + $0x200] sm:$0xff] }
  0x22   :  { %v92_v31 = vld [vmem:[%s4068_s1 + $0x228] sm:$0xff]  ;;  %v91_v38 = vld [vmem:[%s4068_s1 + $0x220] sm:$0xff]  ;;  %1487 = vmatpush1.bf16.msra.mxu1 %v1486_v34 }
  0x23   :  { %v216_v32 = vld [vmem:[%s4068_s1 + $0x608] sm:$0xff]  ;;  %v1488_v36 = vpack.c.bf16 %v92_v31, %v88_v30  ;;  %v215_v39 = vld [vmem:[%s4068_s1 + $0x600] sm:$0xff]  ;;  %1549 = vmatprep.subr.bf16.mxu0 %v1548_v28  ;;  %v1490_v49 = vpack.c.bf16 %v91_v38, %v87_v37 }
  0x24   :  { %v220_v33 = vld [vmem:[%s4068_s1 + $0x628] sm:$0xff]  ;;  %v219_v41 = vld [vmem:[%s4068_s1 + $0x620] sm:$0xff]  ;;  %1551 = vmatpush1.bf16.msra.mxu0 %v1550_v35 }
  0x25   :  { %v1552_v40 = vpack.c.bf16 %v220_v33, %v216_v32  ;;  %v96_v42 = vld [vmem:[%s4068_s1 + $0x248] sm:$0xff]  ;;  %1489 = vmatprep.subr.bf16.mxu1 %v1488_v36  ;;  %v1554_v50 = vpack.c.bf16 %v219_v41, %v215_v39  ;;  %v95_v52 = vld [vmem:[%s4068_s1 + $0x240] sm:$0xff] }
  0x26   :  { %v100_v43 = vld [vmem:[%s4068_s1 + $0x268] sm:$0xff]  ;;  %v99_v53 = vld [vmem:[%s4068_s1 + $0x260] sm:$0xff]  ;;  %1491 = vmatpush1.bf16.msra.mxu1 %v1490_v49 }
  0x27   :  { %v224_v44 = vld [vmem:[%s4068_s1 + $0x648] sm:$0xff]  ;;  %v1492_v51 = vpack.c.bf16 %v100_v43, %v96_v42  ;;  %v223_v54 = vld [vmem:[%s4068_s1 + $0x640] sm:$0xff]  ;;  %1553 = vmatprep.subr.bf16.mxu0 %v1552_v40  ;;  %v1494_v63 = vpack.c.bf16 %v99_v53, %v95_v52 }
  0x28   :  { %v228_v45 = vld [vmem:[%s4068_s1 + $0x668] sm:$0xff]  ;;  %v227_v56 = vld [vmem:[%s4068_s1 + $0x660] sm:$0xff]  ;;  %1555 = vmatpush1.bf16.msra.mxu0 %v1554_v50 }
  0x29   :  { %v1556_v55 = vpack.c.bf16 %v228_v45, %v224_v44  ;;  %v104_v57 = vld [vmem:[%s4068_s1 + $0x288] sm:$0xff]  ;;  %1493 = vmatprep.subr.bf16.mxu1 %v1492_v51  ;;  %v1558_v0 = vpack.c.bf16 %v227_v56, %v223_v54  ;;  %v103_v2 = vld [vmem:[%s4068_s1 + $0x280] sm:$0xff] }
  0x2a   :  { %v108_v58 = vld [vmem:[%s4068_s1 + $0x2a8] sm:$0xff]  ;;  %v107_v3 = vld [vmem:[%s4068_s1 + $0x2a0] sm:$0xff]  ;;  %1495 = vmatpush1.bf16.msra.mxu1 %v1494_v63 }
  0x2b   :  { %v232_v59 = vld [vmem:[%s4068_s1 + $0x688] sm:$0xff]  ;;  %v1496_v1 = vpack.c.bf16 %v108_v58, %v104_v57  ;;  %v231_v4 = vld [vmem:[%s4068_s1 + $0x680] sm:$0xff]  ;;  %1557 = vmatprep.subr.bf16.mxu0 %v1556_v55  ;;  %v1498_v12 = vpack.c.bf16 %v107_v3, %v103_v2 }
  0x2c   :  { %v236_v60 = vld [vmem:[%s4068_s1 + $0x6a8] sm:$0xff]  ;;  %v235_v6 = vld [vmem:[%s4068_s1 + $0x6a0] sm:$0xff]  ;;  %1559 = vmatpush1.bf16.msra.mxu0 %v1558_v0 }
  0x2d   :  { %v1560_v5 = vpack.c.bf16 %v236_v60, %v232_v59  ;;  %v112_v7 = vld [vmem:[%s4068_s1 + $0x2c8] sm:$0xff]  ;;  %v111_v13 = vld [vmem:[%s4068_s1 + $0x2c0] sm:$0xff]  ;;  %1497 = vmatprep.subr.bf16.mxu1 %v1496_v1  ;;  %v1562_v14 = vpack.c.bf16 %v235_v6, %v231_v4 }
  0x2e   :  { %v116_v8 = vld [vmem:[%s4068_s1 + $0x2e8] sm:$0xff]  ;;  %v115_v16 = vld [vmem:[%s4068_s1 + $0x2e0] sm:$0xff]  ;;  %1499 = vmatpush1.bf16.msra.mxu1 %v1498_v12  ;;  %v26_v12 = vld [vmem:[%s4068_s1 + $0x18] sm:$0xff] }
  0x2f   :  { %v240_v9 = vld [vmem:[%s4068_s1 + $0x6c8] sm:$0xff]  ;;  %v1500_v15 = vpack.c.bf16 %v116_v8, %v112_v7  ;;  %v239_v17 = vld [vmem:[%s4068_s1 + $0x6c0] sm:$0xff]  ;;  %1561 = vmatprep.subr.bf16.mxu0 %v1560_v5  ;;  %v1502_v27 = vpack.c.bf16 %v115_v16, %v111_v13  ;;  %v30_v13 = vld [vmem:[%s4068_s1 + $0x38] sm:$0xff] }
  0x30   :  { %v244_v10 = vld [vmem:[%s4068_s1 + $0x6e8] sm:$0xff]  ;;  %v243_v18 = vld [vmem:[%s4068_s1 + $0x6e0] sm:$0xff]  ;;  %1563 = vmatpush1.bf16.msra.mxu0 %v1562_v14 }
  0x31   :  { %v1564_v19 = vpack.c.bf16 %v244_v10, %v240_v9  ;;  %v120_v20 = vld [vmem:[%s4068_s1 + $0x308] sm:$0xff]  ;;  %v21_v22 = vld [vmem:[%s4067_s0] sm:$0xff]  ;;  %v1566_v28 = vpack.c.bf16 %v243_v18, %v239_v17  ;;  %1501 = vmatprep.subr.bf16.mxu1 %v1500_v15  ;;  %v1696_v18 = vpack.c.bf16 %v30_v13, %v26_v12  ;;  %v66_v13 = vld [vmem:[%s4068_s1 + $0x158] sm:$0xff] }
  0x32   :  { %v124_v21 = vld [vmem:[%s4068_s1 + $0x328] sm:$0xff]  ;;  %v2453_v25 = vrot.slane %v21_v22, %v2423_v11  ;;  %v527_v26 = vcombine.high %v21_v22, %v21_v22  ;;  %v119_v30 = vld [vmem:[%s4068_s1 + $0x300] sm:$0xff]  ;;  %1503 = vmatpush1.bf16.msra.mxu1 %v1502_v27 }
  0x33   :  { %v248_v23 = vld [vmem:[%s4068_s1 + $0x708] sm:$0xff]  ;;  %v1504_v29 = vpack.c.bf16 %v124_v21, %v120_v20  ;;  %v123_v31 = vld [vmem:[%s4068_s1 + $0x320] sm:$0xff]  ;;  %1565 = vmatprep.subr.bf16.mxu0 %v1564_v19  ;;  %v25_v20 = vld [vmem:[%s4068_s1 + $0x10] sm:$0xff] }
  0x34   :  { %v252_v24 = vld [vmem:[%s4068_s1 + $0x728] sm:$0xff]  ;;  %v247_v32 = vld [vmem:[%s4068_s1 + $0x700] sm:$0xff]  ;;  %v2466_v33 = vcombine.high %v2453_v25, %v2453_v25  ;;  %v2469_v34 = vrot.slane %v527_v26, %v2423_v11  ;;  %v1506_v42 = vpack.c.bf16 %v123_v31, %v119_v30  ;;  %1567 = vmatpush1.bf16.msra.mxu0 %v1566_v28  ;;  %v29_v21 = vld [vmem:[%s4068_s1 + $0x30] sm:$0xff] }
  0x35   :  { %v1568_v35 = vpack.c.bf16 %v252_v24, %v248_v23  ;;  %v251_v36 = vld [vmem:[%s4068_s1 + $0x720] sm:$0xff]  ;;  %v128_v37 = vld [vmem:[%s4068_s1 + $0x348] sm:$0xff]  ;;  %1505 = vmatprep.subr.bf16.mxu1 %v1504_v29  ;;  %v34_v24 = vld [vmem:[%s4068_s1 + $0x58] sm:$0xff]  ;;  %v1698_v29 = vpack.c.bf16 %v29_v21, %v25_v20 }
  0x36   :  { %v132_v38 = vld [vmem:[%s4068_s1 + $0x368] sm:$0xff]  ;;  %635 = vmatprep.mubr.f32.mxu1 %v2466_v33  ;;  %v2489_v41 = vcombine.high %v2469_v34, %v2469_v34  ;;  %v1570_v43 = vpack.c.bf16 %v251_v36, %v247_v32  ;;  %v127_v45 = vld [vmem:[%s4068_s1 + $0x340] sm:$0xff]  ;;  %1507 = vmatpush1.bf16.msra.mxu1 %v1506_v42  ;;  %v38_v26 = vld [vmem:[%s4068_s1 + $0x78] sm:$0xff] }
  0x37   :  { %v256_v39 = vld [vmem:[%s4068_s1 + $0x748] sm:$0xff]  ;;  %v1508_v44 = vpack.c.bf16 %v132_v38, %v128_v37  ;;  %v131_v46 = vld [vmem:[%s4068_s1 + $0x360] sm:$0xff]  ;;  %1569 = vmatprep.subr.bf16.mxu0 %v1568_v35  ;;  %v1700_v31 = vpack.c.bf16 %v38_v26, %v34_v24  ;;  %v33_v35 = vld [vmem:[%s4068_s1 + $0x50] sm:$0xff] }
  0x38   :  { %v260_v40 = vld [vmem:[%s4068_s1 + $0x768] sm:$0xff]  ;;  %v255_v47 = vld [vmem:[%s4068_s1 + $0x740] sm:$0xff]  ;;  %706 = vmatprep.mubr.f32.mxu0 %v2489_v41  ;;  %v1510_v54 = vpack.c.bf16 %v131_v46, %v127_v45  ;;  %1571 = vmatpush1.bf16.msra.mxu0 %v1570_v43  ;;  %v37_v36 = vld [vmem:[%s4068_s1 + $0x70] sm:$0xff] }
  0x39   :  { %v1572_v48 = vpack.c.bf16 %v260_v40, %v256_v39  ;;  %v259_v49 = vld [vmem:[%s4068_s1 + $0x760] sm:$0xff]  ;;  %v136_v50 = vld [vmem:[%s4068_s1 + $0x388] sm:$0xff]  ;;  %1509 = vmatprep.subr.bf16.mxu1 %v1508_v44  ;;  %v42_v39 = vld [vmem:[%s4068_s1 + $0x98] sm:$0xff]  ;;  %v1702_v44 = vpack.c.bf16 %v37_v36, %v33_v35 }
  0x3a   :  { %v140_v51 = vld [vmem:[%s4068_s1 + $0x3a8] sm:$0xff]  ;;  %v1574_v55 = vpack.c.bf16 %v259_v49, %v255_v47  ;;  %v135_v57 = vld [vmem:[%s4068_s1 + $0x380] sm:$0xff]  ;;  %1511 = vmatpush1.bf16.msra.mxu1 %v1510_v54  ;;  %v46_v40 = vld [vmem:[%s4068_s1 + $0xb8] sm:$0xff] }
  0x3b   :  { %v264_v52 = vld [vmem:[%s4068_s1 + $0x788] sm:$0xff]  ;;  %v1512_v56 = vpack.c.bf16 %v140_v51, %v136_v50  ;;  %v139_v58 = vld [vmem:[%s4068_s1 + $0x3a0] sm:$0xff]  ;;  %1573 = vmatprep.subr.bf16.mxu0 %v1572_v48  ;;  %v1704_v46 = vpack.c.bf16 %v46_v40, %v42_v39  ;;  %v41_v48 = vld [vmem:[%s4068_s1 + $0x90] sm:$0xff] }
  0x3c   :  { %v268_v53 = vld [vmem:[%s4068_s1 + $0x7a8] sm:$0xff]  ;;  %v263_v59 = vld [vmem:[%s4068_s1 + $0x780] sm:$0xff]  ;;  %v1514_v3 = vpack.c.bf16 %v139_v58, %v135_v57  ;;  %1575 = vmatpush1.bf16.msra.mxu0 %v1574_v55  ;;  %v45_v49 = vld [vmem:[%s4068_s1 + $0xb0] sm:$0xff] }
  0x3d   :  { %v1576_v60 = vpack.c.bf16 %v268_v53, %v264_v52  ;;  %v267_v62 = vld [vmem:[%s4068_s1 + $0x7a0] sm:$0xff]  ;;  %v144_v63 = vld [vmem:[%s4068_s1 + $0x3c8] sm:$0xff]  ;;  %1513 = vmatprep.subr.bf16.mxu1 %v1512_v56  ;;  %v50_v52 = vld [vmem:[%s4068_s1 + $0xd8] sm:$0xff]  ;;  %v1706_v56 = vpack.c.bf16 %v45_v49, %v41_v48 }
  0x3e   :  { %v148_v0 = vld [vmem:[%s4068_s1 + $0x3e8] sm:$0xff]  ;;  %v1578_v4 = vpack.c.bf16 %v267_v62, %v263_v59  ;;  %v143_v6 = vld [vmem:[%s4068_s1 + $0x3c0] sm:$0xff]  ;;  %1515 = vmatpush1.bf16.msra.mxu1 %v1514_v3  ;;  %v54_v53 = vld [vmem:[%s4068_s1 + $0xf8] sm:$0xff] }
  0x3f   :  { %v272_v1 = vld [vmem:[%s4068_s1 + $0x7c8] sm:$0xff]  ;;  %v1516_v5 = vpack.c.bf16 %v148_v0, %v144_v63  ;;  %v147_v7 = vld [vmem:[%s4068_s1 + $0x3e0] sm:$0xff]  ;;  %1577 = vmatprep.subr.bf16.mxu0 %v1576_v60  ;;  %v1708_v58 = vpack.c.bf16 %v54_v53, %v50_v52  ;;  %v53_v60 = vld [vmem:[%s4068_s1 + $0xf0] sm:$0xff] }
  0x40   :  { %v276_v2 = vld [vmem:[%s4068_s1 + $0x7e8] sm:$0xff]  ;;  %v271_v8 = vld [vmem:[%s4068_s1 + $0x7c0] sm:$0xff]  ;;  %v1518_v16 = vpack.c.bf16 %v147_v7, %v143_v6  ;;  %1579 = vmatpush1.bf16.msra.mxu0 %v1578_v4  ;;  %v58_v0 = vld [vmem:[%s4068_s1 + $0x118] sm:$0xff] }
  0x41   :  { %v1580_v9 = vpack.c.bf16 %v276_v2, %v272_v1  ;;  %v275_v10 = vld [vmem:[%s4068_s1 + $0x7e0] sm:$0xff]  ;;  %v280_v14 = vld [vmem:[%s4068_s1 + $0x808] sm:$0xff]  ;;  %1517 = vmatprep.subr.bf16.mxu1 %v1516_v5  ;;  %v62_v1 = vld [vmem:[%s4068_s1 + $0x138] sm:$0xff] }
  0x42   :  { %v284_v15 = vld [vmem:[%s4068_s1 + $0x828] sm:$0xff]  ;;  %v1582_v17 = vpack.c.bf16 %v275_v10, %v271_v8  ;;  %v279_v19 = vld [vmem:[%s4068_s1 + $0x800] sm:$0xff]  ;;  %1519 = vmatpush1.bf16.msra.mxu1 %v1518_v16  ;;  %v1712_v6 = vpack.c.bf16 %v62_v1, %v58_v0  ;;  %v57_v8 = vld [vmem:[%s4068_s1 + $0x110] sm:$0xff] }
  0x43   :  { %1581 = vmatprep.subr.bf16.mxu0 %v1580_v9  ;;  %v1584_v22 = vpack.c.bf16 %v284_v15, %v280_v14  ;;  %v283_v23 = vld [vmem:[%s4068_s1 + $0x820] sm:$0xff]  ;;  %v288_v27 = vld [vmem:[%s4068_s1 + $0x848] sm:$0xff]  ;;  %1697 = vmatprep.subr.bf16.mxu1 %v1696_v18  ;;  %v61_v9 = vld [vmem:[%s4068_s1 + $0x130] sm:$0xff] }
  0x44   :  { %v292_v28 = vld [vmem:[%s4068_s1 + $0x868] sm:$0xff]  ;;  %1583 = vmatpush1.bf16.msra.mxu0 %v1582_v17  ;;  %v1586_v30 = vpack.c.bf16 %v283_v23, %v279_v19  ;;  %v287_v32 = vld [vmem:[%s4068_s1 + $0x840] sm:$0xff]  ;;  %v70_v14 = vld [vmem:[%s4068_s1 + $0x178] sm:$0xff]  ;;  %v1714_v17 = vpack.c.bf16 %v61_v9, %v57_v8 }
  0x45   :  { %1585 = vmatprep.subr.bf16.mxu0 %v1584_v22  ;;  %v1588_v37 = vpack.c.bf16 %v292_v28, %v288_v27  ;;  %v291_v38 = vld [vmem:[%s4068_s1 + $0x860] sm:$0xff]  ;;  %636 = vmatmul.mubr.f32.vlgmr.msra.gmra.mrb[0].mxu1 %v2453_v25  ;;  %v296_v42 = vld [vmem:[%s4068_s1 + $0x888] sm:$0xff]  ;;  %v1716_v19 = vpack.c.bf16 %v70_v14, %v66_v13  ;;  %v65_v21 = vld [vmem:[%s4068_s1 + $0x150] sm:$0xff] }
  0x46   :  { %v300_v43 = vld [vmem:[%s4068_s1 + $0x8a8] sm:$0xff]  ;;  %1699 = vmatpush1.bf16.msra.mxu1 %v1698_v29  ;;  %v1590_v45 = vpack.c.bf16 %v291_v38, %v287_v32  ;;  %v295_v47 = vld [vmem:[%s4068_s1 + $0x880] sm:$0xff]  ;;  %919 = vmatprep.mubr.f32.mxu1 %v2466_v33  ;;  %v49_v33 = vld [vmem:[%s4068_s1 + $0xd0] sm:$0xff] }
  0x47   :  { %707 = vmatmul.mubr.f32.vlgmr.msra.gmra.mrb[0].mxu0 %v2469_v34  ;;  %1701 = vmatprep.subr.bf16.mxu1 %v1700_v31  ;;  %v1592_v50 = vpack.c.bf16 %v300_v43, %v296_v42  ;;  %v299_v51 = vld [vmem:[%s4068_s1 + $0x8a0] sm:$0xff]  ;;  %v304_v54 = vld [vmem:[%s4068_s1 + $0x8c8] sm:$0xff]  ;;  %v1710_v4 = vpack.c.bf16 %v53_v60, %v49_v33  ;;  %v69_v22 = vld [vmem:[%s4068_s1 + $0x170] sm:$0xff] }
  0x48   :  { %1587 = vmatpush1.bf16.msra.mxu0 %v1586_v30  ;;  %v308_v55 = vld [vmem:[%s4068_s1 + $0x8e8] sm:$0xff]  ;;  %v1594_v57 = vpack.c.bf16 %v299_v51, %v295_v47  ;;  %v303_v59 = vld [vmem:[%s4068_s1 + $0x8c0] sm:$0xff]  ;;  %v74_v26 = vld [vmem:[%s4068_s1 + $0x198] sm:$0xff]  ;;  %v1718_v30 = vpack.c.bf16 %v69_v22, %v65_v21 }
  0x49   :  { %1589 = vmatprep.subr.bf16.mxu0 %v1588_v37  ;;  %v1596_v62 = vpack.c.bf16 %v308_v55, %v304_v54  ;;  %v307_v63 = vld [vmem:[%s4068_s1 + $0x8e0] sm:$0xff]  ;;  %v312_v2 = vld [vmem:[%s4068_s1 + $0x908] sm:$0xff]  ;;  %v78_v27 = vld [vmem:[%s4068_s1 + $0x1b8] sm:$0xff] }
  0x4a   :  { %1703 = vmatpush1.bf16.msra.mxu1 %v1702_v44  ;;  %v316_v3 = vld [vmem:[%s4068_s1 + $0x928] sm:$0xff]  ;;  %v1598_v5 = vpack.c.bf16 %v307_v63, %v303_v59  ;;  %v311_v7 = vld [vmem:[%s4068_s1 + $0x900] sm:$0xff]  ;;  %v1720_v35 = vpack.c.bf16 %v78_v27, %v74_v26  ;;  %v73_v36 = vld [vmem:[%s4068_s1 + $0x190] sm:$0xff] }
  0x4b   :  { %1705 = vmatprep.subr.bf16.mxu1 %v1704_v46  ;;  %v1600_v10 = vpack.c.bf16 %v316_v3, %v312_v2  ;;  %v315_v12 = vld [vmem:[%s4068_s1 + $0x920] sm:$0xff]  ;;  %v320_v15 = vld [vmem:[%s4068_s1 + $0x948] sm:$0xff]  ;;  %v77_v37 = vld [vmem:[%s4068_s1 + $0x1b0] sm:$0xff] }
  0x4c   :  { %1591 = vmatpush1.bf16.msra.mxu0 %v1590_v45  ;;  %v324_v16 = vld [vmem:[%s4068_s1 + $0x968] sm:$0xff]  ;;  %v1602_v18 = vpack.c.bf16 %v315_v12, %v311_v7  ;;  %v319_v20 = vld [vmem:[%s4068_s1 + $0x940] sm:$0xff]  ;;  %v82_v42 = vld [vmem:[%s4068_s1 + $0x1d8] sm:$0xff]  ;;  %v1722_v47 = vpack.c.bf16 %v77_v37, %v73_v36 }
  0x4d   :  { %1593 = vmatprep.subr.bf16.mxu0 %v1592_v50  ;;  %v1604_v23 = vpack.c.bf16 %v324_v16, %v320_v15  ;;  %v323_v24 = vld [vmem:[%s4068_s1 + $0x960] sm:$0xff]  ;;  %v328_v28 = vld [vmem:[%s4068_s1 + $0x988] sm:$0xff]  ;;  %v86_v43 = vld [vmem:[%s4068_s1 + $0x1f8] sm:$0xff] }
  0x4e   :  { %1707 = vmatpush1.bf16.msra.mxu1 %v1706_v56  ;;  %v332_v29 = vld [vmem:[%s4068_s1 + $0x9a8] sm:$0xff]  ;;  %v327_v31 = vld [vmem:[%s4068_s1 + $0x980] sm:$0xff]  ;;  %v1606_v32 = vpack.c.bf16 %v323_v24, %v319_v20  ;;  %v1724_v50 = vpack.c.bf16 %v86_v43, %v82_v42  ;;  %v81_v52 = vld [vmem:[%s4068_s1 + $0x1d0] sm:$0xff] }
  0x4f   :  { %1709 = vmatprep.subr.bf16.mxu1 %v1708_v58  ;;  %v2723_v38 = vld [vmem:[%s4067_s0 + $0x8] sm:$0xff]  ;;  %v1608_v39 = vpack.c.bf16 %v332_v29, %v328_v28  ;;  %v331_v40 = vld [vmem:[%s4068_s1 + $0x9a0] sm:$0xff]  ;;  %v85_v53 = vld [vmem:[%s4068_s1 + $0x1f0] sm:$0xff] }
  0x50   :  { %1595 = vmatpush1.bf16.msra.mxu0 %v1594_v57  ;;  %v2736_v44 = vrot.slane %v2723_v38, %v2423_v11  ;;  %v336_v45 = vld [vmem:[%s4068_s1 + $0x9c8] sm:$0xff]  ;;  %v1610_v49 = vpack.c.bf16 %v331_v40, %v327_v31  ;;  %v335_v51 = vld [vmem:[%s4068_s1 + $0x9c0] sm:$0xff]  ;;  %v90_v56 = vld [vmem:[%s4068_s1 + $0x218] sm:$0xff]  ;;  %v1726_v33 = vpack.c.bf16 %v85_v53, %v81_v52 }
  0x51   :  { %1597 = vmatprep.subr.bf16.mxu0 %v1596_v62  ;;  %v340_v46 = vld [vmem:[%s4068_s1 + $0x9e8] sm:$0xff]  ;;  %v339_v55 = vld [vmem:[%s4068_s1 + $0x9e0] sm:$0xff]  ;;  %v94_v57 = vld [vmem:[%s4068_s1 + $0x238] sm:$0xff] }
  0x52   :  { %1711 = vmatpush1.bf16.msra.mxu1 %v1710_v4  ;;  %v2746_v48 = vcombine.high %v2736_v44, %v2736_v44  ;;  %v1612_v54 = vpack.c.bf16 %v340_v46, %v336_v45  ;;  %v344_v58 = vld [vmem:[%s4068_s1 + $0xa08] sm:$0xff]  ;;  %v1614_v60 = vpack.c.bf16 %v339_v55, %v335_v51  ;;  %v1728_v62 = vpack.c.bf16 %v94_v57, %v90_v56  ;;  %v343_v63 = vld [vmem:[%s4068_s1 + $0xa00] sm:$0xff]  ;;  %v89_v0 = vld [vmem:[%s4068_s1 + $0x210] sm:$0xff] }
  0x53   :  { %1713 = vmatprep.subr.bf16.mxu1 %v1712_v6  ;;  %v348_v59 = vld [vmem:[%s4068_s1 + $0xa28] sm:$0xff]  ;;  %v93_v1 = vld [vmem:[%s4068_s1 + $0x230] sm:$0xff]  ;;  %v347_v3 = vld [vmem:[%s4068_s1 + $0xa20] sm:$0xff] }
  0x54   :  { %1599 = vmatpush1.bf16.msra.mxu0 %v1598_v5  ;;  %777 = vmatprep.mubr.f32.mxu0 %v2746_v48  ;;  %v1616_v2 = vpack.c.bf16 %v348_v59, %v344_v58  ;;  %v98_v4 = vld [vmem:[%s4068_s1 + $0x258] sm:$0xff]  ;;  %v352_v6 = vld [vmem:[%s4068_s1 + $0xa48] sm:$0xff]  ;;  %v1730_v8 = vpack.c.bf16 %v93_v1, %v89_v0  ;;  %v1618_v9 = vpack.c.bf16 %v347_v3, %v343_v63  ;;  %v351_v12 = vld [vmem:[%s4068_s1 + $0xa40] sm:$0xff] }
  0x55   :  { %1601 = vmatprep.subr.bf16.mxu0 %v1600_v10  ;;  %v102_v5 = vld [vmem:[%s4068_s1 + $0x278] sm:$0xff]  ;;  %v356_v7 = vld [vmem:[%s4068_s1 + $0xa68] sm:$0xff]  ;;  %v97_v13 = vld [vmem:[%s4068_s1 + $0x250] sm:$0xff] }
  0x56   :  { %1715 = vmatpush1.bf16.msra.mxu1 %v1714_v17  ;;  %v1732_v10 = vpack.c.bf16 %v102_v5, %v98_v4  ;;  %v101_v14 = vld [vmem:[%s4068_s1 + $0x270] sm:$0xff]  ;;  %v1620_v15 = vpack.c.bf16 %v356_v7, %v352_v6  ;;  %v355_v16 = vld [vmem:[%s4068_s1 + $0xa60] sm:$0xff]  ;;  %v106_v17 = vld [vmem:[%s4068_s1 + $0x298] sm:$0xff] }
  0x57   :  { %1717 = vmatprep.subr.bf16.mxu1 %v1716_v19  ;;  %v360_v19 = vld [vmem:[%s4068_s1 + $0xa88] sm:$0xff]  ;;  %v1734_v21 = vpack.c.bf16 %v101_v14, %v97_v13  ;;  %v1622_v22 = vpack.c.bf16 %v355_v16, %v351_v12  ;;  %v359_v24 = vld [vmem:[%s4068_s1 + $0xa80] sm:$0xff]  ;;  %v105_v26 = vld [vmem:[%s4068_s1 + $0x290] sm:$0xff] }
  0x58   :  { %1603 = vmatpush1.bf16.msra.mxu0 %v1602_v18  ;;  %v110_v18 = vld [vmem:[%s4068_s1 + $0x2b8] sm:$0xff]  ;;  %v364_v20 = vld [vmem:[%s4068_s1 + $0xaa8] sm:$0xff]  ;;  %v109_v27 = vld [vmem:[%s4068_s1 + $0x2b0] sm:$0xff] }
  0x59   :  { %1605 = vmatprep.subr.bf16.mxu0 %v1604_v23  ;;  %v1736_v23 = vpack.c.bf16 %v110_v18, %v106_v17  ;;  %v1624_v28 = vpack.c.bf16 %v364_v20, %v360_v19  ;;  %v363_v29 = vld [vmem:[%s4068_s1 + $0xaa0] sm:$0xff]  ;;  %v118_v31 = vld [vmem:[%s4068_s1 + $0x2f8] sm:$0xff]  ;;  %v1738_v36 = vpack.c.bf16 %v109_v27, %v105_v26  ;;  %v113_v42 = vld [vmem:[%s4068_s1 + $0x2d0] sm:$0xff] }
  0x5a   :  { %1719 = vmatpush1.bf16.msra.mxu1 %v1718_v30  ;;  %v114_v30 = vld [vmem:[%s4068_s1 + $0x2d8] sm:$0xff]  ;;  %v1626_v37 = vpack.c.bf16 %v363_v29, %v359_v24  ;;  %v367_v40 = vld [vmem:[%s4068_s1 + $0xac0] sm:$0xff]  ;;  %v117_v43 = vld [vmem:[%s4068_s1 + $0x2f0] sm:$0xff] }
  0x5b   :  { %1721 = vmatprep.subr.bf16.mxu1 %v1720_v35  ;;  %v372_v35 = vld [vmem:[%s4068_s1 + $0xae8] sm:$0xff]  ;;  %v371_v46 = vld [vmem:[%s4068_s1 + $0xae0] sm:$0xff]  ;;  %v1742_v52 = vpack.c.bf16 %v117_v43, %v113_v42  ;;  %v121_v56 = vld [vmem:[%s4068_s1 + $0x310] sm:$0xff] }
  0x5c   :  { %1607 = vmatpush1.bf16.msra.mxu0 %v1606_v32  ;;  %v368_v32 = vld [vmem:[%s4068_s1 + $0xac8] sm:$0xff]  ;;  %v1630_v53 = vpack.c.bf16 %v371_v46, %v367_v40  ;;  %v375_v55 = vld [vmem:[%s4068_s1 + $0xb00] sm:$0xff]  ;;  %v125_v57 = vld [vmem:[%s4068_s1 + $0x330] sm:$0xff] }
  0x5d   :  { %1609 = vmatprep.subr.bf16.mxu0 %v1608_v39  ;;  %v1740_v39 = vpack.c.bf16 %v118_v31, %v114_v30  ;;  %v1628_v45 = vpack.c.bf16 %v372_v35, %v368_v32  ;;  %v380_v51 = vld [vmem:[%s4068_s1 + $0xb28] sm:$0xff]  ;;  %v379_v59 = vld [vmem:[%s4068_s1 + $0xb20] sm:$0xff]  ;;  %v1746_v0 = vpack.c.bf16 %v125_v57, %v121_v56  ;;  %v129_v4 = vld [vmem:[%s4068_s1 + $0x350] sm:$0xff] }
  0x5e   :  { %1723 = vmatpush1.bf16.msra.mxu1 %v1722_v47  ;;  %v122_v47 = vld [vmem:[%s4068_s1 + $0x318] sm:$0xff]  ;;  %v388_v63 = vld [vmem:[%s4068_s1 + $0xb68] sm:$0xff]  ;;  %v1634_v1 = vpack.c.bf16 %v379_v59, %v375_v55  ;;  %v383_v3 = vld [vmem:[%s4068_s1 + $0xb40] sm:$0xff] }
  0x5f   :  { %1725 = vmatprep.subr.bf16.mxu1 %v1724_v50  ;;  %v376_v50 = vld [vmem:[%s4068_s1 + $0xb08] sm:$0xff]  ;;  %v133_v5 = vld [vmem:[%s4068_s1 + $0x370] sm:$0xff]  ;;  %v387_v7 = vld [vmem:[%s4068_s1 + $0xb60] sm:$0xff] }
  0x60   :  { %1611 = vmatpush1.bf16.msra.mxu0 %v1610_v49  ;;  %v126_v49 = vld [vmem:[%s4068_s1 + $0x338] sm:$0xff]  ;;  %v1632_v58 = vpack.c.bf16 %v380_v51, %v376_v50  ;;  %v396_v12 = vld [vmem:[%s4068_s1 + $0xba8] sm:$0xff]  ;;  %v1750_v13 = vpack.c.bf16 %v133_v5, %v129_v4  ;;  %v1638_v14 = vpack.c.bf16 %v387_v7, %v383_v3  ;;  %v391_v16 = vld [vmem:[%s4068_s1 + $0xb80] sm:$0xff] }
  0x61   :  { %1613 = vmatprep.subr.bf16.mxu0 %v1612_v54  ;;  %v1744_v54 = vpack.c.bf16 %v126_v49, %v122_v47  ;;  %v137_v17 = vld [vmem:[%s4068_s1 + $0x390] sm:$0xff]  ;;  %v395_v20 = vld [vmem:[%s4068_s1 + $0xba0] sm:$0xff]  ;;  %v404_v24 = vld [vmem:[%s4068_s1 + $0xbe8] sm:$0xff] }
  0x62   :  { %1727 = vmatpush1.bf16.msra.mxu1 %v1726_v33  ;;  %v130_v33 = vld [vmem:[%s4068_s1 + $0x358] sm:$0xff]  ;;  %v141_v18 = vld [vmem:[%s4068_s1 + $0x3b0] sm:$0xff]  ;;  %v1642_v27 = vpack.c.bf16 %v395_v20, %v391_v16  ;;  %v399_v29 = vld [vmem:[%s4068_s1 + $0xbc0] sm:$0xff] }
  0x63   :  { %1729 = vmatprep.subr.bf16.mxu1 %v1728_v62  ;;  %v384_v62 = vld [vmem:[%s4068_s1 + $0xb48] sm:$0xff]  ;;  %v1754_v26 = vpack.c.bf16 %v141_v18, %v137_v17  ;;  %v145_v30 = vld [vmem:[%s4068_s1 + $0x3d0] sm:$0xff]  ;;  %v403_v35 = vld [vmem:[%s4068_s1 + $0xbe0] sm:$0xff] }
  0x64   :  { %1615 = vmatpush1.bf16.msra.mxu0 %v1614_v60  ;;  %v134_v60 = vld [vmem:[%s4068_s1 + $0x378] sm:$0xff]  ;;  %v1636_v6 = vpack.c.bf16 %v388_v63, %v384_v62  ;;  %v149_v31 = vld [vmem:[%s4068_s1 + $0x3f0] sm:$0xff]  ;;  %v408_v40 = vld [vmem:[%s4068_s1 + $0xc08] sm:$0xff] }
  0x65   :  { %1617 = vmatprep.subr.bf16.mxu0 %v1616_v2  ;;  %v1748_v2 = vpack.c.bf16 %v134_v60, %v130_v33  ;;  %v412_v42 = vld [vmem:[%s4068_s1 + $0xc28] sm:$0xff]  ;;  %v1758_v43 = vpack.c.bf16 %v149_v31, %v145_v30  ;;  %v407_v46 = vld [vmem:[%s4068_s1 + $0xc00] sm:$0xff]  ;;  %v153_v47 = vld [vmem:[%s4068_s1 + $0x410] sm:$0xff] }
  0x66   :  { %1731 = vmatpush1.bf16.msra.mxu1 %v1730_v8  ;;  %v138_v8 = vld [vmem:[%s4068_s1 + $0x398] sm:$0xff]  ;;  %v157_v49 = vld [vmem:[%s4068_s1 + $0x430] sm:$0xff]  ;;  %v1648_v50 = vpack.c.bf16 %v412_v42, %v408_v40  ;;  %v411_v51 = vld [vmem:[%s4068_s1 + $0xc20] sm:$0xff] }
  0x67   :  { %1733 = vmatprep.subr.bf16.mxu1 %v1732_v10  ;;  %v392_v10 = vld [vmem:[%s4068_s1 + $0xb88] sm:$0xff]  ;;  %v1762_v57 = vpack.c.bf16 %v157_v49, %v153_v47  ;;  %v415_v33 = vld [vmem:[%s4068_s1 + $0xc40] sm:$0xff]  ;;  %v161_v60 = vld [vmem:[%s4068_s1 + $0x450] sm:$0xff] }
  0x68   :  { %1619 = vmatpush1.bf16.msra.mxu0 %v1618_v9  ;;  %v142_v9 = vld [vmem:[%s4068_s1 + $0x3b8] sm:$0xff]  ;;  %v1640_v19 = vpack.c.bf16 %v396_v12, %v392_v10  ;;  %v416_v55 = vld [vmem:[%s4068_s1 + $0xc48] sm:$0xff]  ;;  %v165_v62 = vld [vmem:[%s4068_s1 + $0x470] sm:$0xff] }
  0x69   :  { %1621 = vmatprep.subr.bf16.mxu0 %v1620_v15  ;;  %v1752_v15 = vpack.c.bf16 %v142_v9, %v138_v8  ;;  %v420_v56 = vld [vmem:[%s4068_s1 + $0xc68] sm:$0xff]  ;;  %v169_v9 = vld [vmem:[%s4068_s1 + $0x490] sm:$0xff]  ;;  %v443_v40 = vld [vmem:[%s4068_s1 + $0xd20] sm:$0xff] }
  0x6a   :  { %1735 = vmatpush1.bf16.msra.mxu1 %v1734_v21  ;;  %v146_v21 = vld [vmem:[%s4068_s1 + $0x3d8] sm:$0xff]  ;;  %v1652_v63 = vpack.c.bf16 %v420_v56, %v416_v55  ;;  %v424_v4 = vld [vmem:[%s4068_s1 + $0xc88] sm:$0xff]  ;;  %v173_v10 = vld [vmem:[%s4068_s1 + $0x4b0] sm:$0xff] }
  0x6b   :  { %1737 = vmatprep.subr.bf16.mxu1 %v1736_v23  ;;  %v400_v23 = vld [vmem:[%s4068_s1 + $0xbc8] sm:$0xff]  ;;  %v1770_v18 = vpack.c.bf16 %v173_v10, %v169_v9  ;;  %v194_v42 = vld [vmem:[%s4068_s1 + $0x558] sm:$0xff]  ;;  %v451_v55 = vld [vmem:[%s4068_s1 + $0xd60] sm:$0xff] }
  0x6c   :  { %1623 = vmatpush1.bf16.msra.mxu0 %v1622_v22  ;;  %v150_v22 = vld [vmem:[%s4068_s1 + $0x3f8] sm:$0xff]  ;;  %v1644_v32 = vpack.c.bf16 %v404_v24, %v400_v23  ;;  %v428_v5 = vld [vmem:[%s4068_s1 + $0xca8] sm:$0xff]  ;;  %v181_v23 = vld [vmem:[%s4068_s1 + $0x4f0] sm:$0xff] }
  0x6d   :  { %1625 = vmatprep.subr.bf16.mxu0 %v1624_v28  ;;  %v1756_v28 = vpack.c.bf16 %v150_v22, %v146_v21  ;;  %v1656_v12 = vpack.c.bf16 %v428_v5, %v424_v4  ;;  %v432_v16 = vld [vmem:[%s4068_s1 + $0xcc8] sm:$0xff]  ;;  %v431_v21 = vld [vmem:[%s4068_s1 + $0xcc0] sm:$0xff]  ;;  %v177_v22 = vld [vmem:[%s4068_s1 + $0x4d0] sm:$0xff] }
  0x6e   :  { %1739 = vmatpush1.bf16.msra.mxu1 %v1738_v36  ;;  %v544_v36 = vcombine.high %v2723_v38, %v2723_v38  ;;  %v1646_v38 = vpack.c.bf16 %v403_v35, %v399_v29  ;;  %v436_v17 = vld [vmem:[%s4068_s1 + $0xce8] sm:$0xff]  ;;  %v435_v24 = vld [vmem:[%s4068_s1 + $0xce0] sm:$0xff]  ;;  %v1774_v30 = vpack.c.bf16 %v181_v23, %v177_v22  ;;  %v202_v56 = vld [vmem:[%s4068_s1 + $0x598] sm:$0xff] }
  0x6f   :  { %1741 = vmatprep.subr.bf16.mxu1 %v1740_v39  ;;  %v158_v39 = vld [vmem:[%s4068_s1 + $0x438] sm:$0xff]  ;;  %v444_v29 = vld [vmem:[%s4068_s1 + $0xd28] sm:$0xff]  ;;  %v1662_v31 = vpack.c.bf16 %v435_v24, %v431_v21  ;;  %v439_v35 = vld [vmem:[%s4068_s1 + $0xd00] sm:$0xff] }
  0x70   :  { %1627 = vmatpush1.bf16.msra.mxu0 %v1626_v37  ;;  %v154_v37 = vld [vmem:[%s4068_s1 + $0x418] sm:$0xff]  ;;  %v1666_v47 = vpack.c.bf16 %v443_v40, %v439_v35  ;;  %v459_v4 = vld [vmem:[%s4068_s1 + $0xda0] sm:$0xff] }
  0x71   :  { %1629 = vmatprep.subr.bf16.mxu0 %v1628_v45  ;;  %v1760_v45 = vpack.c.bf16 %v158_v39, %v154_v37  ;;  %v189_v37 = vld [vmem:[%s4068_s1 + $0x530] sm:$0xff]  ;;  %v210_v5 = vld [vmem:[%s4068_s1 + $0x5d8] sm:$0xff]  ;;  %v463_v9 = vld [vmem:[%s4068_s1 + $0xdc0] sm:$0xff] }
  0x72   :  { %1743 = vmatpush1.bf16.msra.mxu1 %v1742_v52  ;;  %v162_v52 = vld [vmem:[%s4068_s1 + $0x458] sm:$0xff] }
  0x73   :  { %1745 = vmatprep.subr.bf16.mxu1 %v1744_v54  ;;  %v2986_v54 = vrot.slane %v544_v36, %v2423_v11  ;;  %v185_v36 = vld [vmem:[%s4068_s1 + $0x510] sm:$0xff] }
  0x74   :  { %1631 = vmatpush1.bf16.msra.mxu0 %v1630_v53  ;;  %v166_v53 = vld [vmem:[%s4068_s1 + $0x478] sm:$0xff] }
  0x75   :  { %1633 = vmatprep.subr.bf16.mxu0 %v1632_v58  ;;  %v1650_v58 = vpack.c.bf16 %v411_v51, %v407_v46  ;;  %v1764_v59 = vpack.c.bf16 %v166_v53, %v162_v52  ;;  %v3014_v3 = vcombine.high %v2986_v54, %v2986_v54  ;;  %v1778_v46 = vpack.c.bf16 %v189_v37, %v185_v36  ;;  %v193_v51 = vld [vmem:[%s4068_s1 + $0x550] sm:$0xff] }
  0x76   :  { %1747 = vmatpush1.bf16.msra.mxu1 %v1746_v0  ;;  %v419_v0 = vld [vmem:[%s4068_s1 + $0xc60] sm:$0xff]  ;;  %v197_v52 = vld [vmem:[%s4068_s1 + $0x570] sm:$0xff] }
  0x77   :  { %1749 = vmatprep.subr.bf16.mxu1 %v1748_v2  ;;  %v174_v2 = vld [vmem:[%s4068_s1 + $0x4b8] sm:$0xff]  ;;  %v1654_v7 = vpack.c.bf16 %v419_v0, %v415_v33  ;;  %v1782_v33 = vpack.c.bf16 %v197_v52, %v193_v51  ;;  %v201_v0 = vld [vmem:[%s4068_s1 + $0x590] sm:$0xff] }
  0x78   :  { %1635 = vmatpush1.bf16.msra.mxu0 %v1634_v1  ;;  %v170_v1 = vld [vmem:[%s4068_s1 + $0x498] sm:$0xff] }
  0x79   :  { %1637 = vmatprep.subr.bf16.mxu0 %v1636_v6  ;;  %v1766_v6 = vpack.c.bf16 %v165_v62, %v161_v60  ;;  %v1768_v8 = vpack.c.bf16 %v174_v2, %v170_v1  ;;  %v205_v1 = vld [vmem:[%s4068_s1 + $0x5b0] sm:$0xff] }
  0x7a   :  { %1751 = vmatpush1.bf16.msra.mxu1 %v1750_v13  ;;  %v427_v13 = vld [vmem:[%s4068_s1 + $0xca0] sm:$0xff] }
  0x7b   :  { %1753 = vmatprep.subr.bf16.mxu1 %v1752_v15  ;;  %v182_v15 = vld [vmem:[%s4068_s1 + $0x4f8] sm:$0xff] }
  0x7c   :  { %1639 = vmatpush1.bf16.msra.mxu0 %v1638_v14  ;;  %v178_v14 = vld [vmem:[%s4068_s1 + $0x4d8] sm:$0xff] }
  0x7d   :  { %1641 = vmatprep.subr.bf16.mxu0 %v1640_v19  ;;  %v1772_v20 = vpack.c.bf16 %v182_v15, %v178_v14  ;;  %v209_v14 = vld [vmem:[%s4068_s1 + $0x5d0] sm:$0xff] }
  0x7e   :  { %1755 = vmatpush1.bf16.msra.mxu1 %v1754_v26  ;;  %v186_v26 = vld [vmem:[%s4068_s1 + $0x518] sm:$0xff]  ;;  %v213_v15 = vld [vmem:[%s4068_s1 + $0x5f0] sm:$0xff] }
  0x7f   :  { %1757 = vmatprep.subr.bf16.mxu1 %v1756_v28  ;;  %v440_v28 = vld [vmem:[%s4068_s1 + $0xd08] sm:$0xff] }
  0x80   :  { %1643 = vmatpush1.bf16.msra.mxu0 %v1642_v27  ;;  %v190_v27 = vld [vmem:[%s4068_s1 + $0x538] sm:$0xff]  ;;  %v1664_v39 = vpack.c.bf16 %v444_v29, %v440_v28 }
  0x81   :  { %1645 = vmatprep.subr.bf16.mxu0 %v1644_v32  ;;  %v1776_v32 = vpack.c.bf16 %v190_v27, %v186_v26 }
  0x82   :  { %1759 = vmatpush1.bf16.msra.mxu1 %v1758_v43  ;;  %v198_v43 = vld [vmem:[%s4068_s1 + $0x578] sm:$0xff] }
  0x83   :  { %1761 = vmatprep.subr.bf16.mxu1 %v1760_v45  ;;  %v452_v45 = vld [vmem:[%s4068_s1 + $0xd68] sm:$0xff]  ;;  %v1780_v49 = vpack.c.bf16 %v198_v43, %v194_v42 }
  0x84   :  { %1647 = vmatpush1.bf16.msra.mxu0 %v1646_v38  ;;  %v448_v38 = vld [vmem:[%s4068_s1 + $0xd48] sm:$0xff] }
  0x85   :  { %1649 = vmatprep.subr.bf16.mxu0 %v1648_v50  ;;  %920 = vmatmul.mubr.f32.vlgmr.msra.gmra.mrb[2].mxu1 %v2453_v25  ;;  %v423_v25 = vld [vmem:[%s4068_s1 + $0xc80] sm:$0xff]  ;;  %v1668_v53 = vpack.c.bf16 %v452_v45, %v448_v38 }
  0x86   :  { %1763 = vmatpush1.bf16.msra.mxu1 %v1762_v57  ;;  %990 = vmatprep.mubr.f32.mxu1 %v2489_v41  ;;  %v1658_v19 = vpack.c.bf16 %v427_v13, %v423_v25  ;;  %v1660_v41 = vpack.c.bf16 %v436_v17, %v432_v16  ;;  %v447_v50 = vld [vmem:[%s4068_s1 + $0xd40] sm:$0xff]  ;;  %v206_v57 = vld [vmem:[%s4068_s1 + $0x5b8] sm:$0xff]  ;;  %v1786_v25 = vpack.c.bf16 %v205_v1, %v201_v0 }
  0x87   :  { %778 = vmatmul.mubr.f32.vlgmr.msra.gmra.mrb[0].mxu0 %v2736_v44  ;;  %1765 = vmatprep.subr.bf16.mxu1 %v1764_v59  ;;  %v460_v59 = vld [vmem:[%s4068_s1 + $0xda8] sm:$0xff]  ;;  %v1670_v60 = vpack.c.bf16 %v451_v55, %v447_v50  ;;  %v1784_v62 = vpack.c.bf16 %v206_v57, %v202_v56  ;;  %v467_v13 = vld [vmem:[%s4068_s1 + $0xde0] sm:$0xff]  ;;  %v218_v17 = vld [vmem:[%s4068_s1 + $0x618] sm:$0xff] }
  0x88   :  { %1651 = vmatpush1.bf16.msra.mxu0 %v1650_v58  ;;  %1454 = vmatprep.mubr.msk.f32.mxu0 %vm568_vm0, %v3014_v3  ;;  %v456_v58 = vld [vmem:[%s4068_s1 + $0xd88] sm:$0xff] }
  0x89   :  { %1653 = vmatprep.subr.bf16.mxu0 %v1652_v63  ;;  %v455_v63 = vld [vmem:[%s4068_s1 + $0xd80] sm:$0xff]  ;;  %v1672_v2 = vpack.c.bf16 %v460_v59, %v456_v58 }
  0x8a   :  { %1767 = vmatpush1.bf16.msra.mxu1 %v1766_v6  ;;  %v214_v6 = vld [vmem:[%s4068_s1 + $0x5f8] sm:$0xff]  ;;  %v1674_v10 = vpack.c.bf16 %v459_v4, %v455_v63 }
  0x8b   :  { %1769 = vmatprep.subr.bf16.mxu1 %v1768_v8  ;;  %v468_v8 = vld [vmem:[%s4068_s1 + $0xde8] sm:$0xff] }
  0x8c   :  { %1655 = vmatpush1.bf16.msra.mxu0 %v1654_v7  ;;  %v464_v7 = vld [vmem:[%s4068_s1 + $0xdc8] sm:$0xff] }
  0x8d   :  { %1657 = vmatprep.subr.bf16.mxu0 %v1656_v12  ;;  %v1788_v12 = vpack.c.bf16 %v214_v6, %v210_v5  ;;  %v1676_v16 = vpack.c.bf16 %v468_v8, %v464_v7 }
  0x8e   :  { %1771 = vmatpush1.bf16.msra.mxu1 %v1770_v18  ;;  %v222_v18 = vld [vmem:[%s4068_s1 + $0x638] sm:$0xff] }
  0x8f   :  { %1773 = vmatprep.subr.bf16.mxu1 %v1772_v20 }
  0x90   :  { %1659 = vmatpush1.bf16.msra.mxu0 %v1658_v19 }
  0x91   :  { %1661 = vmatprep.subr.bf16.mxu0 %v1660_v41 }
  0x92   :  { %1775 = vmatpush1.bf16.msra.mxu1 %v1774_v30 }
  0x93   :  { %1777 = vmatprep.subr.bf16.mxu1 %v1776_v32 }
  0x94   :  { %1663 = vmatpush1.bf16.msra.mxu0 %v1662_v31 }
  0x95   :  { %1665 = vmatprep.subr.bf16.mxu0 %v1664_v39 }
  0x96   :  { %1779 = vmatpush1.bf16.msra.mxu1 %v1778_v46 }
  0x97   :  { %1781 = vmatprep.subr.bf16.mxu1 %v1780_v49 }
  0x98   :  { %1667 = vmatpush1.bf16.msra.mxu0 %v1666_v47 }
  0x99   :  { %1669 = vmatprep.subr.bf16.mxu0 %v1668_v53 }
  0x9a   :  { %1783 = vmatpush1.bf16.msra.mxu1 %v1782_v33 }
  0x9b   :  { %1785 = vmatprep.subr.bf16.mxu1 %v1784_v62 }
  0x9c   :  { %1671 = vmatpush1.bf16.msra.mxu0 %v1670_v60 }
  0x9d   :  { %1673 = vmatprep.subr.bf16.mxu0 %v1672_v2 }
  0x9e   :  { %10 = vsyncpa [#allocation3], 0  ;;  %v472_v19 = vld [vmem:[%s4068_s1 + $0xe08] sm:$0xff]  ;;  %1787 = vmatpush1.bf16.msra.mxu1 %v1786_v25  ;;  %v1790_v21 = vpack.c.bf16 %v213_v15, %v209_v14  ;;  %v1678_v22 = vpack.c.bf16 %v467_v13, %v463_v9  ;;  %v1792_v23 = vpack.c.bf16 %v222_v18, %v218_v17  ;;  %v471_v41 = vld [vmem:[%s4068_s1 + $0xe00] sm:$0xff]  ;;  %vm1436_vm1 = vcmask 1041408   ;;  %s2113_s23 = smov [#allocation2]  }
  0x9f   :  { %v476_v20 = vld [vmem:[%s4068_s1 + $0xe28] sm:$0xff]  ;;  %1789 = vmatprep.subr.bf16.mxu1 %v1788_v12  ;;  %v217_v24 = vld [vmem:[%s4068_s1 + $0x610] sm:$0xff]  ;;  %v475_v28 = vld [vmem:[%s4068_s1 + $0xe20] sm:$0xff]  ;;  %vm1437_vm2 = vcmask 519170   ;;  %s1446_s24 = sshll.u32 %s2113_s23, 4  ;;  %s1447_s24 = int_to_ptr.vmem [resolvable:$true] %s1446_s24 }
  0xa0   :  { %1675 = vmatpush1.bf16.msra.mxu0 %v1674_v10  ;;  %v221_v26 = vld [vmem:[%s4068_s1 + $0x630] sm:$0xff]  ;;  %v1680_v27 = vpack.c.bf16 %v476_v20, %v472_v19  ;;  %v226_v29 = vld [vmem:[%s4068_s1 + $0x658] sm:$0xff]  ;;  %v480_v31 = vld [vmem:[%s4068_s1 + $0xe48] sm:$0xff]  ;;  %v1682_v36 = vpack.c.bf16 %v475_v28, %v471_v41  ;;  %p2093_p1 = scmp.lt.s32.totalorder %s1447_s24, %s1447_s24 }
  0xa1   :  { %1677 = vmatprep.subr.bf16.mxu0 %v1676_v16  ;;  %v230_v30 = vld [vmem:[%s4068_s1 + $0x678] sm:$0xff]  ;;  %v484_v32 = vld [vmem:[%s4068_s1 + $0xe68] sm:$0xff]  ;;  %v1794_v35 = vpack.c.bf16 %v221_v26, %v217_v24  ;;  %v479_v39 = vld [vmem:[%s4068_s1 + $0xe40] sm:$0xff] }
  0xa2   :  { %1791 = vmatpush1.bf16.msra.mxu1 %v1790_v21  ;;  %v1796_v37 = vpack.c.bf16 %v230_v30, %v226_v29  ;;  %v225_v40 = vld [vmem:[%s4068_s1 + $0x650] sm:$0xff]  ;;  %v1684_v43 = vpack.c.bf16 %v484_v32, %v480_v31  ;;  %v483_v38 = vld [vmem:[%s4068_s1 + $0xe60] sm:$0xff]  ;;  %v234_v45 = vld [vmem:[%s4068_s1 + $0x698] sm:$0xff] }
  0xa3   :  { %1793 = vmatprep.subr.bf16.mxu1 %v1792_v23  ;;  %v229_v42 = vld [vmem:[%s4068_s1 + $0x670] sm:$0xff]  ;;  %v238_v46 = vld [vmem:[%s4068_s1 + $0x6b8] sm:$0xff]  ;;  %v488_v47 = vld [vmem:[%s4068_s1 + $0xe88] sm:$0xff]  ;;  %v1686_v51 = vpack.c.bf16 %v483_v38, %v479_v39 }
  0xa4   :  { %1679 = vmatpush1.bf16.msra.mxu0 %v1678_v22  ;;  %v492_v49 = vld [vmem:[%s4068_s1 + $0xea8] sm:$0xff]  ;;  %v1798_v50 = vpack.c.bf16 %v229_v42, %v225_v40  ;;  %v1800_v52 = vpack.c.bf16 %v238_v46, %v234_v45  ;;  %v487_v53 = vld [vmem:[%s4068_s1 + $0xe80] sm:$0xff]  ;;  %v233_v55 = vld [vmem:[%s4068_s1 + $0x690] sm:$0xff] }
  0xa5   :  { %1681 = vmatprep.subr.bf16.mxu0 %v1680_v27  ;;  %v237_v56 = vld [vmem:[%s4068_s1 + $0x6b0] sm:$0xff]  ;;  %v1688_v57 = vpack.c.bf16 %v492_v49, %v488_v47  ;;  %v491_v58 = vld [vmem:[%s4068_s1 + $0xea0] sm:$0xff]  ;;  %v242_v59 = vld [vmem:[%s4068_s1 + $0x6d8] sm:$0xff] }
  0xa6   :  { %1795 = vmatpush1.bf16.msra.mxu1 %v1794_v35  ;;  %v246_v33 = vld [vmem:[%s4068_s1 + $0x6f8] sm:$0xff]  ;;  %v496_v60 = vld [vmem:[%s4068_s1 + $0xec8] sm:$0xff]  ;;  %v1802_v63 = vpack.c.bf16 %v237_v56, %v233_v55  ;;  %v1690_v0 = vpack.c.bf16 %v491_v58, %v487_v53  ;;  %v495_v2 = vld [vmem:[%s4068_s1 + $0xec0] sm:$0xff] }
  0xa7   :  { %1797 = vmatprep.subr.bf16.mxu1 %v1796_v37  ;;  %v500_v62 = vld [vmem:[%s4068_s1 + $0xee8] sm:$0xff]  ;;  %v1804_v1 = vpack.c.bf16 %v246_v33, %v242_v59  ;;  %v241_v4 = vld [vmem:[%s4068_s1 + $0x6d0] sm:$0xff]  ;;  %v499_v7 = vld [vmem:[%s4068_s1 + $0xee0] sm:$0xff] }
  0xa8   :  { %1683 = vmatpush1.bf16.msra.mxu0 %v1682_v36  ;;  %v245_v5 = vld [vmem:[%s4068_s1 + $0x6f0] sm:$0xff]  ;;  %v1692_v6 = vpack.c.bf16 %v500_v62, %v496_v60  ;;  %v250_v8 = vld [vmem:[%s4068_s1 + $0x718] sm:$0xff]  ;;  %v1694_v10 = vpack.c.bf16 %v499_v7, %v495_v2  ;;  %v1144_v24 = vld [vmem:[%s4070_s3 + $0x8] sm:$0xff] }
  0xa9   :  { %1685 = vmatprep.subr.bf16.mxu0 %v1684_v43  ;;  %v254_v25 = vld [vmem:[%s4068_s1 + $0x738] sm:$0xff]  ;;  %v1806_v9 = vpack.c.bf16 %v245_v5, %v241_v4  ;;  %v249_v13 = vld [vmem:[%s4068_s1 + $0x710] sm:$0xff]  ;;  %v1143_v27 = vld [vmem:[%s4070_s3] sm:$0xff] }
  0xaa   :  { %1799 = vmatpush1.bf16.msra.mxu1 %v1798_v50  ;;  %v1808_v12 = vpack.c.bf16 %v254_v25, %v250_v8  ;;  %v253_v14 = vld [vmem:[%s4068_s1 + $0x730] sm:$0xff]  ;;  %v258_v15 = vld [vmem:[%s4068_s1 + $0x758] sm:$0xff]  ;;  %v1148_v31 = vld [vmem:[%s4070_s3 + $0x28] sm:$0xff] }
  0xab   :  { %1801 = vmatprep.subr.bf16.mxu1 %v1800_v52  ;;  %v262_v16 = vld [vmem:[%s4068_s1 + $0x778] sm:$0xff]  ;;  %v1810_v17 = vpack.c.bf16 %v253_v14, %v249_v13  ;;  %v257_v19 = vld [vmem:[%s4068_s1 + $0x750] sm:$0xff]  ;;  %v1147_v39 = vld [vmem:[%s4070_s3 + $0x20] sm:$0xff] }
  0xac   :  { %1687 = vmatpush1.bf16.msra.mxu0 %v1686_v51  ;;  %v1812_v18 = vpack.c.bf16 %v262_v16, %v258_v15  ;;  %v261_v20 = vld [vmem:[%s4068_s1 + $0x770] sm:$0xff]  ;;  %v266_v21 = vld [vmem:[%s4068_s1 + $0x798] sm:$0xff]  ;;  %v1152_v42 = vld [vmem:[%s4070_s3 + $0x48] sm:$0xff] }
  0xad   :  { %1689 = vmatprep.subr.bf16.mxu0 %v1688_v57  ;;  %v270_v22 = vld [vmem:[%s4068_s1 + $0x7b8] sm:$0xff]  ;;  %v265_v23 = vld [vmem:[%s4068_s1 + $0x790] sm:$0xff]  ;;  %v1814_v28 = vpack.c.bf16 %v261_v20, %v257_v19  ;;  %v1151_v51 = vld [vmem:[%s4070_s3 + $0x40] sm:$0xff] }
  0xae   :  { %1803 = vmatpush1.bf16.msra.mxu1 %v1802_v63  ;;  %v269_v41 = vld [vmem:[%s4068_s1 + $0x7b0] sm:$0xff]  ;;  %v1146_v26 = vld [vmem:[%s4070_s3 + $0x18] sm:$0xff]  ;;  %v1816_v35 = vpack.c.bf16 %v270_v22, %v266_v21  ;;  %v1156_v56 = vld [vmem:[%s4070_s3 + $0x68] sm:$0xff] }
  0xaf   :  { %1805 = vmatprep.subr.bf16.mxu1 %v1804_v1  ;;  %v1936_v29 = vpack.c.bf16 %v1146_v26, %v1144_v24  ;;  %v1145_v30 = vld [vmem:[%s4070_s3 + $0x10] sm:$0xff]  ;;  %v1150_v32 = vld [vmem:[%s4070_s3 + $0x38] sm:$0xff]  ;;  %v1818_v47 = vpack.c.bf16 %v269_v41, %v265_v23  ;;  %v1155_v63 = vld [vmem:[%s4070_s3 + $0x60] sm:$0xff] }
  0xb0   :  { %1691 = vmatpush1.bf16.msra.mxu0 %v1690_v0  ;;  %v1938_v36 = vpack.c.bf16 %v1145_v30, %v1143_v27  ;;  %v1940_v37 = vpack.c.bf16 %v1150_v32, %v1148_v31  ;;  %v1149_v40 = vld [vmem:[%s4070_s3 + $0x30] sm:$0xff]  ;;  %v274_v43 = vld [vmem:[%s4068_s1 + $0x7d8] sm:$0xff]  ;;  %v1160_v7 = vld [vmem:[%s4070_s3 + $0x88] sm:$0xff] }
  0xb1   :  { %1693 = vmatprep.subr.bf16.mxu0 %v1692_v6  ;;  %v278_v38 = vld [vmem:[%s4068_s1 + $0x7f8] sm:$0xff]  ;;  %v1942_v46 = vpack.c.bf16 %v1149_v40, %v1147_v39  ;;  %v273_v49 = vld [vmem:[%s4068_s1 + $0x7d0] sm:$0xff]  ;;  %v1163_v24 = vld [vmem:[%s4070_s3 + $0xa0] sm:$0xff] }
  0xb2   :  { %1807 = vmatpush1.bf16.msra.mxu1 %v1806_v9  ;;  %v1154_v45 = vld [vmem:[%s4070_s3 + $0x58] sm:$0xff]  ;;  %v1153_v52 = vld [vmem:[%s4070_s3 + $0x50] sm:$0xff]  ;;  %v1820_v53 = vpack.c.bf16 %v278_v38, %v274_v43  ;;  %v1172_v43 = vld [vmem:[%s4070_s3 + $0xe8] sm:$0xff] }
  0xb3   :  { %1809 = vmatprep.subr.bf16.mxu1 %v1808_v12  ;;  %v1944_v50 = vpack.c.bf16 %v1154_v45, %v1152_v42  ;;  %v277_v55 = vld [vmem:[%s4068_s1 + $0x7f0] sm:$0xff]  ;;  %v1158_v57 = vld [vmem:[%s4070_s3 + $0x78] sm:$0xff]  ;;  %v1946_v33 = vpack.c.bf16 %v1153_v52, %v1151_v51  ;;  %v1159_v12 = vld [vmem:[%s4070_s3 + $0x80] sm:$0xff] }
  0xb4   :  { %1695 = vmatpush1.bf16.msra.mxu0 %v1694_v10  ;;  %v282_v58 = vld [vmem:[%s4068_s1 + $0x818] sm:$0xff]  ;;  %v1822_v60 = vpack.c.bf16 %v277_v55, %v273_v49  ;;  %v1948_v62 = vpack.c.bf16 %v1158_v57, %v1156_v56  ;;  %v1157_v0 = vld [vmem:[%s4070_s3 + $0x70] sm:$0xff]  ;;  %v1171_v52 = vld [vmem:[%s4070_s3 + $0xe0] sm:$0xff] }
  0xb5   :  { %1937 = vmatprep.subr.bf16.mxu0 %v1936_v29  ;;  %v286_v59 = vld [vmem:[%s4068_s1 + $0x838] sm:$0xff]  ;;  %v281_v2 = vld [vmem:[%s4068_s1 + $0x810] sm:$0xff]  ;;  %v1950_v25 = vpack.c.bf16 %v1157_v0, %v1155_v63  ;;  %v1176_v57 = vld [vmem:[%s4070_s3 + $0x108] sm:$0xff] }
  0xb6   :  { %1811 = vmatpush1.bf16.msra.mxu1 %v1810_v17  ;;  %v1824_v1 = vpack.c.bf16 %v286_v59, %v282_v58  ;;  %v285_v4 = vld [vmem:[%s4068_s1 + $0x830] sm:$0xff]  ;;  %v290_v5 = vld [vmem:[%s4068_s1 + $0x858] sm:$0xff]  ;;  %v1164_v17 = vld [vmem:[%s4070_s3 + $0xa8] sm:$0xff] }
  0xb7   :  { %849 = vmatmul.mubr.f32.vlgmr.msra.gmra.mrb[0].mxu0 %v2986_v54  ;;  %1813 = vmatprep.subr.bf16.mxu1 %v1812_v18  ;;  %v294_v6 = vld [vmem:[%s4068_s1 + $0x878] sm:$0xff]  ;;  %v1826_v9 = vpack.c.bf16 %v285_v4, %v281_v2  ;;  %v289_v10 = vld [vmem:[%s4068_s1 + $0x850] sm:$0xff]  ;;  %vm1438_vm3 = vmor %vm1437_vm2, %vm1436_vm1 }
  0xb8   :  { %1939 = vmatpush1.bf16.msra.mxu0 %v1938_v36  ;;  %v1162_v8 = vld [vmem:[%s4070_s3 + $0x98] sm:$0xff]  ;;  %v1161_v13 = vld [vmem:[%s4070_s3 + $0x90] sm:$0xff]  ;;  %v1828_v14 = vpack.c.bf16 %v294_v6, %v290_v5  ;;  %v1180_v6 = vld [vmem:[%s4070_s3 + $0x128] sm:$0xff] }
  0xb9   :  { %1941 = vmatprep.subr.bf16.mxu0 %v1940_v37  ;;  %v293_v15 = vld [vmem:[%s4068_s1 + $0x870] sm:$0xff]  ;;  %v1952_v16 = vpack.c.bf16 %v1162_v8, %v1160_v7  ;;  %v1166_v18 = vld [vmem:[%s4070_s3 + $0xb8] sm:$0xff]  ;;  %v1954_v21 = vpack.c.bf16 %v1161_v13, %v1159_v12  ;;  %v1167_v37 = vld [vmem:[%s4070_s3 + $0xc0] sm:$0xff] }
  0xba   :  { %1815 = vmatpush1.bf16.msra.mxu1 %v1814_v28  ;;  %v298_v19 = vld [vmem:[%s4068_s1 + $0x898] sm:$0xff]  ;;  %v1830_v22 = vpack.c.bf16 %v293_v15, %v289_v10  ;;  %v297_v23 = vld [vmem:[%s4068_s1 + $0x890] sm:$0xff]  ;;  %v1956_v41 = vpack.c.bf16 %v1166_v18, %v1164_v17  ;;  %v1184_v18 = vld [vmem:[%s4070_s3 + $0x148] sm:$0xff] }
  0xbb   :  { %1817 = vmatprep.subr.bf16.mxu1 %v1816_v35  ;;  %v302_v20 = vld [vmem:[%s4068_s1 + $0x8b8] sm:$0xff]  ;;  %v1165_v26 = vld [vmem:[%s4070_s3 + $0xb0] sm:$0xff] }
  0xbc   :  { %1943 = vmatpush1.bf16.msra.mxu0 %v1942_v46  ;;  %v301_v27 = vld [vmem:[%s4068_s1 + $0x8b0] sm:$0xff]  ;;  %v1170_v28 = vld [vmem:[%s4070_s3 + $0xd8] sm:$0xff]  ;;  %v1958_v31 = vpack.c.bf16 %v1165_v26, %v1163_v24  ;;  %v1183_v26 = vld [vmem:[%s4070_s3 + $0x140] sm:$0xff] }
  0xbd   :  { %1945 = vmatprep.subr.bf16.mxu0 %v1944_v50  ;;  %v306_v29 = vld [vmem:[%s4068_s1 + $0x8d8] sm:$0xff]  ;;  %v1834_v32 = vpack.c.bf16 %v301_v27, %v297_v23  ;;  %v305_v35 = vld [vmem:[%s4068_s1 + $0x8d0] sm:$0xff] }
  0xbe   :  { %1819 = vmatpush1.bf16.msra.mxu1 %v1818_v47  ;;  %v310_v30 = vld [vmem:[%s4068_s1 + $0x8f8] sm:$0xff]  ;;  %v1169_v39 = vld [vmem:[%s4070_s3 + $0xd0] sm:$0xff] }
  0xbf   :  { %1821 = vmatprep.subr.bf16.mxu1 %v1820_v53  ;;  %v1836_v40 = vpack.c.bf16 %v310_v30, %v306_v29  ;;  %v309_v42 = vld [vmem:[%s4068_s1 + $0x8f0] sm:$0xff]  ;;  %v1174_v38 = vld [vmem:[%s4070_s3 + $0xf8] sm:$0xff]  ;;  %v1962_v47 = vpack.c.bf16 %v1169_v39, %v1167_v37  ;;  %v1187_v39 = vld [vmem:[%s4070_s3 + $0x160] sm:$0xff] }
  0xc0   :  { %1947 = vmatpush1.bf16.msra.mxu0 %v1946_v33  ;;  %v314_v45 = vld [vmem:[%s4068_s1 + $0x918] sm:$0xff]  ;;  %v1838_v49 = vpack.c.bf16 %v309_v42, %v305_v35  ;;  %v313_v50 = vld [vmem:[%s4068_s1 + $0x910] sm:$0xff]  ;;  %v1964_v51 = vpack.c.bf16 %v1174_v38, %v1172_v43  ;;  %v1192_v38 = vld [vmem:[%s4070_s3 + $0x188] sm:$0xff] }
  0xc1   :  { %1949 = vmatprep.subr.bf16.mxu0 %v1948_v62  ;;  %v318_v46 = vld [vmem:[%s4068_s1 + $0x938] sm:$0xff]  ;;  %v1173_v53 = vld [vmem:[%s4070_s3 + $0xf0] sm:$0xff] }
  0xc2   :  { %1823 = vmatpush1.bf16.msra.mxu1 %v1822_v60  ;;  %v1840_v55 = vpack.c.bf16 %v318_v46, %v314_v45  ;;  %v317_v56 = vld [vmem:[%s4068_s1 + $0x930] sm:$0xff]  ;;  %v1178_v58 = vld [vmem:[%s4070_s3 + $0x118] sm:$0xff]  ;;  %v1966_v60 = vpack.c.bf16 %v1173_v53, %v1171_v52  ;;  %v1191_v53 = vld [vmem:[%s4070_s3 + $0x180] sm:$0xff] }
  0xc3   :  { %1825 = vmatprep.subr.bf16.mxu1 %v1824_v1  ;;  %v322_v59 = vld [vmem:[%s4068_s1 + $0x958] sm:$0xff]  ;;  %v1842_v62 = vpack.c.bf16 %v317_v56, %v313_v50  ;;  %v321_v63 = vld [vmem:[%s4068_s1 + $0x950] sm:$0xff]  ;;  %v1968_v0 = vpack.c.bf16 %v1178_v58, %v1176_v57  ;;  %v1175_v1 = vld [vmem:[%s4070_s3 + $0x100] sm:$0xff] }
  0xc4   :  { %1951 = vmatpush1.bf16.msra.mxu0 %v1950_v25  ;;  %v326_v33 = vld [vmem:[%s4068_s1 + $0x978] sm:$0xff]  ;;  %v1177_v2 = vld [vmem:[%s4070_s3 + $0x110] sm:$0xff]  ;;  %v1196_v58 = vld [vmem:[%s4070_s3 + $0x1a8] sm:$0xff] }
  0xc5   :  { %991 = vmatmul.mubr.f32.vlgmr.msra.gmra.mrb[2].mxu1 %v2469_v34  ;;  %v1832_v34 = vpack.c.bf16 %v302_v20, %v298_v19  ;;  %1953 = vmatprep.subr.bf16.mxu0 %v1952_v16  ;;  %v1844_v4 = vpack.c.bf16 %v326_v33, %v322_v59  ;;  %v325_v5 = vld [vmem:[%s4068_s1 + $0x970] sm:$0xff]  ;;  %v1182_v7 = vld [vmem:[%s4070_s3 + $0x138] sm:$0xff] }
  0xc6   :  { %1827 = vmatpush1.bf16.msra.mxu1 %v1826_v9  ;;  %1061 = vmatprep.mubr.f32.mxu1 %v2746_v48  ;;  %v1168_v48 = vld [vmem:[%s4070_s3 + $0xc8] sm:$0xff]  ;;  %v330_v8 = vld [vmem:[%s4068_s1 + $0x998] sm:$0xff]  ;;  %v1970_v9 = vpack.c.bf16 %v1177_v2, %v1175_v1  ;;  %v1846_v10 = vpack.c.bf16 %v325_v5, %v321_v63  ;;  %v329_v12 = vld [vmem:[%s4068_s1 + $0x990] sm:$0xff]  ;;  %v1972_v13 = vpack.c.bf16 %v1182_v7, %v1180_v6 }
  0xc7   :  { %1829 = vmatprep.subr.bf16.mxu1 %v1828_v14  ;;  %v1960_v36 = vpack.c.bf16 %v1170_v28, %v1168_v48  ;;  %v334_v25 = vld [vmem:[%s4068_s1 + $0x9b8] sm:$0xff]  ;;  %v1179_v14 = vld [vmem:[%s4070_s3 + $0x120] sm:$0xff]  ;;  %v1181_v15 = vld [vmem:[%s4070_s3 + $0x130] sm:$0xff] }
  0xc8   :  { %1955 = vmatpush1.bf16.msra.mxu0 %v1954_v21  ;;  %v1848_v16 = vpack.c.bf16 %v334_v25, %v330_v8  ;;  %v333_v17 = vld [vmem:[%s4068_s1 + $0x9b0] sm:$0xff]  ;;  %v1186_v19 = vld [vmem:[%s4070_s3 + $0x158] sm:$0xff]  ;;  %v1188_v28 = vld [vmem:[%s4070_s3 + $0x168] sm:$0xff] }
  0xc9   :  { %1957 = vmatprep.subr.bf16.mxu0 %v1956_v41  ;;  %v338_v20 = vld [vmem:[%s4068_s1 + $0x9d8] sm:$0xff]  ;;  %v1850_v23 = vpack.c.bf16 %v333_v17, %v329_v12  ;;  %v337_v41 = vld [vmem:[%s4068_s1 + $0x9d0] sm:$0xff]  ;;  %v1976_v24 = vpack.c.bf16 %v1186_v19, %v1184_v18  ;;  %v1195_v2 = vld [vmem:[%s4070_s3 + $0x1a0] sm:$0xff] }
  0xca   :  { %1831 = vmatpush1.bf16.msra.mxu1 %v1830_v22  ;;  %v342_v21 = vld [vmem:[%s4068_s1 + $0x9f8] sm:$0xff]  ;;  %v1974_v22 = vpack.c.bf16 %v1181_v15, %v1179_v14  ;;  %v341_v48 = vld [vmem:[%s4068_s1 + $0x9f0] sm:$0xff]  ;;  %v1200_v7 = vld [vmem:[%s4070_s3 + $0x1c8] sm:$0xff] }
  0xcb   :  { %1833 = vmatprep.subr.bf16.mxu1 %v1832_v34  ;;  %v1185_v34 = vld [vmem:[%s4070_s3 + $0x150] sm:$0xff]  ;;  %v1852_v27 = vpack.c.bf16 %v342_v21, %v338_v20  ;;  %v1190_v29 = vld [vmem:[%s4070_s3 + $0x178] sm:$0xff]  ;;  %v1854_v35 = vpack.c.bf16 %v341_v48, %v337_v41 }
  0xcc   :  { %1959 = vmatpush1.bf16.msra.mxu0 %v1958_v31  ;;  %v346_v30 = vld [vmem:[%s4068_s1 + $0xa18] sm:$0xff]  ;;  %v1980_v37 = vpack.c.bf16 %v1190_v29, %v1188_v28  ;;  %v349_v43 = vld [vmem:[%s4068_s1 + $0xa30] sm:$0xff] }
  0xcd   :  { %1961 = vmatprep.subr.bf16.mxu0 %v1960_v36  ;;  %v350_v31 = vld [vmem:[%s4068_s1 + $0xa38] sm:$0xff]  ;;  %v345_v36 = vld [vmem:[%s4068_s1 + $0xa10] sm:$0xff] }
  0xce   :  { %1835 = vmatpush1.bf16.msra.mxu1 %v1834_v32  ;;  %v1978_v32 = vpack.c.bf16 %v1185_v34, %v1183_v26  ;;  %v1856_v42 = vpack.c.bf16 %v350_v31, %v346_v30  ;;  %v1194_v45 = vld [vmem:[%s4070_s3 + $0x198] sm:$0xff]  ;;  %v1858_v50 = vpack.c.bf16 %v349_v43, %v345_v36  ;;  %v357_v57 = vld [vmem:[%s4068_s1 + $0xa70] sm:$0xff] }
  0xcf   :  { %1837 = vmatprep.subr.bf16.mxu1 %v1836_v40  ;;  %v1189_v40 = vld [vmem:[%s4070_s3 + $0x170] sm:$0xff]  ;;  %v354_v46 = vld [vmem:[%s4068_s1 + $0xa58] sm:$0xff]  ;;  %v1984_v52 = vpack.c.bf16 %v1194_v45, %v1192_v38 }
  0xd0   :  { %1963 = vmatpush1.bf16.msra.mxu0 %v1962_v47  ;;  %v358_v47 = vld [vmem:[%s4068_s1 + $0xa78] sm:$0xff]  ;;  %v365_v6 = vld [vmem:[%s4068_s1 + $0xab0] sm:$0xff] }
  0xd1   :  { %1965 = vmatprep.subr.bf16.mxu0 %v1964_v51  ;;  %v353_v51 = vld [vmem:[%s4068_s1 + $0xa50] sm:$0xff]  ;;  %v1860_v56 = vpack.c.bf16 %v358_v47, %v354_v46  ;;  %v1198_v59 = vld [vmem:[%s4070_s3 + $0x1b8] sm:$0xff] }
  0xd2   :  { %1839 = vmatpush1.bf16.msra.mxu1 %v1838_v49  ;;  %v1982_v49 = vpack.c.bf16 %v1189_v40, %v1187_v39  ;;  %v362_v33 = vld [vmem:[%s4068_s1 + $0xa98] sm:$0xff]  ;;  %v1862_v63 = vpack.c.bf16 %v357_v57, %v353_v51  ;;  %v1988_v1 = vpack.c.bf16 %v1198_v59, %v1196_v58  ;;  %v369_v15 = vld [vmem:[%s4068_s1 + $0xad0] sm:$0xff] }
  0xd3   :  { %1841 = vmatprep.subr.bf16.mxu1 %v1840_v55  ;;  %v1193_v55 = vld [vmem:[%s4070_s3 + $0x190] sm:$0xff]  ;;  %v1202_v8 = vld [vmem:[%s4070_s3 + $0x1d8] sm:$0xff] }
  0xd4   :  { %1967 = vmatpush1.bf16.msra.mxu0 %v1966_v60  ;;  %v366_v60 = vld [vmem:[%s4068_s1 + $0xab8] sm:$0xff]  ;;  %v377_v21 = vld [vmem:[%s4068_s1 + $0xb10] sm:$0xff] }
  0xd5   :  { %1969 = vmatprep.subr.bf16.mxu0 %v1968_v0  ;;  %v361_v0 = vld [vmem:[%s4068_s1 + $0xa90] sm:$0xff]  ;;  %v1864_v5 = vpack.c.bf16 %v366_v60, %v362_v33  ;;  %v370_v25 = vld [vmem:[%s4068_s1 + $0xad8] sm:$0xff]  ;;  %v1199_v33 = vld [vmem:[%s4070_s3 + $0x1c0] sm:$0xff] }
  0xd6   :  { %1843 = vmatpush1.bf16.msra.mxu1 %v1842_v62  ;;  %v1986_v62 = vpack.c.bf16 %v1193_v55, %v1191_v53  ;;  %v1866_v12 = vpack.c.bf16 %v365_v6, %v361_v0  ;;  %v378_v17 = vld [vmem:[%s4068_s1 + $0xb18] sm:$0xff]  ;;  %v385_v34 = vld [vmem:[%s4068_s1 + $0xb50] sm:$0xff] }
  0xd7   :  { %1845 = vmatprep.subr.bf16.mxu1 %v1844_v4  ;;  %v1197_v4 = vld [vmem:[%s4070_s3 + $0x1b0] sm:$0xff]  ;;  %v382_v18 = vld [vmem:[%s4068_s1 + $0xb38] sm:$0xff] }
  0xd8   :  { %1971 = vmatpush1.bf16.msra.mxu0 %v1970_v9  ;;  %v374_v9 = vld [vmem:[%s4068_s1 + $0xaf8] sm:$0xff]  ;;  %v1872_v20 = vpack.c.bf16 %v382_v18, %v378_v17  ;;  %v393_v31 = vld [vmem:[%s4068_s1 + $0xb90] sm:$0xff] }
  0xd9   :  { %1973 = vmatprep.subr.bf16.mxu0 %v1972_v13  ;;  %v1992_v13 = vpack.c.bf16 %v1202_v8, %v1200_v7  ;;  %v1868_v14 = vpack.c.bf16 %v374_v9, %v370_v25  ;;  %v390_v41 = vld [vmem:[%s4068_s1 + $0xb78] sm:$0xff]  ;;  %v401_v40 = vld [vmem:[%s4068_s1 + $0xbd0] sm:$0xff]  ;;  %v1203_v7 = vld [vmem:[%s4070_s3 + $0x1e0] sm:$0xff] }
  0xda   :  { %1847 = vmatpush1.bf16.msra.mxu1 %v1846_v10  ;;  %v1990_v10 = vpack.c.bf16 %v1197_v4, %v1195_v2  ;;  %v394_v48 = vld [vmem:[%s4068_s1 + $0xb98] sm:$0xff]  ;;  %v409_v47 = vld [vmem:[%s4068_s1 + $0xc10] sm:$0xff]  ;;  %v1204_v2 = vld [vmem:[%s4070_s3 + $0x1e8] sm:$0xff] }
  0xdb   :  { %1849 = vmatprep.subr.bf16.mxu1 %v1848_v16  ;;  %v373_v16 = vld [vmem:[%s4068_s1 + $0xaf0] sm:$0xff]  ;;  %v398_v28 = vld [vmem:[%s4068_s1 + $0xbb8] sm:$0xff] }
  0xdc   :  { %1975 = vmatpush1.bf16.msra.mxu0 %v1974_v22  ;;  %v1870_v19 = vpack.c.bf16 %v373_v16, %v369_v15  ;;  %v381_v22 = vld [vmem:[%s4068_s1 + $0xb30] sm:$0xff]  ;;  %v1880_v30 = vpack.c.bf16 %v398_v28, %v394_v48  ;;  %v406_v36 = vld [vmem:[%s4068_s1 + $0xbf8] sm:$0xff] }
  0xdd   :  { %1977 = vmatprep.subr.bf16.mxu0 %v1976_v24  ;;  %v1874_v24 = vpack.c.bf16 %v381_v22, %v377_v21  ;;  %v410_v43 = vld [vmem:[%s4068_s1 + $0xc18] sm:$0xff]  ;;  %v417_v55 = vld [vmem:[%s4068_s1 + $0xc50] sm:$0xff]  ;;  %v1208_v21 = vld [vmem:[%s4070_s3 + $0x208] sm:$0xff] }
  0xde   :  { %1851 = vmatpush1.bf16.msra.mxu1 %v1850_v23  ;;  %v386_v23 = vld [vmem:[%s4068_s1 + $0xb58] sm:$0xff]  ;;  %v1201_v60 = vld [vmem:[%s4070_s3 + $0x1d0] sm:$0xff] }
  0xdf   :  { %1853 = vmatprep.subr.bf16.mxu1 %v1852_v27  ;;  %v1876_v26 = vpack.c.bf16 %v390_v41, %v386_v23  ;;  %v389_v27 = vld [vmem:[%s4068_s1 + $0xb70] sm:$0xff]  ;;  %v414_v38 = vld [vmem:[%s4068_s1 + $0xc38] sm:$0xff]  ;;  %v1994_v0 = vpack.c.bf16 %v1201_v60, %v1199_v33 }
  0xe0   :  { %1979 = vmatpush1.bf16.msra.mxu0 %v1978_v32  ;;  %v1878_v29 = vpack.c.bf16 %v389_v27, %v385_v34  ;;  %v397_v32 = vld [vmem:[%s4068_s1 + $0xbb0] sm:$0xff]  ;;  %v1888_v46 = vpack.c.bf16 %v414_v38, %v410_v43  ;;  %v422_v51 = vld [vmem:[%s4068_s1 + $0xc78] sm:$0xff] }
  0xe1   :  { %1981 = vmatprep.subr.bf16.mxu0 %v1980_v37  ;;  %v1882_v37 = vpack.c.bf16 %v397_v32, %v393_v31  ;;  %v426_v57 = vld [vmem:[%s4068_s1 + $0xc98] sm:$0xff]  ;;  %v1205_v8 = vld [vmem:[%s4070_s3 + $0x1f0] sm:$0xff] }
  0xe2   :  { %1855 = vmatpush1.bf16.msra.mxu1 %v1854_v35  ;;  %v402_v35 = vld [vmem:[%s4068_s1 + $0xbd8] sm:$0xff]  ;;  %v433_v9 = vld [vmem:[%s4068_s1 + $0xcd0] sm:$0xff] }
  0xe3   :  { %1857 = vmatprep.subr.bf16.mxu1 %v1856_v42  ;;  %v1884_v39 = vpack.c.bf16 %v406_v36, %v402_v35  ;;  %v405_v42 = vld [vmem:[%s4068_s1 + $0xbf0] sm:$0xff]  ;;  %v430_v58 = vld [vmem:[%s4068_s1 + $0xcb8] sm:$0xff] }
  0xe4   :  { %1983 = vmatpush1.bf16.msra.mxu0 %v1982_v49  ;;  %v1886_v45 = vpack.c.bf16 %v405_v42, %v401_v40  ;;  %v413_v49 = vld [vmem:[%s4068_s1 + $0xc30] sm:$0xff]  ;;  %v1206_v4 = vld [vmem:[%s4070_s3 + $0x1f8] sm:$0xff] }
  0xe5   :  { %1985 = vmatprep.subr.bf16.mxu0 %v1984_v52  ;;  %v1890_v52 = vpack.c.bf16 %v413_v49, %v409_v47  ;;  %v1996_v6 = vpack.c.bf16 %v1206_v4, %v1204_v2  ;;  %v441_v17 = vld [vmem:[%s4068_s1 + $0xd10] sm:$0xff]  ;;  %v1210_v22 = vld [vmem:[%s4070_s3 + $0x218] sm:$0xff] }
  0xe6   :  { %1859 = vmatpush1.bf16.msra.mxu1 %v1858_v50  ;;  %v418_v50 = vld [vmem:[%s4068_s1 + $0xc58] sm:$0xff]  ;;  %v445_v18 = vld [vmem:[%s4068_s1 + $0xd30] sm:$0xff]  ;;  %v2000_v23 = vpack.c.bf16 %v1210_v22, %v1208_v21 }
  0xe7   :  { %1861 = vmatprep.subr.bf16.mxu1 %v1860_v56  ;;  %v1892_v53 = vpack.c.bf16 %v422_v51, %v418_v50  ;;  %v421_v56 = vld [vmem:[%s4068_s1 + $0xc70] sm:$0xff]  ;;  %v1906_v41 = vpack.c.bf16 %v445_v18, %v441_v17  ;;  %v458_v27 = vld [vmem:[%s4068_s1 + $0xd98] sm:$0xff]  ;;  %v1212_v18 = vld [vmem:[%s4070_s3 + $0x228] sm:$0xff] }
  0xe8   :  { %1987 = vmatpush1.bf16.msra.mxu0 %v1986_v62  ;;  %v1894_v59 = vpack.c.bf16 %v421_v56, %v417_v55  ;;  %v1896_v62 = vpack.c.bf16 %v430_v58, %v426_v57  ;;  %v453_v34 = vld [vmem:[%s4068_s1 + $0xd70] sm:$0xff]  ;;  %v462_v48 = vld [vmem:[%s4068_s1 + $0xdb8] sm:$0xff] }
  0xe9   :  { %1989 = vmatprep.subr.bf16.mxu0 %v1988_v1  ;;  %v438_v1 = vld [vmem:[%s4068_s1 + $0xcf8] sm:$0xff]  ;;  %v461_v31 = vld [vmem:[%s4068_s1 + $0xdb0] sm:$0xff] }
  0xea   :  { %1863 = vmatpush1.bf16.msra.mxu1 %v1862_v63  ;;  %v425_v63 = vld [vmem:[%s4068_s1 + $0xc90] sm:$0xff]  ;;  %v466_v35 = vld [vmem:[%s4068_s1 + $0xdd8] sm:$0xff] }
  0xeb   :  { %1865 = vmatprep.subr.bf16.mxu1 %v1864_v5  ;;  %v470_v36 = vld [vmem:[%s4068_s1 + $0xdf8] sm:$0xff]  ;;  %v465_v42 = vld [vmem:[%s4068_s1 + $0xdd0] sm:$0xff] }
  0xec   :  { %1991 = vmatpush1.bf16.msra.mxu0 %v1990_v10  ;;  %v437_v10 = vld [vmem:[%s4068_s1 + $0xcf0] sm:$0xff]  ;;  %v1916_v40 = vpack.c.bf16 %v470_v36, %v466_v35  ;;  %v474_v38 = vld [vmem:[%s4068_s1 + $0xe18] sm:$0xff]  ;;  %v1219_v36 = vld [vmem:[%s4070_s3 + $0x260] sm:$0xff] }
  0xed   :  { %1993 = vmatprep.subr.bf16.mxu0 %v1992_v13  ;;  %v442_v13 = vld [vmem:[%s4068_s1 + $0xd18] sm:$0xff]  ;;  %v1902_v15 = vpack.c.bf16 %v437_v10, %v433_v9  ;;  %v469_v43 = vld [vmem:[%s4068_s1 + $0xdf0] sm:$0xff] }
  0xee   :  { %1867 = vmatpush1.bf16.msra.mxu1 %v1866_v12  ;;  %v1998_v12 = vpack.c.bf16 %v1205_v8, %v1203_v7  ;;  %v473_v49 = vld [vmem:[%s4068_s1 + $0xe10] sm:$0xff]  ;;  %v482_v51 = vld [vmem:[%s4068_s1 + $0xe58] sm:$0xff]  ;;  %v3848_v7 = vld [vmem:[%s4069_s2] sm:$0xf]  ;;  %v511_v8 = vsub.s32 1, %v2396_v61 }
  0xef   :  { %1869 = vmatprep.subr.bf16.mxu1 %v1868_v14  ;;  %v446_v14 = vld [vmem:[%s4068_s1 + $0xd38] sm:$0xff]  ;;  %v477_v50 = vld [vmem:[%s4068_s1 + $0xe30] sm:$0xff] }
  0xf0   :  { %1995 = vmatpush1.bf16.msra.mxu0 %v1994_v0  ;;  %v1904_v16 = vpack.c.bf16 %v446_v14, %v442_v13  ;;  %v481_v56 = vld [vmem:[%s4068_s1 + $0xe50] sm:$0xff]  ;;  %v490_v58 = vld [vmem:[%s4068_s1 + $0xe98] sm:$0xff]  ;;  %v512_v9 = vrot.slane %v3848_v7, %v511_v8 }
  0xf1   :  { %1997 = vmatprep.subr.bf16.mxu0 %v1996_v6  ;;  %v485_v57 = vld [vmem:[%s4068_s1 + $0xe70] sm:$0xff]  ;;  %v502_v0 = vld [vmem:[%s4068_s1 + $0xef8] sm:$0xff]  ;;  %v507_v6 = vsub.s32 0, %v2396_v61 }
  0xf2   :  { %1871 = vmatpush1.bf16.msra.mxu1 %v1870_v19  ;;  %v450_v19 = vld [vmem:[%s4068_s1 + $0xd58] sm:$0xff]  ;;  %v1926_v33 = vpack.c.bf16 %v485_v57, %v481_v56  ;;  %v497_v2 = vld [vmem:[%s4068_s1 + $0xed0] sm:$0xff] }
  0xf3   :  { %1873 = vmatprep.subr.bf16.mxu1 %v1872_v20  ;;  %v454_v20 = vld [vmem:[%s4068_s1 + $0xd78] sm:$0xff]  ;;  %v501_v4 = vld [vmem:[%s4068_s1 + $0xef0] sm:$0xff] }
  0xf4   :  { %1999 = vmatpush1.bf16.msra.mxu0 %v1998_v12 }
  0xf5   :  { %2001 = vmatprep.subr.bf16.mxu0 %v2000_v23 }
  0xf6   :  { %1875 = vmatpush1.bf16.msra.mxu1 %v1874_v24  ;;  %v1908_v24 = vpack.c.bf16 %v454_v20, %v450_v19  ;;  %v1214_v19 = vld [vmem:[%s4070_s3 + $0x238] sm:$0xff] }
  0xf7   :  { %1877 = vmatprep.subr.bf16.mxu1 %v1876_v26  ;;  %v449_v26 = vld [vmem:[%s4068_s1 + $0xd50] sm:$0xff]  ;;  %v2004_v23 = vpack.c.bf16 %v1214_v19, %v1212_v18  ;;  %v1247_v19 = vld [vmem:[%s4070_s3 + $0x340] sm:$0xff] }
  0xf8   :  { %v1910_v28 = vpack.c.bf16 %v453_v34, %v449_v26  ;;  %v1216_v26 = vld [vmem:[%s4070_s3 + $0x248] sm:$0xff]  ;;  %v1218_v34 = vld [vmem:[%s4070_s3 + $0x258] sm:$0xff] }
  0xfa   :  { %1879 = vmatpush1.bf16.msra.mxu1 %v1878_v29  ;;  %v1912_v29 = vpack.c.bf16 %v462_v48, %v458_v27  ;;  %v2008_v48 = vpack.c.bf16 %v1218_v34, %v1216_v26  ;;  %v1253_v26 = vld [vmem:[%s4070_s3 + $0x370] sm:$0xff]  ;;  %v1256_v34 = vld [vmem:[%s4070_s3 + $0x388] sm:$0xff] }
  0xfb   :  { %1881 = vmatprep.subr.bf16.mxu1 %v1880_v30  ;;  %v457_v30 = vld [vmem:[%s4068_s1 + $0xd90] sm:$0xff] }
  0xfe   :  { %1883 = vmatpush1.bf16.msra.mxu1 %v1882_v37 }
  0xff   :  { %1885 = vmatprep.subr.bf16.mxu1 %v1884_v39  ;;  %v1914_v39 = vpack.c.bf16 %v461_v31, %v457_v30  ;;  %v1220_v30 = vld [vmem:[%s4070_s3 + $0x268] sm:$0xff]  ;;  %v1222_v31 = vld [vmem:[%s4070_s3 + $0x278] sm:$0xff] }
 0x100   :  { %v2012_v35 = vpack.c.bf16 %v1222_v31, %v1220_v30  ;;  %v1257_v30 = vld [vmem:[%s4070_s3 + $0x390] sm:$0xff]  ;;  %v1260_v31 = vld [vmem:[%s4070_s3 + $0x3a8] sm:$0xff] }
 0x102   :  { %1887 = vmatpush1.bf16.msra.mxu1 %v1886_v45  ;;  %v478_v45 = vld [vmem:[%s4068_s1 + $0xe38] sm:$0xff] }
 0x103   :  { %1889 = vmatprep.subr.bf16.mxu1 %v1888_v46  ;;  %v1918_v46 = vpack.c.bf16 %v469_v43, %v465_v42  ;;  %v1920_v47 = vpack.c.bf16 %v478_v45, %v474_v38  ;;  %v1223_v38 = vld [vmem:[%s4070_s3 + $0x280] sm:$0xff]  ;;  %v1225_v45 = vld [vmem:[%s4070_s3 + $0x290] sm:$0xff] }
 0x105   :  { %1062 = vmatmul.mubr.f32.vlgmr.msra.gmra.mrb[2].mxu1 %v2736_v44  ;;  %v429_v44 = vld [vmem:[%s4068_s1 + $0xcb0] sm:$0xff] }
 0x106   :  { %1891 = vmatpush1.bf16.msra.mxu1 %v1890_v52  ;;  %1455 = vmatprep.mubr.msk.f32.mxu1 %vm568_vm0, %v3014_v3  ;;  %v434_v3 = vld [vmem:[%s4068_s1 + $0xcd8] sm:$0xff]  ;;  %v1898_v5 = vpack.c.bf16 %v429_v44, %v425_v63  ;;  %v493_v63 = vld [vmem:[%s4068_s1 + $0xeb0] sm:$0xff] }
 0x107   :  { %1893 = vmatprep.subr.bf16.mxu1 %v1892_v53  ;;  %v1900_v25 = vpack.c.bf16 %v438_v1, %v434_v3  ;;  %v486_v52 = vld [vmem:[%s4068_s1 + $0xe78] sm:$0xff]  ;;  %v1922_v53 = vpack.c.bf16 %v477_v50, %v473_v49  ;;  %v2018_v49 = vpack.c.bf16 %v1225_v45, %v1223_v38  ;;  %v1263_v45 = vld [vmem:[%s4070_s3 + $0x3c0] sm:$0xff] }
 0x108   :  { %v1924_v55 = vpack.c.bf16 %v486_v52, %v482_v51  ;;  %v498_v44 = vld [vmem:[%s4068_s1 + $0xed8] sm:$0xff]  ;;  %v1227_v51 = vld [vmem:[%s4070_s3 + $0x2a0] sm:$0xff]  ;;  %v1229_v52 = vld [vmem:[%s4070_s3 + $0x2b0] sm:$0xff] }
 0x109   :  { %v1932_v1 = vpack.c.bf16 %v502_v0, %v498_v44  ;;  %v2022_v56 = vpack.c.bf16 %v1229_v52, %v1227_v51  ;;  %v1235_v44 = vld [vmem:[%s4070_s3 + $0x2e0] sm:$0xff]  ;;  %v1237_v0 = vld [vmem:[%s4070_s3 + $0x2f0] sm:$0xff] }
 0x10a   :  { %1895 = vmatpush1.bf16.msra.mxu1 %v1894_v59  ;;  %v494_v59 = vld [vmem:[%s4068_s1 + $0xeb8] sm:$0xff]  ;;  %v1267_v52 = vld [vmem:[%s4070_s3 + $0x3e0] sm:$0xff] }
 0x10b   :  { %1897 = vmatprep.subr.bf16.mxu1 %v1896_v62  ;;  %v1928_v60 = vpack.c.bf16 %v494_v59, %v490_v58  ;;  %v489_v62 = vld [vmem:[%s4068_s1 + $0xe90] sm:$0xff]  ;;  %v1231_v58 = vld [vmem:[%s4070_s3 + $0x2c0] sm:$0xff] }
 0x10c   :  { %v1930_v3 = vpack.c.bf16 %v493_v63, %v489_v62  ;;  %v1233_v59 = vld [vmem:[%s4070_s3 + $0x2d0] sm:$0xff] }
 0x10d   :  { %v2026_v62 = vpack.c.bf16 %v1233_v59, %v1231_v58 }
 0x10e   :  { %1899 = vmatpush1.bf16.msra.mxu1 %v1898_v5  ;;  %v1934_v5 = vpack.c.bf16 %v501_v4, %v497_v2  ;;  %v2030_v2 = vpack.c.bf16 %v1237_v0, %v1235_v44 }
 0x10f   :  { %1901 = vmatprep.subr.bf16.mxu1 %v1900_v25  ;;  %v508_v25 = vrot.slane %v3848_v7, %v507_v6 }
 0x112   :  { %1903 = vmatpush1.bf16.msra.mxu1 %v1902_v15  ;;  %v1207_v15 = vld [vmem:[%s4070_s3 + $0x200] sm:$0xff] }
 0x113   :  { %1905 = vmatprep.subr.bf16.mxu1 %v1904_v16  ;;  %v1209_v16 = vld [vmem:[%s4070_s3 + $0x210] sm:$0xff] }
 0x114   :  { %v2002_v21 = vpack.c.bf16 %v1209_v16, %v1207_v15  ;;  %v1248_v15 = vld [vmem:[%s4070_s3 + $0x348] sm:$0xff]  ;;  %v1250_v16 = vld [vmem:[%s4070_s3 + $0x358] sm:$0xff] }
 0x115   :  { %v2040_v18 = vpack.c.bf16 %v1250_v16, %v1248_v15 }
 0x116   :  { %1907 = vmatpush1.bf16.msra.mxu1 %v1906_v41  ;;  %v1211_v41 = vld [vmem:[%s4070_s3 + $0x220] sm:$0xff] }
 0x117   :  { %1909 = vmatprep.subr.bf16.mxu1 %v1908_v24  ;;  %v1213_v24 = vld [vmem:[%s4070_s3 + $0x230] sm:$0xff] }
 0x118   :  { %v637_v32 = vpop.f32.mrb[0].mxu1  ;;  %v2006_v27 = vpack.c.bf16 %v1213_v24, %v1211_v41  ;;  %v1251_v24 = vld [vmem:[%s4070_s3 + $0x360] sm:$0xff] }
 0x119   :  { %v639_v37 = vpop.f32.mrb[1].mxu1  ;;  %v638_v10 = vadd.f32 %v637_v32, %v508_v25  ;;  %v1241_v25 = vld [vmem:[%s4070_s3 + $0x310] sm:$0xff] }
 0x11a   :  { %1911 = vmatpush1.bf16.msra.mxu1 %v1910_v28  ;;  %v640_v12 = vadd.f32 %v639_v37, %v512_v9  ;;  %v1215_v28 = vld [vmem:[%s4070_s3 + $0x240] sm:$0xff]  ;;  %v1221_v37 = vld [vmem:[%s4070_s3 + $0x270] sm:$0xff]  ;;  %v1244_v9 = vld [vmem:[%s4070_s3 + $0x328] sm:$0xff] }
 0x11b   :  { %1913 = vmatprep.subr.bf16.mxu1 %v1912_v29  ;;  %v1217_v29 = vld [vmem:[%s4070_s3 + $0x250] sm:$0xff]  ;;  %v2014_v42 = vpack.c.bf16 %v1221_v37, %v1219_v36  ;;  %v1259_v37 = vld [vmem:[%s4070_s3 + $0x3a0] sm:$0xff] }
 0x11c   :  { %v2010_v32 = vpack.c.bf16 %v1217_v29, %v1215_v28  ;;  %v1255_v29 = vld [vmem:[%s4070_s3 + $0x380] sm:$0xff] }
 0x11e   :  { %1915 = vmatpush1.bf16.msra.mxu1 %v1914_v39  ;;  %v1224_v39 = vld [vmem:[%s4070_s3 + $0x288] sm:$0xff] }
 0x11f   :  { %1917 = vmatprep.subr.bf16.mxu1 %v1916_v40  ;;  %v1226_v40 = vld [vmem:[%s4070_s3 + $0x298] sm:$0xff] }
 0x120   :  { %v2016_v43 = vpack.c.bf16 %v1226_v40, %v1224_v39  ;;  %v1261_v39 = vld [vmem:[%s4070_s3 + $0x3b0] sm:$0xff]  ;;  %v1264_v40 = vld [vmem:[%s4070_s3 + $0x3c8] sm:$0xff] }
 0x122   :  { %1919 = vmatpush1.bf16.msra.mxu1 %v1918_v46  ;;  %v1228_v46 = vld [vmem:[%s4070_s3 + $0x2a8] sm:$0xff] }
 0x123   :  { %1921 = vmatprep.subr.bf16.mxu1 %v1920_v47  ;;  %v1230_v47 = vld [vmem:[%s4070_s3 + $0x2b8] sm:$0xff] }
 0x124   :  { %v2020_v50 = vpack.c.bf16 %v1230_v47, %v1228_v46  ;;  %v1265_v46 = vld [vmem:[%s4070_s3 + $0x3d0] sm:$0xff]  ;;  %v1268_v47 = vld [vmem:[%s4070_s3 + $0x3e8] sm:$0xff] }
 0x126   :  { %1923 = vmatpush1.bf16.msra.mxu1 %v1922_v53  ;;  %v1232_v53 = vld [vmem:[%s4070_s3 + $0x2c8] sm:$0xff] }
 0x127   :  { %1925 = vmatprep.subr.bf16.mxu1 %v1924_v55  ;;  %v1234_v55 = vld [vmem:[%s4070_s3 + $0x2d8] sm:$0xff] }
 0x128   :  { %v2024_v57 = vpack.c.bf16 %v1234_v55, %v1232_v53  ;;  %v1269_v53 = vld [vmem:[%s4070_s3 + $0x3f0] sm:$0xff] }
 0x129   :  { %v2062_v55 = vpack.c.bf16 %v1269_v53, %v1267_v52 }
 0x12a   :  { %1927 = vmatpush1.bf16.msra.mxu1 %v1926_v33  ;;  %v1236_v33 = vld [vmem:[%s4070_s3 + $0x2e8] sm:$0xff] }
 0x12b   :  { %1929 = vmatprep.subr.bf16.mxu1 %v1928_v60  ;;  %v1238_v60 = vld [vmem:[%s4070_s3 + $0x2f8] sm:$0xff] }
 0x12c   :  { %v2028_v63 = vpack.c.bf16 %v1238_v60, %v1236_v33 }
 0x12e   :  { %1931 = vmatpush1.bf16.msra.mxu1 %v1930_v3  ;;  %v1240_v3 = vld [vmem:[%s4070_s3 + $0x308] sm:$0xff] }
 0x12f   :  { %1933 = vmatprep.subr.bf16.mxu1 %v1932_v1  ;;  %v1242_v1 = vld [vmem:[%s4070_s3 + $0x318] sm:$0xff] }
 0x130   :  { %v2032_v4 = vpack.c.bf16 %v1242_v1, %v1240_v3  ;;  %v1271_v3 = vld [vmem:[%s4071_s4] sm:$0x3]  ;;  %s2088_s4 = scalar_lea.vmem %s1447_s24, 64 }
 0x131   :  { %v1276_v1 = vrot.slane %v1271_v3, %v507_v6  ;;  %p2089_p0 = scmp.ne.s32.totalorder %s1447_s24, %s2088_s4  ;;  %p2094_p2 = scmp.lt.s32.totalorder %s2088_s4, %s2088_s4 }
 0x132   :  { %1935 = vmatpush1.bf16.msra.mxu1 %v1934_v5  ;;  %v1239_v5 = vld [vmem:[%s4070_s3 + $0x300] sm:$0xff] }
 0x133   :  { %p2095_p3 = por %p2094_p2, %p2093_p1 }
 0x135   :  { %1133 = vmatmul.mubr.f32.vlgmr.msra.gmra.mrb[2].mxu1 %v2986_v54  ;;  %p2096_p4 = pnand %p2095_p3, %p2089_p0 }
 0x18a   :  { %v850_v54 = vpop.f32.mrb[0].mxu0 }
 0x18b   :  { %v2065_v13 = vadd.f32 %v850_v54, %v638_v10  ;;  %v852_v14 = vpop.f32.mrb[1].mxu0  ;;  %v1246_v10 = vld [vmem:[%s4070_s3 + $0x338] sm:$0xff] }
 0x18c   :  { %v2067_v17 = vadd.f32 %v852_v14, %v640_v12  ;;  %v2034_v12 = vpack.c.bf16 %v1241_v25, %v1239_v5  ;;  %v2036_v54 = vpack.c.bf16 %v1246_v10, %v1244_v9  ;;  %v1245_v14 = vld [vmem:[%s4070_s3 + $0x330] sm:$0xff] }
 0x18d   :  { %v1139_v22 = vmax.f32 %v2065_v13, 0.0  ;;  %v1243_v13 = vld [vmem:[%s4070_s3 + $0x320] sm:$0xff] }
 0x18e   :  { %v1140_v20 = vmax.f32 %v2067_v17, 0.0  ;;  %v2038_v17 = vpack.c.bf16 %v1245_v14, %v1243_v13 }
 0x190   :  { %1347 = vmatprep.mubr.f32.mxu0 %v1140_v20  ;;  %v1249_v20 = vld [vmem:[%s4070_s3 + $0x350] sm:$0xff] }
 0x191   :  { %1348 = vmatmul.mubr.f32.vlgmr.msra.gmra.mrb[2].mxu0 %v1139_v22  ;;  %v1254_v22 = vld [vmem:[%s4070_s3 + $0x378] sm:$0xff] }
 0x192   :  { %2003 = vmatpush1.bf16.msra.mxu0 %v2002_v21  ;;  %v1252_v21 = vld [vmem:[%s4070_s3 + $0x368] sm:$0xff] }
 0x193   :  { %2005 = vmatprep.subr.bf16.mxu0 %v2004_v23  ;;  %v2042_v23 = vpack.c.bf16 %v1249_v20, %v1247_v19  ;;  %v2044_v41 = vpack.c.bf16 %v1254_v22, %v1252_v21 }
 0x196   :  { %2007 = vmatpush1.bf16.msra.mxu0 %v2006_v27  ;;  %v1258_v27 = vld [vmem:[%s4070_s3 + $0x398] sm:$0xff] }
 0x197   :  { %2009 = vmatprep.subr.bf16.mxu0 %v2008_v48  ;;  %v2046_v48 = vpack.c.bf16 %v1253_v26, %v1251_v24  ;;  %v2048_v28 = vpack.c.bf16 %v1258_v27, %v1256_v34 }
 0x19a   :  { %2011 = vmatpush1.bf16.msra.mxu0 %v2010_v32  ;;  %v1262_v32 = vld [vmem:[%s4070_s3 + $0x3b8] sm:$0xff] }
 0x19b   :  { %2013 = vmatprep.subr.bf16.mxu0 %v2012_v35  ;;  %v2050_v35 = vpack.c.bf16 %v1257_v30, %v1255_v29  ;;  %v2052_v36 = vpack.c.bf16 %v1262_v32, %v1260_v31 }
 0x19e   :  { %2015 = vmatpush1.bf16.msra.mxu0 %v2014_v42  ;;  %v1266_v42 = vld [vmem:[%s4070_s3 + $0x3d8] sm:$0xff] }
 0x19f   :  { %2017 = vmatprep.subr.bf16.mxu0 %v2016_v43  ;;  %v2054_v43 = vpack.c.bf16 %v1261_v39, %v1259_v37  ;;  %v2056_v38 = vpack.c.bf16 %v1266_v42, %v1264_v40 }
 0x1a2   :  { %2019 = vmatpush1.bf16.msra.mxu0 %v2018_v49  ;;  %v1270_v49 = vld [vmem:[%s4070_s3 + $0x3f8] sm:$0xff] }
 0x1a3   :  { %2021 = vmatprep.subr.bf16.mxu0 %v2020_v50  ;;  %v2058_v50 = vpack.c.bf16 %v1265_v46, %v1263_v45  ;;  %v2060_v51 = vpack.c.bf16 %v1270_v49, %v1268_v47 }
 0x1a6   :  { %2023 = vmatpush1.bf16.msra.mxu0 %v2022_v56  ;;  %v515_v56 = vsub.s32 2, %v2396_v61 }
 0x1a7   :  { %2025 = vmatprep.subr.bf16.mxu0 %v2024_v57  ;;  %v519_v57 = vsub.s32 3, %v2396_v61 }
 0x1a8   :  { %v516_v58 = vrot.slane %v3848_v7, %v515_v56 }
 0x1a9   :  { %v520_v59 = vrot.slane %v3848_v7, %v519_v57 }
 0x1aa   :  { %2027 = vmatpush1.bf16.msra.mxu0 %v2026_v62 }
 0x1ab   :  { %2029 = vmatprep.subr.bf16.mxu0 %v2028_v63 }
 0x1ae   :  { %2031 = vmatpush1.bf16.msra.mxu0 %v2030_v2  ;;  %v1280_v2 = vrot.slane %v1271_v3, %v511_v8 }
 0x1af   :  { %2033 = vmatprep.subr.bf16.mxu0 %v2032_v4 }
 0x1b2   :  { %2035 = vmatpush1.bf16.msra.mxu0 %v2034_v12 }
 0x1b3   :  { %2037 = vmatprep.subr.bf16.mxu0 %v2036_v54 }
 0x1b6   :  { %2039 = vmatpush1.bf16.msra.mxu0 %v2038_v17 }
 0x1b7   :  { %2041 = vmatprep.subr.bf16.mxu0 %v2040_v18 }
 0x1ba   :  { %2043 = vmatpush1.bf16.msra.mxu0 %v2042_v23 }
 0x1bb   :  { %2045 = vmatprep.subr.bf16.mxu0 %v2044_v41 }
 0x1be   :  { %2047 = vmatpush1.bf16.msra.mxu0 %v2046_v48 }
 0x1bf   :  { %2049 = vmatprep.subr.bf16.mxu0 %v2048_v28 }
 0x1c2   :  { %2051 = vmatpush1.bf16.msra.mxu0 %v2050_v35 }
 0x1c3   :  { %2053 = vmatprep.subr.bf16.mxu0 %v2052_v36 }
 0x1c6   :  { %2055 = vmatpush1.bf16.msra.mxu0 %v2054_v43 }
 0x1c7   :  { %2057 = vmatprep.subr.bf16.mxu0 %v2056_v38 }
 0x1ca   :  { %2059 = vmatpush1.bf16.msra.mxu0 %v2058_v50 }
 0x1cb   :  { %2061 = vmatprep.subr.bf16.mxu0 %v2060_v51 }
 0x1ce   :  { %2063 = vmatpush1.bf16.msra.mxu0 %v2062_v55 }
 0x208   :  { %v1134_v33 = vpop.f32.mrb[2].mxu1 }
 0x209   :  { %v2068_v60 = vadd.f32 %v1134_v33, %v516_v58  ;;  %v1136_v62 = vpop.f32.mrb[3].mxu1 }
 0x20a   :  { %v2069_v63 = vadd.f32 %v1136_v62, %v520_v59 }
 0x20b   :  { %v1141_v0 = vmax.f32 %v2068_v60, 0.0 }
 0x20c   :  { %v1142_v44 = vmax.f32 %v2069_v63, 0.0 }
 0x20e   :  { %1418 = vmatprep.mubr.f32.mxu0 %v1142_v44 }
 0x20f   :  { %1419 = vmatmul.mubr.f32.vlgmr.msra.gmra.mrb[2].mxu0 %v1141_v0 }
 0x2e2   :  { %v1420_v4 = vpop.f32.mrb[2].mxu0 }
 0x2e3   :  { %v2070_v7 = vadd.f32 %v1420_v4, %v1276_v1  ;;  %v1422_v5 = vpop.f32.mrb[3].mxu0 }
 0x2e4   :  { %v2071_v25 = vadd.f32 %v1422_v5, %v1280_v2 }
 0x2e6   :  { %v1427_v9 = vcombine.low %v2070_v7, %v2071_v25 }
 0x2e8   :  { %v1434_v10 = vrot.slane %v1427_v9, %v2423_v11 }
 0x2ea   :  { %1439 = vst.msk [vmem:[#allocation2] sm:$0xf] %vm1438_vm3, %v1434_v10 }
 0x2eb   :  { %2099 = shalt.err (!%p2096_p4)
}
 0x2ec   :  { %s2100_s27 = scalar_lea.hbm %s4072_s5, 64 }
 0x2ed   :  { %p2101_p5 = scmp.ne.s32.totalorder %s4072_s5, %s2100_s27  ;;  %p2104_p6 = scmp.lt.u32.totalorder %s2100_s27, %s4072_s5 }
 0x2ef   :  { %p2106_p7 = pnand %p2104_p6, %p2101_p5 }
 0x2f1   :  { %2109 = shalt.err (!%p2106_p7)
}
 0x2f2   :  { %1449 = dma.vmem_to_hbm [thread:$0]  %s1447_s24, 64, %s4072_s5, [#allocation3]  }
 0x2f3   :  { %2110 = dma.done.wait [#allocation3], 64  }
 0x2f4   :  { %2111 = vsyncadd [#allocation3], 4294967232 }
 0x2f5   :  { %1453 = vsyncpa [#allocation3], 1 }

// kernel: pce_forward.2
= control target key start
LH: loop header
LB: loop body
LE: loop exit
PB: predicated region body
PF: predicated region fallthrough
CT: control target
= control target key end

     0   :  { %s5860_s25 = smov 0   ;;  %s8738_s0 = inlined_call_operand.vmem [shape: f32[10,1,936], index: 0, kind: input, shape index: {}]   ;;  %s8739_s1 = inlined_call_operand.vmem [shape: f32[10,12,9], index: 1, kind: input, shape index: {}]   ;;  %s8740_s2 = inlined_call_operand.vmem [shape: f32[10,12,1], index: 2, kind: input, shape index: {}]   ;;  %s8741_s3 = inlined_call_operand.vmem [shape: f32[10,8,108], index: 3, kind: input, shape index: {}]   ;;  %s8742_s4 = inlined_call_operand.vmem [shape: f32[10,8,1], index: 4, kind: input, shape index: {}]   ;;  %s8743_s5 = inlined_call_operand.vmem [shape: f32[10,4,72], index: 5, kind: input, shape index: {}]   ;;  %s8744_s6 = inlined_call_operand.vmem [shape: f32[10,4,1], index: 6, kind: input, shape index: {}]   ;;  %s8745_s7 = inlined_call_operand.vmem [shape: f32[10,1,36], index: 7, kind: input, shape index: {}]   ;;  %s8746_s8 = inlined_call_operand.vmem [shape: f32[10,1,1], index: 8, kind: input, shape index: {}]   ;;  %s8747_s9 = inlined_call_operand.vmem [shape: f32[936,280], index: 9, kind: input, shape index: {}]   ;;  %s8748_s10 = inlined_call_operand.vmem [shape: f32[140,96], index: 10, kind: input, shape index: {}]   ;;  %s8749_s11 = inlined_call_operand.vmem [shape: f32[1,936], index: 11, kind: input, shape index: {}]   ;;  %s8750_s12 = inlined_call_operand.vmem [shape: f32[1,280], index: 12, kind: input, shape index: {}]   ;;  %s8751_s13 = inlined_call_operand.vmem [shape: f32[10,2,96], index: 13, kind: output, shape index: {}]  }
   0x1   :  { %8829 = sst [smem:[#allocation2_spill]] %s8738_s0 }
   0x2 LB: > { %s4341_s26 = sadd.s32 4294967295, %s5758_s25   ;;  %p4345_p0 = scmp.ge.s32.totalorder %s5758_s25, 1  ;;  %s5758_s25 = sphi %s5860_s25, %s23_s25  }
   0x3   : > { %p458_p1 = scmp.lt.s32.totalorder %s5758_s25, 11 }
   0x5   : > { %p459_p2 = pnand %p4345_p0, %p458_p1 }
   0x6   : > { %p532_p3 = scmp.lt.s32.totalorder (!%p459_p2), %s4341_s26, 9  ;;  %v580_v0 = vlaneseq (!%p459_p2)  ;;  %s8830_s0 = sld [smem:[#allocation2_spill]] (!%p459_p2)  ;;  %v8794_v25 = vmov (!%p459_p2), 0.0   ;;  %v5777_v26 = vmov (!%p459_p2), 0   ;;  %vm8782_vm0 = vcmask (!%p459_p2), 211968  }
   0x7   : > { %462 = sbr.rel (%p459_p2) target bundleno = 2295 (0x8f7), region = 72  ;;  %s5760_s14 = smov (!%p459_p2), 25   ;;  %1203 = vmatprep.mubr.f32.mxu1 (!%p459_p2), %v8794_v25  ;;  %1126 = vmatprep.mubr.f32.mxu0 (!%p459_p2), %v8794_v25  ;;  %vm8773_vm1 = vcmask (!%p459_p2), 203776   ;;  %vm631_vm2 = vcmask (!%p459_p2), 220160   ;;  %vm725_vm3 = vcmask (!%p459_p2), 7168   ;;  %vm8827_vm4 = vcmask (!%p459_p2), 1040384  }
   0x8   : > { %v5870_v1 = vshrl.u32 (!%p459_p2), %v580_v0, 7  ;;  %s5761_s15 = smov (!%p459_p2), 26   ;;  %s5762_s16 = smov (!%p459_p2), 27   ;;  %5320 = vset.pattern.permute.xlu0 (!%p459_p2), %v5777_v26  ;;  %5321 = vset.pattern.permute.xlu1 (!%p459_p2), %v5777_v26  ;;  %vm974_vm5 = vcmask (!%p459_p2), 1041408   ;;  %vm8787_vm6 = vcmask (!%p459_p2), 1039360   ;;  %vm983_vm7 = vcmask (!%p459_p2), 1042432  }
   0x9   : > { %s8821_s17 = smov (!%p459_p2), 1   ;;  %s8819_s18 = smov (!%p459_p2), 127   ;;  %vm781_vm8 = vcmask (!%p459_p2), 842752   ;;  %vm8789_vm9 = vcmask (!%p459_p2), 1043456   ;;  %vm1001_vm10 = vcmask (!%p459_p2), 1044480   ;;  %vm8788_vm11 = vcmask (!%p459_p2), 834560  }
   0xa   : > { %v5876_v2 = vsub.s32 (!%p459_p2), 0, %v5870_v1  ;;  %v5879_v3 = vsub.s32 (!%p459_p2), 2, %v5870_v1  ;;  %v8762_v4 = vsub.s32 (!%p459_p2), 3, %v5870_v1  ;;  %v5887_v5 = vsub.s32 (!%p459_p2), 1, %v5870_v1  ;;  %s5765_s19 = smov (!%p459_p2), 103   ;;  %s5766_s20 = smov (!%p459_p2), 102  }
   0xb   : > { %v8764_v13 = vsub.s32 (!%p459_p2), 4, %v5870_v1  ;;  %v8765_v17 = vsub.s32 (!%p459_p2), 7, %v5870_v1  ;;  %v8766_v18 = vsub.s32 (!%p459_p2), 6, %v5870_v1  ;;  %v8763_v22 = vsub.s32 (!%p459_p2), 5, %v5870_v1  ;;  %s8817_s21 = smov (!%p459_p2), 114   ;;  %s8753_s22 = smov (!%p459_p2), 113  }
   0xc   : > { %s5769_s23 = smov (!%p459_p2), 101   ;;  %s8808_s24 = smov (!%p459_p2), 115   ;;  %vm8783_vm12 = vcmask (!%p459_p2), 1045504   ;;  %vm8781_vm13 = vcmask (!%p459_p2), 1046528   ;;  %vm8780_vm14 = vcmask (!%p459_p2), 826368   ;;  %vm8779_vm15 = vmmov (!%p459_p2), 1  }
   0xd   : > { %s8761_s28 = smov (!%p459_p2), 89   ;;  %s8752_s29 = smov (!%p459_p2), 39  }
   0xe   : > { %s9086_s26 = smov (!%p532_p3, %s4341_s26), 9 }
   0xf   : > { %s5873_s27 = sshll.u32 %s9086_s26, 3 }
  0x10   : > { %s535_s30 = scalar_lea.vmem %s8830_s0, %s5873_s27  ;;  %s9051_s0 = smov 115  }
  0x11   : > { %v574_v6 = vld [vmem:[%s535_s30] sm:$0xff]  ;;  %s8759_s30 = smov 15  }
  0x12   : > { %v5890_v7 = vrot.slane %v574_v6, %v5879_v3  ;;  %v5894_v8 = vrot.slane %v574_v6, %v8762_v4  ;;  %v5897_v9 = vrot.slane %v574_v6, %v5876_v2  ;;  %v5900_v10 = vrot.slane %v574_v6, %v5887_v5 }
  0x13   : > { %v5915_v14 = vrot.slane %v574_v6, %v8764_v13  ;;  %v5929_v19 = vrot.slane %v574_v6, %v8765_v17  ;;  %v5935_v20 = vrot.slane %v574_v6, %v8766_v18  ;;  %v5947_v23 = vrot.slane %v574_v6, %v8763_v22 }
  0x14   : > { %v5210_v11 = vpack.i.bf16 %v5894_v8, %v5890_v7  ;;  %v5205_v12 = vpack.i.bf16 %v5897_v9, %v5900_v10  ;;  %v5245_v15 = vpack.i.bf16 %v5900_v10, %v5890_v7 }
  0x15   : > { %v5240_v16 = vpack.i.bf16 %v5915_v14, %v5894_v8  ;;  %v5270_v21 = vpack.i.bf16 %v5929_v19, %v5935_v20  ;;  %v5300_v24 = vpack.i.bf16 %v5929_v19, %v5897_v9 }
  0x16   : > { %5211 = vrot.lane.b32.xlu1 %v5210_v11, %s5760_s14  ;;  %5201 = vrot.lane.b32.xlu0 %v5210_v11, %s5761_s15 }
  0x1a   : > { %5216 = vrot.lane.b32.xlu1 %v5210_v11, %s5762_s16  ;;  %5206 = vrot.lane.b32.xlu0 %v5205_v12, %s5761_s15 }
  0x1e   : > { %5226 = vrot.lane.b32.xlu1 %v5210_v11, %s8821_s17  ;;  %5221 = vrot.lane.b32.xlu0 %v5205_v12, %s5760_s14 }
  0x22   : > { %5236 = vrot.lane.b32.xlu1 %v5205_v12, %s8821_s17  ;;  %5231 = vrot.lane.b32.xlu0 %v5205_v12, %s5762_s16 }
  0x26   : > { %5246 = vrot.lane.b32.xlu1 %v5245_v15, %s8819_s18  ;;  %5241 = vrot.lane.b32.xlu0 %v5240_v16, %s8819_s18 }
  0x2a   : > { %5256 = vrot.lane.b32.xlu1 %v5245_v15, %s5765_s19  ;;  %5251 = vrot.lane.b32.xlu0 %v5240_v16, %s5765_s19 }
  0x2e   : > { %5266 = vrot.lane.b32.xlu1 %v5245_v15, %s5766_s20  ;;  %5261 = vrot.lane.b32.xlu0 %v5240_v16, %s5766_s20 }
  0x32   : > { %5271 = vrot.lane.b32.xlu1 %v5270_v21, %s5761_s15  ;;  %648 = vrot.lane.b32.xlu0 %v5929_v19, %s8817_s21 }
  0x36   : > { %677 = vrot.lane.b32.xlu1 %v5929_v19, %s8753_s22  ;;  %661 = vrot.lane.b32.xlu0 %v5947_v23, %s5761_s15  ;;  %s8755_s22 = smov 13  }
  0x3a   : > { %5281 = vrot.lane.b32.xlu1 %v5240_v16, %s5769_s23  ;;  %5276 = vrot.lane.b32.xlu0 %v5270_v21, %s5760_s14 }
  0x3e   : > { %5286 = vrot.lane.b32.xlu1 %v5270_v21, %s5762_s16  ;;  %584 = vrot.lane.b32.xlu0 %v5929_v19, %s8808_s24 }
  0x42   : > { %706 = vrot.lane.b32.xlu1 %v5929_v19, %s8761_s28  ;;  %690 = vrot.lane.b32.xlu0 %v5947_v23, %s5760_s14 }
  0x46   : > { %5296 = vrot.lane.b32.xlu1 %v5245_v15, %s5769_s23  ;;  %5291 = vrot.lane.b32.xlu0 %v5270_v21, %s8821_s17 }
  0x4a   : > { %719 = vrot.lane.b32.xlu1 %v5947_v23, %s8821_s17  ;;  %625 = vrot.lane.b32.xlu0 %v5947_v23, %s5762_s16 }
  0x4e   : > { %760 = vrot.lane.b32.xlu1 %v5897_v9, %s8752_s29  ;;  %5301 = vrot.lane.b32.xlu0 %v5300_v24, %s8819_s18  ;;  %s8757_s29 = smov 14  }
  0x52   : > { %5306 = vrot.lane.b32.xlu1 %v5300_v24, %s5765_s19  ;;  %747 = vrot.lane.b32.xlu0 %v5935_v20, %s8819_s18 }
  0x56   : > { %777 = vrot.lane.b32.xlu1 %v5935_v20, %s5765_s19  ;;  %790 = vrot.lane.b32.xlu0 %v5897_v9, %s8759_s30 }
  0x5a   : > { %820 = vrot.lane.b32.xlu1 %v5897_v9, %s8757_s29  ;;  %5311 = vrot.lane.b32.xlu0 %v5300_v24, %s5766_s20  ;;  %s8875_s29 = smov 89  }
  0x5e   : > { %5316 = vrot.lane.b32.xlu1 %v5300_v24, %s5769_s23  ;;  %807 = vrot.lane.b32.xlu0 %v5935_v20, %s5766_s20 }
  0x62   : > { %837 = vrot.lane.b32.xlu1 %v5935_v20, %s5769_s23  ;;  %850 = vrot.lane.b32.xlu0 %v5897_v9, %s8755_s22  ;;  %s4399_s22 = sshll.u32 %s9086_s26, 4 }
  0x63   : > { %s545_s28 = scalar_lea.vmem %s8740_s2, %s4399_s22  ;;  %s540_s30 = scalar_lea.vmem %s8739_s1, %s4399_s22 }
  0x64   : > { %v577_v27 = vld [vmem:[%s545_s28] sm:$0xff]  ;;  %v578_v28 = vld [vmem:[%s545_s28 + $0x8] sm:$0xf]  ;;  %s8888_s22 = smov 14   ;;  %s5780_s28 = smov 118  }
  0x66   : > { %688 = vrot.lane.b32.xlu1 %v5915_v14, %s5760_s14  ;;  %659 = vrot.lane.b32.xlu0 %v5915_v14, %s5761_s15 }
  0x6a   : > { %717 = vrot.lane.b32.xlu1 %v5915_v14, %s8821_s17  ;;  %623 = vrot.lane.b32.xlu0 %v5915_v14, %s5762_s16 }
  0x6e   : > { %775 = vrot.lane.b32.xlu1 %v5947_v23, %s5765_s19  ;;  %745 = vrot.lane.b32.xlu0 %v5947_v23, %s8819_s18 }
  0x72   : > { %835 = vrot.lane.b32.xlu1 %v5947_v23, %s5769_s23  ;;  %805 = vrot.lane.b32.xlu0 %v5947_v23, %s5766_s20 }
  0x76   : > { %1030 = vperm.xlu0 %5320, %v577_v27   ;;  %1035 = vperm.xlu1 %5321, %v578_v28  }
  0x88   : > { %v6014_v29 = vpop.permute.xlu1 %5211  ;;  %v6016_v30 = vpop.permute.xlu0 %5201 }
  0x89   : > { %v8772_v39 = vunpack.i.h.bf16 %v6016_v30  ;;  %v5203_v40 = vunpack.i.l.bf16 %v6016_v30  ;;  %v8775_v43 = vunpack.i.h.bf16 %v6014_v29  ;;  %v5213_v44 = vunpack.i.l.bf16 %v6014_v29 }
  0x8b   : > { %v670_v45 = vsel %vm8782_vm0, %v5203_v40, %v8772_v39  ;;  %v699_v52 = vsel %vm8773_vm1, %v5213_v44, %v8775_v43 }
  0x8c   : > { %v6018_v31 = vpop.permute.xlu1 %5216  ;;  %v6020_v32 = vpop.permute.xlu0 %5206  ;;  %v859_v53 = vrot.slane %v670_v45, 7  ;;  %v876_v21 = vrot.slane %v699_v52, 6 }
  0x8d   : > { %v8769_v46 = vunpack.i.h.bf16 %v6018_v31  ;;  %v5218_v47 = vunpack.i.l.bf16 %v6018_v31  ;;  %v5209_v58 = vunpack.i.h.bf16 %v6020_v32  ;;  %v5208_v59 = vunpack.i.l.bf16 %v6020_v32 }
  0x8f   : > { %v634_v54 = vsel %vm631_vm2, %v5218_v47, %v8769_v46  ;;  %v668_v28 = vsel %vm8782_vm0, %v5209_v58, %v5208_v59  ;;  %v669_v45 = vsel %vm8782_vm0, %v5208_v59, %v5203_v40 }
  0x90   : > { %v6022_v33 = vpop.permute.xlu1 %5226  ;;  %v6024_v34 = vpop.permute.xlu0 %5221  ;;  %v969_v11 = vsel %vm8827_vm4, %v634_v54, %v859_v53 }
  0x91   : > { %v8771_v48 = vunpack.i.h.bf16 %v6022_v33  ;;  %v5228_v49 = vunpack.i.l.bf16 %v6022_v33  ;;  %v8778_v15 = vunpack.i.h.bf16 %v6024_v34  ;;  %v5223_v16 = vunpack.i.l.bf16 %v6024_v34 }
  0x92   : > { %v978_v53 = vsel %vm974_vm5, %v969_v11, %v876_v21  ;;  %v857_v21 = vrot.slane %v668_v28, 7 }
  0x93   : > { %v728_v55 = vsel %vm725_vm3, %v5228_v49, %v8771_v48  ;;  %v697_v59 = vsel %vm8773_vm1, %v8778_v15, %v5223_v16 }
  0x94   : > { %v6026_v35 = vpop.permute.xlu1 %5236  ;;  %v6028_v36 = vpop.permute.xlu0 %5231  ;;  %v893_v12 = vrot.slane %v728_v55, 5  ;;  %v874_v48 = vrot.slane %v697_v59, 6 }
  0x95   : > { %v5234_v24 = vunpack.i.h.bf16 %v6028_v36  ;;  %v5233_v26 = vunpack.i.l.bf16 %v6028_v36  ;;  %v5239_v54 = vunpack.i.h.bf16 %v6026_v35  ;;  %v5238_v55 = vunpack.i.l.bf16 %v6026_v35 }
  0x96   : > { %v987_v11 = vsel %vm983_vm7, %v978_v53, %v893_v12 }
  0x97   : > { %v632_v17 = vsel %vm631_vm2, %v5234_v24, %v5233_v26  ;;  %v633_v46 = vsel %vm631_vm2, %v5233_v26, %v5218_v47  ;;  %v727_v39 = vsel %vm725_vm3, %v5238_v55, %v5228_v49 }
  0x98   : > { %v6030_v37 = vpop.permute.xlu1 %5246  ;;  %v6032_v38 = vpop.permute.xlu0 %5241 }
  0x99   : > { %v8767_v56 = vunpack.i.h.bf16 %v6032_v38  ;;  %v5243_v57 = vunpack.i.l.bf16 %v6032_v38  ;;  %v8777_v53 = vunpack.i.h.bf16 %v6030_v37  ;;  %v5248_v49 = vunpack.i.l.bf16 %v6030_v37 }
  0x9b   : > { %v755_v27 = vsel %vm8787_vm6, %v5243_v57, %v8767_v56  ;;  %v858_v56 = vrot.slane %v669_v45, 7  ;;  %v967_v45 = vsel %vm8827_vm4, %v632_v17, %v857_v21  ;;  %v753_v43 = vsel %vm8787_vm6, %v8777_v53, %v5248_v49 }
  0x9c   : > { %v6036_v41 = vpop.permute.xlu1 %5256  ;;  %v6038_v42 = vpop.permute.xlu0 %5251  ;;  %v918_v13 = vrot.slane %v755_v27, 3  ;;  %v726_v27 = vsel %vm725_vm3, %v5239_v54, %v5238_v55 }
  0x9d   : > { %v8768_v60 = vunpack.i.h.bf16 %v6038_v42  ;;  %v5253_v61 = vunpack.i.l.bf16 %v6038_v42  ;;  %v968_v26 = vsel %vm8827_vm4, %v633_v46, %v858_v56 }
  0x9f   : > { %v785_v52 = vsel %vm781_vm8, %v5253_v61, %v8768_v60  ;;  %v698_v60 = vsel %vm8773_vm1, %v5223_v16, %v5213_v44  ;;  %vm6140_vm1 = vmpackc.low %vm8827_vm4, %vm8779_vm15  ;;  %vm8828_vm15 = vcmask 72704  }
  0xa0   : > { %v6049_v50 = vpop.permute.xlu1 %5266  ;;  %v6051_v51 = vpop.permute.xlu0 %5261  ;;  %v935_v18 = vrot.slane %v785_v52, 2  ;;  %v996_v52 = vsel %vm8789_vm9, %v987_v11, %v5894_v8  ;;  %v5258_v8 = vunpack.i.l.bf16 %v6036_v41  ;;  %v875_v46 = vrot.slane %v698_v60, 6 }
  0xa1   : > { %v8770_v62 = vunpack.i.h.bf16 %v6051_v51  ;;  %v5263_v63 = vunpack.i.l.bf16 %v6051_v51  ;;  %v1005_v16 = vsel %vm1001_vm10, %v996_v52, %v918_v13  ;;  %v5268_v56 = vunpack.i.l.bf16 %v6049_v50  ;;  %v6399_v13 = vld [vmem:[%s8749_s11] sm:$0xff] }
  0xa2   : > { %v1014_v55 = vsel %vm8783_vm12, %v1005_v16, %v935_v18  ;;  %v5269_v18 = vunpack.i.h.bf16 %v6049_v50  ;;  %v891_v16 = vrot.slane %v726_v27, 5  ;;  %v754_v60 = vsel %vm8787_vm6, %v5248_v49, %v5243_v57 }
  0xa3   : > { %v815_v40 = vsel %vm8788_vm11, %v5263_v63, %v8770_v62  ;;  %v916_v49 = vrot.slane %v753_v43, 3 }
  0xa4   : > { %v6070_v0 = vpop.permute.xlu1 %5271  ;;  %v6072_v6 = vpop.permute.xlu0 %648  ;;  %v952_v62 = vrot.slane %v815_v40, 1  ;;  %v8776_v40 = vunpack.i.h.bf16 %v6036_v41  ;;  %v813_v57 = vsel %vm8788_vm11, %v5269_v18, %v5268_v56 }
  0xa6   : > { %v1023_v59 = vsel %vm8781_vm13, %v1014_v55, %v952_v62  ;;  %v976_v62 = vsel %vm974_vm5, %v967_v45, %v874_v48  ;;  %v977_v55 = vsel %vm974_vm5, %v968_v26, %v875_v46  ;;  %v783_v27 = vsel %vm781_vm8, %v8776_v40, %v5258_v8 }
  0xa7   : > { %v814_v48 = vsel %vm8788_vm11, %v5268_v56, %v5263_v63 }
  0xa8   : > { %v6096_v4 = vpop.permute.xlu1 %677  ;;  %v6098_v22 = vpop.permute.xlu0 %661 }
  0xac   : > { %v6118_v12 = vpop.permute.xlu1 %5281  ;;  %v6120_v28 = vpop.permute.xlu0 %5276 }
  0xad   : > { %v8774_v44 = vunpack.i.h.bf16 %v6118_v12  ;;  %v5283_v47 = vunpack.i.l.bf16 %v6118_v12  ;;  %v5278_v32 = vunpack.i.l.bf16 %v6120_v28 }
  0xaf   : > { %v845_v17 = vsel %vm8780_vm14, %v5283_v47, %v8774_v44  ;;  %v892_v44 = vrot.slane %v727_v39, 5  ;;  %v784_v39 = vsel %vm781_vm8, %v5258_v8, %v5253_v61  ;;  %v951_v61 = vrot.slane %v814_v48, 1 }
  0xb0   : > { %v6146_v11 = vpop.permute.xlu1 %5286  ;;  %v6148_v21 = vpop.permute.xlu0 %584  ;;  %v4562_v52 = vpack.c.bf16 %v845_v17, %v1023_v59  ;;  %v917_v17 = vrot.slane %v754_v60, 3  ;;  %v985_v59 = vsel %vm983_vm7, %v976_v62, %v891_v16  ;;  %v934_v40 = vrot.slane %v784_v39, 2 }
  0xb1   : > { %v986_v46 = vsel %vm983_vm7, %v977_v55, %v892_v44  ;;  %v950_v8 = vrot.slane %v813_v57, 1  ;;  %v994_v15 = vsel %vm8789_vm9, %v985_v59, %v5900_v10  ;;  %v676_v59 = vsel %vm8782_vm0, %v6072_v6, %v5209_v58  ;;  %v6224_v58 = vld [vmem:[%s540_s30 + $0x8] sm:$0xf] }
  0xb2   : > { %4564 = vmatprep.subr.msk.bf16.mxu1 %vm6140_vm1, %v4562_v52  ;;  %v933_v52 = vrot.slane %v783_v27, 2  ;;  %v995_v56 = vsel %vm8789_vm9, %v986_v46, %v5890_v7  ;;  %v1003_v44 = vsel %vm1001_vm10, %v994_v15, %v916_v49  ;;  %v5274_v49 = vunpack.i.h.bf16 %v6070_v0 }
  0xb3   : > { %v1004_v62 = vsel %vm1001_vm10, %v995_v56, %v917_v17  ;;  %v5273_v17 = vunpack.i.l.bf16 %v6070_v0  ;;  %v5288_v56 = vunpack.i.l.bf16 %v6146_v11  ;;  %v5279_v0 = vunpack.i.h.bf16 %v6120_v28 }
  0xb4   : > { %v707_v45 = vpop.permute.xlu1 %706  ;;  %v6169_v26 = vpop.permute.xlu0 %690  ;;  %v1012_v55 = vsel %vm8783_vm12, %v1003_v44, %v933_v52  ;;  %v1013_v60 = vsel %vm8783_vm12, %v1004_v62, %v934_v40 }
  0xb5   : > { %v1021_v10 = vsel %vm8781_vm13, %v1012_v55, %v950_v8  ;;  %v1022_v39 = vsel %vm8781_vm13, %v1013_v60, %v951_v61  ;;  %v673_v61 = vsel %vm8782_vm0, %v6098_v22, %v5273_v17  ;;  %v5289_v8 = vunpack.i.h.bf16 %v6146_v11 }
  0xb6   : > { %v674_v6 = vsel %vm8782_vm0, %v5273_v17, %v5274_v49  ;;  %v862_v55 = vrot.slane %v673_v61, 7  ;;  %v647_v60 = vsel %vm631_vm2, %v6148_v21, %v5234_v24  ;;  %v734_v28 = vsel %vm725_vm3, %v707_v45, %v5239_v54 }
  0xb7   : > { %vm8833_vm13 = vcmask 203776   ;;  %v638_v36 = vsel %vm631_vm2, %v5288_v56, %v5289_v8  ;;  %v863_v35 = vrot.slane %v674_v6, 7 }
  0xb8   : > { %v6176_v53 = vpop.permute.xlu1 %5296  ;;  %v5292_v63 = vpop.permute.xlu0 %5291  ;;  %vm8835_vm0 = vmmov %vm8833_vm13 }
  0xb9   : > { %v5299_v43 = vunpack.i.h.bf16 %v6176_v53  ;;  %v5298_v16 = vunpack.i.l.bf16 %v6176_v53  ;;  %v5294_v44 = vunpack.i.h.bf16 %v5292_v63  ;;  %v5293_v62 = vunpack.i.l.bf16 %v5292_v63  ;;  %vm8836_vm12 = vmmov %vm8835_vm0 }
  0xba   : > { %v8834_v63 = vunpack.i.h.bf16 %v6024_v34  ;;  %v703_v54 = vsel %vm8836_vm12, %v5278_v32, %v5279_v0  ;;  %vm8784_vm12 = vcmask 113664  }
  0xbb   : > { %v843_v27 = vsel %vm8780_vm14, %v5299_v43, %v5298_v16  ;;  %v844_v7 = vsel %vm8780_vm14, %v5298_v16, %v5283_v47  ;;  %v6207_v47 = vld [vmem:[%s540_s30] sm:$0xff]  ;;  %v856_v16 = vrot.slane %v676_v59, 7  ;;  %vm8786_vm14 = vcmask 318464   ;;  %s8876_s30 = smov 113  }
  0xbc   : > { %v6199_v15 = vpop.permute.xlu1 %719  ;;  %v6201_v48 = vpop.permute.xlu0 %625  ;;  %v4556_v40 = vpack.c.bf16 %v843_v27, %v1021_v10  ;;  %v4565_v57 = vpack.c.bf16 %v844_v7, %v1022_v39  ;;  %v702_v27 = vsel %vm8833_vm13, %v6169_v26, %v5278_v32  ;;  %v705_v39 = vsel %vm8835_vm0, %v6096_v4, %v8834_v63 }
  0xbd   : > { %v637_v11 = vsel %vm631_vm2, %v6201_v48, %v5288_v56  ;;  %v731_v24 = vsel %vm725_vm3, %v6199_v15, %v5293_v62  ;;  %v966_v34 = vsel %vm8827_vm4, %v647_v60, %v856_v16  ;;  %v890_v4 = vrot.slane %v734_v28, 5 }
  0xbe   : > { %4558 = vmatprep.subr.msk.bf16.mxu0 %vm6140_vm1, %v4556_v40  ;;  %4567 = vmatpush1.bf16.msk.msra.mxu1 %vm6140_vm1, %v4565_v57  ;;  %v972_v45 = vsel %vm8827_vm4, %v637_v11, %v862_v55  ;;  %v879_v57 = vrot.slane %v702_v27, 6  ;;  %v732_v49 = vsel %vm725_vm3, %v5293_v62, %v5294_v44  ;;  %v873_v17 = vrot.slane %v705_v39, 6 }
  0xbf   : > { %v973_v59 = vsel %vm8827_vm4, %v638_v36, %v863_v35  ;;  %v896_v61 = vrot.slane %v731_v24, 5  ;;  %v880_v0 = vrot.slane %v703_v54, 6  ;;  %v8837_v11 = vunpack.i.h.bf16 %v6030_v37 }
  0xc0   : > { %v761_v46 = vpop.permute.xlu1 %760  ;;  %v5302_v52 = vpop.permute.xlu0 %5301  ;;  %v981_v32 = vsel %vm974_vm5, %v972_v45, %v879_v57  ;;  %vm8785_vm0 = vcmask 121856   ;;  %v975_v16 = vsel %vm974_vm5, %v966_v34, %v873_v17  ;;  %v897_v60 = vrot.slane %v732_v49, 5 }
  0xc1   : > { %4362 = vmatmul.mubr.msk.f32.vlgmr.msra.gmra.mrb[0].mxu1 %vm8828_vm15, %v6207_v47  ;;  %v5303_v21 = vunpack.i.l.bf16 %v5302_v52  ;;  %v5304_v8 = vunpack.i.h.bf16 %v5302_v52  ;;  %v8838_v62 = vunpack.i.h.bf16 %v6036_v41  ;;  %v982_v52 = vsel %vm974_vm5, %v973_v59, %v880_v0 }
  0xc2   : > { %1209 = vmatprep.mubr.f32.mxu1 %v8794_v25  ;;  %v984_v27 = vsel %vm983_vm7, %v975_v16, %v890_v4  ;;  %v990_v37 = vsel %vm983_vm7, %v981_v32, %v896_v61  ;;  %vm853_vm13 = vcmask 105472   ;;  %v991_v4 = vsel %vm983_vm7, %v982_v52, %v897_v60 }
  0xc3   : > { %v752_v55 = vsel %vm8787_vm6, %v5303_v21, %v8837_v11  ;;  %v764_v39 = vsel %vm8786_vm14, %v5304_v8, %v761_v46  ;;  %v999_v59 = vsel %vm8789_vm9, %v990_v37, %v5935_v20  ;;  %v1000_v20 = vsel %vm8789_vm9, %v991_v4, %v5929_v19 }
  0xc4   : > { %v5307_v10 = vpop.permute.xlu1 %5306  ;;  %v6238_v7 = vpop.permute.xlu0 %747  ;;  %v915_v36 = vrot.slane %v752_v55, 3  ;;  %v922_v57 = vrot.slane %v764_v39, 3 }
  0xc5   : > { %4363 = vmatmul.mubr.msk.f32.gmra.mrb[2].mxu1 %vm8828_vm15, %v6224_v58  ;;  %v5308_v40 = vunpack.i.l.bf16 %v5307_v10  ;;  %v5309_v44 = vunpack.i.h.bf16 %v5307_v10  ;;  %v758_v63 = vsel %vm8787_vm6, %v6238_v7, %v5304_v8  ;;  %vm8842_vm6 = vcmask 826368  }
  0xc6   : > { %1357 = vmatprep.mubr.f32.mxu1 %v8794_v25  ;;  %v921_v34 = vrot.slane %v758_v63, 3 }
  0xc7   : > { %v782_v28 = vsel %vm781_vm8, %v5308_v40, %v8838_v62  ;;  %v993_v40 = vsel %vm8789_vm9, %v984_v27, %v5897_v9  ;;  %vm8845_vm9 = vmmov %vm8842_vm6 }
  0xc8   : > { %v6255_v56 = vpop.permute.xlu1 %777  ;;  %v791_v6 = vpop.permute.xlu0 %790  ;;  %v932_v21 = vrot.slane %v782_v28, 2  ;;  %v1002_v9 = vsel %vm1001_vm10, %v993_v40, %v915_v36  ;;  %v1008_v50 = vsel %vm1001_vm10, %v999_v59, %v921_v34  ;;  %v1009_v28 = vsel %vm1001_vm10, %v1000_v20, %v922_v57 }
  0xc9   : > { %v788_v10 = vsel %vm781_vm8, %v6255_v56, %v5309_v44  ;;  %v794_v35 = vsel %vm8785_vm0, %v5309_v44, %v791_v6  ;;  %vm8840_vm0 = vcmask 1046528   ;;  %v8850_v40 = vunpack.i.h.bf16 %v6016_v30 }
  0xca   : > { %v938_v46 = vrot.slane %v788_v10, 2  ;;  %v939_v61 = vrot.slane %v794_v35, 2  ;;  %v8847_v35 = vunpack.i.h.bf16 %v6014_v29  ;;  %v8853_v30 = vunpack.i.h.bf16 %v6022_v33 }
  0xcc   : > { %v821_v24 = vpop.permute.xlu1 %820  ;;  %v5312_v41 = vpop.permute.xlu0 %5311 }
  0xcd   : > { %v5314_v54 = vunpack.i.h.bf16 %v5312_v41  ;;  %v5313_v45 = vunpack.i.l.bf16 %v5312_v41 }
  0xcf   : > { %v824_v49 = vsel %vm8784_vm12, %v5314_v54, %v821_v24  ;;  %v812_v17 = vsel %vm8788_vm11, %v5313_v45, %v5269_v18  ;;  %vm8839_vm12 = vcmask 1045504  }
  0xd0   : > { %v949_v8 = vrot.slane %v812_v17, 1  ;;  %v5317_v6 = vpop.permute.xlu1 %5316  ;;  %v6283_v0 = vpop.permute.xlu0 %807  ;;  %v956_v55 = vrot.slane %v824_v49, 1  ;;  %v1011_v16 = vsel %vm8839_vm12, %v1002_v9, %v932_v21  ;;  %vm8841_vm14 = vmmov %vm8839_vm12 }
  0xd1   : > { %v5318_v32 = vunpack.i.l.bf16 %v5317_v6  ;;  %v818_v11 = vsel %vm8788_vm11, %v6283_v0, %v5314_v54  ;;  %v5319_v44 = vunpack.i.h.bf16 %v5317_v6  ;;  %v1017_v62 = vsel %vm8841_vm14, %v1008_v50, %v938_v46  ;;  %vm8843_vm12 = vmmov %vm8840_vm0 }
  0xd2   : > { %v955_v18 = vrot.slane %v818_v11, 1  ;;  %v1020_v60 = vsel %vm8840_vm0, %v1011_v16, %v949_v8  ;;  %vm8844_vm11 = vmmov %vm8841_vm14 }
  0xd3   : > { %v842_v52 = vsel %vm8842_vm6, %v5318_v32, %v5299_v43  ;;  %v1018_v39 = vsel %vm8844_vm11, %v1009_v28, %v939_v61  ;;  %vm8846_vm14 = vmmov %vm8840_vm0  ;;  %vm8848_vm6 = vcmask 203776   ;;  %vm8851_vm11 = vcmask 211968  }
  0xd4   : > { %v6298_v27 = vpop.permute.xlu1 %837  ;;  %v1026_v63 = vsel %vm8843_vm12, %v1017_v62, %v955_v18  ;;  %v851_v37 = vpop.permute.xlu0 %850  ;;  %v4559_v36 = vpack.c.bf16 %v842_v52, %v1020_v60  ;;  %v1027_v24 = vsel %vm8846_vm14, %v1018_v39, %v956_v55  ;;  %vm8852_vm0 = vmmov %vm8851_vm11  ;;  %v8854_v61 = vunpack.i.h.bf16 %v6018_v31 }
  0xd5   : > { %v848_v19 = vsel %vm8845_vm9, %v6298_v27, %v5319_v44  ;;  %v854_v10 = vsel %vm853_vm13, %v5319_v44, %v851_v37  ;;  %vm8849_vm9 = vmmov %vm8848_vm6  ;;  %v8855_v18 = vunpack.i.h.bf16 %v6038_v42  ;;  %v8856_v44 = vunpack.i.h.bf16 %v6032_v38 }
  0xd6   : > { %v4577_v41 = vpack.c.bf16 %v848_v19, %v1026_v63  ;;  %v4574_v21 = vpack.c.bf16 %v854_v10, %v1027_v24  ;;  %4561 = vmatpush1.bf16.msk.msra.mxu0 %vm6140_vm1, %v4559_v36 }
  0xd8   : > { %v689_v53 = vpop.permute.xlu1 %688  ;;  %v660_v43 = vpop.permute.xlu0 %659  ;;  %4576 = vmatprep.subr.msk.bf16.mxu1 %vm6140_vm1, %v4574_v21 }
  0xd9   : > { %v700_v54 = vsel %vm8848_vm6, %v8847_v35, %v689_v53  ;;  %v701_v45 = vsel %vm8849_vm9, %v689_v53, %v6169_v26  ;;  %v671_v34 = vsel %vm8851_vm11, %v8850_v40, %v660_v43  ;;  %v672_v4 = vsel %vm8852_vm0, %v660_v43, %v6098_v22  ;;  %4358 = vmatmul.mubr.msk.f32.vlgmr.msra.gmra.mrb[0].mxu0 %vm8828_vm15, %v6207_v47 }
  0xda   : > { %4579 = vmatpush1.bf16.msk.msra.mxu1 %vm6140_vm1, %v4577_v41  ;;  %1132 = vmatprep.mubr.f32.mxu0 %v8794_v25  ;;  %v877_v29 = vrot.slane %v700_v54, 6  ;;  %v878_v57 = vrot.slane %v701_v45, 6  ;;  %v860_v46 = vrot.slane %v671_v34, 7  ;;  %v861_v49 = vrot.slane %v672_v4, 7 }
  0xdb   : > { %vm8862_vm6 = vcmask 834560   ;;  %vm8864_vm11 = vcmask 1045504  }
  0xdc   : > { %v718_v26 = vpop.permute.xlu1 %717  ;;  %v624_v17 = vpop.permute.xlu0 %623  ;;  %vm8863_vm9 = vmmov %vm8862_vm6 }
  0xdd   : > { %v729_v59 = vsel %vm725_vm3, %v8853_v30, %v718_v26  ;;  %v730_v22 = vsel %vm725_vm3, %v718_v26, %v6199_v15  ;;  %v635_v8 = vsel %vm631_vm2, %v8854_v61, %v624_v17  ;;  %v636_v6 = vsel %vm631_vm2, %v624_v17, %v6201_v48  ;;  %4370 = vmatmul.mubr.msk.f32.vlgmr.msra.gmra.mrb[4].mxu1 %vm8828_vm15, %v6207_v47  ;;  %vm8865_vm0 = vmmov %vm8864_vm11 }
  0xde   : > { %v894_v9 = vrot.slane %v729_v59, 5  ;;  %v895_v32 = vrot.slane %v730_v22, 5  ;;  %v970_v11 = vsel %vm8827_vm4, %v635_v8, %v860_v46  ;;  %v971_v33 = vsel %vm8827_vm4, %v636_v6, %v861_v49  ;;  %4359 = vmatmul.mubr.msk.f32.gmra.mrb[2].mxu0 %vm8828_vm15, %v6224_v58  ;;  %1363 = vmatprep.mubr.f32.mxu1 %v8794_v25 }
  0xdf   : > { %v979_v31 = vsel %vm974_vm5, %v970_v11, %v877_v29  ;;  %v980_v15 = vsel %vm974_vm5, %v971_v33, %v878_v57  ;;  %1280 = vmatprep.mubr.f32.mxu0 %v8794_v25  ;;  %vm8857_vm5 = vcmask 1039360   ;;  %v1394_v26 = vrot.slane %v6399_v13, %v5887_v5 }
  0xe0   : > { %v776_v48 = vpop.permute.xlu1 %775  ;;  %v746_v55 = vpop.permute.xlu0 %745  ;;  %v988_v16 = vsel %vm983_vm7, %v979_v31, %v894_v9  ;;  %v989_v50 = vsel %vm983_vm7, %v980_v15, %v895_v32  ;;  %vm8858_vm12 = vmmov %vm8857_vm5  ;;  %vm8859_vm7 = vcmask 1043456   ;;  %v8871_v6 = vsub.s32 6, %v5870_v1 }
  0xe1   : > { %v786_v20 = vsel %vm781_vm8, %v8855_v18, %v776_v48  ;;  %v787_v60 = vsel %vm781_vm8, %v776_v48, %v6255_v56  ;;  %4371 = vmatmul.mubr.msk.f32.gmra.mrb[6].mxu1 %vm8828_vm15, %v6224_v58  ;;  %v756_v62 = vsel %vm8857_vm5, %v8856_v44, %v746_v55  ;;  %v757_v28 = vsel %vm8858_vm12, %v746_v55, %v6238_v7  ;;  %vm8860_vm14 = vmmov %vm8859_vm7 }
  0xe2   : > { %2319 = vmatprep.mubr.f32.mxu1 %v8794_v25  ;;  %v919_v52 = vrot.slane %v756_v62, 3  ;;  %v920_v63 = vrot.slane %v757_v28, 3  ;;  %v936_v42 = vrot.slane %v786_v20, 2  ;;  %v937_v37 = vrot.slane %v787_v60, 2 }
  0xe3   : > { %v997_v39 = vsel %vm8859_vm7, %v988_v16, %v5915_v14  ;;  %v998_v56 = vsel %vm8860_vm14, %v989_v50, %v5947_v23  ;;  %v8861_v7 = vunpack.i.h.bf16 %v6051_v51  ;;  %v8866_v23 = vunpack.i.h.bf16 %v6118_v12 }
  0xe4   : > { %v806_v36 = vpop.permute.xlu0 %805  ;;  %v1006_v38 = vsel %vm1001_vm10, %v997_v39, %v919_v52  ;;  %v1007_v19 = vsel %vm1001_vm10, %v998_v56, %v920_v63  ;;  %v836_v10 = vpop.permute.xlu1 %835  ;;  %vm8867_vm5 = vcmask 826368   ;;  %vm8869_vm12 = vcmask 1046528  }
  0xe5   : > { %v816_v24 = vsel %vm8862_vm6, %v8861_v7, %v806_v36  ;;  %v817_v41 = vsel %vm8863_vm9, %v806_v36, %v6283_v0  ;;  %v1015_v14 = vsel %vm8864_vm11, %v1006_v38, %v936_v42  ;;  %v1016_v43 = vsel %vm8865_vm0, %v1007_v19, %v937_v37  ;;  %vm8868_vm10 = vmmov %vm8867_vm5 }
  0xe6   : > { %v953_v21 = vrot.slane %v816_v24, 1  ;;  %v954_v53 = vrot.slane %v817_v41, 1  ;;  %v846_v35 = vsel %vm8867_vm5, %v8866_v23, %v836_v10  ;;  %v847_v54 = vsel %vm8868_vm10, %v836_v10, %v6298_v27  ;;  %vm8870_vm7 = vmmov %vm8869_vm12 }
  0xe7   : > { %v1414_v9 = vrot.slane %v6399_v13, %v8871_v6  ;;  %v1398_v19 = vrot.slane %v6399_v13, %v5879_v3  ;;  %v8872_v24 = vsub.s32 7, %v5870_v1  ;;  %vm8882_vm9 = vcmask 203776  }
  0xe8   : > { %v1024_v51 = vsel %vm8869_vm12, %v1015_v14, %v953_v21  ;;  %v1025_v45 = vsel %vm8870_vm7, %v1016_v43, %v954_v53  ;;  %vm8883_vm11 = vcmask 1043456   ;;  %vm8889_vm12 = vcmask 1039360   ;;  %vm8890_vm7 = vmmov %vm8882_vm9 }
  0xe9   : > { %v4571_v40 = vpack.c.bf16 %v846_v35, %v1024_v51  ;;  %v4568_v34 = vpack.c.bf16 %v847_v54, %v1025_v45  ;;  %v1418_v41 = vrot.slane %v6399_v13, %v8872_v24  ;;  %v8873_v54 = vsub.s32 4, %v5870_v1  ;;  %vm8886_vm5 = vmmov %vm8883_vm11 }
  0xea   : > { %vm8887_vm10 = vmmov %vm8886_vm5 }
  0xeb   : > { %4570 = vmatprep.subr.msk.bf16.mxu0 %vm6140_vm1, %v4568_v34  ;;  %v1406_v51 = vrot.slane %v6399_v13, %v8873_v54 }
  0xec   : > { %4573 = vmatpush1.bf16.msk.msra.mxu0 %vm6140_vm1, %v4571_v40  ;;  %vm8878_vm1 = vcmask 211968  }
  0xed   : > { %vm8879_vm14 = vmmov %vm8878_vm1 }
  0xee   : > { %vm8881_vm6 = vmmov %vm8878_vm1 }
  0xef   : > { %4366 = vmatmul.mubr.msk.f32.vlgmr.msra.gmra.mrb[4].mxu0 %vm8828_vm15, %v6207_v47  ;;  %vm8885_vm0 = vmmov %vm8878_vm1 }
  0xf0   : > { %1286 = vmatprep.mubr.f32.mxu0 %v8794_v25 }
  0xf3   : > { %4367 = vmatmul.mubr.msk.f32.gmra.mrb[6].mxu0 %vm8828_vm15, %v6224_v58  ;;  %v1390_v58 = vrot.slane %v6399_v13, %v5876_v2 }
  0xf4   : > { %2248 = vmatprep.mubr.f32.mxu0 %v8794_v25 }
  0xf5   : > { %v6394_v29 = vpop.permute.xlu0 %1030  ;;  %v6407_v30 = vpop.permute.xlu1 %1035 }
 0x194   : > { %v1205_v12 = vpop.f32.mrb[0].mxu1 }
 0x195   : > { %v6390_v0 = vpop.f32.mrb[1].mxu1  ;;  %v1206_v42 = vadd.f32 %v1205_v12, %v6394_v29  ;;  %v8874_v12 = vsub.s32 5, %v5870_v1 }
 0x197   : > { %v1372_v38 = vmax.f32 %v1206_v42, 0.0 }
 0x198   : > { %v1211_v27 = vpop.f32.mrb[2].mxu1 }
 0x199   : > { %v6392_v4 = vpop.f32.mrb[3].mxu1  ;;  %v6445_v21 = vmul.f32 %v1398_v19, %v1372_v38  ;;  %v1212_v23 = vadd.f32 %v1211_v27, %v6407_v30 }
 0x1ac   : > { %v1128_v47 = vpop.f32.mrb[0].mxu0 }
 0x1ad   : > { %v1129_v57 = vadd.f32 %v1128_v47, %v6394_v29  ;;  %v1130_v46 = vpop.f32.mrb[1].mxu0  ;;  %v1410_v47 = vrot.slane %v6399_v13, %v8874_v12 }
 0x1ae   : > { %v1131_v49 = vadd.f32 %v1130_v46, %v6394_v29 }
 0x1af   : > { %v1370_v17 = vmax.f32 %v1129_v57, 0.0 }
 0x1b0   : > { %v1371_v59 = vmax.f32 %v1131_v49, 0.0  ;;  %v1359_v22 = vpop.f32.mrb[4].mxu1  ;;  %v1380_v49 = vmax.f32 %v1212_v23, 0.0 }
 0x1b1   : > { %v6409_v61 = vmul.f32 %v1390_v58, %v1370_v17  ;;  %v1360_v8 = vadd.f32 %v1359_v22, %v6394_v29  ;;  %v1134_v32 = vpop.f32.mrb[2].mxu0  ;;  %v1361_v11 = vpop.f32.mrb[5].mxu1 }
 0x1b2   : > { %v6415_v33 = vmul.f32 %v1394_v26, %v1371_v59  ;;  %v1135_v31 = vadd.f32 %v1134_v32, %v6407_v30  ;;  %v1136_v15 = vpop.f32.mrb[3].mxu0  ;;  %v1362_v36 = vadd.f32 %v1361_v11, %v6394_v29  ;;  %v6481_v11 = vmul.f32 %v1398_v19, %v1380_v49 }
 0x1b3   : > { %v1376_v48 = vmax.f32 %v1360_v8, 0.0  ;;  %v1137_v55 = vadd.f32 %v1136_v15, %v6407_v30 }
 0x1b4   : > { %v1378_v16 = vmax.f32 %v1135_v31, 0.0  ;;  %v1365_v50 = vpop.f32.mrb[6].mxu1  ;;  %v5322_v18 = vpack.i.bf16 %v6415_v33, %v6409_v61  ;;  %v1377_v7 = vmax.f32 %v1362_v36, 0.0  ;;  %v5342_v40 = vpack.i.bf16 %v6445_v21, %v6415_v33 }
 0x1b5   : > { %v6421_v20 = vmul.f32 %v1414_v9, %v1376_v48  ;;  %v1379_v60 = vmax.f32 %v1137_v55, 0.0  ;;  %v1366_v44 = vadd.f32 %v1365_v50, %v6407_v30  ;;  %v1367_v62 = vpop.f32.mrb[7].mxu1 }
 0x1b6   : > { %v6424_v28 = vmul.f32 %v1390_v58, %v1378_v16  ;;  %5323 = vrot.lane.b32.xlu1 %v5322_v18, %s5761_s15  ;;  %v1368_v39 = vadd.f32 %v1367_v62, %v6407_v30  ;;  %v6450_v14 = vmul.f32 %v1418_v41, %v1377_v7  ;;  %v1208_v16 = vadd.f32 %v6390_v0, %v6394_v29 }
 0x1b7   : > { %v6427_v52 = vmul.f32 %v1394_v26, %v1379_v60  ;;  %v1384_v63 = vmax.f32 %v1366_v44, 0.0  ;;  %v8877_v60 = vsub.s32 3, %v5870_v1  ;;  %v1214_v62 = vadd.f32 %v6392_v4, %v6407_v30 }
 0x1b8   : > { %v1385_v10 = vmax.f32 %v1368_v39, 0.0  ;;  %v5392_v55 = vpack.i.bf16 %v6424_v28, %v6481_v11  ;;  %v5602_v19 = vpack.i.bf16 %v6450_v14, %v6421_v20 }
 0x1b9   : > { %v6430_v37 = vmul.f32 %v1414_v9, %v1384_v63  ;;  %v5352_v56 = vpack.i.bf16 %v6427_v52, %v6424_v28  ;;  %v5377_v48 = vpack.i.bf16 %v6427_v52, %v6409_v61  ;;  %v5412_v50 = vpack.i.bf16 %v6481_v11, %v6427_v52 }
 0x1ba   : > { %5328 = vrot.lane.b32.xlu1 %v5322_v18, %s5762_s16  ;;  %v6447_v53 = vmul.f32 %v1418_v41, %v1385_v10  ;;  %v1402_v44 = vrot.slane %v6399_v13, %v8877_v60  ;;  %v6512_v63 = vpack.i.bf16 %v6424_v28, %v6409_v61 }
 0x1bb   : > { %5353 = vrot.lane.b32.xlu0 %v5352_v56, %s5761_s15 }
 0x1bc   : > { %v6466_v57 = vpack.i.bf16 %v6447_v53, %v6450_v14  ;;  %v5372_v6 = vpack.i.bf16 %v6450_v14, %v6447_v53  ;;  %v5622_v41 = vpack.i.bf16 %v6447_v53, %v6430_v37 }
 0x1be   : > { %5333 = vrot.lane.b32.xlu1 %v5322_v18, %s5760_s14 }
 0x1bf   : > { %5358 = vrot.lane.b32.xlu0 %v5352_v56, %s8821_s17 }
 0x1c2   : > { %5338 = vrot.lane.b32.xlu1 %v5322_v18, %s8821_s17  ;;  %v1282_v43 = vpop.f32.mrb[4].mxu0  ;;  %v1373_v18 = vmax.f32 %v1208_v16, 0.0 }
 0x1c3   : > { %5363 = vrot.lane.b32.xlu0 %v5352_v56, %s5760_s14  ;;  %v1283_v35 = vadd.f32 %v1282_v43, %v6394_v29  ;;  %v1284_v45 = vpop.f32.mrb[5].mxu0 }
 0x1c4   : > { %v1285_v34 = vadd.f32 %v1284_v45, %v6394_v29  ;;  %v6517_v0 = vmul.f32 %v1402_v44, %v1373_v18  ;;  %v1381_v29 = vmax.f32 %v1214_v62, 0.0 }
 0x1c5   : > { %v1374_v27 = vmax.f32 %v1283_v35, 0.0 }
 0x1c6   : > { %5343 = vrot.lane.b32.xlu1 %v5342_v40, %s8819_s18  ;;  %v1375_v58 = vmax.f32 %v1285_v34, 0.0  ;;  %v1288_v46 = vpop.f32.mrb[6].mxu0  ;;  %v5442_v1 = vpack.i.bf16 %v6517_v0, %v6445_v21  ;;  %v6523_v4 = vmul.f32 %v1402_v44, %v1381_v29 }
 0x1c7   : > { %5368 = vrot.lane.b32.xlu0 %v6466_v57, %s8817_s21  ;;  %v6471_v26 = vmul.f32 %v1406_v51, %v1374_v27  ;;  %v1289_v17 = vadd.f32 %v1288_v46, %v6407_v30  ;;  %v1290_v59 = vpop.f32.mrb[7].mxu0  ;;  %s8826_s21 = smov 117  }
 0x1c8   : > { %v6474_v22 = vmul.f32 %v1410_v47, %v1375_v58  ;;  %v1291_v8 = vadd.f32 %v1290_v59, %v6407_v30  ;;  %v5447_v13 = vpack.i.bf16 %v6523_v4, %v6481_v11 }
 0x1c9   : > { %v1382_v9 = vmax.f32 %v1289_v17, 0.0  ;;  %v5482_v30 = vpack.i.bf16 %v6471_v26, %v6517_v0 }
 0x1ca   : > { %5348 = vrot.lane.b32.xlu1 %v5352_v56, %s5762_s16  ;;  %v1383_v32 = vmax.f32 %v1291_v8, 0.0  ;;  %v5522_v39 = vpack.i.bf16 %v6474_v22, %v6471_v26  ;;  %v5557_v36 = vpack.i.bf16 %v6421_v20, %v6474_v22 }
 0x1cb   : > { %5373 = vrot.lane.b32.xlu0 %v5372_v6, %s8808_s24  ;;  %v6483_v31 = vmul.f32 %v1406_v51, %v1382_v9  ;;  %s9048_s24 = smov 1  }
 0x1cc   : > { %v6485_v15 = vmul.f32 %v1410_v47, %v1383_v32 }
 0x1cd   : > { %v5487_v42 = vpack.i.bf16 %v6483_v31, %v6523_v4 }
 0x1ce   : > { %5388 = vrot.lane.b32.xlu1 %v6466_v57, %s8875_s29  ;;  %v5537_v56 = vpack.i.bf16 %v6485_v15, %v6483_v31  ;;  %v5572_v38 = vpack.i.bf16 %v6430_v37, %v6485_v15  ;;  %s8825_s29 = smov 119  }
 0x1cf   : > { %5378 = vrot.lane.b32.xlu0 %v5377_v48, %s8819_s18 }
 0x1d2   : > { %5393 = vrot.lane.b32.xlu1 %v5392_v55, %s8819_s18 }
 0x1d3   : > { %5383 = vrot.lane.b32.xlu0 %v6466_v57, %s8876_s30 }
 0x1d6   : > { %5403 = vrot.lane.b32.xlu1 %v5377_v48, %s5765_s19 }
 0x1d7   : > { %5398 = vrot.lane.b32.xlu0 %v5342_v40, %s5765_s19 }
 0x1da   : > { %5413 = vrot.lane.b32.xlu1 %v5412_v50, %s5766_s20 }
 0x1db   : > { %5408 = vrot.lane.b32.xlu0 %v5342_v40, %s5766_s20 }
 0x1de   : > { %5423 = vrot.lane.b32.xlu1 %v5392_v55, %s5765_s19 }
 0x1df   : > { %5418 = vrot.lane.b32.xlu0 %v6512_v63, %s5766_s20 }
 0x1e2   : > { %5433 = vrot.lane.b32.xlu1 %v5412_v50, %s5769_s23 }
 0x1e3   : > { %5428 = vrot.lane.b32.xlu0 %v5342_v40, %s5769_s23 }
 0x1e6   : > { %5443 = vrot.lane.b32.xlu1 %v5442_v1, %s5761_s15 }
 0x1e7   : > { %5438 = vrot.lane.b32.xlu0 %v6512_v63, %s5769_s23 }
 0x1ea   : > { %5453 = vrot.lane.b32.xlu1 %v5442_v1, %s5762_s16 }
 0x1eb   : > { %5448 = vrot.lane.b32.xlu0 %v5447_v13, %s5762_s16 }
 0x1ee   : > { %5463 = vrot.lane.b32.xlu1 %v5442_v1, %s5760_s14 }
 0x1ef   : > { %5458 = vrot.lane.b32.xlu0 %v5447_v13, %s5761_s15 }
 0x1f2   : > { %5473 = vrot.lane.b32.xlu1 %v5447_v13, %s8821_s17 }
 0x1f3   : > { %5468 = vrot.lane.b32.xlu0 %v5442_v1, %s8821_s17 }
 0x1f6   : > { %5483 = vrot.lane.b32.xlu1 %v5482_v30, %s8819_s18 }
 0x1f7   : > { %5478 = vrot.lane.b32.xlu0 %v5447_v13, %s5760_s14 }
 0x1fa   : > { %5493 = vrot.lane.b32.xlu1 %v5482_v30, %s5765_s19 }
 0x1fb   : > { %5488 = vrot.lane.b32.xlu0 %v5487_v42, %s8819_s18 }
 0x1fe   : > { %5503 = vrot.lane.b32.xlu1 %v5487_v42, %s5766_s20 }
 0x1ff   : > { %5498 = vrot.lane.b32.xlu0 %v5482_v30, %s5766_s20 }
 0x202   : > { %5513 = vrot.lane.b32.xlu1 %v5482_v30, %s5769_s23 }
 0x203   : > { %5508 = vrot.lane.b32.xlu0 %v5487_v42, %s5765_s19 }
 0x206   : > { %5523 = vrot.lane.b32.xlu1 %v5522_v39, %s5761_s15 }
 0x207   : > { %5518 = vrot.lane.b32.xlu0 %v5487_v42, %s5769_s23 }
 0x20a   : > { %5528 = vrot.lane.b32.xlu1 %v5522_v39, %s5762_s16 }
 0x20b   : > { %5538 = vrot.lane.b32.xlu0 %v5537_v56, %s5762_s16 }
 0x20e   : > { %5533 = vrot.lane.b32.xlu1 %v5522_v39, %s5760_s14 }
 0x20f   : > { %5543 = vrot.lane.b32.xlu0 %v5537_v56, %s5761_s15 }
 0x212   : > { %5553 = vrot.lane.b32.xlu1 %v5537_v56, %s8821_s17 }
 0x213   : > { %5548 = vrot.lane.b32.xlu0 %v5522_v39, %s8821_s17 }
 0x216   : > { %5558 = vrot.lane.b32.xlu1 %v5557_v36, %s8819_s18 }
 0x217   : > { %5568 = vrot.lane.b32.xlu0 %v5537_v56, %s5760_s14 }
 0x21a   : > { %5563 = vrot.lane.b32.xlu1 %v5557_v36, %s5765_s19 }
 0x21b   : > { %5573 = vrot.lane.b32.xlu0 %v5572_v38, %s8819_s18 }
 0x21e   : > { %5583 = vrot.lane.b32.xlu1 %v5572_v38, %s5766_s20 }
 0x21f   : > { %5578 = vrot.lane.b32.xlu0 %v5557_v36, %s5766_s20 }
 0x222   : > { %5593 = vrot.lane.b32.xlu1 %v5557_v36, %s5769_s23 }
 0x223   : > { %5588 = vrot.lane.b32.xlu0 %v5572_v38, %s5765_s19 }
 0x226   : > { %5603 = vrot.lane.b32.xlu1 %v5602_v19, %s5761_s15 }
 0x227   : > { %5598 = vrot.lane.b32.xlu0 %v5572_v38, %s5769_s23 }
 0x228   : > { %v6576_v10 = vpop.permute.xlu1 %5323 }
 0x229   : > { %v5326_v51 = vunpack.i.h.bf16 %v6576_v10  ;;  %v5325_v45 = vunpack.i.l.bf16 %v6576_v10 }
 0x22a   : > { %5608 = vrot.lane.b32.xlu1 %v5602_v19, %s5762_s16 }
 0x22b   : > { %5618 = vrot.lane.b32.xlu0 %v5602_v19, %s8821_s17  ;;  %v1569_v47 = vsel %vm8879_vm14, %v5325_v45, %v5326_v51 }
 0x22c   : > { %v6580_v7 = vpop.permute.xlu1 %5328  ;;  %v1961_v55 = vrot.slane %v1569_v47, 4 }
 0x22d   : > { %v6582_v24 = vpop.permute.xlu0 %5353  ;;  %v5331_v27 = vunpack.i.h.bf16 %v6580_v7  ;;  %v5330_v58 = vunpack.i.l.bf16 %v6580_v7 }
 0x22e   : > { %5613 = vrot.lane.b32.xlu1 %v5602_v19, %s5760_s14  ;;  %v8793_v23 = vunpack.i.h.bf16 %v6582_v24  ;;  %v5355_v35 = vunpack.i.l.bf16 %v6582_v24 }
 0x22f   : > { %5623 = vrot.lane.b32.xlu0 %v5622_v41, %s5762_s16  ;;  %v1499_v18 = vsel %vm631_vm2, %v5330_v58, %v5331_v27  ;;  %s9050_s16 = smov 114  }
 0x230   : > { %v6588_v43 = vpop.permute.xlu1 %5333  ;;  %v1576_v34 = vsel %vm8878_vm1, %v5355_v35, %v8793_v23  ;;  %vm8891_vm1 = vmmov %vm8886_vm5 }
 0x231   : > { %v6592_v54 = vpop.permute.xlu0 %5358  ;;  %v1970_v17 = vrot.slane %v1576_v34, 4  ;;  %v8792_v59 = vunpack.i.h.bf16 %v6588_v43  ;;  %v5335_v8 = vunpack.i.l.bf16 %v6588_v43  ;;  %vm8892_vm14 = vmmov %vm8891_vm1 }
 0x232   : > { %5633 = vrot.lane.b32.xlu1 %v5622_v41, %s8821_s17  ;;  %v8791_v9 = vunpack.i.h.bf16 %v6592_v54  ;;  %v5360_v32 = vunpack.i.l.bf16 %v6592_v54  ;;  %s8823_s17 = smov 11  }
 0x233   : > { %5628 = vrot.lane.b32.xlu0 %v5622_v41, %s5761_s15  ;;  %v1625_v29 = vsel %vm8882_vm9, %v5335_v8, %v8792_v59  ;;  %v1971_v1 = vsel %vm8883_vm11, %v1961_v55, %v1970_v17  ;;  %s8884_s15 = smov 15   ;;  %vm8895_vm9 = vmmov %vm8891_vm1 }
 0x234   : > { %v6598_v40 = vpop.permute.xlu1 %5338  ;;  %v1702_v13 = vsel %vm725_vm3, %v5360_v32, %v8791_v9 }
 0x235   : > { %v6603_v12 = vpop.permute.xlu0 %5363  ;;  %v8790_v46 = vunpack.i.h.bf16 %v6598_v40  ;;  %v5340_v49 = vunpack.i.l.bf16 %v6598_v40 }
 0x236   : > { %5653 = vrot.lane.b32.xlu1 %v6466_v57, %s8819_s18  ;;  %v5366_v30 = vunpack.i.h.bf16 %v6603_v12  ;;  %v5365_v36 = vunpack.i.l.bf16 %v6603_v12  ;;  %s5782_s18 = smov 105  }
 0x237   : > { %5638 = vrot.lane.b32.xlu0 %v5622_v41, %s5760_s14  ;;  %v1695_v50 = vsel %vm725_vm3, %v5340_v49, %v8790_v46  ;;  %s8880_s14 = smov 39  }
 0x238   : > { %v6617_v6 = vpop.permute.xlu1 %5343  ;;  %v2003_v38 = vrot.slane %v1695_v50, 4 }
 0x239   : > { %v5369_v48 = vpop.permute.xlu0 %5368  ;;  %v5345_v34 = vunpack.i.l.bf16 %v6617_v6 }
 0x23a   : > { %v5370_v16 = vunpack.i.l.bf16 %v5369_v48  ;;  %5658 = vrot.lane.b32.xlu1 %v6466_v57, %s5765_s19  ;;  %v5371_v60 = vunpack.i.h.bf16 %v5369_v48  ;;  %s4353_s19 = sshll.u32 %s9086_s26, 2 }
 0x23b   : > { %5643 = vrot.lane.b32.xlu0 %v6512_v63, %s8880_s14  ;;  %s549_s14 = scalar_lea.vmem %s8741_s3, %s5873_s27 }
 0x23c   : > { %v1585_v44 = vsel %vm8881_vm6, %v5370_v16, %v5325_v45  ;;  %v6632_v62 = vpop.permute.xlu1 %5348  ;;  %v5346_v45 = vunpack.i.h.bf16 %v6617_v6  ;;  %v1586_v48 = vsel %vm8885_vm0, %v5371_v60, %v5355_v35  ;;  %vm8893_vm6 = vmmov %vm8889_vm12 }
 0x23d   : > { %v5351_v42 = vunpack.i.h.bf16 %v6632_v62  ;;  %v5350_v39 = vunpack.i.l.bf16 %v6632_v62  ;;  %v5374_v56 = vpop.permute.xlu0 %5373  ;;  %v1960_v47 = vrot.slane %v1585_v44, 4  ;;  %v1968_v60 = vrot.slane %v1586_v48, 4  ;;  %vm8896_vm11 = vmmov %vm8893_vm6 }
 0x23e   : > { %v5376_v19 = vunpack.i.h.bf16 %v5374_v56  ;;  %v5375_v41 = vunpack.i.l.bf16 %v5374_v56  ;;  %5663 = vrot.lane.b32.xlu1 %v6466_v57, %s5766_s20  ;;  %s553_s20 = scalar_lea.vmem %s8742_s4, %s5873_s27  ;;  %vm8897_vm0 = vmmov %vm8890_vm7  ;;  %s9049_s27 = smov 127  }
 0x23f   : > { %5648 = vrot.lane.b32.xlu0 %v6512_v63, %s8884_s15  ;;  %v1506_v17 = vsel %vm631_vm2, %v5350_v39, %v5351_v42 }
 0x240   : > { %v1529_v16 = vsel %vm631_vm2, %v5376_v19, %v5330_v58  ;;  %v1530_v50 = vsel %vm631_vm2, %v5375_v41, %v5350_v39  ;;  %v5389_v56 = vpop.permute.xlu1 %5388  ;;  %v2127_v46 = vsel %vm8886_vm5, %v1506_v17, %v1961_v55  ;;  %v2012_v58 = vrot.slane %v1702_v13, 4  ;;  %v1444_v19 = vld [vmem:[%s553_s20] sm:$0xff]  ;;  %vm8898_vm5 = vmmov %vm8897_vm0  ;;  %s5787_s20 = smov 10  }
 0x241   : > { %v5391_v44 = vunpack.i.h.bf16 %v5389_v56  ;;  %v5390_v9 = vunpack.i.l.bf16 %v5389_v56  ;;  %v5379_v59 = vpop.permute.xlu0 %5378  ;;  %v4580_v23 = vpack.c.bf16 %v2127_v46, %v1499_v18  ;;  %v2126_v25 = vsel %vm8887_vm10, %v1530_v50, %v1960_v47  ;;  %vm8899_vm10 = vmmov %vm8893_vm6 }
 0x242   : > { %5673 = vrot.lane.b32.xlu1 %v6466_v57, %s5769_s23  ;;  %v4582_v35 = vpack.c.bf16 %v2126_v25, %v1529_v16  ;;  %v5380_v39 = vunpack.i.l.bf16 %v5379_v59  ;;  %v4584_v55 = vpack.c.bf16 %v1625_v29, %v1971_v1  ;;  %v1746_v41 = vsel %vm8889_vm12, %v5345_v34, %v5346_v45  ;;  %s8894_s23 = smov 13   ;;  %vm8900_vm12 = vmmov %vm8891_vm1 }
 0x243   : > { %5668 = vrot.lane.b32.xlu0 %v6512_v63, %s8888_s22  ;;  %4581 = vmatprep.subr.bf16.mxu0 %v4580_v23  ;;  %v1712_v46 = vsel %vm725_vm3, %v5391_v44, %v5360_v32  ;;  %v1632_v25 = vsel %vm8890_vm7, %v5365_v36, %v5366_v30  ;;  %v1711_v57 = vsel %vm725_vm3, %v5390_v9, %v5340_v49  ;;  %v5381_v17 = vunpack.i.h.bf16 %v5379_v59  ;;  %vm8901_vm7 = vmmov %vm8891_vm1 }
 0x244   : > { %v6673_v18 = vpop.permute.xlu1 %5393  ;;  %4583 = vmatpush1.bf16.msra.mxu0 %v4582_v35  ;;  %v2013_v1 = vsel %vm8891_vm1, %v2003_v38, %v2012_v58  ;;  %v2135_v16 = vsel %vm8892_vm14, %v1632_v25, %v2003_v38  ;;  %v2045_v50 = vrot.slane %v1746_v41, 4  ;;  %v2010_v56 = vrot.slane %v1712_v46, 4  ;;  %vm8902_vm14 = vmmov %vm8891_vm1 }
 0x245   : > { %v5396_v13 = vunpack.i.h.bf16 %v6673_v18  ;;  %v5395_v23 = vunpack.i.l.bf16 %v6673_v18  ;;  %v5384_v29 = vpop.permute.xlu0 %5383  ;;  %4585 = vmatprep.subr.bf16.mxu0 %v4584_v55  ;;  %v1745_v44 = vsel %vm8893_vm6, %v5380_v39, %v5345_v34  ;;  %v1969_v49 = vsel %vm8895_vm9, %v1960_v47, %v1968_v60  ;;  %vm8904_vm9 = vmmov %vm8891_vm1 }
 0x246   : > { %v5386_v48 = vunpack.i.h.bf16 %v5384_v29  ;;  %v5385_v32 = vunpack.i.l.bf16 %v5384_v29  ;;  %2160 = vperm.xlu1 %5321, %v1444_v19   ;;  %v2002_v9 = vrot.slane %v1711_v57, 4  ;;  %v4588_v19 = vpack.c.bf16 %v2013_v1, %v2135_v16 }
 0x247   : > { %5678 = vrot.lane.b32.xlu0 %v6512_v63, %s8894_s23  ;;  %v1753_v35 = vsel %vm8896_vm11, %v5381_v17, %v5395_v23  ;;  %v1752_v55 = vsel %vm8899_vm10, %v5396_v13, %v5381_v17  ;;  %v2044_v63 = vrot.slane %v1745_v44, 4  ;;  %vm8903_vm6 = vcmask 834560  }
 0x248   : > { %v1656_v59 = vsel %vm8897_vm0, %v5386_v48, %v5365_v36  ;;  %v1655_v38 = vsel %vm8898_vm5, %v5385_v32, %v5335_v8  ;;  %v5404_v58 = vpop.permute.xlu1 %5403  ;;  %v2054_v60 = vrot.slane %v1753_v35, 4  ;;  %v2143_v36 = vsel %vm8901_vm7, %v6427_v52, %v2045_v50  ;;  %vm8905_vm11 = vmmov %vm8903_vm6 }
 0x249   : > { %v6695_v34 = vpop.permute.xlu0 %5398  ;;  %v4586_v39 = vpack.c.bf16 %v1655_v38, %v1969_v49  ;;  %v2134_v47 = vsel %vm8900_vm12, %v1656_v59, %v2002_v9  ;;  %v2052_v8 = vrot.slane %v1752_v55, 4  ;;  %v5405_v25 = vunpack.i.l.bf16 %v5404_v58  ;;  %vm8906_vm0 = vmmov %vm8891_vm1 }
 0x24a   : > { %v5401_v41 = vunpack.i.h.bf16 %v6695_v34  ;;  %v5400_v46 = vunpack.i.l.bf16 %v6695_v34  ;;  %v2011_v13 = vsel %vm8891_vm1, %v2002_v9, %v2010_v56  ;;  %v4592_v52 = vpack.c.bf16 %v2143_v36, %v6415_v33  ;;  %vm8907_vm5 = vmmov %vm8903_vm6 }
 0x24b   : > { %4587 = vmatpush1.bf16.msra.mxu0 %v4586_v39  ;;  %v4590_v48 = vpack.c.bf16 %v2011_v13, %v2134_v47  ;;  %v2142_v44 = vsel %vm8902_vm14, %v6424_v28, %v2044_v63  ;;  %v2055_v9 = vsel %vm8904_vm9, %v2045_v50, %v2054_v60  ;;  %v2053_v38 = vsel %vm8906_vm0, %v2044_v63, %v2052_v8  ;;  %vm8908_vm10 = vmmov %vm8907_vm5 }
 0x24c   : > { %4589 = vmatprep.subr.bf16.mxu0 %v4588_v19  ;;  %v6702_v57 = vpop.permute.xlu1 %5413  ;;  %v1802_v49 = vsel %vm781_vm8, %v5400_v46, %v5401_v41  ;;  %v1801_v35 = vsel %vm781_vm8, %v5405_v25, %v5400_v46  ;;  %v5406_v55 = vunpack.i.h.bf16 %v5404_v58  ;;  %v4594_v36 = vpack.c.bf16 %v2142_v44, %v6409_v61  ;;  %vm8909_vm12 = vmmov %vm8906_vm0 }
 0x24d   : > { %v5416_v29 = vunpack.i.h.bf16 %v6702_v57  ;;  %v5415_v1 = vunpack.i.l.bf16 %v6702_v57  ;;  %v6707_v17 = vpop.permute.xlu0 %5408  ;;  %v4596_v25 = vpack.c.bf16 %v1802_v49, %v2055_v9  ;;  %v4598_v13 = vpack.c.bf16 %v1801_v35, %v2053_v38  ;;  %vm8910_vm7 = vmmov %vm8906_vm0 }
 0x24e   : > { %v5411_v32 = vunpack.i.h.bf16 %v6707_v17  ;;  %v5410_v16 = vunpack.i.l.bf16 %v6707_v17  ;;  %vm8911_vm1 = vcmask 826368   ;;  %vm8912_vm14 = vmmov %vm8906_vm0 }
 0x24f   : > { %v1879_v56 = vsel %vm8903_vm6, %v5415_v1, %v5416_v29  ;;  %4591 = vmatpush1.bf16.msra.mxu0 %v4590_v48  ;;  %vm8913_vm6 = vmmov %vm8906_vm0 }
 0x250   : > { %v2096_v59 = vrot.slane %v1879_v56, 4  ;;  %v1872_v33 = vsel %vm8905_vm11, %v5410_v16, %v5411_v32  ;;  %4593 = vmatprep.subr.bf16.mxu0 %v4592_v52  ;;  %v6725_v28 = vpop.permute.xlu1 %5423  ;;  %vm8914_vm9 = vmmov %vm8911_vm1  ;;  %vm8915_vm11 = vmmov 1  }
 0x251   : > { %v2087_v39 = vrot.slane %v1872_v33, 4  ;;  %v5425_v19 = vunpack.i.l.bf16 %v6725_v28  ;;  %v5419_v47 = vpop.permute.xlu0 %5418  ;;  %v5426_v50 = vunpack.i.h.bf16 %v6725_v28 }
 0x252   : > { %v5421_v60 = vunpack.i.h.bf16 %v5419_v47  ;;  %v5420_v46 = vunpack.i.l.bf16 %v5419_v47 }
 0x253   : > { %4595 = vmatpush1.bf16.msra.mxu0 %v4594_v36  ;;  %v1809_v48 = vsel %vm781_vm8, %v5406_v55, %v5425_v19  ;;  %v2097_v61 = vsel %vm8909_vm12, %v2087_v39, %v2096_v59  ;;  %v1808_v33 = vsel %vm781_vm8, %v5426_v50, %v5406_v55 }
 0x254   : > { %v1878_v63 = vsel %vm8907_vm5, %v5421_v60, %v5415_v1  ;;  %v1871_v58 = vsel %vm8908_vm10, %v5420_v46, %v5410_v16  ;;  %4597 = vmatprep.subr.bf16.mxu0 %v4596_v25  ;;  %v6736_v8 = vpop.permute.xlu1 %5433  ;;  %v2151_v52 = vsel %vm8910_vm7, %v1809_v48, %v2087_v39  ;;  %vm6759_vm5 = vmpackc.low %vm8906_vm0, %vm8915_vm11  ;;  %vm8918_vm10 = vcmask 211968  }
 0x255   : > { %v2094_v44 = vrot.slane %v1878_v63, 4  ;;  %v2086_v56 = vrot.slane %v1871_v58, 4  ;;  %v8800_v49 = vunpack.i.h.bf16 %v6736_v8  ;;  %v5435_v9 = vunpack.i.l.bf16 %v6736_v8  ;;  %v6742_v35 = vpop.permute.xlu0 %5428  ;;  %vm8919_vm12 = vmmov %vm8918_vm10 }
 0x256   : > { %v8798_v1 = vunpack.i.h.bf16 %v6742_v35  ;;  %v5430_v16 = vunpack.i.l.bf16 %v6742_v35  ;;  %v4600_v38 = vpack.c.bf16 %v2097_v61, %v2151_v52  ;;  %vm8920_vm7 = vmmov %vm8911_vm1 }
 0x257   : > { %v1935_v59 = vsel %vm8911_vm1, %v5435_v9, %v8800_v49  ;;  %4599 = vmatpush1.bf16.msra.mxu0 %v4598_v13  ;;  %v2095_v39 = vsel %vm8912_vm14, %v2086_v56, %v2094_v44  ;;  %v2150_v47 = vsel %vm8913_vm6, %v1808_v33, %v2086_v56  ;;  %vm2163_vm14 = vcmask 883712   ;;  %vm8921_vm6 = vmmov %vm8906_vm0 }
 0x258   : > { %v1928_v36 = vsel %vm8914_vm9, %v5430_v16, %v8798_v1  ;;  %4601 = vmatprep.subr.bf16.mxu0 %v4600_v38  ;;  %v6755_v55 = vpop.permute.xlu1 %5443  ;;  %v4602_v50 = vpack.c.bf16 %v2095_v39, %v2150_v47  ;;  %vm8922_vm9 = vmmov %vm8906_vm0  ;;  %v8933_v49 = vunpack.i.h.bf16 %v6598_v40 }
 0x259   : > { %v8801_v46 = vunpack.i.h.bf16 %v6755_v55  ;;  %v5445_v25 = vunpack.i.l.bf16 %v6755_v55  ;;  %v5439_v13 = vpop.permute.xlu0 %5438  ;;  %v4604_v48 = vpack.c.bf16 %v1935_v59, %v1928_v36  ;;  %vm8925_vm11 = vmmov %vm8918_vm10 }
 0x25a   : > { %v5441_v63 = vunpack.i.h.bf16 %v5439_v13  ;;  %v5440_v58 = vunpack.i.l.bf16 %v5439_v13  ;;  %vm8926_vm0 = vmmov %vm8918_vm10 }
 0x25b   : > { %4603 = vmatpush1.bf16.msra.mxu0 %v4602_v50  ;;  %v1570_v61 = vsel %vm8918_vm10, %v5326_v51, %v5445_v25  ;;  %v1571_v52 = vsel %vm8919_vm12, %v5445_v25, %v8801_v46  ;;  %v6792_v50 = vld [vmem:[%s549_s14] sm:$0xff]  ;;  %vm8928_vm10 = vcmask 203776   ;;  %s8824_s14 = smov 23  }
 0x25c   : > { %v1934_v44 = vsel %vm8920_vm7, %v5441_v63, %v5435_v9  ;;  %v1927_v56 = vsel %vm8911_vm1, %v5440_v58, %v5430_v16  ;;  %4606 = vmatprep.subr.msk.bf16.mxu0 %vm6759_vm5, %v4604_v48  ;;  %v6775_v33 = vpop.permute.xlu1 %5453  ;;  %v1962_v39 = vrot.slane %v1570_v61, 4  ;;  %v1963_v47 = vrot.slane %v1571_v52, 4  ;;  %vm8929_vm12 = vmmov %vm8928_vm10 }
 0x25d   : > { %v4607_v10 = vpack.c.bf16 %v1934_v44, %v1927_v56  ;;  %v8797_v51 = vunpack.i.h.bf16 %v6775_v33  ;;  %v5455_v38 = vunpack.i.l.bf16 %v6775_v33  ;;  %v6783_v59 = vpop.permute.xlu0 %5448  ;;  %vm8931_vm7 = vmmov %vm8921_vm6 }
 0x25e   : > { %v8796_v9 = vunpack.i.h.bf16 %v6783_v59  ;;  %v5450_v16 = vunpack.i.l.bf16 %v6783_v59  ;;  %vm8932_vm1 = vmmov %vm8921_vm6 }
 0x25f   : > { %v1500_v36 = vsel %vm631_vm2, %v5331_v27, %v5455_v38  ;;  %4609 = vmatpush1.bf16.msk.msra.mxu0 %vm6759_vm5, %v4607_v10  ;;  %v1501_v25 = vsel %vm631_vm2, %v5455_v38, %v8797_v51  ;;  %v8923_v10 = vmov 0.0   ;;  %v8924_v38 = vunpack.i.h.bf16 %v6582_v24 }
 0x260   : > { %v1507_v13 = vsel %vm631_vm2, %v5351_v42, %v5450_v16  ;;  %v6800_v48 = vpop.permute.xlu1 %5463  ;;  %v1508_v7 = vsel %vm631_vm2, %v5450_v16, %v8796_v9  ;;  %v8927_v24 = vunpack.i.h.bf16 %v6588_v43 }
 0x261   : > { %v8802_v27 = vunpack.i.h.bf16 %v6800_v48  ;;  %v5465_v63 = vunpack.i.l.bf16 %v6800_v48  ;;  %v6807_v58 = vpop.permute.xlu0 %5458  ;;  %v2129_v61 = vsel %vm8921_vm6, %v1508_v7, %v1963_v47  ;;  %v2128_v52 = vsel %vm8922_vm9, %v1507_v13, %v1962_v39 }
 0x262   : > { %v8799_v62 = vunpack.i.h.bf16 %v6807_v58  ;;  %v5460_v42 = vunpack.i.l.bf16 %v6807_v58  ;;  %4374 = vmatmul.mubr.msk.f32.vlgmr.msra.gmra.mrb[8].mxu0 %vm2163_vm14, %v6792_v50  ;;  %v4610_v44 = vpack.c.bf16 %v2129_v61, %v1501_v25  ;;  %v4612_v56 = vpack.c.bf16 %v2128_v52, %v1500_v36 }
 0x263   : > { %2390 = vmatprep.mubr.f32.mxu0 %v8923_v10  ;;  %v1626_v61 = vsel %vm8928_vm10, %v8927_v24, %v5465_v63  ;;  %vm8934_vm6 = vcmask 1039360  }
 0x264   : > { %v1577_v16 = vsel %vm8925_vm11, %v8924_v38, %v5460_v42  ;;  %v1578_v7 = vsel %vm8926_vm0, %v5460_v42, %v8799_v62  ;;  %4611 = vmatprep.subr.bf16.mxu1 %v4610_v44  ;;  %v6822_v13 = vpop.permute.xlu1 %5473  ;;  %v1627_v44 = vsel %vm8929_vm12, %v5465_v63, %v8802_v27  ;;  %v8930_v38 = vunpack.i.h.bf16 %v6592_v54  ;;  %vm8935_vm9 = vmmov %vm8934_vm6 }
 0x265   : > { %v1972_v9 = vrot.slane %v1577_v16, 4  ;;  %v1974_v51 = vrot.slane %v1578_v7, 4  ;;  %v5476_v1 = vunpack.i.h.bf16 %v6822_v13  ;;  %v5475_v25 = vunpack.i.l.bf16 %v6822_v13  ;;  %v6826_v36 = vpop.permute.xlu0 %5468  ;;  %4613 = vmatpush1.bf16.msra.mxu1 %v4612_v56  ;;  %vm8936_vm11 = vmmov %vm8928_vm10 }
 0x266   : > { %v8803_v52 = vunpack.i.h.bf16 %v6826_v36  ;;  %v5470_v42 = vunpack.i.l.bf16 %v6826_v36  ;;  %vm8937_vm0 = vmmov %vm8928_vm10 }
 0x267   : > { %v1703_v16 = vsel %vm725_vm3, %v8930_v38, %v5475_v25  ;;  %v1704_v56 = vsel %vm725_vm3, %v5475_v25, %v5476_v1  ;;  %v1975_v43 = vsel %vm8931_vm7, %v1963_v47, %v1974_v51  ;;  %v1973_v7 = vsel %vm8932_vm1, %v1962_v39, %v1972_v9  ;;  %vm8938_vm10 = vmmov %vm8932_vm1 }
 0x268   : > { %v2014_v24 = vrot.slane %v1703_v16, 4  ;;  %v2016_v62 = vrot.slane %v1704_v56, 4  ;;  %v1696_v46 = vsel %vm725_vm3, %v8933_v49, %v5470_v42  ;;  %v1697_v54 = vsel %vm725_vm3, %v5470_v42, %v8803_v52  ;;  %v6850_v63 = vpop.permute.xlu1 %5483  ;;  %vm8939_vm12 = vmmov %vm8932_vm1 }
 0x269   : > { %v2004_v38 = vrot.slane %v1696_v46, 4  ;;  %v2005_v27 = vrot.slane %v1697_v54, 4  ;;  %v5486_v25 = vunpack.i.h.bf16 %v6850_v63  ;;  %v5485_v51 = vunpack.i.l.bf16 %v6850_v63  ;;  %v6854_v47 = vpop.permute.xlu0 %5478  ;;  %vm8940_vm7 = vmmov %vm8932_vm1 }
 0x26a   : > { %v5481_v9 = vunpack.i.h.bf16 %v6854_v47  ;;  %v5480_v40 = vunpack.i.l.bf16 %v6854_v47  ;;  %v4614_v39 = vpack.c.bf16 %v1627_v44, %v1975_v43  ;;  %v4616_v49 = vpack.c.bf16 %v1626_v61, %v1973_v7 }
 0x26b   : > { %v1747_v42 = vsel %vm8934_vm6, %v5346_v45, %v5485_v51  ;;  %v1748_v46 = vsel %vm8935_vm9, %v5485_v51, %v5486_v25  ;;  %v2017_v45 = vsel %vm8938_vm10, %v2005_v27, %v2016_v62  ;;  %v2015_v43 = vsel %vm8940_vm7, %v2004_v38, %v2014_v24  ;;  %vm8941_vm6 = vmmov %vm8932_vm1 }
 0x26c   : > { %v2046_v16 = vrot.slane %v1747_v42, 4  ;;  %v2047_v56 = vrot.slane %v1748_v46, 4  ;;  %v1633_v54 = vsel %vm8936_vm11, %v5366_v30, %v5480_v40  ;;  %v1634_v52 = vsel %vm8937_vm0, %v5480_v40, %v5481_v9  ;;  %4615 = vmatprep.subr.bf16.mxu1 %v4614_v39  ;;  %v6870_v61 = vpop.permute.xlu1 %5493  ;;  %vm8942_vm9 = vmmov %vm8932_vm1 }
 0x26d   : > { %4617 = vmatpush1.bf16.msra.mxu1 %v4616_v49  ;;  %v6872_v6 = vpop.permute.xlu0 %5488  ;;  %v2137_v44 = vsel %vm8939_vm12, %v1634_v52, %v2005_v27  ;;  %v2136_v12 = vsel %vm8932_vm1, %v1633_v54, %v2004_v38  ;;  %v5496_v39 = vunpack.i.h.bf16 %v6870_v61  ;;  %v5495_v27 = vunpack.i.l.bf16 %v6870_v61  ;;  %vm8947_vm7 = vmmov %vm8932_vm1 }
 0x26e   : > { %v5491_v30 = vunpack.i.h.bf16 %v6872_v6  ;;  %v5490_v7 = vunpack.i.l.bf16 %v6872_v6  ;;  %v4618_v51 = vpack.c.bf16 %v2017_v45, %v2137_v44  ;;  %v4620_v40 = vpack.c.bf16 %v2015_v43, %v2136_v12 }
 0x26f   : > { %v2145_v49 = vsel %vm8941_vm6, %v6523_v4, %v2047_v56  ;;  %v2144_v62 = vsel %vm8942_vm9, %v6481_v11, %v2046_v16  ;;  %vm8943_vm11 = vcmask 1039360   ;;  %vm8945_vm10 = vcmask 834560  }
 0x270   : > { %v1754_v52 = vsel %vm8943_vm11, %v5395_v23, %v5490_v7  ;;  %vm8944_vm0 = vmmov %vm8943_vm11  ;;  %4619 = vmatprep.subr.bf16.mxu1 %v4618_v51  ;;  %v6892_v38 = vpop.permute.xlu1 %5503  ;;  %v4622_v42 = vpack.c.bf16 %v2145_v49, %v6517_v0  ;;  %v4624_v44 = vpack.c.bf16 %v2144_v62, %v6445_v21  ;;  %v1803_v17 = vsel %vm781_vm8, %v5401_v41, %v5495_v27 }
 0x271   : > { %v1755_v24 = vsel %vm8944_vm0, %v5490_v7, %v5491_v30  ;;  %v2056_v46 = vrot.slane %v1754_v52, 4  ;;  %v5506_v54 = vunpack.i.h.bf16 %v6892_v38  ;;  %v5505_v11 = vunpack.i.l.bf16 %v6892_v38  ;;  %v6897_v45 = vpop.permute.xlu0 %5498  ;;  %4621 = vmatpush1.bf16.msra.mxu1 %v4620_v40  ;;  %vm8946_vm12 = vmmov %vm8945_vm10 }
 0x272   : > { %v2058_v4 = vrot.slane %v1755_v24, 4  ;;  %v5501_v18 = vunpack.i.h.bf16 %v6897_v45  ;;  %v5500_v23 = vunpack.i.l.bf16 %v6897_v45  ;;  %4623 = vmatprep.subr.bf16.mxu1 %v4622_v42  ;;  %vm8948_vm6 = vmmov %vm8945_vm10 }
 0x273   : > { %v1880_v0 = vsel %vm8945_vm10, %v5416_v29, %v5505_v11  ;;  %v1881_v43 = vsel %vm8946_vm12, %v5505_v11, %v5506_v54  ;;  %v2057_v7 = vsel %vm8932_vm1, %v2046_v16, %v2056_v46  ;;  %vm8949_vm9 = vmmov %vm8948_vm6  ;;  %v1804_v16 = vsel %vm781_vm8, %v5495_v27, %v5496_v39 }
 0x274   : > { %v2059_v12 = vsel %vm8947_vm7, %v2047_v56, %v2058_v4  ;;  %v2098_v51 = vrot.slane %v1880_v0, 4  ;;  %v2100_v40 = vrot.slane %v1881_v43, 4  ;;  %v1873_v49 = vsel %vm8948_vm6, %v5411_v32, %v5500_v23  ;;  %v6916_v57 = vpop.permute.xlu1 %5513  ;;  %vm8950_vm11 = vmmov %vm8932_vm1 }
 0x275   : > { %v1874_v21 = vsel %vm8949_vm9, %v5500_v23, %v5501_v18  ;;  %v2088_v29 = vrot.slane %v1873_v49, 4  ;;  %v6918_v52 = vpop.permute.xlu0 %5508  ;;  %4625 = vmatpush1.bf16.msra.mxu1 %v4624_v44  ;;  %v4626_v24 = vpack.c.bf16 %v1804_v16, %v2059_v12  ;;  %v5516_v42 = vunpack.i.h.bf16 %v6916_v57  ;;  %vm8951_vm0 = vmmov %vm8932_vm1 }
 0x276   : > { %v2089_v62 = vrot.slane %v1874_v21, 4  ;;  %v5511_v32 = vunpack.i.h.bf16 %v6918_v52  ;;  %v5510_v56 = vunpack.i.l.bf16 %v6918_v52  ;;  %v5515_v46 = vunpack.i.l.bf16 %v6916_v57  ;;  %vm8952_vm10 = vmmov %vm8951_vm0  ;;  %v2477_v52 = vld [vmem:[%s8747_s9 + $0x8] sm:$0xff] }
 0x277   : > { %v4628_v4 = vpack.c.bf16 %v1803_v17, %v2057_v7  ;;  %4627 = vmatprep.subr.bf16.mxu1 %v4626_v24  ;;  %v2099_v23 = vsel %vm8951_vm0, %v2088_v29, %v2098_v51  ;;  %vm8953_vm12 = vmmov %vm8951_vm0  ;;  %vm8955_vm7 = vcmask 211968   ;;  %vm8956_vm1 = vcmask 826368  }
 0x278   : > { %v1810_v11 = vsel %vm781_vm8, %v5425_v19, %v5510_v56  ;;  %v1811_v34 = vsel %vm781_vm8, %v5510_v56, %v5511_v32  ;;  %v6936_v41 = vpop.permute.xlu1 %5523  ;;  %v2101_v27 = vsel %vm8950_vm11, %v2089_v62, %v2100_v40  ;;  %v8954_v40 = vunpack.i.h.bf16 %v6755_v55  ;;  %vm8957_vm6 = vmmov %vm8955_vm7 }
 0x279   : > { %v5526_v44 = vunpack.i.h.bf16 %v6936_v41  ;;  %v5525_v0 = vunpack.i.l.bf16 %v6936_v41  ;;  %v6942_v43 = vpop.permute.xlu0 %5518  ;;  %4629 = vmatpush1.bf16.msra.mxu1 %v4628_v4  ;;  %v2153_v28 = vsel %vm8952_vm10, %v1811_v34, %v2089_v62  ;;  %v2152_v19 = vsel %vm8953_vm12, %v1810_v11, %v2088_v29  ;;  %vm8959_vm9 = vmmov %vm8956_vm1 }
 0x27a   : > { %v5521_v12 = vunpack.i.h.bf16 %v6942_v43  ;;  %v5520_v7 = vunpack.i.l.bf16 %v6942_v43  ;;  %v4630_v49 = vpack.c.bf16 %v2101_v27, %v2153_v28  ;;  %v4632_v21 = vpack.c.bf16 %v2099_v23, %v2152_v19  ;;  %vm8960_vm11 = vmmov %vm8956_vm1  ;;  %v7189_v43 = vld [vmem:[%s8747_s9 + $0x60] sm:$0xff] }
 0x27b   : > { %v1572_v51 = vsel %vm8955_vm7, %v8954_v40, %v5525_v0  ;;  %v1930_v16 = vsel %vm8956_vm1, %v5515_v46, %v5516_v42  ;;  %v1573_v62 = vsel %vm8957_vm6, %v5525_v0, %v5526_v44  ;;  %v8958_v29 = vunpack.i.h.bf16 %v6736_v8  ;;  %vm8962_vm0 = vmmov %vm8956_vm1 }
 0x27c   : > { %v1937_v56 = vsel %vm8960_vm11, %v5520_v7, %v5521_v12  ;;  %4631 = vmatprep.subr.bf16.mxu1 %v4630_v49  ;;  %v6963_v55 = vpop.permute.xlu1 %5528  ;;  %v8961_v27 = vunpack.i.h.bf16 %v6742_v35  ;;  %v1964_v23 = vrot.slane %v1572_v51, 4  ;;  %v1965_v19 = vrot.slane %v1573_v62, 4  ;;  %vm8965_vm12 = vmmov %vm8952_vm10 }
 0x27d   : > { %v1936_v17 = vsel %vm8959_vm9, %v8958_v29, %v5520_v7  ;;  %v4634_v24 = vpack.c.bf16 %v1937_v56, %v1930_v16  ;;  %v8807_v4 = vunpack.i.h.bf16 %v6963_v55  ;;  %v5530_v11 = vunpack.i.l.bf16 %v6963_v55  ;;  %v6967_v34 = vpop.permute.xlu0 %5538  ;;  %4633 = vmatpush1.bf16.msra.mxu1 %v4632_v21  ;;  %vm8967_vm7 = vmmov %vm8957_vm6 }
 0x27e   : > { %v1929_v8 = vsel %vm8962_vm0, %v8961_v27, %v5515_v46  ;;  %v8805_v0 = vunpack.i.h.bf16 %v6967_v34  ;;  %v5540_v28 = vunpack.i.l.bf16 %v6967_v34  ;;  %v8963_v49 = vunpack.i.h.bf16 %v6775_v33  ;;  %vm8968_vm1 = vmmov %vm8957_vm6 }
 0x27f   : > { %v4637_v7 = vpack.c.bf16 %v1936_v17, %v1929_v8  ;;  %4636 = vmatprep.subr.msk.bf16.mxu1 %vm6759_vm5, %v4634_v24  ;;  %v1503_v35 = vsel %vm631_vm2, %v5530_v11, %v8807_v4  ;;  %v8964_v46 = vunpack.i.h.bf16 %v6783_v59  ;;  %v8966_v8 = vunpack.i.h.bf16 %v6807_v58  ;;  %vm8972_vm11 = vmmov %vm8952_vm10 }
 0x280   : > { %v1502_v40 = vsel %vm631_vm2, %v8963_v49, %v5530_v11  ;;  %v1510_v51 = vsel %vm631_vm2, %v5540_v28, %v8805_v0  ;;  %v6988_v16 = vpop.permute.xlu1 %5533  ;;  %v8969_v58 = vunpack.i.h.bf16 %v6800_v48  ;;  %vm8970_vm6 = vcmask 203776   ;;  %vm8973_vm0 = vmmov %vm8952_vm10 }
 0x281   : > { %v1509_v21 = vsel %vm631_vm2, %v8964_v46, %v5540_v28  ;;  %v8806_v33 = vunpack.i.h.bf16 %v6988_v16  ;;  %v5535_v62 = vunpack.i.l.bf16 %v6988_v16  ;;  %v6992_v29 = vpop.permute.xlu0 %5543  ;;  %4639 = vmatpush1.bf16.msk.msra.mxu1 %vm6759_vm5, %v4637_v7  ;;  %v2131_v17 = vsel %vm8952_vm10, %v1510_v51, %v1965_v19  ;;  %vm8971_vm9 = vmmov %vm8970_vm6 }
 0x282   : > { %v2130_v59 = vsel %vm8965_vm12, %v1509_v21, %v1964_v23  ;;  %v8804_v56 = vunpack.i.h.bf16 %v6992_v29  ;;  %v5545_v24 = vunpack.i.l.bf16 %v6992_v29  ;;  %v4640_v11 = vpack.c.bf16 %v2131_v17, %v1503_v35 }
 0x283   : > { %v4642_v27 = vpack.c.bf16 %v2130_v59, %v1502_v40  ;;  %v1628_v17 = vsel %vm8970_vm6, %v8969_v58, %v5535_v62  ;;  %vm8975_vm10 = vcmask 1039360  }
 0x284   : > { %v1579_v28 = vsel %vm8967_vm7, %v8966_v8, %v5545_v24  ;;  %v1580_v49 = vsel %vm8968_vm1, %v5545_v24, %v8804_v56  ;;  %4377 = vmatmul.mubr.msk.f32.vlgmr.msra.gmra.mrb[8].mxu1 %vm2163_vm14, %v6792_v50  ;;  %4641 = vmatprep.subr.bf16.mxu0 %v4640_v11  ;;  %v7008_v7 = vpop.permute.xlu1 %5553  ;;  %v1629_v11 = vsel %vm8971_vm9, %v5535_v62, %v8806_v33  ;;  %v8974_v56 = vunpack.i.h.bf16 %v6826_v36  ;;  %vm8976_vm12 = vmmov %vm8975_vm10 }
 0x285   : > { %v1976_v46 = vrot.slane %v1579_v28, 4  ;;  %v1978_v21 = vrot.slane %v1580_v49, 4  ;;  %v5556_v51 = vunpack.i.h.bf16 %v7008_v7  ;;  %v5555_v40 = vunpack.i.l.bf16 %v7008_v7  ;;  %v7012_v35 = vpop.permute.xlu0 %5548  ;;  %4643 = vmatpush1.bf16.msra.mxu0 %v4642_v27  ;;  %2461 = vmatprep.mubr.f32.mxu1 %v8923_v10  ;;  %vm8977_vm7 = vmmov %vm8970_vm6 }
 0x286   : > { %v5551_v59 = vunpack.i.h.bf16 %v7012_v35  ;;  %v5550_v24 = vunpack.i.l.bf16 %v7012_v35  ;;  %vm8978_vm1 = vmmov %vm8970_vm6 }
 0x287   : > { %v1705_v8 = vsel %vm725_vm3, %v5476_v1, %v5555_v40  ;;  %v1706_v27 = vsel %vm725_vm3, %v5555_v40, %v5556_v51  ;;  %v1979_v48 = vsel %vm8972_vm11, %v1965_v19, %v1978_v21  ;;  %v1977_v28 = vsel %vm8973_vm0, %v1964_v23, %v1976_v46  ;;  %vm8979_vm6 = vmmov %vm8973_vm0 }
 0x288   : > { %v2018_v49 = vrot.slane %v1705_v8, 4  ;;  %v2020_v58 = vrot.slane %v1706_v27, 4  ;;  %v1698_v0 = vsel %vm725_vm3, %v8974_v56, %v5550_v24  ;;  %v1699_v13 = vsel %vm725_vm3, %v5550_v24, %v5551_v59  ;;  %v7037_v62 = vpop.permute.xlu1 %5558  ;;  %vm8980_vm9 = vmmov %vm8973_vm0 }
 0x289   : > { %v2006_v1 = vrot.slane %v1698_v0, 4  ;;  %v2007_v33 = vrot.slane %v1699_v13, 4  ;;  %v7039_v4 = vpop.permute.xlu0 %5568  ;;  %v5561_v19 = vunpack.i.h.bf16 %v7037_v62  ;;  %v5560_v23 = vunpack.i.l.bf16 %v7037_v62  ;;  %vm8981_vm11 = vmmov %vm8973_vm0 }
 0x28a   : > { %v5571_v46 = vunpack.i.h.bf16 %v7039_v4  ;;  %v5570_v36 = vunpack.i.l.bf16 %v7039_v4  ;;  %v4644_v21 = vpack.c.bf16 %v1629_v11, %v1979_v48  ;;  %v4646_v56 = vpack.c.bf16 %v1628_v17, %v1977_v28 }
 0x28b   : > { %v1749_v40 = vsel %vm8975_vm10, %v5486_v25, %v5560_v23  ;;  %v1750_v0 = vsel %vm8976_vm12, %v5560_v23, %v5561_v19  ;;  %v2021_v25 = vsel %vm8979_vm6, %v2007_v33, %v2020_v58  ;;  %v2019_v47 = vsel %vm8981_vm11, %v2006_v1, %v2018_v49  ;;  %vm8982_vm10 = vmmov %vm8973_vm0 }
 0x28c   : > { %v1635_v24 = vsel %vm8977_vm7, %v5481_v9, %v5570_v36  ;;  %v1636_v8 = vsel %vm8978_vm1, %v5570_v36, %v5571_v46  ;;  %v2048_v27 = vrot.slane %v1749_v40, 4  ;;  %v2049_v13 = vrot.slane %v1750_v0, 4  ;;  %4645 = vmatprep.subr.bf16.mxu0 %v4644_v21  ;;  %v7057_v17 = vpop.permute.xlu1 %5563  ;;  %vm8983_vm7 = vmmov %vm8976_vm12 }
 0x28d   : > { %4647 = vmatpush1.bf16.msra.mxu0 %v4646_v56  ;;  %v7059_v63 = vpop.permute.xlu0 %5573  ;;  %v2139_v11 = vsel %vm8980_vm9, %v1636_v8, %v2007_v33  ;;  %v2138_v9 = vsel %vm8973_vm0, %v1635_v24, %v2006_v1  ;;  %v8813_v21 = vunpack.i.h.bf16 %v7057_v17  ;;  %v5565_v56 = vunpack.i.l.bf16 %v7057_v17  ;;  %vm8984_vm1 = vmmov %vm8973_vm0 }
 0x28e   : > { %v8816_v48 = vunpack.i.h.bf16 %v7059_v63  ;;  %v5575_v28 = vunpack.i.l.bf16 %v7059_v63  ;;  %v4648_v23 = vpack.c.bf16 %v2021_v25, %v2139_v11  ;;  %v4650_v36 = vpack.c.bf16 %v2019_v47, %v2138_v9  ;;  %vm8987_vm11 = vmmov %vm8973_vm0 }
 0x28f   : > { %v2147_v40 = vsel %vm8982_vm10, %v6485_v15, %v2049_v13  ;;  %v2146_v0 = vsel %vm8984_vm1, %v6483_v31, %v2048_v27  ;;  %vm8985_vm6 = vcmask 834560   ;;  %v1805_v45 = vsel %vm781_vm8, %v5496_v39, %v5565_v56  ;;  %vm8991_vm1 = vmmov %vm8973_vm0 }
 0x290   : > { %v1756_v33 = vsel %vm8976_vm12, %v5491_v30, %v5575_v28  ;;  %v1757_v49 = vsel %vm8983_vm7, %v5575_v28, %v8816_v48  ;;  %4649 = vmatprep.subr.bf16.mxu0 %v4648_v23  ;;  %v7077_v58 = vpop.permute.xlu1 %5583  ;;  %v4652_v1 = vpack.c.bf16 %v2147_v40, %v6474_v22  ;;  %vm8986_vm9 = vmmov %vm8985_vm6  ;;  %v4654_v47 = vpack.c.bf16 %v2146_v0, %v6471_v26 }
 0x291   : > { %v2060_v24 = vrot.slane %v1756_v33, 4  ;;  %v2062_v8 = vrot.slane %v1757_v49, 4  ;;  %4651 = vmatpush1.bf16.msra.mxu0 %v4650_v36  ;;  %v7082_v15 = vpop.permute.xlu0 %5578  ;;  %v8814_v6 = vunpack.i.h.bf16 %v7077_v58  ;;  %v5585_v30 = vunpack.i.l.bf16 %v7077_v58  ;;  %vm8988_vm10 = vmmov %vm8985_vm6 }
 0x292   : > { %v8815_v25 = vunpack.i.h.bf16 %v7082_v15  ;;  %v5580_v11 = vunpack.i.l.bf16 %v7082_v15  ;;  %4653 = vmatprep.subr.bf16.mxu0 %v4652_v1  ;;  %vm8989_vm12 = vmmov %vm8985_vm6 }
 0x293   : > { %v1882_v22 = vsel %vm8985_vm6, %v5506_v54, %v5585_v30  ;;  %v1883_v31 = vsel %vm8986_vm9, %v5585_v30, %v8814_v6  ;;  %v2063_v9 = vsel %vm8987_vm11, %v2049_v13, %v2062_v8  ;;  %v2061_v28 = vsel %vm8973_vm0, %v2048_v27, %v2060_v24  ;;  %vm8990_vm7 = vmmov %vm8973_vm0 }
 0x294   : > { %v1875_v23 = vsel %vm8988_vm10, %v5501_v18, %v5580_v11  ;;  %v1876_v38 = vsel %vm8989_vm12, %v5580_v11, %v8815_v25  ;;  %v7103_v36 = vpop.permute.xlu1 %5593  ;;  %v1806_v54 = vsel %vm781_vm8, %v5565_v56, %v8813_v21  ;;  %v2102_v33 = vrot.slane %v1882_v22, 4  ;;  %vm8992_vm6 = vmmov %vm8973_vm0 }
 0x295   : > { %v2090_v40 = vrot.slane %v1875_v23, 4  ;;  %v2091_v26 = vrot.slane %v1876_v38, 4  ;;  %v2104_v13 = vrot.slane %v1883_v31, 4  ;;  %v7108_v49 = vpop.permute.xlu0 %5588  ;;  %4655 = vmatpush1.bf16.msra.mxu0 %v4654_v47  ;;  %v4656_v1 = vpack.c.bf16 %v1806_v54, %v2063_v9  ;;  %vm8993_vm9 = vmmov %vm8973_vm0  ;;  %v7140_v54 = vld [vmem:[%s8747_s9] sm:$0xff] }
 0x296   : > { %v8812_v18 = vunpack.i.h.bf16 %v7108_v49  ;;  %v5590_v27 = vunpack.i.l.bf16 %v7108_v49  ;;  %v4658_v0 = vpack.c.bf16 %v1805_v45, %v2061_v28  ;;  %v8810_v24 = vunpack.i.h.bf16 %v7103_v36  ;;  %v7163_v45 = vld [vmem:[%s8747_s9 + $0x30] sm:$0xff] }
 0x297   : > { %v5595_v8 = vunpack.i.l.bf16 %v7103_v36  ;;  %4657 = vmatprep.subr.bf16.mxu0 %v4656_v1  ;;  %v2105_v11 = vsel %vm8990_vm7, %v2091_v26, %v2104_v13  ;;  %v2103_v31 = vsel %vm8992_vm6, %v2090_v40, %v2102_v33  ;;  %vm8994_vm11 = vcmask 826368   ;;  %v7158_v13 = vld [vmem:[%s8747_s9 + $0x50] sm:$0xff] }
 0x298   : > { %v1812_v30 = vsel %vm781_vm8, %v5511_v32, %v5590_v27  ;;  %v1813_v61 = vsel %vm781_vm8, %v5590_v27, %v8812_v18  ;;  %v5604_v39 = vpop.permute.xlu1 %5603  ;;  %v2480_v32 = vld [vmem:[%s8747_s9 + $0x20] sm:$0xff]  ;;  %v7168_v27 = vld [vmem:[%s8747_s9 + $0x48] sm:$0xff]  ;;  %vm8995_vm0 = vmmov %vm8994_vm11  ;;  %vm8998_vm7 = vcmask 211968   ;;  %v9000_v25 = vunpack.i.h.bf16 %v6963_v55 }
 0x299   : > { %v7123_v56 = vpop.permute.xlu0 %5598  ;;  %4659 = vmatpush1.bf16.msra.mxu0 %v4658_v0  ;;  %v2155_v22 = vsel %vm8991_vm1, %v1813_v61, %v2091_v26  ;;  %v2154_v47 = vsel %vm8993_vm9, %v1812_v30, %v2090_v40  ;;  %v7145_v40 = vld [vmem:[%s8747_s9 + $0x18] sm:$0xff]  ;;  %v1932_v33 = vsel %vm8994_vm11, %v5595_v8, %v8810_v24  ;;  %vm8996_vm10 = vmmov %vm8995_vm0  ;;  %v5606_v30 = vunpack.i.h.bf16 %v5604_v39  ;;  %v7217_v24 = vld [vmem:[%s8747_s9 + $0xa8] sm:$0xff] }
 0x29a   : > { %v8811_v9 = vunpack.i.h.bf16 %v7123_v56  ;;  %v5600_v28 = vunpack.i.l.bf16 %v7123_v56  ;;  %v4660_v23 = vpack.c.bf16 %v2105_v11, %v2155_v22  ;;  %v4662_v38 = vpack.c.bf16 %v2103_v31, %v2154_v47  ;;  %v7150_v26 = vld [vmem:[%s8747_s9 + $0x38] sm:$0xff]  ;;  %v7179_v22 = vld [vmem:[%s8747_s9 + $0x68] sm:$0xff]  ;;  %v7184_v31 = vld [vmem:[%s8747_s9 + $0x80] sm:$0xff] }
 0x29b   : > { %v5605_v61 = vunpack.i.l.bf16 %v5604_v39  ;;  %v7194_v39 = vld [vmem:[%s8747_s9 + $0x78] sm:$0xff]  ;;  %vm8997_vm12 = vmmov %vm8995_vm0  ;;  %v4702_v57 = vpack.c.bf16 %v7145_v40, %v7140_v54 }
 0x29c   : > { %v1938_v1 = vsel %vm8995_vm0, %v5521_v12, %v5600_v28  ;;  %v1939_v0 = vsel %vm8996_vm10, %v5600_v28, %v8811_v9  ;;  %4661 = vmatprep.subr.bf16.mxu0 %v4660_v23  ;;  %v5609_v11 = vpop.permute.xlu1 %5608  ;;  %v7199_v28 = vld [vmem:[%s8747_s9 + $0x98] sm:$0xff]  ;;  %v7204_v23 = vld [vmem:[%s8747_s9 + $0xb0] sm:$0xff]  ;;  %v7222_v9 = vld [vmem:[%s8747_s9 + $0xc8] sm:$0xff]  ;;  %vm9007_vm0 = vcmask 203776  }
 0x29d   : > { %v4664_v12 = vpack.c.bf16 %v1939_v0, %v1932_v33  ;;  %v5619_v47 = vpop.permute.xlu0 %5618  ;;  %4663 = vmatpush1.bf16.msra.mxu0 %v4662_v38  ;;  %v1931_v33 = vsel %vm8997_vm12, %v5516_v42, %v5595_v8  ;;  %v4700_v38 = vpack.c.bf16 %v2480_v32, %v2477_v52  ;;  %v7212_v0 = vld [vmem:[%s8747_s9 + $0x90] sm:$0xff]  ;;  %v4704_v42 = vpack.c.bf16 %v7158_v13, %v7150_v26  ;;  %v7235_v52 = vld [vmem:[%s8747_s9 + $0xe0] sm:$0xff]  ;;  %v7245_v54 = vld [vmem:[%s8747_s9 + $0xd8] sm:$0xff] }
 0x29e   : > { %v4667_v18 = vpack.c.bf16 %v1938_v1, %v1931_v33  ;;  %v4706_v8 = vpack.c.bf16 %v7168_v27, %v7163_v45  ;;  %v7240_v32 = vld [vmem:[%s8747_s9 + $0xc0] sm:$0xff]  ;;  %v7250_v40 = vsel %vm8998_vm7, %v5526_v44, %v5605_v61  ;;  %vm8999_vm1 = vmmov %vm8998_vm7  ;;  %v5611_v13 = vunpack.i.h.bf16 %v5609_v11 }
 0x29f   : > { %4666 = vmatprep.subr.msk.bf16.mxu0 %vm6759_vm5, %v4664_v12  ;;  %v1575_v26 = vsel %vm8999_vm1, %v5605_v61, %v5606_v30  ;;  %v5610_v45 = vunpack.i.l.bf16 %v5609_v11  ;;  %v4708_v12 = vpack.c.bf16 %v7184_v31, %v7179_v22  ;;  %v1966_v22 = vrot.slane %v7250_v40, 4  ;;  %vm9002_vm9 = vmmov %vm8992_vm6 }
 0x2a0   : > { %v7253_v27 = vpop.permute.xlu1 %5613  ;;  %v1967_v31 = vrot.slane %v1575_v26, 4  ;;  %v5621_v21 = vunpack.i.h.bf16 %v5619_v47  ;;  %v5620_v6 = vunpack.i.l.bf16 %v5619_v47  ;;  %v9001_v44 = vunpack.i.h.bf16 %v6967_v34  ;;  %vm9005_vm11 = vmmov %vm8999_vm1 }
 0x2a1   : > { %v5624_v1 = vpop.permute.xlu0 %5623  ;;  %4669 = vmatpush1.bf16.msk.msra.mxu0 %vm6759_vm5, %v4667_v18  ;;  %v1504_v41 = vsel %vm631_vm2, %v9000_v25, %v5610_v45  ;;  %v1505_v18 = vsel %vm631_vm2, %v5610_v45, %v5611_v13  ;;  %v5615_v13 = vunpack.i.l.bf16 %v7253_v27  ;;  %vm9008_vm10 = vmmov %vm8992_vm6 }
 0x2a2   : > { %v5626_v30 = vunpack.i.h.bf16 %v5624_v1  ;;  %v5625_v61 = vunpack.i.l.bf16 %v5624_v1  ;;  %4701 = vmatprep.subr.bf16.mxu0 %v4700_v38  ;;  %vm9009_vm12 = vmmov %vm8992_vm6 }
 0x2a3   : > { %vm9010_vm7 = vmmov %vm9007_vm0 }
 0x2a4   : > { %v1511_v1 = vsel %vm631_vm2, %v9001_v44, %v5625_v61  ;;  %v1512_v38 = vsel %vm631_vm2, %v5625_v61, %v5626_v30  ;;  %4380 = vmatmul.mubr.msk.f32.vlgmr.msra.gmra.mrb[10].mxu0 %vm2163_vm14, %v6792_v50  ;;  %v5634_v11 = vpop.permute.xlu1 %5633  ;;  %v1700_v30 = vsel %vm725_vm3, %v5551_v59, %v5620_v6  ;;  %v1701_v61 = vsel %vm725_vm3, %v5620_v6, %v5621_v21  ;;  %vm9004_vm2 = vmmov %vm8999_vm1 }
 0x2a5   : > { %v5629_v40 = vpop.permute.xlu0 %5628  ;;  %v5636_v26 = vunpack.i.h.bf16 %v5634_v11  ;;  %v5635_v33 = vunpack.i.l.bf16 %v5634_v11  ;;  %v2133_v47 = vsel %vm8992_vm6, %v1512_v38, %v1967_v31  ;;  %v2132_v55 = vsel %vm9002_vm9, %v1511_v1, %v1966_v22  ;;  %4703 = vmatpush1.bf16.msra.mxu0 %v4702_v57  ;;  %vm9011_vm1 = vmmov %vm9007_vm0 }
 0x2a6   : > { %v5631_v25 = vunpack.i.h.bf16 %v5629_v40  ;;  %v5630_v34 = vunpack.i.l.bf16 %v5629_v40  ;;  %v4670_v48 = vpack.c.bf16 %v2133_v47, %v1505_v18  ;;  %v4672_v44 = vpack.c.bf16 %v2132_v55, %v1504_v41  ;;  %4705 = vmatprep.subr.bf16.mxu0 %v4704_v42  ;;  %vm9013_vm9 = vmmov %vm9007_vm0 }
 0x2a7   : > { %v1708_v45 = vsel %vm725_vm3, %v5635_v33, %v5636_v26  ;;  %v5616_v11 = vunpack.i.h.bf16 %v7253_v27  ;;  %v9003_v1 = vunpack.i.h.bf16 %v6992_v29  ;;  %v1707_v35 = vsel %vm725_vm3, %v5556_v51, %v5635_v33 }
 0x2a8   : > { %v1582_v18 = vsel %vm9005_vm11, %v5630_v34, %v5631_v25  ;;  %4671 = vmatprep.subr.bf16.mxu1 %v4670_v48  ;;  %v5654_v59 = vpop.permute.xlu1 %5653  ;;  %v2009_v27 = vrot.slane %v1701_v61, 4  ;;  %v2024_v40 = vrot.slane %v1708_v45, 4  ;;  %v9006_v47 = vunpack.i.h.bf16 %v6988_v16  ;;  %vm9017_vm11 = vmmov %vm9008_vm10 }
 0x2a9   : > { %v1581_v57 = vsel %vm9004_vm2, %v9003_v1, %v5630_v34  ;;  %v1982_v21 = vrot.slane %v1582_v18, 4  ;;  %v5639_v6 = vpop.permute.xlu0 %5638  ;;  %v5656_v41 = vunpack.i.h.bf16 %v5654_v59  ;;  %v5655_v38 = vunpack.i.l.bf16 %v5654_v59  ;;  %4673 = vmatpush1.bf16.msra.mxu1 %v4672_v44  ;;  %4707 = vmatpush1.bf16.msra.mxu0 %v4706_v8 }
 0x2aa   : > { %v1980_v42 = vrot.slane %v1581_v57, 4  ;;  %v5641_v29 = vunpack.i.h.bf16 %v5639_v6  ;;  %v5640_v26 = vunpack.i.l.bf16 %v5639_v6  ;;  %4709 = vmatprep.subr.bf16.mxu0 %v4708_v12  ;;  %v1630_v7 = vsel %vm9007_vm0, %v9006_v47, %v5615_v13  ;;  %vm9018_vm0 = vmmov %vm9008_vm10  ;;  %v2510_v57 = vld [vmem:[%s8747_s9 + $0x110] sm:$0xff]  ;;  %v2513_v6 = vld [vmem:[%s8747_s9 + $0x128] sm:$0xff] }
 0x2ab   : > { %v2022_v55 = vrot.slane %v1707_v35, 4  ;;  %v1983_v51 = vsel %vm9008_vm10, %v1967_v31, %v1982_v21  ;;  %vm9012_vm6 = vcmask 1039360   ;;  %v1631_v16 = vsel %vm9013_vm9, %v5615_v13, %v5616_v11  ;;  %vm9020_vm10 = vmmov %vm9018_vm0 }
 0x2ac   : > { %v1981_v48 = vsel %vm9009_vm12, %v1966_v22, %v1980_v42  ;;  %v1637_v33 = vsel %vm9010_vm7, %v5571_v46, %v5640_v26  ;;  %v1638_v8 = vsel %vm9011_vm1, %v5640_v26, %v5641_v29  ;;  %v1751_v25 = vsel %vm9012_vm6, %v5561_v19, %v5655_v38  ;;  %v7308_v12 = vpop.permute.xlu1 %5658  ;;  %vm9015_vm2 = vmmov %vm9012_vm6 }
 0x2ad   : > { %v2008_v34 = vrot.slane %v1700_v30, 4  ;;  %v9014_v44 = vunpack.i.h.bf16 %v7059_v63  ;;  %v5644_v22 = vpop.permute.xlu0 %5643  ;;  %v4674_v61 = vpack.c.bf16 %v1631_v16, %v1983_v51  ;;  %v4676_v4 = vpack.c.bf16 %v1630_v7, %v1981_v48  ;;  %v2507_v63 = vld [vmem:[%s8747_s9 + $0xf8] sm:$0xff]  ;;  %vm9021_vm12 = vmmov %vm9018_vm0 }
 0x2ae   : > { %v9016_v46 = vpack.c.bf16 %v7194_v39, %v7189_v43  ;;  %v5646_v45 = vunpack.i.h.bf16 %v5644_v22  ;;  %v5645_v62 = vunpack.i.l.bf16 %v5644_v22  ;;  %v2025_v19 = vsel %vm9017_vm11, %v2009_v27, %v2024_v40  ;;  %vm9026_vm6 = vmmov %vm9018_vm0 }
 0x2af   : > { %v1758_v31 = vsel %vm9015_vm2, %v9014_v44, %v5656_v41  ;;  %v2141_v1 = vsel %vm9018_vm0, %v1638_v8, %v2009_v27  ;;  %v9019_v30 = vpack.c.bf16 %v7204_v23, %v7199_v28  ;;  %v2050_v13 = vrot.slane %v1751_v25, 4  ;;  %4675 = vmatprep.subr.bf16.mxu1 %v4674_v61  ;;  %v2506_v28 = vld [vmem:[%s8747_s9 + $0xf0] sm:$0xff]  ;;  %v2509_v23 = vld [vmem:[%s8747_s9 + $0x108] sm:$0xff]  ;;  %v2516_v27 = vld [vmem:[%s8747_s9 + $0x140] sm:$0xff] }
 0x2b0   : > { %4711 = vmatpush1.bf16.msra.mxu0 %v9016_v46  ;;  %v4678_v11 = vpack.c.bf16 %v2025_v19, %v2141_v1  ;;  %v2023_v43 = vsel %vm9020_vm10, %v2008_v34, %v2022_v55  ;;  %v2140_v39 = vsel %vm9021_vm12, %v1637_v33, %v2008_v34  ;;  %v2064_v18 = vrot.slane %v1758_v31, 4  ;;  %4677 = vmatpush1.bf16.msra.mxu1 %v4676_v4  ;;  %v5664_v21 = vpop.permute.xlu1 %5663  ;;  %vm9027_vm9 = vmmov %vm9018_vm0  ;;  %v2519_v46 = vld [vmem:[%s8747_s9 + $0x158] sm:$0xff] }
 0x2b1   : > { %4713 = vmatprep.subr.bf16.mxu0 %v9019_v30  ;;  %vm9022_vm7 = vcmask 318464   ;;  %v5660_v42 = vunpack.i.l.bf16 %v7308_v12  ;;  %v5649_v26 = vpop.permute.xlu0 %5648  ;;  %v5666_v47 = vunpack.i.h.bf16 %v5664_v21  ;;  %v4680_v55 = vpack.c.bf16 %v2023_v43, %v2140_v39  ;;  %vm9028_vm2 = vmmov %vm9018_vm0 }
 0x2b2   : > { %v1767_v35 = vsel %vm9022_vm7, %v5655_v38, %v5645_v62  ;;  %vm9023_vm1 = vmmov %vm9022_vm7  ;;  %4679 = vmatprep.subr.bf16.mxu1 %v4678_v11  ;;  %v5665_v38 = vunpack.i.l.bf16 %v5664_v21  ;;  %v5650_v7 = vunpack.i.l.bf16 %v5649_v26  ;;  %v9025_v51 = vpack.c.bf16 %v7235_v52, %v7222_v9 }
 0x2b3   : > { %v1768_v59 = vsel %vm9023_vm1, %v5656_v41, %v5646_v45  ;;  %v2051_v40 = vrot.slane %v1767_v35, 4  ;;  %v9024_v41 = vpack.c.bf16 %v7217_v24, %v7212_v0  ;;  %v4720_v48 = vpack.c.bf16 %v2510_v57, %v2507_v63  ;;  %vm9035_vm12 = vmmov %vm9028_vm2 }
 0x2b4   : > { %v2066_v29 = vrot.slane %v1768_v59, 4  ;;  %v4722_v33 = vpack.c.bf16 %v2509_v23, %v2506_v28  ;;  %v5661_v8 = vunpack.i.h.bf16 %v7308_v12  ;;  %v2148_v16 = vsel %vm9027_vm9, %v6430_v37, %v2050_v13  ;;  %4681 = vmatpush1.bf16.msra.mxu1 %v4680_v55  ;;  %v2515_v37 = vld [vmem:[%s8747_s9 + $0x138] sm:$0xff]  ;;  %vm9042_vm9 = vmmov %vm9028_vm2 }
 0x2b5   : > { %4715 = vmatpush1.bf16.msra.mxu0 %v9024_v41  ;;  %v2149_v25 = vsel %vm9026_vm6, %v6447_v53, %v2051_v40  ;;  %v4724_v34 = vpack.c.bf16 %v2516_v27, %v2513_v6  ;;  %v2065_v24 = vsel %vm9028_vm2, %v2050_v13, %v2064_v18  ;;  %v9029_v0 = vunpack.i.h.bf16 %v7082_v15  ;;  %v2512_v53 = vld [vmem:[%s8747_s9 + $0x120] sm:$0xff]  ;;  %v5669_v61 = vpop.permute.xlu0 %5668  ;;  %v5674_v13 = vpop.permute.xlu1 %5673  ;;  %v2518_v6 = vld [vmem:[%s8747_s9 + $0x150] sm:$0xff]  ;;  %v2521_v27 = vld [vmem:[%s8747_s9 + $0x168] sm:$0xff] }
 0x2b6   : > { %4717 = vmatprep.subr.bf16.mxu0 %v9025_v51  ;;  %vm9030_vm11 = vcmask 834560   ;;  %v9031_v9 = vunpack.i.h.bf16 %v7077_v58  ;;  %v4682_v12 = vpack.c.bf16 %v2149_v25, %v6450_v14  ;;  %v9033_v31 = vunpack.i.h.bf16 %v7057_v17  ;;  %v2522_v17 = vld [vmem:[%s8747_s9 + $0x170] sm:$0xff]  ;;  %v2528_v41 = vld [vmem:[%s8747_s9 + $0x1a0] sm:$0xff] }
 0x2b7   : > { %v1877_v44 = vsel %vm9030_vm11, %v9029_v0, %v5665_v38  ;;  %vm9032_vm0 = vmmov %vm9030_vm11  ;;  %v5651_v22 = vunpack.i.h.bf16 %v5649_v26  ;;  %vm9034_vm10 = vcmask 121856   ;;  %v2067_v4 = vsel %vm9035_vm12, %v2051_v40, %v2066_v29  ;;  %v2529_v0 = vld [vmem:[%s8747_s9 + $0x1a8] sm:$0xff] }
 0x2b8   : > { %v1884_v52 = vsel %vm9032_vm0, %v9031_v9, %v5666_v47  ;;  %v1807_v15 = vsel %vm781_vm8, %v9033_v31, %v5660_v42  ;;  %v1837_v58 = vsel %vm9034_vm10, %v5660_v42, %v5650_v7  ;;  %v9036_v14 = vpack.c.bf16 %v7245_v54, %v7240_v32  ;;  %4683 = vmatprep.subr.bf16.mxu1 %v4682_v12  ;;  %vm9040_vm6 = vmmov %vm9034_vm10 }
 0x2b9   : > { %v5671_v45 = vunpack.i.h.bf16 %v5669_v61  ;;  %v5670_v62 = vunpack.i.l.bf16 %v5669_v61  ;;  %v4684_v19 = vpack.c.bf16 %v2148_v16, %v6421_v20  ;;  %v4686_v1 = vpack.c.bf16 %v1837_v58, %v2067_v4  ;;  %v5679_v35 = vpop.permute.xlu0 %5678  ;;  %vm9043_vm11 = vmmov %vm9028_vm2  ;;  %v2533_v4 = vld [vmem:[%s8747_s9 + $0x1c8] sm:$0xff] }
 0x2ba   : > { %4719 = vmatpush1.bf16.msra.mxu0 %v9036_v14  ;;  %v2092_v30 = vrot.slane %v1877_v44, 4  ;;  %v2106_v63 = vrot.slane %v1884_v52, 4  ;;  %v4726_v32 = vpack.c.bf16 %v2515_v37, %v2512_v53  ;;  %v9037_v54 = vunpack.i.h.bf16 %v7108_v49  ;;  %v2531_v53 = vld [vmem:[%s8747_s9 + $0x1b8] sm:$0xff]  ;;  %v2534_v37 = vld [vmem:[%s8747_s9 + $0x1d0] sm:$0xff]  ;;  %v2532_v14 = vld [vmem:[%s8747_s9 + $0x1c0] sm:$0xff] }
 0x2bb   : > { %4721 = vmatprep.subr.bf16.mxu0 %v4720_v48  ;;  %vm9038_vm7 = vcmask 113664   ;;  %4685 = vmatpush1.bf16.msra.mxu1 %v4684_v19  ;;  %v4728_v57 = vpack.c.bf16 %v2522_v17, %v2519_v46  ;;  %v4688_v28 = vpack.c.bf16 %v1807_v15, %v2065_v24  ;;  %v1838_v23 = vsel %vm9040_vm6, %v5661_v8, %v5651_v22  ;;  %v2526_v24 = vld [vmem:[%s8747_s9 + $0x190] sm:$0xff]  ;;  %v2481_v15 = vld [vmem:[%s8747_s9 + $0x28] sm:$0xff]  ;;  %v2535_v46 = vld [vmem:[%s8747_s9 + $0x1d8] sm:$0xff] }
 0x2bc   : > { %v1814_v11 = vsel %vm781_vm8, %v9037_v54, %v5661_v8  ;;  %v1893_v43 = vsel %vm9038_vm7, %v5665_v38, %v5670_v62  ;;  %vm9039_vm1 = vmmov %vm9038_vm7  ;;  %4687 = vmatprep.subr.bf16.mxu1 %v4686_v1  ;;  %v5676_v59 = vunpack.i.h.bf16 %v5674_v13  ;;  %v5675_v42 = vunpack.i.l.bf16 %v5674_v13  ;;  %v2525_v38 = vld [vmem:[%s8747_s9 + $0x188] sm:$0xff]  ;;  %v2524_v8 = vld [vmem:[%s8747_s9 + $0x180] sm:$0xff] }
 0x2bd   : > { %v1894_v39 = vsel %vm9039_vm1, %v5666_v47, %v5671_v45  ;;  %v2093_v20 = vrot.slane %v1893_v43, 4  ;;  %v5681_v21 = vunpack.i.h.bf16 %v5679_v35  ;;  %v5680_v49 = vunpack.i.l.bf16 %v5679_v35  ;;  %vm9041_vm8 = vmmov %vm9028_vm2  ;;  %v2530_v22 = vld [vmem:[%s8747_s9 + $0x1b0] sm:$0xff]  ;;  %v2537_v17 = vld [vmem:[%s8747_s9 + $0x1e8] sm:$0xff] }
 0x2be   : > { %v2108_v18 = vrot.slane %v1894_v39, 4  ;;  %4723 = vmatpush1.bf16.msra.mxu0 %v4722_v33  ;;  %v2107_v26 = vsel %vm9028_vm2, %v2092_v30, %v2106_v63  ;;  %v2156_v47 = vsel %vm9043_vm11, %v1814_v11, %v2092_v30  ;;  %v4730_v33 = vpack.c.bf16 %v2521_v27, %v2518_v6  ;;  %v2540_v45 = vld [vmem:[%s8747_s9 + $0x200] sm:$0xff]  ;;  %v2487_v63 = vld [vmem:[%s8747_s9 + $0x58] sm:$0xff]  ;;  %v2538_v11 = vld [vmem:[%s8747_s9 + $0x1f0] sm:$0xff] }
 0x2bf   : > { %4725 = vmatprep.subr.bf16.mxu0 %v4724_v34  ;;  %v2157_v29 = vsel %vm9042_vm9, %v1838_v23, %v2093_v20  ;;  %v1956_v7 = vsel %vm853_vm13, %v5675_v42, %v5680_v49  ;;  %v1957_v55 = vsel %vm853_vm13, %v5676_v59, %v5681_v21  ;;  %4689 = vmatpush1.bf16.msra.mxu1 %v4688_v28  ;;  %v2527_v34 = vld [vmem:[%s8747_s9 + $0x198] sm:$0xff]  ;;  %v9044_v44 = vunpack.i.h.bf16 %v7123_v56  ;;  %v2484_v30 = vld [vmem:[%s8747_s9 + $0x40] sm:$0xff]  ;;  %v2541_v43 = vld [vmem:[%s8747_s9 + $0x208] sm:$0xff] }
 0x2c0   : > { %v2109_v40 = vsel %vm9041_vm8, %v2093_v20, %v2108_v18  ;;  %v4694_v48 = vpack.c.bf16 %v1957_v55, %v1956_v7  ;;  %v4692_v25 = vpack.c.bf16 %v2107_v26, %v2156_v47  ;;  %v4732_v16 = vpack.c.bf16 %v2528_v41, %v2525_v38  ;;  %v2536_v13 = vld [vmem:[%s8747_s9 + $0x1e0] sm:$0xff]  ;;  %v2539_v54 = vld [vmem:[%s8747_s9 + $0x1f8] sm:$0xff]  ;;  %v2490_v18 = vld [vmem:[%s8747_s9 + $0x70] sm:$0xff] }
 0x2c1   : > { %v4690_v51 = vpack.c.bf16 %v2109_v40, %v2157_v29  ;;  %vm9045_vm0 = vcmask 826368   ;;  %v9046_v52 = vunpack.i.h.bf16 %v7103_v36  ;;  %v4734_v56 = vpack.c.bf16 %v2527_v34, %v2524_v8  ;;  %v2478_v36 = vld [vmem:[%s8747_s9 + $0x10] sm:$0xff]  ;;  %v2543_v39 = vld [vmem:[%s8747_s9 + $0x218] sm:$0xff]  ;;  %v2544_v21 = vld [vmem:[%s8747_s9 + $0x220] sm:$0xff] }
 0x2c2   : > { %4727 = vmatpush1.bf16.msra.mxu0 %v4726_v32  ;;  %v1940_v9 = vsel %vm9045_vm0, %v9044_v44, %v5676_v59  ;;  %vm9047_vm10 = vmmov %vm9045_vm0  ;;  %v4932_v31 = vpack.c.bf16 %v2529_v0, %v2526_v24  ;;  %v4736_v58 = vpack.c.bf16 %v2534_v37, %v2531_v53  ;;  %v4934_v62 = vpack.c.bf16 %v2481_v15, %v2478_v36  ;;  %v2542_v35 = vld [vmem:[%s8747_s9 + $0x210] sm:$0xff]  ;;  %v2547_v49 = vld [vmem:[%s8747_s9 + $0x238] sm:$0xff] }
 0x2c3   : > { %4691 = vmatprep.subr.bf16.mxu1 %v4690_v51  ;;  %4729 = vmatprep.subr.bf16.mxu0 %v4728_v57  ;;  %v1933_v12 = vsel %vm9047_vm10, %v9046_v52, %v5675_v42  ;;  %v4738_v19 = vpack.c.bf16 %v2533_v4, %v2530_v22  ;;  %v4936_v1 = vpack.c.bf16 %v2535_v46, %v2532_v14  ;;  %v2546_v57 = vld [vmem:[%s8747_s9 + $0x230] sm:$0xff]  ;;  %v2545_v42 = vld [vmem:[%s8747_s9 + $0x228] sm:$0xff]  ;;  %v2552_v27 = vld [vmem:[%s8747_s9 + $0x260] sm:$0xff]  ;;  %vm5786_vm12 = vmmov 0  }
 0x2c4   : > { %4693 = vmatpush1.bf16.msra.mxu1 %v4692_v25  ;;  %v4697_v61 = vpack.c.bf16 %v1940_v9, %v1933_v12  ;;  %v4740_v32 = vpack.c.bf16 %v2540_v45, %v2537_v17  ;;  %v4938_v28 = vpack.c.bf16 %v2487_v63, %v2484_v30  ;;  %v4742_v23 = vpack.c.bf16 %v2539_v54, %v2536_v13  ;;  %v2549_v6 = vld [vmem:[%s8747_s9 + $0x248] sm:$0xff]  ;;  %v2496_v47 = vld [vmem:[%s8747_s9 + $0xa0] sm:$0xff]  ;;  %v2499_v38 = vld [vmem:[%s8747_s9 + $0xb8] sm:$0xff] }
 0x2c5   : > { %4696 = vmatprep.subr.msk.bf16.mxu1 %vm6759_vm5, %v4694_v48  ;;  %v4940_v20 = vpack.c.bf16 %v2541_v43, %v2538_v11  ;;  %v4744_v59 = vpack.c.bf16 %v2546_v57, %v2543_v39  ;;  %v4746_v29 = vpack.c.bf16 %v2545_v42, %v2542_v35  ;;  %v4944_v26 = vpack.c.bf16 %v2547_v49, %v2544_v21  ;;  %v2548_v41 = vld [vmem:[%s8747_s9 + $0x240] sm:$0xff]  ;;  %v2551_v55 = vld [vmem:[%s8747_s9 + $0x258] sm:$0xff]  ;;  %v2550_v51 = vld [vmem:[%s8747_s9 + $0x250] sm:$0xff] }
 0x2c6   : > { %4731 = vmatpush1.bf16.msra.mxu0 %v4730_v33  ;;  %v4748_v7 = vpack.c.bf16 %v2552_v27, %v2549_v6  ;;  %v2553_v48 = vld [vmem:[%s8747_s9 + $0x268] sm:$0xff]  ;;  %v2555_v33 = vld [vmem:[%s8747_s9 + $0x278] sm:$0xff]  ;;  %v2558_v8 = vld [vmem:[%s8747_s9 + $0x290] sm:$0xff]  ;;  %v4946_v25 = vpack.c.bf16 %v2499_v38, %v2496_v47  ;;  %v7619_v27 = vpop.permute.xlu1 %2160  ;;  %vm3474_vm11 = vcmask 187392   ;;  %vm9056_vm0 = vcmask 1039360  }
 0x2c7   : > { %4733 = vmatprep.subr.bf16.mxu0 %v4732_v16  ;;  %v4750_v16 = vpack.c.bf16 %v2551_v55, %v2548_v41  ;;  %v4948_v34 = vpack.c.bf16 %v2553_v48, %v2550_v51  ;;  %v2502_v24 = vld [vmem:[%s8747_s9 + $0xd0] sm:$0xff]  ;;  %v2505_v0 = vld [vmem:[%s8747_s9 + $0xe8] sm:$0xff]  ;;  %v4752_v9 = vpack.c.bf16 %v2558_v8, %v2555_v33  ;;  %v2556_v12 = vld [vmem:[%s8747_s9 + $0x280] sm:$0xff]  ;;  %vm3482_vm10 = vcmask 941056  }
 0x2c8   : > { %4699 = vmatpush1.bf16.msk.msra.mxu1 %vm6759_vm5, %v4697_v61  ;;  %v2554_v44 = vld [vmem:[%s8747_s9 + $0x270] sm:$0xff]  ;;  %v2557_v52 = vld [vmem:[%s8747_s9 + $0x288] sm:$0xff]  ;;  %v2559_v53 = vld [vmem:[%s8747_s9 + $0x298] sm:$0xff] }
 0x2c9   : > { %4933 = vmatprep.subr.bf16.mxu1 %v4932_v31  ;;  %v2561_v37 = vld [vmem:[%s8747_s9 + $0x2a8] sm:$0xff]  ;;  %v4950_v31 = vpack.c.bf16 %v2505_v0, %v2502_v24  ;;  %v4754_v36 = vpack.c.bf16 %v2557_v52, %v2554_v44  ;;  %v4952_v15 = vpack.c.bf16 %v2559_v53, %v2556_v12  ;;  %v2508_v22 = vld [vmem:[%s8747_s9 + $0x100] sm:$0xff]  ;;  %v2511_v61 = vld [vmem:[%s8747_s9 + $0x118] sm:$0xff] }
 0x2ca   : > { %4735 = vmatpush1.bf16.msra.mxu0 %v4734_v56  ;;  %v2564_v56 = vld [vmem:[%s8747_s9 + $0x2c0] sm:$0xff]  ;;  %v2563_v14 = vld [vmem:[%s8747_s9 + $0x2b8] sm:$0xff]  ;;  %v2562_v46 = vld [vmem:[%s8747_s9 + $0x2b0] sm:$0xff] }
 0x2cb   : > { %4737 = vmatprep.subr.bf16.mxu0 %v4736_v58  ;;  %4383 = vmatmul.mubr.msk.f32.vlgmr.msra.gmra.mrb[10].mxu1 %vm2163_vm14, %v6792_v50  ;;  %v2493_v50 = vld [vmem:[%s8747_s9 + $0x88] sm:$0xff]  ;;  %v2560_v58 = vld [vmem:[%s8747_s9 + $0x2a0] sm:$0xff]  ;;  %v4756_v4 = vpack.c.bf16 %v2564_v56, %v2561_v37  ;;  %v2567_v45 = vld [vmem:[%s8747_s9 + $0x2d8] sm:$0xff]  ;;  %vm2827_vm14 = vcmask 326656  }
 0x2cc   : > { %4935 = vmatpush3.bf16.msra.mxu1 %v4934_v62  ;;  %v4942_v40 = vpack.c.bf16 %v2493_v50, %v2490_v18  ;;  %v2565_v17 = vld [vmem:[%s8747_s9 + $0x2c8] sm:$0xff]  ;;  %v2570_v62 = vld [vmem:[%s8747_s9 + $0x2f0] sm:$0xff]  ;;  %v2568_v43 = vld [vmem:[%s8747_s9 + $0x2e0] sm:$0xff] }
 0x2cd   : > { %4937 = vmatprep.subr.bf16.mxu1 %v4936_v1  ;;  %v4758_v1 = vpack.c.bf16 %v2563_v14, %v2560_v58  ;;  %v4956_v30 = vpack.c.bf16 %v2565_v17, %v2562_v46  ;;  %v2514_v63 = vld [vmem:[%s8747_s9 + $0x130] sm:$0xff]  ;;  %v2517_v13 = vld [vmem:[%s8747_s9 + $0x148] sm:$0xff]  ;;  %v4760_v54 = vpack.c.bf16 %v2570_v62, %v2567_v45  ;;  %v2571_v39 = vld [vmem:[%s8747_s9 + $0x2f8] sm:$0xff] }
 0x2ce   : > { %4739 = vmatpush1.bf16.msra.mxu0 %v4738_v19  ;;  %v4954_v19 = vpack.c.bf16 %v2511_v61, %v2508_v22  ;;  %v2569_v11 = vld [vmem:[%s8747_s9 + $0x2e8] sm:$0xff]  ;;  %v4960_v18 = vpack.c.bf16 %v2571_v39, %v2568_v43  ;;  %v2520_v50 = vld [vmem:[%s8747_s9 + $0x160] sm:$0xff]  ;;  %v2523_v35 = vld [vmem:[%s8747_s9 + $0x178] sm:$0xff] }
 0x2cf   : > { %4741 = vmatprep.subr.bf16.mxu0 %v4740_v32  ;;  %v2566_v32 = vld [vmem:[%s8747_s9 + $0x2d0] sm:$0xff]  ;;  %v2573_v57 = vld [vmem:[%s8747_s9 + $0x308] sm:$0xff]  ;;  %v4962_v49 = vpack.c.bf16 %v2523_v35, %v2520_v50  ;;  %v2579_v55 = vld [vmem:[%s8747_s9 + $0x338] sm:$0xff] }
 0x2d0   : > { %4939 = vmatpush3.bf16.msra.mxu1 %v4938_v28  ;;  %v2576_v28 = vld [vmem:[%s8747_s9 + $0x320] sm:$0xff]  ;;  %v2622_v42 = vld [vmem:[%s8747_s9 + $0x490] sm:$0xff]  ;;  %v2625_v21 = vld [vmem:[%s8747_s9 + $0x4a8] sm:$0xff] }
 0x2d1   : > { %4941 = vmatprep.subr.bf16.mxu1 %v4940_v20  ;;  %v4762_v20 = vpack.c.bf16 %v2569_v11, %v2566_v32  ;;  %v4964_v6 = vpack.c.bf16 %v2625_v21, %v2622_v42  ;;  %v2574_v41 = vld [vmem:[%s8747_s9 + $0x310] sm:$0xff]  ;;  %v2628_v33 = vld [vmem:[%s8747_s9 + $0x4c0] sm:$0xff]  ;;  %v2631_v8 = vld [vmem:[%s8747_s9 + $0x4d8] sm:$0xff] }
 0x2d2   : > { %4743 = vmatpush1.bf16.msra.mxu0 %v4742_v23  ;;  %v4958_v23 = vpack.c.bf16 %v2517_v13, %v2514_v63  ;;  %v2582_v48 = vld [vmem:[%s8747_s9 + $0x350] sm:$0xff]  ;;  %v2581_v0 = vld [vmem:[%s8747_s9 + $0x348] sm:$0xff]  ;;  %v4968_v52 = vpack.c.bf16 %v2631_v8, %v2628_v33  ;;  %v2580_v12 = vld [vmem:[%s8747_s9 + $0x340] sm:$0xff] }
 0x2d3   : > { %4745 = vmatprep.subr.bf16.mxu0 %v4744_v59  ;;  %v4764_v59 = vpack.c.bf16 %v2576_v28, %v2573_v57  ;;  %v2578_v24 = vld [vmem:[%s8747_s9 + $0x330] sm:$0xff]  ;;  %v2583_v53 = vld [vmem:[%s8747_s9 + $0x358] sm:$0xff]  ;;  %v2585_v37 = vld [vmem:[%s8747_s9 + $0x368] sm:$0xff] }
 0x2d4   : > { %4943 = vmatpush3.bf16.msra.mxu1 %v4942_v40  ;;  %v2588_v56 = vld [vmem:[%s8747_s9 + $0x380] sm:$0xff]  ;;  %v4970_v22 = vpack.c.bf16 %v2583_v53, %v2580_v12  ;;  %v2587_v58 = vld [vmem:[%s8747_s9 + $0x378] sm:$0xff]  ;;  %v2586_v46 = vld [vmem:[%s8747_s9 + $0x370] sm:$0xff] }
 0x2d5   : > { %4945 = vmatprep.subr.bf16.mxu1 %v4944_v26  ;;  %v2575_v26 = vld [vmem:[%s8747_s9 + $0x318] sm:$0xff]  ;;  %v2584_v61 = vld [vmem:[%s8747_s9 + $0x360] sm:$0xff]  ;;  %v2589_v17 = vld [vmem:[%s8747_s9 + $0x388] sm:$0xff] }
 0x2d6   : > { %4747 = vmatpush1.bf16.msra.mxu0 %v4746_v29  ;;  %v2572_v29 = vld [vmem:[%s8747_s9 + $0x300] sm:$0xff]  ;;  %v2591_v45 = vld [vmem:[%s8747_s9 + $0x398] sm:$0xff]  ;;  %v2594_v62 = vld [vmem:[%s8747_s9 + $0x3b0] sm:$0xff]  ;;  %v4974_v63 = vpack.c.bf16 %v2589_v17, %v2586_v46 }
 0x2d7   : > { %4749 = vmatprep.subr.bf16.mxu0 %v4748_v7  ;;  %v2577_v7 = vld [vmem:[%s8747_s9 + $0x328] sm:$0xff]  ;;  %v2590_v13 = vld [vmem:[%s8747_s9 + $0x390] sm:$0xff]  ;;  %v2592_v43 = vld [vmem:[%s8747_s9 + $0x3a0] sm:$0xff] }
 0x2d8   : > { %4947 = vmatpush3.bf16.msra.mxu1 %v4946_v25  ;;  %v2593_v32 = vld [vmem:[%s8747_s9 + $0x3a8] sm:$0xff]  ;;  %v2595_v39 = vld [vmem:[%s8747_s9 + $0x3b8] sm:$0xff]  ;;  %v2600_v28 = vld [vmem:[%s8747_s9 + $0x3e0] sm:$0xff] }
 0x2d9   : > { %4949 = vmatprep.subr.bf16.mxu1 %v4948_v34  ;;  %v4966_v34 = vpack.c.bf16 %v2577_v7, %v2574_v41  ;;  %v2597_v57 = vld [vmem:[%s8747_s9 + $0x3c8] sm:$0xff]  ;;  %v4978_v50 = vpack.c.bf16 %v2595_v39, %v2592_v43  ;;  %v2596_v35 = vld [vmem:[%s8747_s9 + $0x3c0] sm:$0xff]  ;;  %v2602_v7 = vld [vmem:[%s8747_s9 + $0x3f0] sm:$0xff] }
 0x2da   : > { %4751 = vmatpush1.bf16.msra.mxu0 %v4750_v16  ;;  %v4766_v16 = vpack.c.bf16 %v2575_v26, %v2572_v29  ;;  %v4780_v42 = vpack.c.bf16 %v2600_v28, %v2597_v57  ;;  %v2606_v29 = vld [vmem:[%s8747_s9 + $0x410] sm:$0xff]  ;;  %v2652_v26 = vld [vmem:[%s8747_s9 + $0x580] sm:$0xff]  ;;  %v2607_v8 = vld [vmem:[%s8747_s9 + $0x418] sm:$0xff] }
 0x2db   : > { %4753 = vmatprep.subr.bf16.mxu0 %v4752_v9  ;;  %v4768_v9 = vpack.c.bf16 %v2582_v48, %v2579_v55  ;;  %v2605_v55 = vld [vmem:[%s8747_s9 + $0x408] sm:$0xff]  ;;  %v2604_v33 = vld [vmem:[%s8747_s9 + $0x400] sm:$0xff]  ;;  %v2623_v43 = vld [vmem:[%s8747_s9 + $0x498] sm:$0xff] }
 0x2dc   : > { %4951 = vmatpush3.bf16.msra.mxu1 %v4950_v31  ;;  %v2634_v31 = vld [vmem:[%s8747_s9 + $0x4f0] sm:$0xff]  ;;  %v2627_v28 = vld [vmem:[%s8747_s9 + $0x4b8] sm:$0xff]  ;;  %vm9052_vm7 = vmmov %vm9039_vm1 }
 0x2dd   : > { %4953 = vmatprep.subr.bf16.mxu1 %v4952_v15  ;;  %v4770_v15 = vpack.c.bf16 %v2581_v0, %v2578_v24  ;;  %v2661_v24 = vld [vmem:[%s8747_s9 + $0x5c8] sm:$0xff]  ;;  %v4786_v0 = vpack.c.bf16 %v2605_v55, %v2602_v7  ;;  %vm9053_vm8 = vmmov %vm9040_vm6 }
 0x2de   : > { %4755 = vmatpush1.bf16.msra.mxu0 %v4754_v36  ;;  %v2637_v36 = vld [vmem:[%s8747_s9 + $0x508] sm:$0xff]  ;;  %vm9054_vm9 = vmmov %vm9040_vm6 }
 0x2df   : > { %4757 = vmatprep.subr.bf16.mxu0 %v4756_v4  ;;  %v4772_v4 = vpack.c.bf16 %v2588_v56, %v2585_v37  ;;  %v4972_v14 = vpack.c.bf16 %v2637_v36, %v2634_v31  ;;  %v2610_v37 = vld [vmem:[%s8747_s9 + $0x430] sm:$0xff]  ;;  %v2613_v56 = vld [vmem:[%s8747_s9 + $0x448] sm:$0xff]  ;;  %v2615_v31 = vld [vmem:[%s8747_s9 + $0x458] sm:$0xff] }
 0x2e0   : > { %4955 = vmatpush3.bf16.msra.mxu1 %v4954_v19  ;;  %v2640_v19 = vld [vmem:[%s8747_s9 + $0x520] sm:$0xff]  ;;  %v2618_v36 = vld [vmem:[%s8747_s9 + $0x470] sm:$0xff]  ;;  %vm9055_vm2 = vmmov %vm9039_vm1 }
 0x2e1   : > { %4957 = vmatprep.subr.bf16.mxu1 %v4956_v30  ;;  %v4774_v30 = vpack.c.bf16 %v2587_v58, %v2584_v61  ;;  %v4990_v58 = vpack.c.bf16 %v2613_v56, %v2610_v37  ;;  %v4792_v46 = vpack.c.bf16 %v2618_v36, %v2615_v31  ;;  %v2685_v37 = vld [vmem:[%s8747_s9 + $0x688] sm:$0xff]  ;;  %v2638_v56 = vld [vmem:[%s8747_s9 + $0x510] sm:$0xff] }
 0x2e2   : > { %4759 = vmatpush1.bf16.msra.mxu0 %v4758_v1  ;;  %v2643_v1 = vld [vmem:[%s8747_s9 + $0x538] sm:$0xff]  ;;  %v2641_v36 = vld [vmem:[%s8747_s9 + $0x528] sm:$0xff] }
 0x2e3   : > { %4761 = vmatprep.subr.bf16.mxu0 %v4760_v54  ;;  %v4776_v54 = vpack.c.bf16 %v2594_v62, %v2591_v45  ;;  %v4976_v11 = vpack.c.bf16 %v2643_v1, %v2640_v19  ;;  %v2616_v45 = vld [vmem:[%s8747_s9 + $0x460] sm:$0xff]  ;;  %v2619_v62 = vld [vmem:[%s8747_s9 + $0x478] sm:$0xff]  ;;  %v2621_v19 = vld [vmem:[%s8747_s9 + $0x488] sm:$0xff] }
 0x2e4   : > { %4959 = vmatpush3.bf16.msra.mxu1 %v4958_v23  ;;  %v2646_v23 = vld [vmem:[%s8747_s9 + $0x550] sm:$0xff]  ;;  %v2624_v1 = vld [vmem:[%s8747_s9 + $0x4a0] sm:$0xff] }
 0x2e5   : > { %4961 = vmatprep.subr.bf16.mxu1 %v4960_v18  ;;  %v4778_v18 = vpack.c.bf16 %v2593_v32, %v2590_v13  ;;  %v4994_v32 = vpack.c.bf16 %v2619_v62, %v2616_v45  ;;  %v2691_v45 = vld [vmem:[%s8747_s9 + $0x6b8] sm:$0xff]  ;;  %v2644_v62 = vld [vmem:[%s8747_s9 + $0x540] sm:$0xff] }
 0x2e6   : > { %4763 = vmatpush1.bf16.msra.mxu0 %v4762_v20  ;;  %v2649_v20 = vld [vmem:[%s8747_s9 + $0x568] sm:$0xff] }
 0x2e7   : > { %4765 = vmatprep.subr.bf16.mxu0 %v4764_v59  ;;  %v2599_v59 = vld [vmem:[%s8747_s9 + $0x3d8] sm:$0xff]  ;;  %v4980_v21 = vpack.c.bf16 %v2649_v20, %v2646_v23  ;;  %v2630_v23 = vld [vmem:[%s8747_s9 + $0x4d0] sm:$0xff] }
 0x2e8   : > { %4963 = vmatpush3.bf16.msra.mxu1 %v4962_v49  ;;  %v2598_v49 = vld [vmem:[%s8747_s9 + $0x3d0] sm:$0xff] }
 0x2e9   : > { %4965 = vmatprep.subr.bf16.mxu1 %v4964_v6  ;;  %v2601_v6 = vld [vmem:[%s8747_s9 + $0x3e8] sm:$0xff] }
 0x2ea   : > { %v4982_v41 = vpack.c.bf16 %v2601_v6, %v2598_v49  ;;  %v4800_v49 = vpack.c.bf16 %v2630_v23, %v2627_v28  ;;  %v2629_v6 = vld [vmem:[%s8747_s9 + $0x4c8] sm:$0xff]  ;;  %v2650_v28 = vld [vmem:[%s8747_s9 + $0x570] sm:$0xff] }
 0x335   : > { %v2250_v40 = vpop.f32.mrb[8].mxu0 }
 0x336   : > { %v2251_v47 = vadd.f32 %v2250_v40, %v7619_v27  ;;  %v2252_v38 = vpop.f32.mrb[9].mxu0  ;;  %v2603_v40 = vld [vmem:[%s8747_s9 + $0x3f8] sm:$0xff] }
 0x337   : > { %v2253_v51 = vadd.f32 %v2252_v38, %v7619_v27  ;;  %v4782_v38 = vpack.c.bf16 %v2599_v59, %v2596_v35  ;;  %v2670_v59 = vld [vmem:[%s8747_s9 + $0x610] sm:$0xff] }
 0x338   : > { %v2468_v44 = vmax.f32 %v2251_v47, 0.0  ;;  %v2655_v47 = vld [vmem:[%s8747_s9 + $0x598] sm:$0xff] }
 0x339   : > { %v2469_v25 = vmax.f32 %v2253_v51, 0.0  ;;  %v4784_v51 = vpack.c.bf16 %v2606_v29, %v2603_v40  ;;  %v4984_v48 = vpack.c.bf16 %v2655_v47, %v2652_v26  ;;  %v2724_v40 = vld [vmem:[%s8747_s9 + $0x7c0] sm:$0xff]  ;;  %v2727_v29 = vld [vmem:[%s8747_s9 + $0x7d8] sm:$0xff]  ;;  %v2633_v47 = vld [vmem:[%s8747_s9 + $0x4e8] sm:$0xff] }
 0x33b   : > { %2895 = vmatprep.mubr.f32.mxu0 %v2469_v25  ;;  %3179 = vmatprep.mubr.f32.mxu1 %v2469_v25  ;;  %v2609_v25 = vld [vmem:[%s8747_s9 + $0x428] sm:$0xff] }
 0x33c   : > { %2896 = vmatmul.mubr.f32.vlgmr.msra.gmra.mrb[12].mxu0 %v2468_v44  ;;  %3180 = vmatmul.mubr.f32.vlgmr.msra.gmra.mrb[12].mxu1 %v2468_v44  ;;  %v4986_v44 = vpack.c.bf16 %v2607_v8, %v2604_v33  ;;  %v2679_v33 = vld [vmem:[%s8747_s9 + $0x658] sm:$0xff]  ;;  %v2632_v8 = vld [vmem:[%s8747_s9 + $0x4e0] sm:$0xff] }
 0x33d   : > { %4767 = vmatpush1.bf16.msra.mxu0 %v4766_v16  ;;  %4967 = vmatpush3.bf16.msra.mxu1 %v4966_v34  ;;  %v2612_v16 = vld [vmem:[%s8747_s9 + $0x440] sm:$0xff]  ;;  %v2658_v34 = vld [vmem:[%s8747_s9 + $0x5b0] sm:$0xff] }
 0x33e   : > { %4769 = vmatprep.subr.bf16.mxu0 %v4768_v9  ;;  %4969 = vmatprep.subr.bf16.mxu1 %v4968_v52  ;;  %v2608_v9 = vld [vmem:[%s8747_s9 + $0x420] sm:$0xff]  ;;  %v2611_v52 = vld [vmem:[%s8747_s9 + $0x438] sm:$0xff]  ;;  %v4788_v12 = vpack.c.bf16 %v2612_v16, %v2609_v25  ;;  %v4988_v53 = vpack.c.bf16 %v2661_v24, %v2658_v34  ;;  %v2730_v34 = vld [vmem:[%s8747_s9 + $0x7f0] sm:$0xff] }
 0x33f   : > { %v4790_v61 = vpack.c.bf16 %v2611_v52, %v2608_v9  ;;  %v2635_v16 = vld [vmem:[%s8747_s9 + $0x4f8] sm:$0xff]  ;;  %v2733_v24 = vld [vmem:[%s8747_s9 + $0x808] sm:$0xff] }
 0x340   : > { %v4806_v52 = vpack.c.bf16 %v2635_v16, %v2632_v8  ;;  %v2706_v16 = vld [vmem:[%s8747_s9 + $0x730] sm:$0xff] }
 0x341   : > { %4771 = vmatpush1.bf16.msra.mxu0 %v4770_v15  ;;  %4971 = vmatpush3.bf16.msra.mxu1 %v4970_v22  ;;  %v2664_v15 = vld [vmem:[%s8747_s9 + $0x5e0] sm:$0xff]  ;;  %v2667_v22 = vld [vmem:[%s8747_s9 + $0x5f8] sm:$0xff] }
 0x342   : > { %4773 = vmatprep.subr.bf16.mxu0 %v4772_v4  ;;  %4973 = vmatprep.subr.bf16.mxu1 %v4972_v14  ;;  %v2614_v4 = vld [vmem:[%s8747_s9 + $0x450] sm:$0xff]  ;;  %v2617_v14 = vld [vmem:[%s8747_s9 + $0x468] sm:$0xff]  ;;  %v4992_v17 = vpack.c.bf16 %v2667_v22, %v2664_v15  ;;  %v2736_v15 = vld [vmem:[%s8747_s9 + $0x820] sm:$0xff] }
 0x343   : > { %v4794_v13 = vpack.c.bf16 %v2617_v14, %v2614_v4  ;;  %v2739_v22 = vld [vmem:[%s8747_s9 + $0x838] sm:$0xff]  ;;  %v4810_v14 = vpack.c.bf16 %v2641_v36, %v2638_v56  ;;  %v2712_v36 = vld [vmem:[%s8747_s9 + $0x760] sm:$0xff] }
 0x345   : > { %4775 = vmatpush1.bf16.msra.mxu0 %v4774_v30  ;;  %4975 = vmatpush3.bf16.msra.mxu1 %v4974_v63  ;;  %v2718_v30 = vld [vmem:[%s8747_s9 + $0x790] sm:$0xff]  ;;  %v2721_v63 = vld [vmem:[%s8747_s9 + $0x7a8] sm:$0xff] }
 0x346   : > { %4777 = vmatprep.subr.bf16.mxu0 %v4776_v54  ;;  %4977 = vmatprep.subr.bf16.mxu1 %v4976_v11  ;;  %v4796_v54 = vpack.c.bf16 %v2624_v1, %v2621_v19  ;;  %v2620_v11 = vld [vmem:[%s8747_s9 + $0x480] sm:$0xff]  ;;  %v4996_v39 = vpack.c.bf16 %v2721_v63, %v2718_v30  ;;  %v2647_v1 = vld [vmem:[%s8747_s9 + $0x558] sm:$0xff]  ;;  %v2742_v30 = vld [vmem:[%s8747_s9 + $0x850] sm:$0xff] }
 0x347   : > { %v4798_v35 = vpack.c.bf16 %v2623_v43, %v2620_v11  ;;  %v2745_v63 = vld [vmem:[%s8747_s9 + $0x868] sm:$0xff]  ;;  %v4814_v11 = vpack.c.bf16 %v2647_v1, %v2644_v62 }
 0x348   : > { %v5012_v43 = vpack.c.bf16 %v2745_v63, %v2742_v30  ;;  %v2766_v30 = vld [vmem:[%s8747_s9 + $0x910] sm:$0xff]  ;;  %v2769_v63 = vld [vmem:[%s8747_s9 + $0x928] sm:$0xff] }
 0x349   : > { %4779 = vmatpush1.bf16.msra.mxu0 %v4778_v18  ;;  %4979 = vmatpush3.bf16.msra.mxu1 %v4978_v50 }
 0x34a   : > { %4781 = vmatprep.subr.bf16.mxu0 %v4780_v42  ;;  %4981 = vmatprep.subr.bf16.mxu1 %v4980_v21  ;;  %v2673_v42 = vld [vmem:[%s8747_s9 + $0x628] sm:$0xff]  ;;  %v2626_v21 = vld [vmem:[%s8747_s9 + $0x4b0] sm:$0xff] }
 0x34b   : > { %v4802_v55 = vpack.c.bf16 %v2629_v6, %v2626_v21 }
 0x34d   : > { %4783 = vmatpush1.bf16.msra.mxu0 %v4782_v38  ;;  %4983 = vmatpush3.bf16.msra.mxu1 %v4982_v41  ;;  %v2636_v38 = vld [vmem:[%s8747_s9 + $0x500] sm:$0xff]  ;;  %v4998_v41 = vpack.c.bf16 %v2673_v42, %v2670_v59  ;;  %v2657_v59 = vld [vmem:[%s8747_s9 + $0x5a8] sm:$0xff] }
 0x34e   : > { %4785 = vmatprep.subr.bf16.mxu0 %v4784_v51  ;;  %4985 = vmatprep.subr.bf16.mxu1 %v4984_v48  ;;  %v5000_v51 = vpack.c.bf16 %v2727_v29, %v2724_v40  ;;  %v2676_v48 = vld [vmem:[%s8747_s9 + $0x640] sm:$0xff]  ;;  %v4804_v25 = vpack.c.bf16 %v2636_v38, %v2633_v47  ;;  %v2703_v29 = vld [vmem:[%s8747_s9 + $0x718] sm:$0xff] }
 0x34f   : > { %v5002_v9 = vpack.c.bf16 %v2679_v33, %v2676_v48  ;;  %v2660_v42 = vld [vmem:[%s8747_s9 + $0x5c0] sm:$0xff]  ;;  %v2659_v38 = vld [vmem:[%s8747_s9 + $0x5b8] sm:$0xff]  ;;  %v2666_v48 = vld [vmem:[%s8747_s9 + $0x5f0] sm:$0xff] }
 0x350   : > { %v2700_v40 = vld [vmem:[%s8747_s9 + $0x700] sm:$0xff]  ;;  %v4820_v47 = vpack.c.bf16 %v2660_v42, %v2657_v59  ;;  %v2683_v59 = vld [vmem:[%s8747_s9 + $0x678] sm:$0xff] }
 0x351   : > { %4787 = vmatpush1.bf16.msra.mxu0 %v4786_v0  ;;  %4987 = vmatpush3.bf16.msra.mxu1 %v4986_v44  ;;  %v2639_v0 = vld [vmem:[%s8747_s9 + $0x518] sm:$0xff]  ;;  %v2642_v44 = vld [vmem:[%s8747_s9 + $0x530] sm:$0xff]  ;;  %v5018_v33 = vpack.c.bf16 %v2703_v29, %v2700_v40  ;;  %v2781_v29 = vld [vmem:[%s8747_s9 + $0x988] sm:$0xff] }
 0x352   : > { %4789 = vmatprep.subr.bf16.mxu0 %v4788_v12  ;;  %4989 = vmatprep.subr.bf16.mxu1 %v4988_v53  ;;  %v5004_v12 = vpack.c.bf16 %v2733_v24, %v2730_v34  ;;  %v2682_v53 = vld [vmem:[%s8747_s9 + $0x670] sm:$0xff]  ;;  %v4808_v31 = vpack.c.bf16 %v2642_v44, %v2639_v0  ;;  %v2709_v34 = vld [vmem:[%s8747_s9 + $0x748] sm:$0xff]  ;;  %v2687_v42 = vld [vmem:[%s8747_s9 + $0x698] sm:$0xff] }
 0x353   : > { %v5006_v4 = vpack.c.bf16 %v2685_v37, %v2682_v53  ;;  %v2662_v24 = vld [vmem:[%s8747_s9 + $0x5d0] sm:$0xff]  ;;  %v2665_v44 = vld [vmem:[%s8747_s9 + $0x5e8] sm:$0xff]  ;;  %v2672_v53 = vld [vmem:[%s8747_s9 + $0x620] sm:$0xff]  ;;  %v5022_v37 = vpack.c.bf16 %v2709_v34, %v2706_v16 }
 0x354   : > { %v4826_v56 = vpack.c.bf16 %v2665_v44, %v2662_v24  ;;  %v2778_v40 = vld [vmem:[%s8747_s9 + $0x970] sm:$0xff]  ;;  %v2692_v16 = vld [vmem:[%s8747_s9 + $0x6c0] sm:$0xff]  ;;  %v2695_v34 = vld [vmem:[%s8747_s9 + $0x6d8] sm:$0xff] }
 0x355   : > { %4791 = vmatpush1.bf16.msra.mxu0 %v4790_v61  ;;  %4991 = vmatpush3.bf16.msra.mxu1 %v4990_v58  ;;  %v2645_v61 = vld [vmem:[%s8747_s9 + $0x548] sm:$0xff]  ;;  %v2648_v58 = vld [vmem:[%s8747_s9 + $0x560] sm:$0xff]  ;;  %v2699_v24 = vld [vmem:[%s8747_s9 + $0x6f8] sm:$0xff] }
 0x356   : > { %4793 = vmatprep.subr.bf16.mxu0 %v4792_v46  ;;  %4993 = vmatprep.subr.bf16.mxu1 %v4992_v17  ;;  %v5008_v46 = vpack.c.bf16 %v2739_v22, %v2736_v15  ;;  %v2688_v17 = vld [vmem:[%s8747_s9 + $0x6a0] sm:$0xff]  ;;  %v4812_v19 = vpack.c.bf16 %v2648_v58, %v2645_v61  ;;  %v2715_v15 = vld [vmem:[%s8747_s9 + $0x778] sm:$0xff] }
 0x357   : > { %v2321_v57 = vpop.f32.mrb[8].mxu1  ;;  %v2668_v61 = vld [vmem:[%s8747_s9 + $0x600] sm:$0xff]  ;;  %v2671_v58 = vld [vmem:[%s8747_s9 + $0x618] sm:$0xff] }
 0x358   : > { %v2323_v20 = vpop.f32.mrb[9].mxu1  ;;  %v7828_v18 = vadd.f32 %v2321_v57, %v7619_v27  ;;  %v2697_v57 = vld [vmem:[%s8747_s9 + $0x6e8] sm:$0xff]  ;;  %v4830_v1 = vpack.c.bf16 %v2671_v58, %v2668_v61  ;;  %v2796_v61 = vld [vmem:[%s8747_s9 + $0xa00] sm:$0xff]  ;;  %v2799_v58 = vld [vmem:[%s8747_s9 + $0xa18] sm:$0xff] }
 0x359   : > { %v2324_v50 = vadd.f32 %v2323_v20, %v7619_v27  ;;  %4795 = vmatpush1.bf16.msra.mxu0 %v4794_v13  ;;  %4995 = vmatpush3.bf16.msra.mxu1 %v4994_v32  ;;  %v2651_v13 = vld [vmem:[%s8747_s9 + $0x578] sm:$0xff]  ;;  %v2654_v32 = vld [vmem:[%s8747_s9 + $0x590] sm:$0xff]  ;;  %v2653_v20 = vld [vmem:[%s8747_s9 + $0x588] sm:$0xff] }
 0x35a   : > { %4797 = vmatprep.subr.bf16.mxu0 %v4796_v54  ;;  %4997 = vmatprep.subr.bf16.mxu1 %v4996_v39  ;;  %v2470_v7 = vmax.f32 %v7828_v18, 0.0  ;;  %v5010_v54 = vpack.c.bf16 %v2691_v45, %v2688_v17  ;;  %v2694_v39 = vld [vmem:[%s8747_s9 + $0x6d0] sm:$0xff]  ;;  %v4816_v23 = vpack.c.bf16 %v2654_v32, %v2651_v13  ;;  %v2675_v17 = vld [vmem:[%s8747_s9 + $0x638] sm:$0xff]  ;;  %v2677_v32 = vld [vmem:[%s8747_s9 + $0x648] sm:$0xff] }
 0x35b   : > { %v2471_v26 = vmax.f32 %v2324_v50, 0.0  ;;  %v2748_v50 = vld [vmem:[%s8747_s9 + $0x880] sm:$0xff]  ;;  %v5014_v21 = vpack.c.bf16 %v2697_v57, %v2694_v39  ;;  %v2678_v45 = vld [vmem:[%s8747_s9 + $0x650] sm:$0xff]  ;;  %v5029_v57 = vpack.c.bf16 %v2769_v63, %v2766_v30  ;;  %v2805_v63 = vld [vmem:[%s8747_s9 + $0xa48] sm:$0xff] }
 0x35c   : > { %v2674_v13 = vld [vmem:[%s8747_s9 + $0x630] sm:$0xff]  ;;  %v2684_v39 = vld [vmem:[%s8747_s9 + $0x680] sm:$0xff] }
 0x35d   : > { %4799 = vmatpush1.bf16.msra.mxu0 %v4798_v35  ;;  %2966 = vmatprep.mubr.f32.mxu0 %v2471_v26  ;;  %v2751_v35 = vld [vmem:[%s8747_s9 + $0x898] sm:$0xff]  ;;  %v2802_v30 = vld [vmem:[%s8747_s9 + $0xa30] sm:$0xff] }
 0x35e   : > { %3249 = vmatprep.mubr.f32.mxu1 %v2471_v26  ;;  %4801 = vmatprep.subr.bf16.mxu0 %v4800_v49  ;;  %v4818_v49 = vpack.c.bf16 %v2653_v20, %v2650_v28  ;;  %v5016_v6 = vpack.c.bf16 %v2751_v35, %v2748_v50  ;;  %v2656_v26 = vld [vmem:[%s8747_s9 + $0x5a0] sm:$0xff]  ;;  %v2775_v50 = vld [vmem:[%s8747_s9 + $0x958] sm:$0xff]  ;;  %v5779_v35 = vmov 0.0|0.0  }
 0x35f   : > { %3250 = vmatmul.mubr.f32.vlgmr.msra.gmra.mrb[14].mxu1 %v2470_v7  ;;  %v4822_v8 = vpack.c.bf16 %v2659_v38, %v2656_v26  ;;  %v2772_v20 = vld [vmem:[%s8747_s9 + $0x940] sm:$0xff]  ;;  %v2689_v38 = vld [vmem:[%s8747_s9 + $0x6a8] sm:$0xff] }
 0x360   : > { %4999 = vmatpush3.bf16.msra.mxu1 %v4998_v41  ;;  %v2754_v41 = vld [vmem:[%s8747_s9 + $0x8b0] sm:$0xff] }
 0x361   : > { %4803 = vmatpush1.bf16.msra.mxu0 %v4802_v55  ;;  %5001 = vmatprep.subr.bf16.mxu1 %v5000_v51  ;;  %v2757_v55 = vld [vmem:[%s8747_s9 + $0x8c8] sm:$0xff]  ;;  %v2663_v51 = vld [vmem:[%s8747_s9 + $0x5d8] sm:$0xff] }
 0x362   : > { %4805 = vmatprep.subr.bf16.mxu0 %v4804_v25  ;;  %v5020_v25 = vpack.c.bf16 %v2757_v55, %v2754_v41  ;;  %v4824_v0 = vpack.c.bf16 %v2666_v48, %v2663_v51  ;;  %v2693_v41 = vld [vmem:[%s8747_s9 + $0x6c8] sm:$0xff]  ;;  %v2696_v55 = vld [vmem:[%s8747_s9 + $0x6e0] sm:$0xff]  ;;  %v5035_v51 = vpack.c.bf16 %v2781_v29, %v2778_v40 }
 0x363   : > { %v2817_v40 = vld [vmem:[%s8747_s9 + $0xaa8] sm:$0xff] }
 0x364   : > { %5003 = vmatpush3.bf16.msra.mxu1 %v5002_v9  ;;  %v2760_v9 = vld [vmem:[%s8747_s9 + $0x8e0] sm:$0xff] }
 0x365   : > { %4807 = vmatpush1.bf16.msra.mxu0 %v4806_v52  ;;  %5005 = vmatprep.subr.bf16.mxu1 %v5004_v12  ;;  %v2763_v52 = vld [vmem:[%s8747_s9 + $0x8f8] sm:$0xff]  ;;  %v2669_v12 = vld [vmem:[%s8747_s9 + $0x608] sm:$0xff] }
 0x366   : > { %4809 = vmatprep.subr.bf16.mxu0 %v4808_v31  ;;  %v5024_v31 = vpack.c.bf16 %v2763_v52, %v2760_v9  ;;  %v4828_v22 = vpack.c.bf16 %v2672_v53, %v2669_v12  ;;  %v4846_v9 = vpack.c.bf16 %v2695_v34, %v2692_v16  ;;  %v2790_v52 = vld [vmem:[%s8747_s9 + $0x9d0] sm:$0xff]  ;;  %v2793_v12 = vld [vmem:[%s8747_s9 + $0x9e8] sm:$0xff]  ;;  %v2823_v16 = vld [vmem:[%s8747_s9 + $0xad8] sm:$0xff] }
 0x368   : > { %5007 = vmatpush3.bf16.msra.mxu1 %v5006_v4 }
 0x369   : > { %4811 = vmatpush1.bf16.msra.mxu0 %v4810_v14  ;;  %5009 = vmatprep.subr.bf16.mxu1 %v5008_v46  ;;  %v5026_v46 = vpack.c.bf16 %v2715_v15, %v2712_v36  ;;  %v2708_v36 = vld [vmem:[%s8747_s9 + $0x740] sm:$0xff]  ;;  %v5041_v15 = vpack.c.bf16 %v2793_v12, %v2790_v52  ;;  %v2738_v52 = vld [vmem:[%s8747_s9 + $0x830] sm:$0xff] }
 0x36a   : > { %4813 = vmatprep.subr.bf16.mxu0 %v4812_v19 }
 0x36c   : > { %5011 = vmatpush3.bf16.msra.mxu1 %v5010_v54 }
 0x36d   : > { %4815 = vmatpush1.bf16.msra.mxu0 %v4814_v11  ;;  %5013 = vmatprep.subr.bf16.mxu1 %v5012_v43  ;;  %v4832_v11 = vpack.c.bf16 %v2678_v45, %v2675_v17  ;;  %v2681_v43 = vld [vmem:[%s8747_s9 + $0x668] sm:$0xff]  ;;  %v2711_v17 = vld [vmem:[%s8747_s9 + $0x758] sm:$0xff]  ;;  %v2714_v45 = vld [vmem:[%s8747_s9 + $0x770] sm:$0xff] }
 0x36e   : > { %4817 = vmatprep.subr.bf16.mxu0 %v4816_v23  ;;  %v4834_v23 = vpack.c.bf16 %v2677_v32, %v2674_v13  ;;  %v4836_v18 = vpack.c.bf16 %v2684_v39, %v2681_v43  ;;  %v4856_v13 = vpack.c.bf16 %v2714_v45, %v2711_v17  ;;  %v2710_v32 = vld [vmem:[%s8747_s9 + $0x750] sm:$0xff]  ;;  %v2720_v43 = vld [vmem:[%s8747_s9 + $0x7a0] sm:$0xff]  ;;  %v5047_v39 = vpack.c.bf16 %v2805_v63, %v2802_v30  ;;  %v2747_v17 = vld [vmem:[%s8747_s9 + $0x878] sm:$0xff] }
 0x36f   : > { %v2750_v45 = vld [vmem:[%s8747_s9 + $0x890] sm:$0xff]  ;;  %v2749_v63 = vld [vmem:[%s8747_s9 + $0x888] sm:$0xff] }
 0x370   : > { %5015 = vmatpush3.bf16.msra.mxu1 %v5014_v21  ;;  %v2690_v21 = vld [vmem:[%s8747_s9 + $0x6b0] sm:$0xff] }
 0x371   : > { %4819 = vmatpush1.bf16.msra.mxu0 %v4818_v49  ;;  %5017 = vmatprep.subr.bf16.mxu1 %v5016_v6  ;;  %v5032_v49 = vpack.c.bf16 %v2775_v50, %v2772_v20  ;;  %v4840_v26 = vpack.c.bf16 %v2690_v21, %v2687_v42  ;;  %v2811_v20 = vld [vmem:[%s8747_s9 + $0xa78] sm:$0xff]  ;;  %v2726_v42 = vld [vmem:[%s8747_s9 + $0x7d0] sm:$0xff] }
 0x372   : > { %4821 = vmatprep.subr.bf16.mxu0 %v4820_v47  ;;  %v2686_v47 = vld [vmem:[%s8747_s9 + $0x690] sm:$0xff] }
 0x373   : > { %v4842_v48 = vpack.c.bf16 %v2689_v38, %v2686_v47  ;;  %v2722_v47 = vld [vmem:[%s8747_s9 + $0x7b0] sm:$0xff]  ;;  %v2725_v38 = vld [vmem:[%s8747_s9 + $0x7c8] sm:$0xff] }
 0x374   : > { %5019 = vmatpush3.bf16.msra.mxu1 %v5018_v33  ;;  %v2784_v33 = vld [vmem:[%s8747_s9 + $0x9a0] sm:$0xff]  ;;  %v2746_v30 = vld [vmem:[%s8747_s9 + $0x870] sm:$0xff] }
 0x375   : > { %4823 = vmatpush1.bf16.msra.mxu0 %v4822_v8  ;;  %5021 = vmatprep.subr.bf16.mxu1 %v5020_v25  ;;  %v2787_v8 = vld [vmem:[%s8747_s9 + $0x9b8] sm:$0xff]  ;;  %v4844_v25 = vpack.c.bf16 %v2696_v55, %v2693_v41  ;;  %v2729_v55 = vld [vmem:[%s8747_s9 + $0x7e8] sm:$0xff] }
 0x376   : > { %4825 = vmatprep.subr.bf16.mxu0 %v4824_v0  ;;  %v2702_v0 = vld [vmem:[%s8747_s9 + $0x710] sm:$0xff]  ;;  %v5038_v44 = vpack.c.bf16 %v2787_v8, %v2784_v33  ;;  %v4866_v8 = vpack.c.bf16 %v2725_v38, %v2722_v47 }
 0x377   : > { %v2392_v4 = vpop.f32.mrb[10].mxu0  ;;  %v4848_v53 = vpack.c.bf16 %v2702_v0, %v2699_v24  ;;  %v2728_v0 = vld [vmem:[%s8747_s9 + $0x7e0] sm:$0xff] }
 0x378   : > { %5023 = vmatpush3.bf16.msra.mxu1 %v5022_v37  ;;  %v2394_v14 = vpop.f32.mrb[11].mxu0  ;;  %v8021_v62 = vadd.f32 %v2392_v4, %v7619_v27  ;;  %v2698_v37 = vld [vmem:[%s8747_s9 + $0x6f0] sm:$0xff] }
 0x379   : > { %v2395_v19 = vadd.f32 %v2394_v14, %v7619_v27  ;;  %4827 = vmatpush1.bf16.msra.mxu0 %v4826_v56  ;;  %5025 = vmatprep.subr.bf16.mxu1 %v5024_v31  ;;  %v2701_v56 = vld [vmem:[%s8747_s9 + $0x708] sm:$0xff]  ;;  %v2704_v14 = vld [vmem:[%s8747_s9 + $0x720] sm:$0xff] }
 0x37a   : > { %4829 = vmatprep.subr.bf16.mxu0 %v4828_v22  ;;  %v2472_v28 = vmax.f32 %v8021_v62, 0.0  ;;  %v2705_v31 = vld [vmem:[%s8747_s9 + $0x728] sm:$0xff]  ;;  %v4850_v22 = vpack.c.bf16 %v2701_v56, %v2698_v37  ;;  %v2734_v56 = vld [vmem:[%s8747_s9 + $0x810] sm:$0xff]  ;;  %v2783_v62 = vld [vmem:[%s8747_s9 + $0x998] sm:$0xff] }
 0x37b   : > { %v2473_v54 = vmax.f32 %v2395_v19, 0.0  ;;  %v4852_v4 = vpack.c.bf16 %v2708_v36, %v2705_v31  ;;  %v5044_v19 = vpack.c.bf16 %v2799_v58, %v2796_v61  ;;  %v2737_v31 = vld [vmem:[%s8747_s9 + $0x828] sm:$0xff]  ;;  %v2826_v61 = vld [vmem:[%s8747_s9 + $0xaf0] sm:$0xff] }
 0x37c   : > { %5027 = vmatpush3.bf16.msra.mxu1 %v5026_v46  ;;  %2967 = vmatmul.mubr.f32.vlgmr.msra.gmra.mrb[12].mxu0 %v2470_v7  ;;  %v2680_v7 = vld [vmem:[%s8747_s9 + $0x660] sm:$0xff]  ;;  %v2707_v46 = vld [vmem:[%s8747_s9 + $0x738] sm:$0xff]  ;;  %v4874_v58 = vpack.c.bf16 %v2737_v31, %v2734_v56 }
 0x37d   : > { %4831 = vmatpush1.bf16.msra.mxu0 %v4830_v1  ;;  %3037 = vmatprep.mubr.f32.mxu0 %v2473_v54  ;;  %v4838_v6 = vpack.c.bf16 %v2683_v59, %v2680_v7  ;;  %v4854_v1 = vpack.c.bf16 %v2707_v46, %v2704_v14  ;;  %v2719_v7 = vld [vmem:[%s8747_s9 + $0x798] sm:$0xff] }
 0x37e   : > { %3319 = vmatprep.mubr.f32.mxu1 %v2473_v54  ;;  %5028 = vmatprep.subr.bf16.mxu1 %v5779_v35  ;;  %v2713_v54 = vld [vmem:[%s8747_s9 + $0x768] sm:$0xff]  ;;  %v2723_v59 = vld [vmem:[%s8747_s9 + $0x7b8] sm:$0xff] }
 0x37f   : > { %3320 = vmatmul.mubr.f32.vlgmr.msra.gmra.mrb[16].mxu1 %v2472_v28  ;;  %4833 = vmatprep.subr.bf16.mxu0 %v4832_v11  ;;  %v2717_v11 = vld [vmem:[%s8747_s9 + $0x788] sm:$0xff]  ;;  %v2743_v14 = vld [vmem:[%s8747_s9 + $0x858] sm:$0xff] }
 0x380   : > { %5030 = vmatpush1.bf16.msra.mxu1 %v5029_v57  ;;  %v4858_v57 = vpack.c.bf16 %v2713_v54, %v2710_v32  ;;  %v4860_v50 = vpack.c.bf16 %v2720_v43, %v2717_v11  ;;  %v2756_v32 = vld [vmem:[%s8747_s9 + $0x8c0] sm:$0xff]  ;;  %v4882_v54 = vpack.c.bf16 %v2749_v63, %v2746_v30  ;;  %v2791_v56 = vld [vmem:[%s8747_s9 + $0x9d8] sm:$0xff]  ;;  %v2810_v63 = vld [vmem:[%s8747_s9 + $0xa70] sm:$0xff] }
 0x381   : > { %4835 = vmatpush1.bf16.msra.mxu0 %v4834_v23  ;;  %5031 = vmatprep.subr.bf16.mxu1 %v5779_v35  ;;  %v2808_v23 = vld [vmem:[%s8747_s9 + $0xa60] sm:$0xff]  ;;  %v2795_v31 = vld [vmem:[%s8747_s9 + $0x9f8] sm:$0xff] }
 0x382   : > { %4837 = vmatprep.subr.bf16.mxu0 %v4836_v18  ;;  %v2716_v18 = vld [vmem:[%s8747_s9 + $0x780] sm:$0xff]  ;;  %v5050_v21 = vpack.c.bf16 %v2811_v20, %v2808_v23  ;;  %v2762_v23 = vld [vmem:[%s8747_s9 + $0x8f0] sm:$0xff]  ;;  %v2807_v30 = vld [vmem:[%s8747_s9 + $0xa58] sm:$0xff] }
 0x383   : > { %v2752_v43 = vld [vmem:[%s8747_s9 + $0x8a0] sm:$0xff] }
 0x384   : > { %5033 = vmatpush1.bf16.msra.mxu1 %v5032_v49  ;;  %v4862_v49 = vpack.c.bf16 %v2719_v7, %v2716_v18  ;;  %v2758_v18 = vld [vmem:[%s8747_s9 + $0x8d0] sm:$0xff]  ;;  %v2761_v7 = vld [vmem:[%s8747_s9 + $0x8e8] sm:$0xff] }
 0x385   : > { %4839 = vmatpush1.bf16.msra.mxu0 %v4838_v6  ;;  %5034 = vmatprep.subr.bf16.mxu1 %v5779_v35  ;;  %v2814_v6 = vld [vmem:[%s8747_s9 + $0xa90] sm:$0xff] }
 0x386   : > { %4841 = vmatprep.subr.bf16.mxu0 %v4840_v26  ;;  %v4864_v26 = vpack.c.bf16 %v2726_v42, %v2723_v59  ;;  %v5053_v33 = vpack.c.bf16 %v2817_v40, %v2814_v6  ;;  %v2765_v59 = vld [vmem:[%s8747_s9 + $0x908] sm:$0xff]  ;;  %v2768_v42 = vld [vmem:[%s8747_s9 + $0x920] sm:$0xff]  ;;  %v2767_v40 = vld [vmem:[%s8747_s9 + $0x918] sm:$0xff] }
 0x387   : > { %v2764_v6 = vld [vmem:[%s8747_s9 + $0x900] sm:$0xff] }
 0x388   : > { %5036 = vmatpush1.bf16.msra.mxu1 %v5035_v51  ;;  %v2732_v51 = vld [vmem:[%s8747_s9 + $0x800] sm:$0xff]  ;;  %v4894_v47 = vpack.c.bf16 %v2767_v40, %v2764_v6  ;;  %v2825_v40 = vld [vmem:[%s8747_s9 + $0xae8] sm:$0xff] }
 0x389   : > { %4843 = vmatpush1.bf16.msra.mxu0 %v4842_v48  ;;  %5037 = vmatprep.subr.bf16.mxu1 %v5779_v35  ;;  %v4868_v24 = vpack.c.bf16 %v2732_v51, %v2729_v55  ;;  %v2773_v55 = vld [vmem:[%s8747_s9 + $0x948] sm:$0xff] }
 0x38a   : > { %4845 = vmatprep.subr.bf16.mxu0 %v4844_v25  ;;  %v2820_v25 = vld [vmem:[%s8747_s9 + $0xac0] sm:$0xff]  ;;  %v2777_v51 = vld [vmem:[%s8747_s9 + $0x968] sm:$0xff] }
 0x38b   : > { %v5056_v12 = vpack.c.bf16 %v2823_v16, %v2820_v25  ;;  %v2776_v16 = vld [vmem:[%s8747_s9 + $0x960] sm:$0xff] }
 0x38c   : > { %5039 = vmatpush1.bf16.msra.mxu1 %v5038_v44  ;;  %v2731_v44 = vld [vmem:[%s8747_s9 + $0x7f8] sm:$0xff] }
 0x38d   : > { %4847 = vmatpush1.bf16.msra.mxu0 %v4846_v9  ;;  %5040 = vmatprep.subr.bf16.mxu1 %v5779_v35  ;;  %v2735_v9 = vld [vmem:[%s8747_s9 + $0x818] sm:$0xff] }
 0x38e   : > { %4849 = vmatprep.subr.bf16.mxu0 %v4848_v53  ;;  %v4870_v53 = vpack.c.bf16 %v2731_v44, %v2728_v0  ;;  %v4872_v37 = vpack.c.bf16 %v2738_v52, %v2735_v9  ;;  %v2782_v0 = vld [vmem:[%s8747_s9 + $0x990] sm:$0xff]  ;;  %v2785_v44 = vld [vmem:[%s8747_s9 + $0x9a8] sm:$0xff]  ;;  %v2792_v52 = vld [vmem:[%s8747_s9 + $0x9e0] sm:$0xff] }
 0x38f   : > { %v2789_v9 = vld [vmem:[%s8747_s9 + $0x9c8] sm:$0xff] }
 0x390   : > { %5042 = vmatpush1.bf16.msra.mxu1 %v5041_v15  ;;  %v2741_v15 = vld [vmem:[%s8747_s9 + $0x848] sm:$0xff] }
 0x391   : > { %4851 = vmatpush1.bf16.msra.mxu0 %v4850_v22  ;;  %5043 = vmatprep.subr.bf16.mxu1 %v5779_v35  ;;  %v2744_v22 = vld [vmem:[%s8747_s9 + $0x860] sm:$0xff] }
 0x392   : > { %4853 = vmatprep.subr.bf16.mxu0 %v4852_v4  ;;  %v2740_v4 = vld [vmem:[%s8747_s9 + $0x840] sm:$0xff] }
 0x394   : > { %5045 = vmatpush1.bf16.msra.mxu1 %v5044_v19  ;;  %v4878_v19 = vpack.c.bf16 %v2743_v14, %v2740_v4  ;;  %v2801_v4 = vld [vmem:[%s8747_s9 + $0xa28] sm:$0xff]  ;;  %v2804_v14 = vld [vmem:[%s8747_s9 + $0xa40] sm:$0xff] }
 0x395   : > { %4855 = vmatpush1.bf16.msra.mxu0 %v4854_v1  ;;  %5046 = vmatprep.subr.bf16.mxu1 %v5779_v35  ;;  %v4880_v1 = vpack.c.bf16 %v2750_v45, %v2747_v17  ;;  %v4916_v45 = vpack.c.bf16 %v2804_v14, %v2801_v4 }
 0x396   : > { %4857 = vmatprep.subr.bf16.mxu0 %v4856_v13  ;;  %v2753_v13 = vld [vmem:[%s8747_s9 + $0x8a8] sm:$0xff] }
 0x397   : > { %v4884_v11 = vpack.c.bf16 %v2756_v32, %v2753_v13  ;;  %v4920_v32 = vpack.c.bf16 %v2810_v63, %v2807_v30 }
 0x398   : > { %5048 = vmatpush1.bf16.msra.mxu1 %v5047_v39  ;;  %v2755_v39 = vld [vmem:[%s8747_s9 + $0x8b8] sm:$0xff] }
 0x399   : > { %4859 = vmatpush1.bf16.msra.mxu0 %v4858_v57  ;;  %5049 = vmatprep.subr.bf16.mxu1 %v5779_v35  ;;  %v2759_v57 = vld [vmem:[%s8747_s9 + $0x8d8] sm:$0xff]  ;;  %v4886_v20 = vpack.c.bf16 %v2755_v39, %v2752_v43  ;;  %v2813_v43 = vld [vmem:[%s8747_s9 + $0xa88] sm:$0xff]  ;;  %v2816_v39 = vld [vmem:[%s8747_s9 + $0xaa0] sm:$0xff] }
 0x39a   : > { %4861 = vmatprep.subr.bf16.mxu0 %v4860_v50  ;;  %v4888_v50 = vpack.c.bf16 %v2762_v23, %v2759_v57  ;;  %v4924_v23 = vpack.c.bf16 %v2816_v39, %v2813_v43 }
 0x39c   : > { %5051 = vmatpush1.bf16.msra.mxu1 %v5050_v21  ;;  %v4890_v21 = vpack.c.bf16 %v2761_v7, %v2758_v18  ;;  %v2819_v18 = vld [vmem:[%s8747_s9 + $0xab8] sm:$0xff]  ;;  %v2822_v7 = vld [vmem:[%s8747_s9 + $0xad0] sm:$0xff] }
 0x39d   : > { %4863 = vmatpush1.bf16.msra.mxu0 %v4862_v49  ;;  %5052 = vmatprep.subr.bf16.mxu1 %v5779_v35  ;;  %v4892_v49 = vpack.c.bf16 %v2768_v42, %v2765_v59  ;;  %v4928_v42 = vpack.c.bf16 %v2822_v7, %v2819_v18 }
 0x39e   : > { %v2463_v29 = vpop.f32.mrb[10].mxu1  ;;  %4865 = vmatprep.subr.bf16.mxu0 %v4864_v26  ;;  %v2774_v26 = vld [vmem:[%s8747_s9 + $0x950] sm:$0xff] }
 0x39f   : > { %v2465_v41 = vpop.f32.mrb[11].mxu1  ;;  %v8233_v36 = vadd.f32 %v2463_v29, %v7619_v27  ;;  %v2771_v29 = vld [vmem:[%s8747_s9 + $0x938] sm:$0xff] }
 0x3a0   : > { %v8200_v48 = vadd.f32 %v2465_v41, %v7619_v27  ;;  %5054 = vmatpush1.bf16.msra.mxu1 %v5053_v33  ;;  %v4876_v27 = vpack.c.bf16 %v2744_v22, %v2741_v15  ;;  %v4896_v38 = vpack.c.bf16 %v2774_v26, %v2771_v29  ;;  %v2770_v41 = vld [vmem:[%s8747_s9 + $0x930] sm:$0xff]  ;;  %v2780_v33 = vld [vmem:[%s8747_s9 + $0x980] sm:$0xff] }
 0x3a1   : > { %4867 = vmatpush1.bf16.msra.mxu0 %v4866_v8  ;;  %5055 = vmatprep.subr.bf16.mxu1 %v5779_v35  ;;  %v2474_v46 = vmax.f32 %v8233_v36, 0.0  ;;  %v4898_v8 = vpack.c.bf16 %v2773_v55, %v2770_v41  ;;  %v4900_v25 = vpack.c.bf16 %v2780_v33, %v2777_v51  ;;  %v2798_v15 = vld [vmem:[%s8747_s9 + $0xa10] sm:$0xff]  ;;  %v2824_v29 = vld [vmem:[%s8747_s9 + $0xae0] sm:$0xff] }
 0x3a2   : > { %v2475_v34 = vmax.f32 %v8200_v48, 0.0  ;;  %4869 = vmatprep.subr.bf16.mxu0 %v4868_v24  ;;  %v2779_v24 = vld [vmem:[%s8747_s9 + $0x978] sm:$0xff] }
 0x3a3   : > { %v4902_v48 = vpack.c.bf16 %v2779_v24, %v2776_v16 }
 0x3a4   : > { %4385 = vmatprep.mubr.msk.f32.mxu1 %vm2827_vm14, %v2475_v34  ;;  %5057 = vmatpush1.bf16.msra.mxu1 %v5056_v12  ;;  %v4906_v12 = vpack.c.bf16 %v2785_v44, %v2782_v0 }
 0x3a5   : > { %4871 = vmatpush1.bf16.msra.mxu0 %v4870_v53  ;;  %3365 = vmatprep.subr.mxu1 %v8923_v10  ;;  %v4908_v53 = vpack.c.bf16 %v2792_v52, %v2789_v9 }
 0x3a6   : > { %4873 = vmatprep.subr.bf16.mxu0 %v4872_v37  ;;  %v2788_v37 = vld [vmem:[%s8747_s9 + $0x9c0] sm:$0xff] }
 0x3a7   : > { %v4910_v22 = vpack.c.bf16 %v2791_v56, %v2788_v37 }
 0x3a8   : > { %3366 = vmatpush1.msra.mxu1 %v2826_v61  ;;  %v4912_v61 = vpack.c.bf16 %v2798_v15, %v2795_v31 }
 0x3a9   : > { %3390 = vmatmul.mubr.f32.vlgmr.msra.gmra.mrb[18].mxu1 %v2474_v46  ;;  %4875 = vmatpush1.bf16.msra.mxu0 %v4874_v58  ;;  %v2794_v58 = vld [vmem:[%s8747_s9 + $0x9f0] sm:$0xff] }
 0x3aa   : > { %4877 = vmatprep.subr.bf16.mxu0 %v4876_v27  ;;  %5074 = vmatprep.subr.bf16.mxu1 %v5779_v35  ;;  %v2797_v27 = vld [vmem:[%s8747_s9 + $0xa08] sm:$0xff] }
 0x3ab   : > { %v4914_v17 = vpack.c.bf16 %v2797_v27, %v2794_v58  ;;  %4540 = vmatprep.mubr.msk.f32.mxu1 %vm5786_vm12, %v8923_v10 }
 0x3ad   : > { %4879 = vmatpush1.bf16.msra.mxu0 %v4878_v19  ;;  %v2800_v19 = vld [vmem:[%s8747_s9 + $0xa20] sm:$0xff] }
 0x3ae   : > { %4881 = vmatprep.subr.bf16.mxu0 %v4880_v1  ;;  %v2803_v1 = vld [vmem:[%s8747_s9 + $0xa38] sm:$0xff] }
 0x3af   : > { %v4918_v13 = vpack.c.bf16 %v2803_v1, %v2800_v19 }
 0x3b1   : > { %4883 = vmatpush1.bf16.msra.mxu0 %v4882_v54  ;;  %v2806_v54 = vld [vmem:[%s8747_s9 + $0xa50] sm:$0xff] }
 0x3b2   : > { %4885 = vmatprep.subr.bf16.mxu0 %v4884_v11  ;;  %v2809_v11 = vld [vmem:[%s8747_s9 + $0xa68] sm:$0xff] }
 0x3b3   : > { %v4922_v57 = vpack.c.bf16 %v2809_v11, %v2806_v54 }
 0x3b5   : > { %4887 = vmatpush1.bf16.msra.mxu0 %v4886_v20  ;;  %v2812_v20 = vld [vmem:[%s8747_s9 + $0xa80] sm:$0xff] }
 0x3b6   : > { %4889 = vmatprep.subr.bf16.mxu0 %v4888_v50  ;;  %v2815_v50 = vld [vmem:[%s8747_s9 + $0xa98] sm:$0xff] }
 0x3b7   : > { %v4926_v59 = vpack.c.bf16 %v2815_v50, %v2812_v20 }
 0x3b9   : > { %4891 = vmatpush1.bf16.msra.mxu0 %v4890_v21  ;;  %v2818_v21 = vld [vmem:[%s8747_s9 + $0xab0] sm:$0xff] }
 0x3ba   : > { %4893 = vmatprep.subr.bf16.mxu0 %v4892_v49  ;;  %v2821_v49 = vld [vmem:[%s8747_s9 + $0xac8] sm:$0xff] }
 0x3bb   : > { %v4930_v6 = vpack.c.bf16 %v2821_v49, %v2818_v21 }
 0x3bc   : > { %3038 = vmatmul.mubr.f32.vlgmr.msra.gmra.mrb[12].mxu0 %v2472_v28  ;;  %v2786_v28 = vld [vmem:[%s8747_s9 + $0x9b0] sm:$0xff] }
 0x3bd   : > { %4895 = vmatpush1.bf16.msra.mxu0 %v4894_v47  ;;  %4384 = vmatprep.mubr.msk.f32.mxu0 %vm2827_vm14, %v2475_v34  ;;  %v4904_v34 = vpack.c.bf16 %v2786_v28, %v2783_v62  ;;  %vm9057_vm14 = vmmov %vm9056_vm0 }
 0x3be   : > { %4897 = vmatprep.subr.bf16.mxu0 %v4896_v38 }
 0x3c1   : > { %4899 = vmatpush1.bf16.msra.mxu0 %v4898_v8 }
 0x3c2   : > { %4901 = vmatprep.subr.bf16.mxu0 %v4900_v25 }
 0x3c5   : > { %4903 = vmatpush1.bf16.msra.mxu0 %v4902_v48 }
 0x3c6   : > { %4905 = vmatprep.subr.bf16.mxu0 %v4904_v34 }
 0x3c9   : > { %4907 = vmatpush1.bf16.msra.mxu0 %v4906_v12 }
 0x3ca   : > { %4909 = vmatprep.subr.bf16.mxu0 %v4908_v53 }
 0x3cd   : > { %4911 = vmatpush1.bf16.msra.mxu0 %v4910_v22 }
 0x3ce   : > { %4913 = vmatprep.subr.bf16.mxu0 %v4912_v61 }
 0x3d1   : > { %4915 = vmatpush1.bf16.msra.mxu0 %v4914_v17 }
 0x3d2   : > { %4917 = vmatprep.subr.bf16.mxu0 %v4916_v45 }
 0x3d5   : > { %4919 = vmatpush1.bf16.msra.mxu0 %v4918_v13 }
 0x3d6   : > { %4921 = vmatprep.subr.bf16.mxu0 %v4920_v32 }
 0x3d9   : > { %4923 = vmatpush1.bf16.msra.mxu0 %v4922_v57 }
 0x3da   : > { %4925 = vmatprep.subr.bf16.mxu0 %v4924_v23 }
 0x3dd   : > { %4927 = vmatpush1.bf16.msra.mxu0 %v4926_v59 }
 0x3de   : > { %4929 = vmatprep.subr.bf16.mxu0 %v4928_v42 }
 0x3e1   : > { %4931 = vmatpush1.bf16.msra.mxu0 %v4930_v6 }
 0x3e2   : > { %3084 = vmatprep.subr.mxu0 %v2825_v40 }
 0x3e5   : > { %3085 = vmatpush1.msra.mxu0 %v2824_v29 }
 0x3e6   : > { %3109 = vmatmul.mubr.f32.vlgmr.msra.gmra.mrb[12].mxu0 %v2474_v46 }
 0x3e7   : > { %3599 = vmatprep.mubr.f32.mxu0 %v8923_v10 }
 0x40f   : > { %v4433_v26 = vpop.f32.mrb[12].mxu1 }
 0x410   : > { %v4434_v47 = vpop.f32.mrb[13].mxu1 }
 0x411   : > { %v4435_v38 = vadd.f32 %v4434_v47, %v4433_v26 }
 0x432   : > { %v4468_v41 = vpop.f32.mrb[14].mxu1 }
 0x433   : > { %v4469_v55 = vpop.f32.mrb[15].mxu1 }
 0x434   : > { %v4470_v51 = vadd.f32 %v4469_v55, %v4468_v41 }
 0x436   : > { %v3252_v33 = vadd.f32 %v4470_v51, %v4435_v38 }
 0x452   : > { %v4503_v8 = vpop.f32.mrb[16].mxu1 }
 0x453   : > { %v4504_v25 = vpop.f32.mrb[17].mxu1 }
 0x454   : > { %v4505_v16 = vadd.f32 %v4504_v25, %v4503_v8 }
 0x456   : > { %v3322_v24 = vadd.f32 %v4505_v16, %v3252_v33 }
 0x47c   : > { %v3391_v62 = vpop.f32.mrb[18].mxu1 }
 0x47d   : > { %v8425_v28 = vadd.f32 %v3391_v62, %v3322_v24  ;;  %v3393_v48 = vpop.f32.mrb[19].mxu1 }
 0x47f   : > { %3415 = vrot.lane.b32.xlu1 %v8425_v28, %s5780_s28  ;;  %3398 = vrot.lane.b32.xlu0 %v8425_v28, %s8825_s29  ;;  %s561_s29 = scalar_lea.vmem %s8744_s6, %s4353_s19 }
 0x480   : > { %v3396_v44 = vld [vmem:[%s561_s29] sm:$0xf]  ;;  %s4355_s29 = sshll.u32 %s9086_s26, 1 }
 0x483   : > { %3422 = vrot.lane.b32.xlu1 %v8425_v28, %s8888_s22  ;;  %3407 = vrot.lane.b32.xlu0 %v8425_v28, %s8884_s15 }
 0x487   : > { %3445 = vrot.lane.b32.xlu1 %v8425_v28, %s5782_s18  ;;  %3430 = vrot.lane.b32.xlu0 %v8425_v28, %s8826_s21  ;;  %s5788_s21 = smov 9  }
 0x48b   : > { %3452 = vrot.lane.b32.xlu1 %v8425_v28, %s9048_s24  ;;  %3437 = vrot.lane.b32.xlu0 %v8425_v28, %s8894_s23 }
 0x4b9   : > { %v8443_v36 = vpop.f32.mrb[12].mxu0 }
 0x4ba   : > { %3471 = vrot.lane.b32.xlu0 %v8443_v36, %s8824_s14  ;;  %3460 = vrot.lane.b32.xlu1 %v8443_v36, %s9049_s27  ;;  %v8449_v46 = vpop.f32.mrb[13].mxu0  ;;  %s9058_s14 = smov 117  }
 0x4bb   : > { %v5687_v34 = vpack.i.bf16 %v8449_v46, %v8443_v36  ;;  %v5702_v0 = vpack.i.bf16 %v8425_v28, %v8449_v46 }
 0x4be   : > { %3493 = vrot.lane.b32.xlu0 %v8443_v36, %s9050_s16  ;;  %3476 = vrot.lane.b32.xlu1 %v8443_v36, %s9051_s0 }
 0x4c2   : > { %5688 = vrot.lane.b32.xlu1 %v5687_v34, %s8888_s22  ;;  %5683 = vrot.lane.b32.xlu0 %v5687_v34, %s8884_s15 }
 0x4c6   : > { %5698 = vrot.lane.b32.xlu1 %v5687_v34, %s9048_s24  ;;  %5693 = vrot.lane.b32.xlu0 %v5687_v34, %s8894_s23 }
 0x4ca   : > { %3488 = vrot.lane.b32.xlu1 %v8443_v36, %s8823_s17  ;;  %5703 = vrot.lane.b32.xlu0 %v5702_v0, %s9049_s27  ;;  %s557_s17 = scalar_lea.vmem %s8743_s5, %s4353_s19  ;;  %s5789_s19 = smov 116  }
 0x4ce   : > { %5708 = vrot.lane.b32.xlu1 %v5702_v0, %s9051_s0  ;;  %5713 = vrot.lane.b32.xlu0 %v5702_v0, %s9050_s16 }
 0x4d2   : > { %3512 = vrot.lane.b32.xlu1 %v8449_v46, %s8876_s30  ;;  %3505 = vrot.lane.b32.xlu0 %v8443_v36, %s5787_s20 }
 0x4d6   : > { %3510 = vrot.lane.b32.xlu1 %v8443_v36, %s8876_s30  ;;  %3514 = vrot.lane.b32.xlu0 %v8425_v28, %s8876_s30 }
 0x4da   : > { %3528 = vperm.xlu1 %5321, %v3396_v44   ;;  %3522 = vrot.lane.b32.xlu0 %v8443_v36, %s5788_s21 }
 0x4f1   : > { %v3416_v9 = vpop.permute.xlu1 %3415  ;;  %v3399_v52 = vpop.permute.xlu0 %3398 }
 0x4f5   : > { %v3423_v12 = vpop.permute.xlu1 %3422  ;;  %v3408_v53 = vpop.permute.xlu0 %3407 }
 0x4f9   : > { %v3446_v37 = vpop.permute.xlu1 %3445  ;;  %v3431_v56 = vpop.permute.xlu0 %3430 }
 0x4fd   : > { %v3453_v31 = vpop.permute.xlu1 %3452  ;;  %v3438_v15 = vpop.permute.xlu0 %3437 }
 0x52c   : > { %v3472_v22 = vpop.permute.xlu0 %3471  ;;  %v3461_v61 = vpop.permute.xlu1 %3460 }
 0x530   : > { %v8486_v58 = vpop.permute.xlu0 %3493  ;;  %v8488_v27 = vpop.permute.xlu1 %3476 }
 0x534   : > { %v5689_v4 = vpop.permute.xlu1 %5688  ;;  %v5684_v14 = vpop.permute.xlu0 %5683 }
 0x535   : > { %v5691_v17 = vunpack.i.h.bf16 %v5689_v4  ;;  %v5690_v45 = vunpack.i.l.bf16 %v5689_v4  ;;  %v5686_v19 = vunpack.i.h.bf16 %v5684_v14  ;;  %v5685_v1 = vunpack.i.l.bf16 %v5684_v14 }
 0x537   : > { %v3425_v30 = vsel %vm9052_vm7, %v5691_v17, %v3423_v12  ;;  %v3429_v63 = vsel %vm9039_vm1, %v3416_v9, %v5690_v45  ;;  %v3410_v13 = vsel %vm9040_vm6, %v5686_v19, %v3408_v53  ;;  %v3414_v32 = vsel %vm9053_vm8, %v3399_v52, %v5685_v1 }
 0x538   : > { %v5075_v54 = vpack.c.bf16 %v3425_v30, %v3410_v13  ;;  %v5060_v11 = vpack.c.bf16 %v3429_v63, %v3414_v32  ;;  %v5699_v43 = vpop.permute.xlu1 %5698  ;;  %v5694_v39 = vpop.permute.xlu0 %5693  ;;  %v3409_v57 = vsel %vm9054_vm9, %v5685_v1, %v5686_v19  ;;  %v3424_v23 = vsel %vm9055_vm2, %v5690_v45, %v5691_v17  ;;  %v3395_v45 = vld [vmem:[%s557_s17] sm:$0xf]  ;;  %s9059_s17 = smov 119  }
 0x539   : > { %v5701_v20 = vunpack.i.h.bf16 %v5699_v43  ;;  %v5700_v50 = vunpack.i.l.bf16 %v5699_v43  ;;  %v5696_v18 = vunpack.i.h.bf16 %v5694_v39  ;;  %v5695_v7 = vunpack.i.l.bf16 %v5694_v39  ;;  %v573_v13 = vld [vmem:[%s8750_s12] sm:$0x7] }
 0x53a   : > { %v5058_v59 = vpack.c.bf16 %v3424_v23, %v3409_v57  ;;  %5076 = vmatpush3.bf16.msra.mxu1 %v5075_v54  ;;  %vm3499_vm7 = vcmask 932864   ;;  %vm3491_vm1 = vcmask 89088   ;;  %vm3508_vm6 = vcmask 80896  }
 0x53b   : > { %v3455_v42 = vsel %vm725_vm3, %v5701_v20, %v3453_v31  ;;  %v3459_v21 = vsel %vm725_vm3, %v3446_v37, %v5700_v50  ;;  %v3440_v49 = vsel %vm853_vm13, %v5696_v18, %v3438_v15  ;;  %v3444_v6 = vsel %vm853_vm13, %v3431_v56, %v5695_v7  ;;  %5077 = vmatprep.subr.bf16.mxu1 %v5779_v35 }
 0x53c   : > { %v5078_v40 = vpack.c.bf16 %v3455_v42, %v3440_v49  ;;  %5059 = vmatprep.subr.bf16.mxu0 %v5058_v59  ;;  %v3489_v29 = vpop.permute.xlu1 %3488  ;;  %v5704_v26 = vpop.permute.xlu0 %5703  ;;  %v3439_v47 = vsel %vm853_vm13, %v5695_v7, %v5696_v18  ;;  %v3454_v38 = vsel %vm725_vm3, %v5700_v50, %v5701_v20  ;;  %v5064_v41 = vpack.c.bf16 %v3459_v21, %v3444_v6 }
 0x53d   : > { %5061 = vmatpush1.bf16.msra.mxu0 %v5060_v11  ;;  %v5706_v55 = vunpack.i.h.bf16 %v5704_v26  ;;  %v5705_v51 = vunpack.i.l.bf16 %v5704_v26  ;;  %v5062_v33 = vpack.c.bf16 %v3454_v38, %v3439_v47  ;;  %vm3516_vm8 = vcmask 924672  }
 0x53e   : > { %5079 = vmatpush3.bf16.msra.mxu1 %v5078_v40  ;;  %vm3531_vm9 = vcmask 588800   ;;  %v3691_v43 = vrot.slane %v573_v13, %v5879_v3  ;;  %v3683_v3 = vrot.slane %v573_v13, %v5876_v2  ;;  %v3687_v42 = vrot.slane %v573_v13, %v5887_v5 }
 0x53f   : > { %v3475_v8 = vsel %vm3474_vm11, %v5706_v55, %v3472_v22  ;;  %v3466_v25 = vsel %vm9056_vm0, %v3461_v61, %v5705_v51  ;;  %5063 = vmatprep.subr.bf16.mxu0 %v5062_v33  ;;  %5080 = vmatprep.subr.bf16.mxu1 %v5779_v35  ;;  %v3467_v16 = vsel %vm9057_vm14, %v5705_v51, %v5706_v55  ;;  %vm9062_vm0 = vmmov %vm9055_vm2  ;;  %vm9063_vm14 = vcmask 121856  }
 0x540   : > { %v5081_v24 = vpack.c.bf16 %v3475_v8, %v8425_v28  ;;  %v5068_v62 = vpack.c.bf16 %v3466_v25, %v8443_v36  ;;  %v5709_v48 = vpop.permute.xlu1 %5708  ;;  %v5714_v34 = vpop.permute.xlu0 %5713  ;;  %v5066_v0 = vpack.c.bf16 %v3467_v16, %v8449_v46 }
 0x541   : > { %5065 = vmatpush1.bf16.msra.mxu0 %v5064_v41  ;;  %v5711_v44 = vunpack.i.h.bf16 %v5709_v48  ;;  %v5710_v9 = vunpack.i.l.bf16 %v5709_v48  ;;  %v5716_v52 = vunpack.i.h.bf16 %v5714_v34  ;;  %v5715_v12 = vunpack.i.l.bf16 %v5714_v34 }
 0x542   : > { %5067 = vmatprep.subr.bf16.mxu0 %v5066_v0  ;;  %5082 = vmatpush3.bf16.msra.mxu1 %v5081_v24 }
 0x543   : > { %v3483_v28 = vsel %vm3482_vm10, %v8488_v27, %v5710_v9  ;;  %v3500_v36 = vsel %vm3499_vm7, %v8486_v58, %v5715_v12  ;;  %v3484_v53 = vsel %vm3482_vm10, %v5710_v9, %v5711_v44  ;;  %5083 = vmatprep.subr.bf16.mxu1 %v5779_v35  ;;  %v3501_v56 = vsel %vm3499_vm7, %v5715_v12, %v5716_v52 }
 0x544   : > { %v3513_v46 = vpop.permute.xlu1 %3512  ;;  %v3506_v37 = vpop.permute.xlu0 %3505  ;;  %v5072_v31 = vpack.c.bf16 %v3500_v36, %v3483_v28  ;;  %v3492_v15 = vsel %vm3491_vm1, %v5711_v44, %v3489_v29  ;;  %v5070_v61 = vpack.c.bf16 %v3501_v56, %v3484_v53 }
 0x545   : > { %5069 = vmatpush1.bf16.msra.mxu0 %v5068_v62  ;;  %v3509_v22 = vsel %vm3508_vm6, %v5716_v52, %v3506_v37 }
 0x546   : > { %v5084_v4 = vpack.c.bf16 %v3509_v22, %v3492_v15  ;;  %5071 = vmatprep.subr.bf16.mxu0 %v5070_v61 }
 0x548   : > { %v3511_v58 = vpop.permute.xlu1 %3510  ;;  %v3515_v27 = vpop.permute.xlu0 %3514  ;;  %5085 = vmatpush3.bf16.msra.mxu1 %v5084_v4 }
 0x549   : > { %5073 = vmatpush1.bf16.msra.mxu0 %v5072_v31  ;;  %v3518_v14 = vsel %vm3516_vm8, %v3513_v46, %v3515_v27  ;;  %4538 = vmatprep.subr.mxu1 %v8923_v10  ;;  %v3517_v17 = vsel %vm3516_vm8, %v3511_v58, %v3513_v46 }
 0x54a   : > { %3551 = vmatprep.subr.mxu0 %v3518_v14 }
 0x54c   : > { %v3523_v19 = vpop.permute.xlu0 %3522 }
 0x54d   : > { %3552 = vmatpush1.msra.mxu0 %v3517_v17  ;;  %v3525_v1 = vsel %vm8828_vm15, %v3515_v27, %v3523_v19 }
 0x54e   : > { %4386 = vmatmul.mubr.msk.f32.vlgmr.msra.gmra.mrb[14].mxu0 %vm3531_vm9, %v3395_v45  ;;  %4539 = vmatpush3.msra.mxu1 %v3525_v1 }
 0x54f   : > { %4541 = vmatmul.mubr.msk.f32.vlgmr.msra.gmra.mrb[20].mxu1 %vm3531_vm9, %v3395_v45  ;;  %vm9064_vm9 = vmmov %vm9063_vm14 }
 0x550   : > { %3937 = vmatprep.mubr.f32.mxu1 %v8923_v10 }
 0x559   : > { %v3529_v30 = vpop.permute.xlu1 %3528 }
 0x621   : > { %v3601_v63 = vpop.f32.mrb[14].mxu0 }
 0x622   : > { %v3603_v32 = vpop.f32.mrb[15].mxu0  ;;  %v3672_v54 = vpop.f32.mrb[20].mxu1  ;;  %v3602_v20 = vadd.f32 %v3601_v63, %v3529_v30 }
 0x623   : > { %v3673_v11 = vadd.f32 %v3672_v54, %v3529_v30  ;;  %v4542_v39 = vpop.f32.mrb[21].mxu1  ;;  %v3604_v18 = vadd.f32 %v3603_v32, %v3529_v30 }
 0x624   : > { %v3676_v50 = vmax.f32 %v3602_v20, 0.0 }
 0x625   : > { %v3678_v57 = vmax.f32 %v3673_v11, 0.0  ;;  %v3677_v59 = vmax.f32 %v3604_v18, 0.0 }
 0x626   : > { %v8548_v7 = vmul.f32 %v3683_v3, %v3676_v50 }
 0x627   : > { %v8533_v23 = vmul.f32 %v3691_v43, %v3678_v57  ;;  %v8555_v21 = vmul.f32 %v3687_v42, %v3677_v59 }
 0x629   : > { %3746 = vrot.lane.b32.xlu1 %v8533_v23, %s5782_s18  ;;  %3718 = vrot.lane.b32.xlu0 %v8533_v23, %s5780_s28  ;;  %v5722_v49 = vpack.i.bf16 %v8555_v21, %v8548_v7  ;;  %v5742_v5 = vpack.i.bf16 %v8533_v23, %v8555_v21  ;;  %s567_s18 = scalar_lea.vmem %s8746_s8, %s9086_s26 }
 0x62a   : > { %v3699_v6 = vld [vmem:[%s567_s18] sm:$0x1] }
 0x62d   : > { %3731 = vrot.lane.b32.xlu1 %v8533_v23, %s9058_s14  ;;  %3701 = vrot.lane.b32.xlu0 %v8533_v23, %s9059_s17 }
 0x631   : > { %3753 = vrot.lane.b32.xlu1 %v8533_v23, %s9048_s24  ;;  %3725 = vrot.lane.b32.xlu0 %v8533_v23, %s8888_s22 }
 0x635   : > { %3710 = vrot.lane.b32.xlu0 %v8533_v23, %s8884_s15  ;;  %3787 = vrot.lane.b32.xlu1 %v8548_v7, %s9050_s16 }
 0x639   : > { %3772 = vrot.lane.b32.xlu1 %v8548_v7, %s9051_s0  ;;  %3759 = vrot.lane.b32.xlu0 %v8548_v7, %s9049_s27 }
 0x63d   : > { %5723 = vrot.lane.b32.xlu1 %v5722_v49, %s9048_s24  ;;  %5718 = vrot.lane.b32.xlu0 %v5722_v49, %s8888_s22  ;;  %s9060_s22 = smov 23   ;;  %s9061_s24 = smov 11  }
 0x641   : > { %5733 = vrot.lane.b32.xlu1 %v5722_v49, %s8894_s23  ;;  %5728 = vrot.lane.b32.xlu0 %v5722_v49, %s8884_s15 }
 0x645   : > { %5743 = vrot.lane.b32.xlu1 %v5742_v5, %s9050_s16  ;;  %5738 = vrot.lane.b32.xlu0 %v5742_v5, %s9049_s27 }
 0x649   : > { %3738 = vrot.lane.b32.xlu1 %v8533_v23, %s8894_s23  ;;  %5748 = vrot.lane.b32.xlu0 %v5742_v5, %s9051_s0 }
 0x64d   : > { %3804 = vrot.lane.b32.xlu1 %v8533_v23, %s8876_s30  ;;  %3800 = vrot.lane.b32.xlu0 %v8548_v7, %s8876_s30 }
 0x651   : > { %3768 = vrot.lane.b32.xlu1 %v8548_v7, %s9060_s22  ;;  %3802 = vrot.lane.b32.xlu0 %v8555_v21, %s8876_s30  ;;  %s571_s22 = scalar_lea.vmem %s8751_s13, %s4355_s29 }
 0x655   : > { %3783 = vrot.lane.b32.xlu1 %v8548_v7, %s9061_s24  ;;  %3796 = vrot.lane.b32.xlu0 %v8548_v7, %s5787_s20 }
 0x659   : > { %3855 = vperm.xlu1 %5321, %v3699_v6   ;;  %3809 = vrot.lane.b32.xlu0 %v8548_v7, %s5788_s21  ;;  %s564_s21 = scalar_lea.vmem %s8745_s7, %s9086_s26 }
 0x69b   : > { %v3747_v40 = vpop.permute.xlu1 %3746  ;;  %v3719_v29 = vpop.permute.xlu0 %3718 }
 0x69f   : > { %v3732_v26 = vpop.permute.xlu1 %3731  ;;  %v3702_v47 = vpop.permute.xlu0 %3701 }
 0x6a3   : > { %v3754_v38 = vpop.permute.xlu1 %3753  ;;  %v8592_v41 = vpop.permute.xlu0 %3725 }
 0x6a7   : > { %v8594_v55 = vpop.permute.xlu0 %3710  ;;  %v3788_v51 = vpop.permute.xlu1 %3787 }
 0x6ab   : > { %v3773_v33 = vpop.permute.xlu1 %3772  ;;  %v3760_v8 = vpop.permute.xlu0 %3759 }
 0x6af   : > { %v5724_v25 = vpop.permute.xlu1 %5723  ;;  %v5719_v16 = vpop.permute.xlu0 %5718 }
 0x6b0   : > { %v5726_v24 = vunpack.i.h.bf16 %v5724_v25  ;;  %v5725_v62 = vunpack.i.l.bf16 %v5724_v25  ;;  %v5721_v48 = vunpack.i.h.bf16 %v5719_v16  ;;  %v5720_v34 = vunpack.i.l.bf16 %v5719_v16 }
 0x6b2   : > { %v3755_v0 = vsel %vm725_vm3, %v5725_v62, %v5726_v24  ;;  %v3758_v44 = vsel %vm725_vm3, %v3747_v40, %v5725_v62  ;;  %v3727_v12 = vsel %vm9055_vm2, %v5720_v34, %v5721_v48  ;;  %v3730_v28 = vsel %vm9062_vm0, %v3719_v29, %v5720_v34 }
 0x6b3   : > { %v5734_v9 = vpop.permute.xlu1 %5733  ;;  %v5729_v52 = vpop.permute.xlu0 %5728  ;;  %v3821_v56 = vrot.slane %v3758_v44, 4  ;;  %v3822_v31 = vrot.slane %v3755_v0, 4  ;;  %v3814_v61 = vrot.slane %v3730_v28, 4  ;;  %v3815_v4 = vrot.slane %v3727_v12, 4 }
 0x6b4   : > { %v5736_v36 = vunpack.i.h.bf16 %v5734_v9  ;;  %v5735_v53 = vunpack.i.l.bf16 %v5734_v9  ;;  %v5731_v46 = vunpack.i.h.bf16 %v5729_v52  ;;  %v5730_v37 = vunpack.i.l.bf16 %v5729_v52 }
 0x6b5   : > { %vm9065_vm2 = vcmask 1043456   ;;  %v3756_v29 = vsel %vm725_vm3, %v5726_v24, %v3754_v38  ;;  %vm9075_vm3 = vcmask 113664  }
 0x6b6   : > { %v3740_v15 = vsel %vm853_vm13, %v5735_v53, %v5736_v36  ;;  %v3745_v22 = vsel %vm853_vm13, %v3732_v26, %v5735_v53  ;;  %v3712_v58 = vsel %vm9063_vm14, %v5730_v37, %v5731_v46  ;;  %v3717_v27 = vsel %vm9064_vm9, %v3702_v47, %v5730_v37  ;;  %vm9066_vm0 = vmmov %vm9065_vm2 }
 0x6b7   : > { %v5744_v14 = vpop.permute.xlu1 %5743  ;;  %v5739_v17 = vpop.permute.xlu0 %5738  ;;  %v3842_v63 = vsel %vm9065_vm2, %v3712_v58, %v3815_v4  ;;  %v3845_v13 = vsel %vm9066_vm0, %v3740_v15, %v3822_v31  ;;  %vm9067_vm4 = vmmov %vm9066_vm0  ;;  %vm9069_vm14 = vcmask 1039360   ;;  %v3823_v44 = vrot.slane %v3756_v29, 4  ;;  %v4034_v29 = vld [vmem:[%s8748_s10 + $0x88] sm:$0xf] }
 0x6b8   : > { %v5746_v45 = vunpack.i.h.bf16 %v5744_v14  ;;  %v5745_v19 = vunpack.i.l.bf16 %v5744_v14  ;;  %v5741_v1 = vunpack.i.h.bf16 %v5739_v17  ;;  %v5740_v30 = vunpack.i.l.bf16 %v5739_v17  ;;  %vm9068_vm15 = vmmov %vm9066_vm0  ;;  %v4018_v14 = vld [vmem:[%s8748_s10 + $0x8] sm:$0xff] }
 0x6b9   : > { %v3841_v32 = vsel %vm9067_vm4, %v3717_v27, %v3814_v61  ;;  %v3844_v54 = vsel %vm9068_vm15, %v3745_v22, %v3821_v56  ;;  %vm9070_vm9 = vmmov %vm9069_vm14  ;;  %v5086_v59 = vpack.c.bf16 %v3845_v13, %v3842_v63  ;;  %v4017_v27 = vld [vmem:[%s8748_s10] sm:$0xff]  ;;  %v4022_v63 = vld [vmem:[%s8748_s10 + $0x28] sm:$0xff] }
 0x6ba   : > { %v3793_v11 = vsel %vm3499_vm7, %v3788_v51, %v5745_v19  ;;  %v3794_v43 = vsel %vm3499_vm7, %v5745_v19, %v5746_v45  ;;  %v3765_v39 = vsel %vm9069_vm14, %v3760_v8, %v5740_v30  ;;  %v3766_v57 = vsel %vm9070_vm9, %v5740_v30, %v5741_v1  ;;  %vm9071_vm4 = vmmov %vm9066_vm0 }
 0x6bb   : > { %v3828_v20 = vrot.slane %v3765_v39, 4  ;;  %v3829_v50 = vrot.slane %v3766_v57, 4  ;;  %v3739_v3 = vpop.permute.xlu1 %3738  ;;  %v5749_v18 = vpop.permute.xlu0 %5748  ;;  %v3835_v5 = vrot.slane %v3793_v11, 4  ;;  %v3836_v6 = vrot.slane %v3794_v43, 4  ;;  %5087 = vmatprep.subr.bf16.mxu1 %v5086_v59  ;;  %vm9072_vm15 = vmmov %vm9066_vm0  ;;  %v4025_v43 = vld [vmem:[%s8748_s10 + $0x40] sm:$0xff]  ;;  %v4026_v39 = vld [vmem:[%s8748_s10 + $0x48] sm:$0xff] }
 0x6bc   : > { %v5751_v42 = vunpack.i.h.bf16 %v5749_v18  ;;  %v5750_v49 = vunpack.i.l.bf16 %v5749_v18  ;;  %v5088_v40 = vpack.c.bf16 %v3844_v54, %v3841_v32  ;;  %vm9073_vm7 = vmmov %vm9066_vm0  ;;  %v3741_v0 = vsel %vm853_vm13, %v5736_v36, %v3739_v3  ;;  %v4023_v32 = vld [vmem:[%s8748_s10 + $0x30] sm:$0xff]  ;;  %v4024_v54 = vld [vmem:[%s8748_s10 + $0x38] sm:$0xff] }
 0x6bd   : > { %v3848_v25 = vsel %vm9071_vm4, %v8555_v21, %v3829_v50  ;;  %v3847_v62 = vsel %vm9073_vm7, %v8548_v7, %v3828_v20  ;;  %vm9074_vm2 = vmmov %vm9066_vm0  ;;  %v3846_v12 = vsel %vm9066_vm0, %v3741_v0, %v3823_v44  ;;  %vm3862_vm14 = vcmask 293888   ;;  %v4027_v20 = vld [vmem:[%s8748_s10 + $0x50] sm:$0xff]  ;;  %v4028_v50 = vld [vmem:[%s8748_s10 + $0x58] sm:$0xff] }
 0x6be   : > { %v3778_v26 = vsel %vm3482_vm10, %v3773_v33, %v5750_v49  ;;  %v3779_v47 = vsel %vm3482_vm10, %v5750_v49, %v5751_v42  ;;  %5089 = vmatpush1.bf16.msra.mxu1 %v5088_v40  ;;  %v3728_v33 = vsel %vm9075_vm3, %v5721_v48, %v8592_v41  ;;  %vm9076_vm10 = vcmask 121856   ;;  %vm9077_vm13 = vmmov %vm9066_vm0  ;;  %v3698_v48 = vld [vmem:[%s564_s21] sm:$0x1]  ;;  %v4030_v59 = vld [vmem:[%s8748_s10 + $0x68] sm:$0xff] }
 0x6bf   : > { %v3805_v51 = vpop.permute.xlu1 %3804  ;;  %v3801_v8 = vpop.permute.xlu0 %3800  ;;  %v3851_v16 = vsel %vm9072_vm15, %v3779_v47, %v3836_v6  ;;  %v3850_v34 = vsel %vm9074_vm2, %v3778_v26, %v3835_v5  ;;  %v3713_v21 = vsel %vm9076_vm10, %v5731_v46, %v8594_v55  ;;  %v3816_v52 = vrot.slane %v3728_v33, 4  ;;  %vm9078_vm9 = vmmov %vm9066_vm0  ;;  %v4029_v18 = vld [vmem:[%s8748_s10 + $0x60] sm:$0xff]  ;;  %v4031_v49 = vld [vmem:[%s8748_s10 + $0x70] sm:$0xff] }
 0x6c0   : > { %v5090_v38 = vpack.c.bf16 %v3851_v16, %v3848_v25  ;;  %v5092_v24 = vpack.c.bf16 %v3850_v34, %v3847_v62  ;;  %vm9079_vm4 = vmmov %vm9066_vm0  ;;  %v5110_v11 = vpack.c.bf16 %v4024_v54, %v4023_v32  ;;  %v5113_v57 = vpack.c.bf16 %v4026_v39, %v4025_v43  ;;  %v4032_v5 = vld [vmem:[%s8748_s10 + $0x78] sm:$0xff]  ;;  %v4033_v40 = vld [vmem:[%s8748_s10 + $0x80] sm:$0xff] }
 0x6c1   : > { %v3843_v36 = vsel %vm9078_vm9, %v3713_v21, %v3816_v52  ;;  %v5116_v3 = vpack.c.bf16 %v4028_v50, %v4027_v20  ;;  %v5122_v6 = vpack.c.bf16 %v4032_v5, %v4031_v49  ;;  %v5125_v26 = vpack.c.bf16 %v4034_v29, %v4033_v40 }
 0x6c2   : > { %5091 = vmatprep.subr.bf16.mxu1 %v5090_v38  ;;  %v5095_v37 = vpack.c.bf16 %v3846_v12, %v3843_v36  ;;  %vm4117_vm15 = vcmask 949248   ;;  %vm4196_vm7 = vcmask 779264   ;;  %vm9084_vm2 = vcmask 1040384  }
 0x6c3   : > { %v3769_v9 = vpop.permute.xlu1 %3768  ;;  %v3803_v7 = vpop.permute.xlu0 %3802  ;;  %5093 = vmatpush1.bf16.msra.mxu1 %v5092_v24 }
 0x6c4   : > { %v3771_v28 = vsel %vm3474_vm11, %v5741_v1, %v3769_v9  ;;  %v3807_v41 = vsel %vm3516_vm8, %v3803_v7, %v3805_v51  ;;  %v3806_v53 = vsel %vm3516_vm8, %v3801_v8, %v3803_v7  ;;  %vm9080_vm11 = vmmov %vm9066_vm0  ;;  %v4020_v1 = vld [vmem:[%s8748_s10 + $0x18] sm:$0xff] }
 0x6c5   : > { %4388 = vmatprep.subr.msk.mxu1 %vm9077_vm13, %v3807_v41  ;;  %v3830_v55 = vrot.slane %v3771_v28, 4  ;;  %vm9081_vm8 = vmmov %vm9066_vm0 }
 0x6c7   : > { %v3784_v46 = vpop.permute.xlu1 %3783  ;;  %v3797_v56 = vpop.permute.xlu0 %3796  ;;  %4389 = vmatpush1.msk.msra.mxu1 %vm9079_vm4, %v3806_v53  ;;  %v3849_v61 = vsel %vm9080_vm11, %v8533_v23, %v3830_v55  ;;  %v4019_v23 = vld [vmem:[%s8748_s10 + $0x10] sm:$0xff] }
 0x6c8   : > { %v3799_v31 = vsel %vm3508_vm6, %v5746_v45, %v3797_v56  ;;  %4390 = vmatmul.mubr.msk.f32.vlgmr.msra.gmra.mrb[22].mxu1 %vm3862_vm14, %v3698_v48  ;;  %5094 = vmatprep.subr.bf16.mxu1 %v5779_v35  ;;  %v3786_v22 = vsel %vm3491_vm1, %v5751_v42, %v3784_v46  ;;  %v5101_v45 = vpack.c.bf16 %v4018_v14, %v4017_v27  ;;  %vm9083_vm1 = vmmov %vm9066_vm0  ;;  %vm4035_vm6 = vcmask 97280  }
 0x6c9   : > { %v3837_v15 = vrot.slane %v3799_v31, 4  ;;  %5096 = vmatpush3.bf16.msra.mxu1 %v5095_v37  ;;  %4553 = vmatprep.mubr.msk.f32.mxu1 %vm5786_vm12, %v8923_v10  ;;  %vm9082_vm12 = vcmask 72704   ;;  %v5104_v30 = vpack.c.bf16 %v4020_v1, %v4019_v23  ;;  %v5119_v42 = vpack.c.bf16 %v4030_v59, %v4029_v18 }
 0x6ca   : > { %5097 = vmatprep.subr.bf16.mxu1 %v5779_v35 }
 0x6cb   : > { %v3852_v4 = vsel %vm9081_vm8, %v3786_v22, %v3837_v15  ;;  %v3810_v17 = vpop.permute.xlu0 %3809 }
 0x6cc   : > { %v5098_v58 = vpack.c.bf16 %v3852_v4, %v3849_v61  ;;  %v3812_v19 = vsel %vm9082_vm12, %v3805_v51, %v3810_v17 }
 0x6ce   : > { %5099 = vmatpush3.bf16.msra.mxu1 %v5098_v58 }
 0x6cf   : > { %4551 = vmatprep.subr.mxu1 %v8923_v10  ;;  %v4021_v10 = vld [vmem:[%s8748_s10 + $0x20] sm:$0xff] }
 0x6d0   : > { %v5107_v13 = vpack.c.bf16 %v4022_v63, %v4021_v10 }
 0x6d2   : > { %4552 = vmatpush3.msk.msra.mxu1 %vm9083_vm1, %v3812_v19 }
 0x6d3   : > { %4554 = vmatmul.mubr.msk.f32.vlgmr.msra.gmra.mrb[24].mxu1 %vm3862_vm14, %v3698_v48  ;;  %5100 = vmatprep.subr.bf16.mxu1 %v5779_v35 }
 0x6d4   : > { %5102 = vmatpush1.bf16.msra.mxu1 %v5101_v45 }
 0x6d5   : > { %5103 = vmatprep.subr.bf16.mxu1 %v5779_v35 }
 0x6d8   : > { %5105 = vmatpush1.bf16.msra.mxu1 %v5104_v30  ;;  %v3856_v47 = vpop.permute.xlu1 %3855 }
 0x6d9   : > { %5106 = vmatprep.subr.bf16.mxu1 %v5779_v35  ;;  %v3861_v51 = vrot.slane %v3856_v47, %v5876_v2 }
 0x6dc   : > { %5108 = vmatpush1.bf16.msra.mxu1 %v5107_v13 }
 0x6dd   : > { %5109 = vmatprep.subr.bf16.mxu1 %v5779_v35 }
 0x6e0   : > { %5111 = vmatpush1.bf16.msra.mxu1 %v5110_v11 }
 0x6e1   : > { %5112 = vmatprep.subr.bf16.mxu1 %v5779_v35 }
 0x6e4   : > { %5114 = vmatpush1.bf16.msra.mxu1 %v5113_v57 }
 0x6e5   : > { %5115 = vmatprep.subr.bf16.mxu1 %v5779_v35 }
 0x6e8   : > { %5117 = vmatpush1.bf16.msra.mxu1 %v5116_v3 }
 0x6e9   : > { %5118 = vmatprep.subr.bf16.mxu1 %v5779_v35 }
 0x6ec   : > { %5120 = vmatpush1.bf16.msra.mxu1 %v5119_v42 }
 0x6ed   : > { %5121 = vmatprep.subr.bf16.mxu1 %v5779_v35 }
 0x6f0   : > { %5123 = vmatpush1.bf16.msra.mxu1 %v5122_v6 }
 0x6f1   : > { %5124 = vmatprep.subr.bf16.mxu1 %v5779_v35 }
 0x6f4   : > { %5127 = vmatpush1.bf16.msk.msra.mxu1 %vm6759_vm5, %v5125_v26 }
 0x6f5   : > { %5128 = vmatprep.subr.bf16.mxu1 %v5779_v35 }
 0x79b   : > { %v3939_v8 = vpop.f32.mrb[22].mxu1 }
 0x79c   : > { %v3940_v25 = vadd.f32 %v3939_v8, %v3861_v51  ;;  %v3941_v16 = vpop.f32.mrb[23].mxu1 }
 0x79d   : > { %v3942_v62 = vadd.f32 %v3941_v16, %v3861_v51 }
 0x79e   : > { %v4014_v38 = vmax.f32 %v3940_v25, 0.0 }
 0x79f   : > { %v4015_v34 = vmax.f32 %v3942_v62, 0.0 }
 0x7a1   : > { %4113 = vrot.lane.b32.xlu0 %v4015_v34, %s5789_s19  ;;  %4394 = vmatprep.mubr.msk.f32.mxu1 %vm4035_vm6, %v4015_v34 }
 0x7a2   : > { %4107 = vmatmul.mubr.f32.vlgmr.msra.gmra.mrb[26].mxu1 %v4014_v38 }
 0x7a3   : > { %5130 = vmatpush1.bf16.msra.mxu1 %v5101_v45 }
 0x7a4   : > { %5131 = vmatprep.subr.bf16.mxu1 %v5779_v35 }
 0x7a6   : > { %v4010_v24 = vpop.f32.mrb[24].mxu1 }
 0x7a7   : > { %v4011_v33 = vadd.f32 %v4010_v24, %v3861_v51  ;;  %v4555_v0 = vpop.f32.mrb[25].mxu1  ;;  %5133 = vmatpush1.bf16.msra.mxu1 %v5104_v30 }
 0x7a8   : > { %5134 = vmatprep.subr.bf16.mxu1 %v5779_v35 }
 0x7a9   : > { %v4016_v2 = vmax.f32 %v4011_v33, 0.0 }
 0x7ab   : > { %4115 = vrot.lane.b32.xlu1 %v4016_v2, %s5789_s19  ;;  %5136 = vmatpush1.bf16.msra.mxu1 %v5107_v13 }
 0x7ac   : > { %5137 = vmatprep.subr.bf16.mxu1 %v5779_v35 }
 0x7af   : > { %5139 = vmatpush1.bf16.msra.mxu1 %v5110_v11 }
 0x7b0   : > { %5140 = vmatprep.subr.bf16.mxu1 %v5779_v35 }
 0x7b3   : > { %5142 = vmatpush1.bf16.msra.mxu1 %v5113_v57 }
 0x7b4   : > { %5143 = vmatprep.subr.bf16.mxu1 %v5779_v35 }
 0x7b7   : > { %5145 = vmatpush1.bf16.msra.mxu1 %v5116_v3 }
 0x7b8   : > { %5146 = vmatprep.subr.bf16.mxu1 %v5779_v35 }
 0x7bb   : > { %5148 = vmatpush1.bf16.msra.mxu1 %v5119_v42 }
 0x7bc   : > { %5149 = vmatprep.subr.bf16.mxu1 %v5779_v35 }
 0x7bf   : > { %5151 = vmatpush1.bf16.msra.mxu1 %v5122_v6 }
 0x7c0   : > { %5152 = vmatprep.subr.bf16.mxu1 %v5779_v35 }
 0x7c3   : > { %5155 = vmatpush1.bf16.msk.msra.mxu1 %vm6759_vm5, %v5125_v26 }
 0x813   : > { %v4114_v44 = vpop.permute.xlu0 %4113 }
 0x81d   : > { %v4116_v21 = vpop.permute.xlu1 %4115 }
 0x81e   : > { %v4118_v9 = vsel %vm4117_vm15, %v4114_v44, %v4116_v21  ;;  %4396 = vmatprep.mubr.msk.f32.mxu1 %vm4035_vm6, %v4116_v21 }
 0x81f   : > { %4187 = vmatmul.mubr.f32.vlgmr.msra.gmra.mrb[28].mxu1 %v4118_v9 }
 0x875   : > { %v4108_v7 = vpop.f32.mrb[26].mxu1 }
 0x876   : > { %v4110_v52 = vpop.f32.mrb[27].mxu1 }
 0x8f2   : > { %v4188_v12 = vpop.f32.mrb[28].mxu1 }
 0x8f3   : > { %v4193_v28 = vrot.slane %v4188_v12, 7  ;;  %v4190_v35 = vpop.f32.mrb[29].mxu1 }
 0x8f5   : > { %v4195_v60 = vsel %vm9084_vm2, %v4108_v7, %v4193_v28 }
 0x8f6   : > { %4197 = vst.msk [vmem:[%s571_s22] sm:$0x3] %vm4196_vm7, %v4195_v60 }
 0x8f7 PF: > { %s23_s25 = sadd.s32 1, %s5758_s25  }
 0x8f8   : > { %p20_p4 = scmp.ge.s32.totalorder %s23_s25, 12  }
 0x8fa   :  { %22 = sbr.rel (!%p20_p4) target bundleno = 2 (0x2), region = 126 }

</bundles_post_ra>
